<compile_context>
chip_gen: v7x
topology: tpu7x:2x2x1
jax: 0.10.0
libtpu: 0.0.40
codegen_flags: <defaults>
</compile_context>

<pallas_src>
import jax
import jax.numpy as jnp
from jax import lax
from jax.experimental import pallas as pl
from jax.experimental.pallas import tpu as pltpu

EPS = 1e-5


def _conv_specs(in_ch, mid_ch, out_ch):
    """(input-channel split, out channels, dilation) for the 16 convs, in execution order."""
    return [
        ((in_ch,), out_ch, 1), ((out_ch,), out_ch, 1),           # rebnconvin
        ((out_ch,), mid_ch, 1), ((mid_ch,), mid_ch, 1),          # rebnconv1
        ((mid_ch,), mid_ch, 2), ((mid_ch,), mid_ch, 2),          # rebnconv2
        ((mid_ch,), mid_ch, 4), ((mid_ch,), mid_ch, 4),          # rebnconv3
        ((mid_ch,), mid_ch, 8), ((mid_ch,), mid_ch, 8),          # rebnconv4
        ((mid_ch, mid_ch), mid_ch, 4), ((mid_ch,), mid_ch, 4),   # rebnconv3d  cat(hx4, hx3)
        ((mid_ch, mid_ch), mid_ch, 2), ((mid_ch,), mid_ch, 2),   # rebnconv2d  cat(hx3d, hx2)
        ((mid_ch, mid_ch), out_ch, 1), ((out_ch,), out_ch, 1),   # rebnconv1d  cat(hx2d, hx1)
    ]


def _make_rsu4f_kernel(H, W, specs):
    HW = H * W

    def kernel(*refs):
        x_ref, o_ref = refs[0], refs[-1]
        prm = refs[1:-1]

        # regroup flat param refs: per conv -> ([weight ref per input source], shift ref)
        conv_refs, pos = [], 0
        for cin_parts, _, _ in specs:
            n = len(cin_parts)
            conv_refs.append((prm[pos:pos + n], prm[pos + n]))
            pos += n + 1

        # column-within-row index, used for the W-boundary masks of the shifted taps
        col = lax.broadcasted_iota(jnp.int32, (1, HW), 1) % W

        def im2col(x, d):
            """x: (ci, HW) bf16 -> (9*ci, HW) bf16 slab for a 3x3 conv, dilation=padding=d."""
            ci = x.shape[0]
            P = d * W + d                              # flat halo covers both H shifts & W shifts
            zpad = jnp.zeros((ci, P), x.dtype)
            xp = jnp.concatenate([zpad, x, zpad], axis=1)   # one pad/copy per conv source
            keep_l = col >= d                          # valid lanes for the dw=0 (left) taps
            keep_r = col < (W - d)                     # valid lanes for the dw=2 (right) taps
            taps = []
            for dh in range(3):
                for dw in range(3):
                    off = P + (dh - 1) * d * W + (dw - 1) * d    # static lane-slice offset
                    t = xp[:, off:off + HW]
                    if dw == 0:
                        t = jnp.where(keep_l, t, 0)    # zero wrapped-from-previous-row lanes
                    elif dw == 2:
                        t = jnp.where(keep_r, t, 0)    # zero wrapped-from-next-row lanes
                    taps.append(t)
            return jnp.concatenate(taps, axis=0)       # (9*ci, HW)

        def dconv(i, parts):
            """Dilated 3x3 conv over the channel-concat of `parts` + folded BN + ReLU."""
            w_refs, sh_ref = conv_refs[i]
            _, _, d = specs[i]
            acc = None
            for xsrc, w_ref in zip(parts, w_refs):
                slab = im2col(xsrc, d)                 # (9*ci, HW) bf16
                y = jnp.dot(w_ref[...], slab,          # (cout, 9*ci) x (9*ci, HW) -> f32
                            preferred_element_type=jnp.float32)
                acc = y if acc is None else acc + y    # concat fused via weight split
            y = jnp.maximum(acc + sh_ref[...], 0.0)    # folded bias+BN shift, ReLU (f32)
            return y.astype(jnp.bfloat16)              # single cast per conv output

        x = x_ref[0]                                   # (Cin, HW) bf16
        hxin = dconv(1, [dconv(0, [x])])
        hx1 = dconv(3, [dconv(2, [hxin])])
        hx2 = dconv(5, [dconv(4, [hx1])])
        hx3 = dconv(7, [dconv(6, [hx2])])
        hx4 = dconv(9, [dconv(8, [hx3])])
        hx3d = dconv(11, [dconv(10, [hx4, hx3])])
        hx2d = dconv(13, [dconv(12, [hx3d, hx2])])
        hx1d = dconv(15, [dconv(14, [hx2d, hx1])])
        # residual connection; output stays channel-major with HW on the lane axis
        o_ref[0] = hx1d.astype(jnp.float32) + hxin.astype(jnp.float32)

    return kernel


def rsu4f_forward(x_nchw, params):
    """RSU4F forward.  x_nchw: (N, Cin, H, W) float32; params from init_rsu4f_params."""
    N, in_ch, H, W = x_nchw.shape
    HW = H * W
    assert HW % 128 == 0, "H*W must be a multiple of 128 for the lane-dense layout"
    out_ch = params[0][0][0].shape[0]
    mid_ch = params[2][0][0].shape[0]
    specs = _conv_specs(in_ch, mid_ch, out_ch)

    flat = []
    for ws, sh in params:
        flat.extend(ws)
        flat.append(sh)

    # (N, C, HW): channel-major, spatial axis on the 128 lanes; bf16 halves input DMA.
    x = x_nchw.reshape(N, in_ch, HW).astype(jnp.bfloat16)

    def _const_spec(a):  # whole 2-D array, resident across the batch grid
        return pl.BlockSpec(a.shape, lambda n: (0, 0))

    out = pl.pallas_call(
        _make_rsu4f_kernel(H, W, specs),
        out_shape=jax.ShapeDtypeStruct((N, out_ch, HW), jnp.float32),
        grid=(N,),
        in_specs=[pl.BlockSpec((1, in_ch, HW), lambda n: (n, 0, 0))]
                 + [_const_spec(a) for a in flat],
        out_specs=pl.BlockSpec((1, out_ch, HW), lambda n: (n, 0, 0)),
        compiler_params=pltpu.CompilerParams(
            dimension_semantics=("parallel",),        # v7x: shard batch over 2 TensorCores
            vmem_limit_bytes=32 << 20),               # explicit scoped-VMEM budget
    )(x, *flat)
    return out.reshape(N, out_ch, H, W)               # NCHW via free reshape (no transpose)


# ---------------------------- parameters ----------------------------

def _conv_bn_params(key, cin_parts, cout):
    cin = sum(cin_parts)
    kw, kb, kg, kbe, km, kv = jax.random.split(key, 6)
    # PyTorch weight (cout, cin, kh, kw) handled here in (kh, kw, cin, cout) order.
    w = jax.random.normal(kw, (3, 3, cin, cout), jnp.float32) * (2.0 / (9 * cin)) ** 0.5
    b = 0.1 * jax.random.normal(kb, (cout,), jnp.float32)
    gamma = 1.0 + 0.1 * jax.random.normal(kg, (cout,), jnp.float32)
    beta = 0.1 * jax.random.normal(kbe, (cout,), jnp.float32)
    mean = 0.05 * jax.random.normal(km, (cout,), jnp.float32)
    var = jax.random.uniform(kv, (cout,), jnp.float32, minval=0.5, maxval=1.5)
    scale = gamma / jnp.sqrt(var + EPS)                 # eval-mode BatchNorm scale
    shift = (b - mean) * scale + beta                   # conv bias + BN shift, folded
    w_scaled = w * scale[None, None, None, :]           # fold BN scale into the weight
    # split along input channels (torch.cat fusion) and pre-transpose to (cout, 9*ci)
    ws, off = [], 0
    for ci in cin_parts:
        wp = w_scaled[:, :, off:off + ci, :]                         # (3, 3, ci, cout)
        wp = wp.reshape(9, ci, cout).transpose(2, 0, 1).reshape(cout, 9 * ci)
        ws.append(wp.astype(jnp.bfloat16))
        off += ci
    return tuple(ws), shift.reshape(cout, 1).astype(jnp.float32)


def init_rsu4f_params(key, in_ch=3, mid_ch=12, out_ch=3):
    specs = _conv_specs(in_ch, mid_ch, out_ch)
    keys = jax.random.split(key, len(specs))
    return [_conv_bn_params(k, cin_parts, cout)
            for k, (cin_parts, cout, _) in zip(keys, specs)]


if __name__ == "__main__":
    key = jax.random.PRNGKey(0)
    kx, kp = jax.random.split(key)
    N, in_ch, mid_ch, out_ch, H, W = 2, 4, 16, 8, 16, 16
    x = jax.random.normal(kx, (N, in_ch, H, W), jnp.float32)   # NCHW, like the PyTorch module
    params = init_rsu4f_params(kp, in_ch, mid_ch, out_ch)
    out = jax.jit(rsu4f_forward)(x, params)
    jax.block_until_ready(out)
    assert out.shape == (N, out_ch, H, W)
    assert bool(jnp.all(jnp.isfinite(out)))
    print("KERNEL_OK")
</pallas_src>

<mosaic_0001>
module attributes {stable_mosaic.version = 11 : i64} {
  func.func @kernel(%arg0: i32, %arg1: memref<1x4x256xbf16, #tpu.memory_space<vmem>>, %arg2: memref<8x36xbf16, #tpu.memory_space<vmem>>, %arg3: memref<8x1xf32, #tpu.memory_space<vmem>>, %arg4: memref<8x72xbf16, #tpu.memory_space<vmem>>, %arg5: memref<8x1xf32, #tpu.memory_space<vmem>>, %arg6: memref<16x72xbf16, #tpu.memory_space<vmem>>, %arg7: memref<16x1xf32, #tpu.memory_space<vmem>>, %arg8: memref<16x144xbf16, #tpu.memory_space<vmem>>, %arg9: memref<16x1xf32, #tpu.memory_space<vmem>>, %arg10: memref<16x144xbf16, #tpu.memory_space<vmem>>, %arg11: memref<16x1xf32, #tpu.memory_space<vmem>>, %arg12: memref<16x144xbf16, #tpu.memory_space<vmem>>, %arg13: memref<16x1xf32, #tpu.memory_space<vmem>>, %arg14: memref<16x144xbf16, #tpu.memory_space<vmem>>, %arg15: memref<16x1xf32, #tpu.memory_space<vmem>>, %arg16: memref<16x144xbf16, #tpu.memory_space<vmem>>, %arg17: memref<16x1xf32, #tpu.memory_space<vmem>>, %arg18: memref<16x144xbf16, #tpu.memory_space<vmem>>, %arg19: memref<16x1xf32, #tpu.memory_space<vmem>>, %arg20: memref<16x144xbf16, #tpu.memory_space<vmem>>, %arg21: memref<16x1xf32, #tpu.memory_space<vmem>>, %arg22: memref<16x144xbf16, #tpu.memory_space<vmem>>, %arg23: memref<16x144xbf16, #tpu.memory_space<vmem>>, %arg24: memref<16x1xf32, #tpu.memory_space<vmem>>, %arg25: memref<16x144xbf16, #tpu.memory_space<vmem>>, %arg26: memref<16x1xf32, #tpu.memory_space<vmem>>, %arg27: memref<16x144xbf16, #tpu.memory_space<vmem>>, %arg28: memref<16x144xbf16, #tpu.memory_space<vmem>>, %arg29: memref<16x1xf32, #tpu.memory_space<vmem>>, %arg30: memref<16x144xbf16, #tpu.memory_space<vmem>>, %arg31: memref<16x1xf32, #tpu.memory_space<vmem>>, %arg32: memref<8x144xbf16, #tpu.memory_space<vmem>>, %arg33: memref<8x144xbf16, #tpu.memory_space<vmem>>, %arg34: memref<8x1xf32, #tpu.memory_space<vmem>>, %arg35: memref<8x72xbf16, #tpu.memory_space<vmem>>, %arg36: memref<8x1xf32, #tpu.memory_space<vmem>>, %arg37: memref<1x8x256xf32, #tpu.memory_space<vmem>>) attributes {dimension_semantics = [#tpu.dimension_semantics<parallel>], iteration_bounds = array<i64: 2>, scalar_prefetch = 0 : i64, scratch_operands = 0 : i64, tpu.core_type = #tpu.core_type<tc>, window_params = [{transform_indices = @transform_0, window_bounds = array<i64: 1, 4, 256>}, {pipeline_mode = #tpu.pipeline_mode<synchronous>, transform_indices = @transform_1, window_bounds = array<i64: 8, 36>}, {pipeline_mode = #tpu.pipeline_mode<synchronous>, transform_indices = @transform_2, window_bounds = array<i64: 8, 1>}, {pipeline_mode = #tpu.pipeline_mode<synchronous>, transform_indices = @transform_3, window_bounds = array<i64: 8, 72>}, {pipeline_mode = #tpu.pipeline_mode<synchronous>, transform_indices = @transform_4, window_bounds = array<i64: 8, 1>}, {pipeline_mode = #tpu.pipeline_mode<synchronous>, transform_indices = @transform_5, window_bounds = array<i64: 16, 72>}, {pipeline_mode = #tpu.pipeline_mode<synchronous>, transform_indices = @transform_6, window_bounds = array<i64: 16, 1>}, {pipeline_mode = #tpu.pipeline_mode<synchronous>, transform_indices = @transform_7, window_bounds = array<i64: 16, 144>}, {pipeline_mode = #tpu.pipeline_mode<synchronous>, transform_indices = @transform_8, window_bounds = array<i64: 16, 1>}, {pipeline_mode = #tpu.pipeline_mode<synchronous>, transform_indices = @transform_9, window_bounds = array<i64: 16, 144>}, {pipeline_mode = #tpu.pipeline_mode<synchronous>, transform_indices = @transform_10, window_bounds = array<i64: 16, 1>}, {pipeline_mode = #tpu.pipeline_mode<synchronous>, transform_indices = @transform_11, window_bounds = array<i64: 16, 144>}, {pipeline_mode = #tpu.pipeline_mode<synchronous>, transform_indices = @transform_12, window_bounds = array<i64: 16, 1>}, {pipeline_mode = #tpu.pipeline_mode<synchronous>, transform_indices = @transform_13, window_bounds = array<i64: 16, 144>}, {pipeline_mode = #tpu.pipeline_mode<synchronous>, transform_indices = @transform_14, window_bounds = array<i64: 16, 1>}, {pipeline_mode = #tpu.pipeline_mode<synchronous>, transform_indices = @transform_15, window_bounds = array<i64: 16, 144>}, {pipeline_mode = #tpu.pipeline_mode<synchronous>, transform_indices = @transform_16, window_bounds = array<i64: 16, 1>}, {pipeline_mode = #tpu.pipeline_mode<synchronous>, transform_indices = @transform_17, window_bounds = array<i64: 16, 144>}, {pipeline_mode = #tpu.pipeline_mode<synchronous>, transform_indices = @transform_18, window_bounds = array<i64: 16, 1>}, {pipeline_mode = #tpu.pipeline_mode<synchronous>, transform_indices = @transform_19, window_bounds = array<i64: 16, 144>}, {pipeline_mode = #tpu.pipeline_mode<synchronous>, transform_indices = @transform_20, window_bounds = array<i64: 16, 1>}, {pipeline_mode = #tpu.pipeline_mode<synchronous>, transform_indices = @transform_21, window_bounds = array<i64: 16, 144>}, {pipeline_mode = #tpu.pipeline_mode<synchronous>, transform_indices = @transform_22, window_bounds = array<i64: 16, 144>}, {pipeline_mode = #tpu.pipeline_mode<synchronous>, transform_indices = @transform_23, window_bounds = array<i64: 16, 1>}, {pipeline_mode = #tpu.pipeline_mode<synchronous>, transform_indices = @transform_24, window_bounds = array<i64: 16, 144>}, {pipeline_mode = #tpu.pipeline_mode<synchronous>, transform_indices = @transform_25, window_bounds = array<i64: 16, 1>}, {pipeline_mode = #tpu.pipeline_mode<synchronous>, transform_indices = @transform_26, window_bounds = array<i64: 16, 144>}, {pipeline_mode = #tpu.pipeline_mode<synchronous>, transform_indices = @transform_27, window_bounds = array<i64: 16, 144>}, {pipeline_mode = #tpu.pipeline_mode<synchronous>, transform_indices = @transform_28, window_bounds = array<i64: 16, 1>}, {pipeline_mode = #tpu.pipeline_mode<synchronous>, transform_indices = @transform_29, window_bounds = array<i64: 16, 144>}, {pipeline_mode = #tpu.pipeline_mode<synchronous>, transform_indices = @transform_30, window_bounds = array<i64: 16, 1>}, {pipeline_mode = #tpu.pipeline_mode<synchronous>, transform_indices = @transform_31, window_bounds = array<i64: 8, 144>}, {pipeline_mode = #tpu.pipeline_mode<synchronous>, transform_indices = @transform_32, window_bounds = array<i64: 8, 144>}, {pipeline_mode = #tpu.pipeline_mode<synchronous>, transform_indices = @transform_33, window_bounds = array<i64: 8, 1>}, {pipeline_mode = #tpu.pipeline_mode<synchronous>, transform_indices = @transform_34, window_bounds = array<i64: 8, 72>}, {pipeline_mode = #tpu.pipeline_mode<synchronous>, transform_indices = @transform_35, window_bounds = array<i64: 8, 1>}, {transform_indices = @transform_36, window_bounds = array<i64: 1, 8, 256>}]} {
    %0 = tpu.iota {dimensions = array<i32: 1>} : vector<1x256xi32>
    %c16_i32 = arith.constant 16 : i32
    %c0_i32 = arith.constant 0 : i32
    %1 = arith.cmpi eq, %c16_i32, %c0_i32 : i32
    %c1_i32 = arith.constant 1 : i32
    %2 = arith.select %1, %c1_i32, %c16_i32 : i32
    %3 = vector.broadcast %2 : i32 to vector<1x256xi32>
    %4 = arith.remsi %0, %3 : vector<1x256xi32>
    %c0_i32_0 = arith.constant 0 : i32
    %5 = vector.broadcast %c0_i32_0 : i32 to vector<1x256xi32>
    %6 = arith.cmpi ne, %4, %5 : vector<1x256xi32>
    %c0_i32_1 = arith.constant 0 : i32
    %7 = vector.broadcast %c0_i32_1 : i32 to vector<1x256xi32>
    %8 = arith.cmpi slt, %4, %7 : vector<1x256xi32>
    %c0_i32_2 = arith.constant 0 : i32
    %9 = arith.cmpi slt, %2, %c0_i32_2 : i32
    %10 = vector.broadcast %9 : i1 to vector<1x256xi1>
    %11 = vector.broadcast %10 : vector<1x256xi1> to vector<1x256xi1>
    %12 = arith.xori %8, %11 : vector<1x256xi1>
    %13 = arith.andi %12, %6 : vector<1x256xi1>
    %14 = vector.broadcast %2 : i32 to vector<1x256xi32>
    %15 = arith.addi %4, %14 : vector<1x256xi32>
    %16 = arith.select %13, %15, %4 : vector<1x256xi1>, vector<1x256xi32>
    %c0 = arith.constant 0 : index
    %c0_3 = arith.constant 0 : index
    %c0_4 = arith.constant 0 : index
    %17 = vector.load %arg1[%c0, %c0_3, %c0_4] : memref<1x4x256xbf16, #tpu.memory_space<vmem>>, vector<1x4x256xbf16>
    %18 = vector.shape_cast %17 : vector<1x4x256xbf16> to vector<4x256xbf16>
    %cst = arith.constant 0.000000e+00 : bf16
    %19 = vector.broadcast %cst : bf16 to vector<4x17xbf16>
    %20 = tpu.concatenate %19, %18, %19 in 1 : vector<4x17xbf16>, vector<4x256xbf16>, vector<4x17xbf16> -> vector<4x290xbf16>
    %c1_i32_5 = arith.constant 1 : i32
    %21 = vector.broadcast %c1_i32_5 : i32 to vector<1x256xi32>
    %22 = arith.cmpi sge, %16, %21 : vector<1x256xi32>
    %c15_i32 = arith.constant 15 : i32
    %23 = vector.broadcast %c15_i32 : i32 to vector<1x256xi32>
    %24 = arith.cmpi slt, %16, %23 : vector<1x256xi32>
    %25 = vector.extract_strided_slice %20 {offsets = [0, 0], sizes = [4, 256], strides = [1, 1]} : vector<4x290xbf16> to vector<4x256xbf16>
    %c0_i32_6 = arith.constant 0 : i32
    %26 = arith.sitofp %c0_i32_6 : i32 to bf16
    %27 = vector.shape_cast %22 : vector<1x256xi1> to vector<1x256xi1>
    %28 = vector.broadcast %27 : vector<1x256xi1> to vector<4x256xi1>
    %29 = vector.broadcast %26 : bf16 to vector<4x256xbf16>
    %30 = arith.select %28, %25, %29 : vector<4x256xi1>, vector<4x256xbf16>
    %31 = vector.extract_strided_slice %20 {offsets = [0, 1], sizes = [4, 256], strides = [1, 1]} : vector<4x290xbf16> to vector<4x256xbf16>
    %32 = vector.extract_strided_slice %20 {offsets = [0, 2], sizes = [4, 256], strides = [1, 1]} : vector<4x290xbf16> to vector<4x256xbf16>
    %c0_i32_7 = arith.constant 0 : i32
    %33 = arith.sitofp %c0_i32_7 : i32 to bf16
    %34 = vector.shape_cast %24 : vector<1x256xi1> to vector<1x256xi1>
    %35 = vector.broadcast %34 : vector<1x256xi1> to vector<4x256xi1>
    %36 = vector.broadcast %33 : bf16 to vector<4x256xbf16>
    %37 = arith.select %35, %32, %36 : vector<4x256xi1>, vector<4x256xbf16>
    %38 = vector.extract_strided_slice %20 {offsets = [0, 16], sizes = [4, 256], strides = [1, 1]} : vector<4x290xbf16> to vector<4x256xbf16>
    %c0_i32_8 = arith.constant 0 : i32
    %39 = arith.sitofp %c0_i32_8 : i32 to bf16
    %40 = vector.shape_cast %22 : vector<1x256xi1> to vector<1x256xi1>
    %41 = vector.broadcast %40 : vector<1x256xi1> to vector<4x256xi1>
    %42 = vector.broadcast %39 : bf16 to vector<4x256xbf16>
    %43 = arith.select %41, %38, %42 : vector<4x256xi1>, vector<4x256xbf16>
    %44 = vector.extract_strided_slice %20 {offsets = [0, 17], sizes = [4, 256], strides = [1, 1]} : vector<4x290xbf16> to vector<4x256xbf16>
    %45 = vector.extract_strided_slice %20 {offsets = [0, 18], sizes = [4, 256], strides = [1, 1]} : vector<4x290xbf16> to vector<4x256xbf16>
    %c0_i32_9 = arith.constant 0 : i32
    %46 = arith.sitofp %c0_i32_9 : i32 to bf16
    %47 = vector.shape_cast %24 : vector<1x256xi1> to vector<1x256xi1>
    %48 = vector.broadcast %47 : vector<1x256xi1> to vector<4x256xi1>
    %49 = vector.broadcast %46 : bf16 to vector<4x256xbf16>
    %50 = arith.select %48, %45, %49 : vector<4x256xi1>, vector<4x256xbf16>
    %51 = vector.extract_strided_slice %20 {offsets = [0, 32], sizes = [4, 256], strides = [1, 1]} : vector<4x290xbf16> to vector<4x256xbf16>
    %c0_i32_10 = arith.constant 0 : i32
    %52 = arith.sitofp %c0_i32_10 : i32 to bf16
    %53 = vector.shape_cast %22 : vector<1x256xi1> to vector<1x256xi1>
    %54 = vector.broadcast %53 : vector<1x256xi1> to vector<4x256xi1>
    %55 = vector.broadcast %52 : bf16 to vector<4x256xbf16>
    %56 = arith.select %54, %51, %55 : vector<4x256xi1>, vector<4x256xbf16>
    %57 = vector.extract_strided_slice %20 {offsets = [0, 33], sizes = [4, 256], strides = [1, 1]} : vector<4x290xbf16> to vector<4x256xbf16>
    %58 = vector.extract_strided_slice %20 {offsets = [0, 34], sizes = [4, 256], strides = [1, 1]} : vector<4x290xbf16> to vector<4x256xbf16>
    %c0_i32_11 = arith.constant 0 : i32
    %59 = arith.sitofp %c0_i32_11 : i32 to bf16
    %60 = vector.shape_cast %24 : vector<1x256xi1> to vector<1x256xi1>
    %61 = vector.broadcast %60 : vector<1x256xi1> to vector<4x256xi1>
    %62 = vector.broadcast %59 : bf16 to vector<4x256xbf16>
    %63 = arith.select %61, %58, %62 : vector<4x256xi1>, vector<4x256xbf16>
    %64 = tpu.concatenate %30, %31, %37, %43, %44, %50, %56, %57, %63 in 0 : vector<4x256xbf16>, vector<4x256xbf16>, vector<4x256xbf16>, vector<4x256xbf16>, vector<4x256xbf16>, vector<4x256xbf16>, vector<4x256xbf16>, vector<4x256xbf16>, vector<4x256xbf16> -> vector<36x256xbf16>
    %c0_12 = arith.constant 0 : index
    %c0_13 = arith.constant 0 : index
    %65 = vector.load %arg2[%c0_12, %c0_13] : memref<8x36xbf16, #tpu.memory_space<vmem>>, vector<8x36xbf16>
    %cst_14 = arith.constant dense<0.000000e+00> : vector<8x256xf32>
    %66 = tpu.matmul %65, %64, %cst_14 {dimension_numbers = #tpu.dot_dimension_numbers<[1], [0], [0], [1], [0, 0, 1, 1], [], []>} : vector<8x36xbf16>, vector<36x256xbf16>, vector<8x256xf32> -> vector<8x256xf32>
    %c0_15 = arith.constant 0 : index
    %c0_16 = arith.constant 0 : index
    %67 = vector.load %arg3[%c0_15, %c0_16] : memref<8x1xf32, #tpu.memory_space<vmem>>, vector<8x1xf32>
    %68 = vector.broadcast %67 : vector<8x1xf32> to vector<8x256xf32>
    %69 = arith.addf %66, %68 : vector<8x256xf32>
    %cst_17 = arith.constant 0.000000e+00 : f32
    %70 = vector.broadcast %cst_17 : f32 to vector<8x256xf32>
    %71 = arith.maximumf %69, %70 : vector<8x256xf32>
    %72 = arith.truncf %71 : vector<8x256xf32> to vector<8x256xbf16>
    %cst_18 = arith.constant 0.000000e+00 : bf16
    %73 = vector.broadcast %cst_18 : bf16 to vector<8x17xbf16>
    %74 = tpu.concatenate %73, %72, %73 in 1 : vector<8x17xbf16>, vector<8x256xbf16>, vector<8x17xbf16> -> vector<8x290xbf16>
    %c1_i32_19 = arith.constant 1 : i32
    %75 = vector.broadcast %c1_i32_19 : i32 to vector<1x256xi32>
    %76 = arith.cmpi sge, %16, %75 : vector<1x256xi32>
    %c15_i32_20 = arith.constant 15 : i32
    %77 = vector.broadcast %c15_i32_20 : i32 to vector<1x256xi32>
    %78 = arith.cmpi slt, %16, %77 : vector<1x256xi32>
    %79 = vector.extract_strided_slice %74 {offsets = [0, 0], sizes = [8, 256], strides = [1, 1]} : vector<8x290xbf16> to vector<8x256xbf16>
    %c0_i32_21 = arith.constant 0 : i32
    %80 = arith.sitofp %c0_i32_21 : i32 to bf16
    %81 = vector.shape_cast %76 : vector<1x256xi1> to vector<1x256xi1>
    %82 = vector.broadcast %81 : vector<1x256xi1> to vector<8x256xi1>
    %83 = vector.broadcast %80 : bf16 to vector<8x256xbf16>
    %84 = arith.select %82, %79, %83 : vector<8x256xi1>, vector<8x256xbf16>
    %85 = vector.extract_strided_slice %74 {offsets = [0, 1], sizes = [8, 256], strides = [1, 1]} : vector<8x290xbf16> to vector<8x256xbf16>
    %86 = vector.extract_strided_slice %74 {offsets = [0, 2], sizes = [8, 256], strides = [1, 1]} : vector<8x290xbf16> to vector<8x256xbf16>
    %c0_i32_22 = arith.constant 0 : i32
    %87 = arith.sitofp %c0_i32_22 : i32 to bf16
    %88 = vector.shape_cast %78 : vector<1x256xi1> to vector<1x256xi1>
    %89 = vector.broadcast %88 : vector<1x256xi1> to vector<8x256xi1>
    %90 = vector.broadcast %87 : bf16 to vector<8x256xbf16>
    %91 = arith.select %89, %86, %90 : vector<8x256xi1>, vector<8x256xbf16>
    %92 = vector.extract_strided_slice %74 {offsets = [0, 16], sizes = [8, 256], strides = [1, 1]} : vector<8x290xbf16> to vector<8x256xbf16>
    %c0_i32_23 = arith.constant 0 : i32
    %93 = arith.sitofp %c0_i32_23 : i32 to bf16
    %94 = vector.shape_cast %76 : vector<1x256xi1> to vector<1x256xi1>
    %95 = vector.broadcast %94 : vector<1x256xi1> to vector<8x256xi1>
    %96 = vector.broadcast %93 : bf16 to vector<8x256xbf16>
    %97 = arith.select %95, %92, %96 : vector<8x256xi1>, vector<8x256xbf16>
    %98 = vector.extract_strided_slice %74 {offsets = [0, 17], sizes = [8, 256], strides = [1, 1]} : vector<8x290xbf16> to vector<8x256xbf16>
    %99 = vector.extract_strided_slice %74 {offsets = [0, 18], sizes = [8, 256], strides = [1, 1]} : vector<8x290xbf16> to vector<8x256xbf16>
    %c0_i32_24 = arith.constant 0 : i32
    %100 = arith.sitofp %c0_i32_24 : i32 to bf16
    %101 = vector.shape_cast %78 : vector<1x256xi1> to vector<1x256xi1>
    %102 = vector.broadcast %101 : vector<1x256xi1> to vector<8x256xi1>
    %103 = vector.broadcast %100 : bf16 to vector<8x256xbf16>
    %104 = arith.select %102, %99, %103 : vector<8x256xi1>, vector<8x256xbf16>
    %105 = vector.extract_strided_slice %74 {offsets = [0, 32], sizes = [8, 256], strides = [1, 1]} : vector<8x290xbf16> to vector<8x256xbf16>
    %c0_i32_25 = arith.constant 0 : i32
    %106 = arith.sitofp %c0_i32_25 : i32 to bf16
    %107 = vector.shape_cast %76 : vector<1x256xi1> to vector<1x256xi1>
    %108 = vector.broadcast %107 : vector<1x256xi1> to vector<8x256xi1>
    %109 = vector.broadcast %106 : bf16 to vector<8x256xbf16>
    %110 = arith.select %108, %105, %109 : vector<8x256xi1>, vector<8x256xbf16>
    %111 = vector.extract_strided_slice %74 {offsets = [0, 33], sizes = [8, 256], strides = [1, 1]} : vector<8x290xbf16> to vector<8x256xbf16>
    %112 = vector.extract_strided_slice %74 {offsets = [0, 34], sizes = [8, 256], strides = [1, 1]} : vector<8x290xbf16> to vector<8x256xbf16>
    %c0_i32_26 = arith.constant 0 : i32
    %113 = arith.sitofp %c0_i32_26 : i32 to bf16
    %114 = vector.shape_cast %78 : vector<1x256xi1> to vector<1x256xi1>
    %115 = vector.broadcast %114 : vector<1x256xi1> to vector<8x256xi1>
    %116 = vector.broadcast %113 : bf16 to vector<8x256xbf16>
    %117 = arith.select %115, %112, %116 : vector<8x256xi1>, vector<8x256xbf16>
    %118 = tpu.concatenate %84, %85, %91, %97, %98, %104, %110, %111, %117 in 0 : vector<8x256xbf16>, vector<8x256xbf16>, vector<8x256xbf16>, vector<8x256xbf16>, vector<8x256xbf16>, vector<8x256xbf16>, vector<8x256xbf16>, vector<8x256xbf16>, vector<8x256xbf16> -> vector<72x256xbf16>
    %c0_27 = arith.constant 0 : index
    %c0_28 = arith.constant 0 : index
    %119 = vector.load %arg4[%c0_27, %c0_28] : memref<8x72xbf16, #tpu.memory_space<vmem>>, vector<8x72xbf16>
    %cst_29 = arith.constant dense<0.000000e+00> : vector<8x256xf32>
    %120 = tpu.matmul %119, %118, %cst_29 {dimension_numbers = #tpu.dot_dimension_numbers<[1], [0], [0], [1], [0, 0, 1, 1], [], []>} : vector<8x72xbf16>, vector<72x256xbf16>, vector<8x256xf32> -> vector<8x256xf32>
    %c0_30 = arith.constant 0 : index
    %c0_31 = arith.constant 0 : index
    %121 = vector.load %arg5[%c0_30, %c0_31] : memref<8x1xf32, #tpu.memory_space<vmem>>, vector<8x1xf32>
    %122 = vector.broadcast %121 : vector<8x1xf32> to vector<8x256xf32>
    %123 = arith.addf %120, %122 : vector<8x256xf32>
    %cst_32 = arith.constant 0.000000e+00 : f32
    %124 = vector.broadcast %cst_32 : f32 to vector<8x256xf32>
    %125 = arith.maximumf %123, %124 : vector<8x256xf32>
    %126 = arith.truncf %125 : vector<8x256xf32> to vector<8x256xbf16>
    %cst_33 = arith.constant 0.000000e+00 : bf16
    %127 = vector.broadcast %cst_33 : bf16 to vector<8x17xbf16>
    %128 = tpu.concatenate %127, %126, %127 in 1 : vector<8x17xbf16>, vector<8x256xbf16>, vector<8x17xbf16> -> vector<8x290xbf16>
    %c1_i32_34 = arith.constant 1 : i32
    %129 = vector.broadcast %c1_i32_34 : i32 to vector<1x256xi32>
    %130 = arith.cmpi sge, %16, %129 : vector<1x256xi32>
    %c15_i32_35 = arith.constant 15 : i32
    %131 = vector.broadcast %c15_i32_35 : i32 to vector<1x256xi32>
    %132 = arith.cmpi slt, %16, %131 : vector<1x256xi32>
    %133 = vector.extract_strided_slice %128 {offsets = [0, 0], sizes = [8, 256], strides = [1, 1]} : vector<8x290xbf16> to vector<8x256xbf16>
    %c0_i32_36 = arith.constant 0 : i32
    %134 = arith.sitofp %c0_i32_36 : i32 to bf16
    %135 = vector.shape_cast %130 : vector<1x256xi1> to vector<1x256xi1>
    %136 = vector.broadcast %135 : vector<1x256xi1> to vector<8x256xi1>
    %137 = vector.broadcast %134 : bf16 to vector<8x256xbf16>
    %138 = arith.select %136, %133, %137 : vector<8x256xi1>, vector<8x256xbf16>
    %139 = vector.extract_strided_slice %128 {offsets = [0, 1], sizes = [8, 256], strides = [1, 1]} : vector<8x290xbf16> to vector<8x256xbf16>
    %140 = vector.extract_strided_slice %128 {offsets = [0, 2], sizes = [8, 256], strides = [1, 1]} : vector<8x290xbf16> to vector<8x256xbf16>
    %c0_i32_37 = arith.constant 0 : i32
    %141 = arith.sitofp %c0_i32_37 : i32 to bf16
    %142 = vector.shape_cast %132 : vector<1x256xi1> to vector<1x256xi1>
    %143 = vector.broadcast %142 : vector<1x256xi1> to vector<8x256xi1>
    %144 = vector.broadcast %141 : bf16 to vector<8x256xbf16>
    %145 = arith.select %143, %140, %144 : vector<8x256xi1>, vector<8x256xbf16>
    %146 = vector.extract_strided_slice %128 {offsets = [0, 16], sizes = [8, 256], strides = [1, 1]} : vector<8x290xbf16> to vector<8x256xbf16>
    %c0_i32_38 = arith.constant 0 : i32
    %147 = arith.sitofp %c0_i32_38 : i32 to bf16
    %148 = vector.shape_cast %130 : vector<1x256xi1> to vector<1x256xi1>
    %149 = vector.broadcast %148 : vector<1x256xi1> to vector<8x256xi1>
    %150 = vector.broadcast %147 : bf16 to vector<8x256xbf16>
    %151 = arith.select %149, %146, %150 : vector<8x256xi1>, vector<8x256xbf16>
    %152 = vector.extract_strided_slice %128 {offsets = [0, 17], sizes = [8, 256], strides = [1, 1]} : vector<8x290xbf16> to vector<8x256xbf16>
    %153 = vector.extract_strided_slice %128 {offsets = [0, 18], sizes = [8, 256], strides = [1, 1]} : vector<8x290xbf16> to vector<8x256xbf16>
    %c0_i32_39 = arith.constant 0 : i32
    %154 = arith.sitofp %c0_i32_39 : i32 to bf16
    %155 = vector.shape_cast %132 : vector<1x256xi1> to vector<1x256xi1>
    %156 = vector.broadcast %155 : vector<1x256xi1> to vector<8x256xi1>
    %157 = vector.broadcast %154 : bf16 to vector<8x256xbf16>
    %158 = arith.select %156, %153, %157 : vector<8x256xi1>, vector<8x256xbf16>
    %159 = vector.extract_strided_slice %128 {offsets = [0, 32], sizes = [8, 256], strides = [1, 1]} : vector<8x290xbf16> to vector<8x256xbf16>
    %c0_i32_40 = arith.constant 0 : i32
    %160 = arith.sitofp %c0_i32_40 : i32 to bf16
    %161 = vector.shape_cast %130 : vector<1x256xi1> to vector<1x256xi1>
    %162 = vector.broadcast %161 : vector<1x256xi1> to vector<8x256xi1>
    %163 = vector.broadcast %160 : bf16 to vector<8x256xbf16>
    %164 = arith.select %162, %159, %163 : vector<8x256xi1>, vector<8x256xbf16>
    %165 = vector.extract_strided_slice %128 {offsets = [0, 33], sizes = [8, 256], strides = [1, 1]} : vector<8x290xbf16> to vector<8x256xbf16>
    %166 = vector.extract_strided_slice %128 {offsets = [0, 34], sizes = [8, 256], strides = [1, 1]} : vector<8x290xbf16> to vector<8x256xbf16>
    %c0_i32_41 = arith.constant 0 : i32
    %167 = arith.sitofp %c0_i32_41 : i32 to bf16
    %168 = vector.shape_cast %132 : vector<1x256xi1> to vector<1x256xi1>
    %169 = vector.broadcast %168 : vector<1x256xi1> to vector<8x256xi1>
    %170 = vector.broadcast %167 : bf16 to vector<8x256xbf16>
    %171 = arith.select %169, %166, %170 : vector<8x256xi1>, vector<8x256xbf16>
    %172 = tpu.concatenate %138, %139, %145, %151, %152, %158, %164, %165, %171 in 0 : vector<8x256xbf16>, vector<8x256xbf16>, vector<8x256xbf16>, vector<8x256xbf16>, vector<8x256xbf16>, vector<8x256xbf16>, vector<8x256xbf16>, vector<8x256xbf16>, vector<8x256xbf16> -> vector<72x256xbf16>
    %c0_42 = arith.constant 0 : index
    %c0_43 = arith.constant 0 : index
    %173 = vector.load %arg6[%c0_42, %c0_43] : memref<16x72xbf16, #tpu.memory_space<vmem>>, vector<16x72xbf16>
    %cst_44 = arith.constant dense<0.000000e+00> : vector<16x256xf32>
    %174 = tpu.matmul %173, %172, %cst_44 {dimension_numbers = #tpu.dot_dimension_numbers<[1], [0], [0], [1], [0, 0, 1, 1], [], []>} : vector<16x72xbf16>, vector<72x256xbf16>, vector<16x256xf32> -> vector<16x256xf32>
    %c0_45 = arith.constant 0 : index
    %c0_46 = arith.constant 0 : index
    %175 = vector.load %arg7[%c0_45, %c0_46] : memref<16x1xf32, #tpu.memory_space<vmem>>, vector<16x1xf32>
    %176 = vector.broadcast %175 : vector<16x1xf32> to vector<16x256xf32>
    %177 = arith.addf %174, %176 : vector<16x256xf32>
    %cst_47 = arith.constant 0.000000e+00 : f32
    %178 = vector.broadcast %cst_47 : f32 to vector<16x256xf32>
    %179 = arith.maximumf %177, %178 : vector<16x256xf32>
    %180 = arith.truncf %179 : vector<16x256xf32> to vector<16x256xbf16>
    %cst_48 = arith.constant 0.000000e+00 : bf16
    %181 = vector.broadcast %cst_48 : bf16 to vector<16x17xbf16>
    %182 = tpu.concatenate %181, %180, %181 in 1 : vector<16x17xbf16>, vector<16x256xbf16>, vector<16x17xbf16> -> vector<16x290xbf16>
    %c1_i32_49 = arith.constant 1 : i32
    %183 = vector.broadcast %c1_i32_49 : i32 to vector<1x256xi32>
    %184 = arith.cmpi sge, %16, %183 : vector<1x256xi32>
    %c15_i32_50 = arith.constant 15 : i32
    %185 = vector.broadcast %c15_i32_50 : i32 to vector<1x256xi32>
    %186 = arith.cmpi slt, %16, %185 : vector<1x256xi32>
    %187 = vector.extract_strided_slice %182 {offsets = [0, 0], sizes = [16, 256], strides = [1, 1]} : vector<16x290xbf16> to vector<16x256xbf16>
    %c0_i32_51 = arith.constant 0 : i32
    %188 = arith.sitofp %c0_i32_51 : i32 to bf16
    %189 = vector.shape_cast %184 : vector<1x256xi1> to vector<1x256xi1>
    %190 = vector.broadcast %189 : vector<1x256xi1> to vector<16x256xi1>
    %191 = vector.broadcast %188 : bf16 to vector<16x256xbf16>
    %192 = arith.select %190, %187, %191 : vector<16x256xi1>, vector<16x256xbf16>
    %193 = vector.extract_strided_slice %182 {offsets = [0, 1], sizes = [16, 256], strides = [1, 1]} : vector<16x290xbf16> to vector<16x256xbf16>
    %194 = vector.extract_strided_slice %182 {offsets = [0, 2], sizes = [16, 256], strides = [1, 1]} : vector<16x290xbf16> to vector<16x256xbf16>
    %c0_i32_52 = arith.constant 0 : i32
    %195 = arith.sitofp %c0_i32_52 : i32 to bf16
    %196 = vector.shape_cast %186 : vector<1x256xi1> to vector<1x256xi1>
    %197 = vector.broadcast %196 : vector<1x256xi1> to vector<16x256xi1>
    %198 = vector.broadcast %195 : bf16 to vector<16x256xbf16>
    %199 = arith.select %197, %194, %198 : vector<16x256xi1>, vector<16x256xbf16>
    %200 = vector.extract_strided_slice %182 {offsets = [0, 16], sizes = [16, 256], strides = [1, 1]} : vector<16x290xbf16> to vector<16x256xbf16>
    %c0_i32_53 = arith.constant 0 : i32
    %201 = arith.sitofp %c0_i32_53 : i32 to bf16
    %202 = vector.shape_cast %184 : vector<1x256xi1> to vector<1x256xi1>
    %203 = vector.broadcast %202 : vector<1x256xi1> to vector<16x256xi1>
    %204 = vector.broadcast %201 : bf16 to vector<16x256xbf16>
    %205 = arith.select %203, %200, %204 : vector<16x256xi1>, vector<16x256xbf16>
    %206 = vector.extract_strided_slice %182 {offsets = [0, 17], sizes = [16, 256], strides = [1, 1]} : vector<16x290xbf16> to vector<16x256xbf16>
    %207 = vector.extract_strided_slice %182 {offsets = [0, 18], sizes = [16, 256], strides = [1, 1]} : vector<16x290xbf16> to vector<16x256xbf16>
    %c0_i32_54 = arith.constant 0 : i32
    %208 = arith.sitofp %c0_i32_54 : i32 to bf16
    %209 = vector.shape_cast %186 : vector<1x256xi1> to vector<1x256xi1>
    %210 = vector.broadcast %209 : vector<1x256xi1> to vector<16x256xi1>
    %211 = vector.broadcast %208 : bf16 to vector<16x256xbf16>
    %212 = arith.select %210, %207, %211 : vector<16x256xi1>, vector<16x256xbf16>
    %213 = vector.extract_strided_slice %182 {offsets = [0, 32], sizes = [16, 256], strides = [1, 1]} : vector<16x290xbf16> to vector<16x256xbf16>
    %c0_i32_55 = arith.constant 0 : i32
    %214 = arith.sitofp %c0_i32_55 : i32 to bf16
    %215 = vector.shape_cast %184 : vector<1x256xi1> to vector<1x256xi1>
    %216 = vector.broadcast %215 : vector<1x256xi1> to vector<16x256xi1>
    %217 = vector.broadcast %214 : bf16 to vector<16x256xbf16>
    %218 = arith.select %216, %213, %217 : vector<16x256xi1>, vector<16x256xbf16>
    %219 = vector.extract_strided_slice %182 {offsets = [0, 33], sizes = [16, 256], strides = [1, 1]} : vector<16x290xbf16> to vector<16x256xbf16>
    %220 = vector.extract_strided_slice %182 {offsets = [0, 34], sizes = [16, 256], strides = [1, 1]} : vector<16x290xbf16> to vector<16x256xbf16>
    %c0_i32_56 = arith.constant 0 : i32
    %221 = arith.sitofp %c0_i32_56 : i32 to bf16
    %222 = vector.shape_cast %186 : vector<1x256xi1> to vector<1x256xi1>
    %223 = vector.broadcast %222 : vector<1x256xi1> to vector<16x256xi1>
    %224 = vector.broadcast %221 : bf16 to vector<16x256xbf16>
    %225 = arith.select %223, %220, %224 : vector<16x256xi1>, vector<16x256xbf16>
    %226 = tpu.concatenate %192, %193, %199, %205, %206, %212, %218, %219, %225 in 0 : vector<16x256xbf16>, vector<16x256xbf16>, vector<16x256xbf16>, vector<16x256xbf16>, vector<16x256xbf16>, vector<16x256xbf16>, vector<16x256xbf16>, vector<16x256xbf16>, vector<16x256xbf16> -> vector<144x256xbf16>
    %c0_57 = arith.constant 0 : index
    %c0_58 = arith.constant 0 : index
    %227 = vector.load %arg8[%c0_57, %c0_58] : memref<16x144xbf16, #tpu.memory_space<vmem>>, vector<16x144xbf16>
    %cst_59 = arith.constant dense<0.000000e+00> : vector<16x256xf32>
    %228 = tpu.matmul %227, %226, %cst_59 {dimension_numbers = #tpu.dot_dimension_numbers<[1], [0], [0], [1], [0, 0, 1, 1], [], []>} : vector<16x144xbf16>, vector<144x256xbf16>, vector<16x256xf32> -> vector<16x256xf32>
    %c0_60 = arith.constant 0 : index
    %c0_61 = arith.constant 0 : index
    %229 = vector.load %arg9[%c0_60, %c0_61] : memref<16x1xf32, #tpu.memory_space<vmem>>, vector<16x1xf32>
    %230 = vector.broadcast %229 : vector<16x1xf32> to vector<16x256xf32>
    %231 = arith.addf %228, %230 : vector<16x256xf32>
    %cst_62 = arith.constant 0.000000e+00 : f32
    %232 = vector.broadcast %cst_62 : f32 to vector<16x256xf32>
    %233 = arith.maximumf %231, %232 : vector<16x256xf32>
    %234 = arith.truncf %233 : vector<16x256xf32> to vector<16x256xbf16>
    %cst_63 = arith.constant 0.000000e+00 : bf16
    %235 = vector.broadcast %cst_63 : bf16 to vector<16x34xbf16>
    %236 = tpu.concatenate %235, %234, %235 in 1 : vector<16x34xbf16>, vector<16x256xbf16>, vector<16x34xbf16> -> vector<16x324xbf16>
    %c2_i32 = arith.constant 2 : i32
    %237 = vector.broadcast %c2_i32 : i32 to vector<1x256xi32>
    %238 = arith.cmpi sge, %16, %237 : vector<1x256xi32>
    %c14_i32 = arith.constant 14 : i32
    %239 = vector.broadcast %c14_i32 : i32 to vector<1x256xi32>
    %240 = arith.cmpi slt, %16, %239 : vector<1x256xi32>
    %241 = vector.extract_strided_slice %236 {offsets = [0, 0], sizes = [16, 256], strides = [1, 1]} : vector<16x324xbf16> to vector<16x256xbf16>
    %c0_i32_64 = arith.constant 0 : i32
    %242 = arith.sitofp %c0_i32_64 : i32 to bf16
    %243 = vector.shape_cast %238 : vector<1x256xi1> to vector<1x256xi1>
    %244 = vector.broadcast %243 : vector<1x256xi1> to vector<16x256xi1>
    %245 = vector.broadcast %242 : bf16 to vector<16x256xbf16>
    %246 = arith.select %244, %241, %245 : vector<16x256xi1>, vector<16x256xbf16>
    %247 = vector.extract_strided_slice %236 {offsets = [0, 2], sizes = [16, 256], strides = [1, 1]} : vector<16x324xbf16> to vector<16x256xbf16>
    %248 = vector.extract_strided_slice %236 {offsets = [0, 4], sizes = [16, 256], strides = [1, 1]} : vector<16x324xbf16> to vector<16x256xbf16>
    %c0_i32_65 = arith.constant 0 : i32
    %249 = arith.sitofp %c0_i32_65 : i32 to bf16
    %250 = vector.shape_cast %240 : vector<1x256xi1> to vector<1x256xi1>
    %251 = vector.broadcast %250 : vector<1x256xi1> to vector<16x256xi1>
    %252 = vector.broadcast %249 : bf16 to vector<16x256xbf16>
    %253 = arith.select %251, %248, %252 : vector<16x256xi1>, vector<16x256xbf16>
    %254 = vector.extract_strided_slice %236 {offsets = [0, 32], sizes = [16, 256], strides = [1, 1]} : vector<16x324xbf16> to vector<16x256xbf16>
    %c0_i32_66 = arith.constant 0 : i32
    %255 = arith.sitofp %c0_i32_66 : i32 to bf16
    %256 = vector.shape_cast %238 : vector<1x256xi1> to vector<1x256xi1>
    %257 = vector.broadcast %256 : vector<1x256xi1> to vector<16x256xi1>
    %258 = vector.broadcast %255 : bf16 to vector<16x256xbf16>
    %259 = arith.select %257, %254, %258 : vector<16x256xi1>, vector<16x256xbf16>
    %260 = vector.extract_strided_slice %236 {offsets = [0, 34], sizes = [16, 256], strides = [1, 1]} : vector<16x324xbf16> to vector<16x256xbf16>
    %261 = vector.extract_strided_slice %236 {offsets = [0, 36], sizes = [16, 256], strides = [1, 1]} : vector<16x324xbf16> to vector<16x256xbf16>
    %c0_i32_67 = arith.constant 0 : i32
    %262 = arith.sitofp %c0_i32_67 : i32 to bf16
    %263 = vector.shape_cast %240 : vector<1x256xi1> to vector<1x256xi1>
    %264 = vector.broadcast %263 : vector<1x256xi1> to vector<16x256xi1>
    %265 = vector.broadcast %262 : bf16 to vector<16x256xbf16>
    %266 = arith.select %264, %261, %265 : vector<16x256xi1>, vector<16x256xbf16>
    %267 = vector.extract_strided_slice %236 {offsets = [0, 64], sizes = [16, 256], strides = [1, 1]} : vector<16x324xbf16> to vector<16x256xbf16>
    %c0_i32_68 = arith.constant 0 : i32
    %268 = arith.sitofp %c0_i32_68 : i32 to bf16
    %269 = vector.shape_cast %238 : vector<1x256xi1> to vector<1x256xi1>
    %270 = vector.broadcast %269 : vector<1x256xi1> to vector<16x256xi1>
    %271 = vector.broadcast %268 : bf16 to vector<16x256xbf16>
    %272 = arith.select %270, %267, %271 : vector<16x256xi1>, vector<16x256xbf16>
    %273 = vector.extract_strided_slice %236 {offsets = [0, 66], sizes = [16, 256], strides = [1, 1]} : vector<16x324xbf16> to vector<16x256xbf16>
    %274 = vector.extract_strided_slice %236 {offsets = [0, 68], sizes = [16, 256], strides = [1, 1]} : vector<16x324xbf16> to vector<16x256xbf16>
    %c0_i32_69 = arith.constant 0 : i32
    %275 = arith.sitofp %c0_i32_69 : i32 to bf16
    %276 = vector.shape_cast %240 : vector<1x256xi1> to vector<1x256xi1>
    %277 = vector.broadcast %276 : vector<1x256xi1> to vector<16x256xi1>
    %278 = vector.broadcast %275 : bf16 to vector<16x256xbf16>
    %279 = arith.select %277, %274, %278 : vector<16x256xi1>, vector<16x256xbf16>
    %280 = tpu.concatenate %246, %247, %253, %259, %260, %266, %272, %273, %279 in 0 : vector<16x256xbf16>, vector<16x256xbf16>, vector<16x256xbf16>, vector<16x256xbf16>, vector<16x256xbf16>, vector<16x256xbf16>, vector<16x256xbf16>, vector<16x256xbf16>, vector<16x256xbf16> -> vector<144x256xbf16>
    %c0_70 = arith.constant 0 : index
    %c0_71 = arith.constant 0 : index
    %281 = vector.load %arg10[%c0_70, %c0_71] : memref<16x144xbf16, #tpu.memory_space<vmem>>, vector<16x144xbf16>
    %cst_72 = arith.constant dense<0.000000e+00> : vector<16x256xf32>
    %282 = tpu.matmul %281, %280, %cst_72 {dimension_numbers = #tpu.dot_dimension_numbers<[1], [0], [0], [1], [0, 0, 1, 1], [], []>} : vector<16x144xbf16>, vector<144x256xbf16>, vector<16x256xf32> -> vector<16x256xf32>
    %c0_73 = arith.constant 0 : index
    %c0_74 = arith.constant 0 : index
    %283 = vector.load %arg11[%c0_73, %c0_74] : memref<16x1xf32, #tpu.memory_space<vmem>>, vector<16x1xf32>
    %284 = vector.broadcast %283 : vector<16x1xf32> to vector<16x256xf32>
    %285 = arith.addf %282, %284 : vector<16x256xf32>
    %cst_75 = arith.constant 0.000000e+00 : f32
    %286 = vector.broadcast %cst_75 : f32 to vector<16x256xf32>
    %287 = arith.maximumf %285, %286 : vector<16x256xf32>
    %288 = arith.truncf %287 : vector<16x256xf32> to vector<16x256xbf16>
    %cst_76 = arith.constant 0.000000e+00 : bf16
    %289 = vector.broadcast %cst_76 : bf16 to vector<16x34xbf16>
    %290 = tpu.concatenate %289, %288, %289 in 1 : vector<16x34xbf16>, vector<16x256xbf16>, vector<16x34xbf16> -> vector<16x324xbf16>
    %c2_i32_77 = arith.constant 2 : i32
    %291 = vector.broadcast %c2_i32_77 : i32 to vector<1x256xi32>
    %292 = arith.cmpi sge, %16, %291 : vector<1x256xi32>
    %c14_i32_78 = arith.constant 14 : i32
    %293 = vector.broadcast %c14_i32_78 : i32 to vector<1x256xi32>
    %294 = arith.cmpi slt, %16, %293 : vector<1x256xi32>
    %295 = vector.extract_strided_slice %290 {offsets = [0, 0], sizes = [16, 256], strides = [1, 1]} : vector<16x324xbf16> to vector<16x256xbf16>
    %c0_i32_79 = arith.constant 0 : i32
    %296 = arith.sitofp %c0_i32_79 : i32 to bf16
    %297 = vector.shape_cast %292 : vector<1x256xi1> to vector<1x256xi1>
    %298 = vector.broadcast %297 : vector<1x256xi1> to vector<16x256xi1>
    %299 = vector.broadcast %296 : bf16 to vector<16x256xbf16>
    %300 = arith.select %298, %295, %299 : vector<16x256xi1>, vector<16x256xbf16>
    %301 = vector.extract_strided_slice %290 {offsets = [0, 2], sizes = [16, 256], strides = [1, 1]} : vector<16x324xbf16> to vector<16x256xbf16>
    %302 = vector.extract_strided_slice %290 {offsets = [0, 4], sizes = [16, 256], strides = [1, 1]} : vector<16x324xbf16> to vector<16x256xbf16>
    %c0_i32_80 = arith.constant 0 : i32
    %303 = arith.sitofp %c0_i32_80 : i32 to bf16
    %304 = vector.shape_cast %294 : vector<1x256xi1> to vector<1x256xi1>
    %305 = vector.broadcast %304 : vector<1x256xi1> to vector<16x256xi1>
    %306 = vector.broadcast %303 : bf16 to vector<16x256xbf16>
    %307 = arith.select %305, %302, %306 : vector<16x256xi1>, vector<16x256xbf16>
    %308 = vector.extract_strided_slice %290 {offsets = [0, 32], sizes = [16, 256], strides = [1, 1]} : vector<16x324xbf16> to vector<16x256xbf16>
    %c0_i32_81 = arith.constant 0 : i32
    %309 = arith.sitofp %c0_i32_81 : i32 to bf16
    %310 = vector.shape_cast %292 : vector<1x256xi1> to vector<1x256xi1>
    %311 = vector.broadcast %310 : vector<1x256xi1> to vector<16x256xi1>
    %312 = vector.broadcast %309 : bf16 to vector<16x256xbf16>
    %313 = arith.select %311, %308, %312 : vector<16x256xi1>, vector<16x256xbf16>
    %314 = vector.extract_strided_slice %290 {offsets = [0, 34], sizes = [16, 256], strides = [1, 1]} : vector<16x324xbf16> to vector<16x256xbf16>
    %315 = vector.extract_strided_slice %290 {offsets = [0, 36], sizes = [16, 256], strides = [1, 1]} : vector<16x324xbf16> to vector<16x256xbf16>
    %c0_i32_82 = arith.constant 0 : i32
    %316 = arith.sitofp %c0_i32_82 : i32 to bf16
    %317 = vector.shape_cast %294 : vector<1x256xi1> to vector<1x256xi1>
    %318 = vector.broadcast %317 : vector<1x256xi1> to vector<16x256xi1>
    %319 = vector.broadcast %316 : bf16 to vector<16x256xbf16>
    %320 = arith.select %318, %315, %319 : vector<16x256xi1>, vector<16x256xbf16>
    %321 = vector.extract_strided_slice %290 {offsets = [0, 64], sizes = [16, 256], strides = [1, 1]} : vector<16x324xbf16> to vector<16x256xbf16>
    %c0_i32_83 = arith.constant 0 : i32
    %322 = arith.sitofp %c0_i32_83 : i32 to bf16
    %323 = vector.shape_cast %292 : vector<1x256xi1> to vector<1x256xi1>
    %324 = vector.broadcast %323 : vector<1x256xi1> to vector<16x256xi1>
    %325 = vector.broadcast %322 : bf16 to vector<16x256xbf16>
    %326 = arith.select %324, %321, %325 : vector<16x256xi1>, vector<16x256xbf16>
    %327 = vector.extract_strided_slice %290 {offsets = [0, 66], sizes = [16, 256], strides = [1, 1]} : vector<16x324xbf16> to vector<16x256xbf16>
    %328 = vector.extract_strided_slice %290 {offsets = [0, 68], sizes = [16, 256], strides = [1, 1]} : vector<16x324xbf16> to vector<16x256xbf16>
    %c0_i32_84 = arith.constant 0 : i32
    %329 = arith.sitofp %c0_i32_84 : i32 to bf16
    %330 = vector.shape_cast %294 : vector<1x256xi1> to vector<1x256xi1>
    %331 = vector.broadcast %330 : vector<1x256xi1> to vector<16x256xi1>
    %332 = vector.broadcast %329 : bf16 to vector<16x256xbf16>
    %333 = arith.select %331, %328, %332 : vector<16x256xi1>, vector<16x256xbf16>
    %334 = tpu.concatenate %300, %301, %307, %313, %314, %320, %326, %327, %333 in 0 : vector<16x256xbf16>, vector<16x256xbf16>, vector<16x256xbf16>, vector<16x256xbf16>, vector<16x256xbf16>, vector<16x256xbf16>, vector<16x256xbf16>, vector<16x256xbf16>, vector<16x256xbf16> -> vector<144x256xbf16>
    %c0_85 = arith.constant 0 : index
    %c0_86 = arith.constant 0 : index
    %335 = vector.load %arg12[%c0_85, %c0_86] : memref<16x144xbf16, #tpu.memory_space<vmem>>, vector<16x144xbf16>
    %cst_87 = arith.constant dense<0.000000e+00> : vector<16x256xf32>
    %336 = tpu.matmul %335, %334, %cst_87 {dimension_numbers = #tpu.dot_dimension_numbers<[1], [0], [0], [1], [0, 0, 1, 1], [], []>} : vector<16x144xbf16>, vector<144x256xbf16>, vector<16x256xf32> -> vector<16x256xf32>
    %c0_88 = arith.constant 0 : index
    %c0_89 = arith.constant 0 : index
    %337 = vector.load %arg13[%c0_88, %c0_89] : memref<16x1xf32, #tpu.memory_space<vmem>>, vector<16x1xf32>
    %338 = vector.broadcast %337 : vector<16x1xf32> to vector<16x256xf32>
    %339 = arith.addf %336, %338 : vector<16x256xf32>
    %cst_90 = arith.constant 0.000000e+00 : f32
    %340 = vector.broadcast %cst_90 : f32 to vector<16x256xf32>
    %341 = arith.maximumf %339, %340 : vector<16x256xf32>
    %342 = arith.truncf %341 : vector<16x256xf32> to vector<16x256xbf16>
    %cst_91 = arith.constant 0.000000e+00 : bf16
    %343 = vector.broadcast %cst_91 : bf16 to vector<16x68xbf16>
    %344 = tpu.concatenate %343, %342, %343 in 1 : vector<16x68xbf16>, vector<16x256xbf16>, vector<16x68xbf16> -> vector<16x392xbf16>
    %c4_i32 = arith.constant 4 : i32
    %345 = vector.broadcast %c4_i32 : i32 to vector<1x256xi32>
    %346 = arith.cmpi sge, %16, %345 : vector<1x256xi32>
    %c12_i32 = arith.constant 12 : i32
    %347 = vector.broadcast %c12_i32 : i32 to vector<1x256xi32>
    %348 = arith.cmpi slt, %16, %347 : vector<1x256xi32>
    %349 = vector.extract_strided_slice %344 {offsets = [0, 0], sizes = [16, 256], strides = [1, 1]} : vector<16x392xbf16> to vector<16x256xbf16>
    %c0_i32_92 = arith.constant 0 : i32
    %350 = arith.sitofp %c0_i32_92 : i32 to bf16
    %351 = vector.shape_cast %346 : vector<1x256xi1> to vector<1x256xi1>
    %352 = vector.broadcast %351 : vector<1x256xi1> to vector<16x256xi1>
    %353 = vector.broadcast %350 : bf16 to vector<16x256xbf16>
    %354 = arith.select %352, %349, %353 : vector<16x256xi1>, vector<16x256xbf16>
    %355 = vector.extract_strided_slice %344 {offsets = [0, 4], sizes = [16, 256], strides = [1, 1]} : vector<16x392xbf16> to vector<16x256xbf16>
    %356 = vector.extract_strided_slice %344 {offsets = [0, 8], sizes = [16, 256], strides = [1, 1]} : vector<16x392xbf16> to vector<16x256xbf16>
    %c0_i32_93 = arith.constant 0 : i32
    %357 = arith.sitofp %c0_i32_93 : i32 to bf16
    %358 = vector.shape_cast %348 : vector<1x256xi1> to vector<1x256xi1>
    %359 = vector.broadcast %358 : vector<1x256xi1> to vector<16x256xi1>
    %360 = vector.broadcast %357 : bf16 to vector<16x256xbf16>
    %361 = arith.select %359, %356, %360 : vector<16x256xi1>, vector<16x256xbf16>
    %362 = vector.extract_strided_slice %344 {offsets = [0, 64], sizes = [16, 256], strides = [1, 1]} : vector<16x392xbf16> to vector<16x256xbf16>
    %c0_i32_94 = arith.constant 0 : i32
    %363 = arith.sitofp %c0_i32_94 : i32 to bf16
    %364 = vector.shape_cast %346 : vector<1x256xi1> to vector<1x256xi1>
    %365 = vector.broadcast %364 : vector<1x256xi1> to vector<16x256xi1>
    %366 = vector.broadcast %363 : bf16 to vector<16x256xbf16>
    %367 = arith.select %365, %362, %366 : vector<16x256xi1>, vector<16x256xbf16>
    %368 = vector.extract_strided_slice %344 {offsets = [0, 68], sizes = [16, 256], strides = [1, 1]} : vector<16x392xbf16> to vector<16x256xbf16>
    %369 = vector.extract_strided_slice %344 {offsets = [0, 72], sizes = [16, 256], strides = [1, 1]} : vector<16x392xbf16> to vector<16x256xbf16>
    %c0_i32_95 = arith.constant 0 : i32
    %370 = arith.sitofp %c0_i32_95 : i32 to bf16
    %371 = vector.shape_cast %348 : vector<1x256xi1> to vector<1x256xi1>
    %372 = vector.broadcast %371 : vector<1x256xi1> to vector<16x256xi1>
    %373 = vector.broadcast %370 : bf16 to vector<16x256xbf16>
    %374 = arith.select %372, %369, %373 : vector<16x256xi1>, vector<16x256xbf16>
    %375 = vector.extract_strided_slice %344 {offsets = [0, 128], sizes = [16, 256], strides = [1, 1]} : vector<16x392xbf16> to vector<16x256xbf16>
    %c0_i32_96 = arith.constant 0 : i32
    %376 = arith.sitofp %c0_i32_96 : i32 to bf16
    %377 = vector.shape_cast %346 : vector<1x256xi1> to vector<1x256xi1>
    %378 = vector.broadcast %377 : vector<1x256xi1> to vector<16x256xi1>
    %379 = vector.broadcast %376 : bf16 to vector<16x256xbf16>
    %380 = arith.select %378, %375, %379 : vector<16x256xi1>, vector<16x256xbf16>
    %381 = vector.extract_strided_slice %344 {offsets = [0, 132], sizes = [16, 256], strides = [1, 1]} : vector<16x392xbf16> to vector<16x256xbf16>
    %382 = vector.extract_strided_slice %344 {offsets = [0, 136], sizes = [16, 256], strides = [1, 1]} : vector<16x392xbf16> to vector<16x256xbf16>
    %c0_i32_97 = arith.constant 0 : i32
    %383 = arith.sitofp %c0_i32_97 : i32 to bf16
    %384 = vector.shape_cast %348 : vector<1x256xi1> to vector<1x256xi1>
    %385 = vector.broadcast %384 : vector<1x256xi1> to vector<16x256xi1>
    %386 = vector.broadcast %383 : bf16 to vector<16x256xbf16>
    %387 = arith.select %385, %382, %386 : vector<16x256xi1>, vector<16x256xbf16>
    %388 = tpu.concatenate %354, %355, %361, %367, %368, %374, %380, %381, %387 in 0 : vector<16x256xbf16>, vector<16x256xbf16>, vector<16x256xbf16>, vector<16x256xbf16>, vector<16x256xbf16>, vector<16x256xbf16>, vector<16x256xbf16>, vector<16x256xbf16>, vector<16x256xbf16> -> vector<144x256xbf16>
    %c0_98 = arith.constant 0 : index
    %c0_99 = arith.constant 0 : index
    %389 = vector.load %arg14[%c0_98, %c0_99] : memref<16x144xbf16, #tpu.memory_space<vmem>>, vector<16x144xbf16>
    %cst_100 = arith.constant dense<0.000000e+00> : vector<16x256xf32>
    %390 = tpu.matmul %389, %388, %cst_100 {dimension_numbers = #tpu.dot_dimension_numbers<[1], [0], [0], [1], [0, 0, 1, 1], [], []>} : vector<16x144xbf16>, vector<144x256xbf16>, vector<16x256xf32> -> vector<16x256xf32>
    %c0_101 = arith.constant 0 : index
    %c0_102 = arith.constant 0 : index
    %391 = vector.load %arg15[%c0_101, %c0_102] : memref<16x1xf32, #tpu.memory_space<vmem>>, vector<16x1xf32>
    %392 = vector.broadcast %391 : vector<16x1xf32> to vector<16x256xf32>
    %393 = arith.addf %390, %392 : vector<16x256xf32>
    %cst_103 = arith.constant 0.000000e+00 : f32
    %394 = vector.broadcast %cst_103 : f32 to vector<16x256xf32>
    %395 = arith.maximumf %393, %394 : vector<16x256xf32>
    %396 = arith.truncf %395 : vector<16x256xf32> to vector<16x256xbf16>
    %cst_104 = arith.constant 0.000000e+00 : bf16
    %397 = vector.broadcast %cst_104 : bf16 to vector<16x68xbf16>
    %398 = tpu.concatenate %397, %396, %397 in 1 : vector<16x68xbf16>, vector<16x256xbf16>, vector<16x68xbf16> -> vector<16x392xbf16>
    %c4_i32_105 = arith.constant 4 : i32
    %399 = vector.broadcast %c4_i32_105 : i32 to vector<1x256xi32>
    %400 = arith.cmpi sge, %16, %399 : vector<1x256xi32>
    %c12_i32_106 = arith.constant 12 : i32
    %401 = vector.broadcast %c12_i32_106 : i32 to vector<1x256xi32>
    %402 = arith.cmpi slt, %16, %401 : vector<1x256xi32>
    %403 = vector.extract_strided_slice %398 {offsets = [0, 0], sizes = [16, 256], strides = [1, 1]} : vector<16x392xbf16> to vector<16x256xbf16>
    %c0_i32_107 = arith.constant 0 : i32
    %404 = arith.sitofp %c0_i32_107 : i32 to bf16
    %405 = vector.shape_cast %400 : vector<1x256xi1> to vector<1x256xi1>
    %406 = vector.broadcast %405 : vector<1x256xi1> to vector<16x256xi1>
    %407 = vector.broadcast %404 : bf16 to vector<16x256xbf16>
    %408 = arith.select %406, %403, %407 : vector<16x256xi1>, vector<16x256xbf16>
    %409 = vector.extract_strided_slice %398 {offsets = [0, 4], sizes = [16, 256], strides = [1, 1]} : vector<16x392xbf16> to vector<16x256xbf16>
    %410 = vector.extract_strided_slice %398 {offsets = [0, 8], sizes = [16, 256], strides = [1, 1]} : vector<16x392xbf16> to vector<16x256xbf16>
    %c0_i32_108 = arith.constant 0 : i32
    %411 = arith.sitofp %c0_i32_108 : i32 to bf16
    %412 = vector.shape_cast %402 : vector<1x256xi1> to vector<1x256xi1>
    %413 = vector.broadcast %412 : vector<1x256xi1> to vector<16x256xi1>
    %414 = vector.broadcast %411 : bf16 to vector<16x256xbf16>
    %415 = arith.select %413, %410, %414 : vector<16x256xi1>, vector<16x256xbf16>
    %416 = vector.extract_strided_slice %398 {offsets = [0, 64], sizes = [16, 256], strides = [1, 1]} : vector<16x392xbf16> to vector<16x256xbf16>
    %c0_i32_109 = arith.constant 0 : i32
    %417 = arith.sitofp %c0_i32_109 : i32 to bf16
    %418 = vector.shape_cast %400 : vector<1x256xi1> to vector<1x256xi1>
    %419 = vector.broadcast %418 : vector<1x256xi1> to vector<16x256xi1>
    %420 = vector.broadcast %417 : bf16 to vector<16x256xbf16>
    %421 = arith.select %419, %416, %420 : vector<16x256xi1>, vector<16x256xbf16>
    %422 = vector.extract_strided_slice %398 {offsets = [0, 68], sizes = [16, 256], strides = [1, 1]} : vector<16x392xbf16> to vector<16x256xbf16>
    %423 = vector.extract_strided_slice %398 {offsets = [0, 72], sizes = [16, 256], strides = [1, 1]} : vector<16x392xbf16> to vector<16x256xbf16>
    %c0_i32_110 = arith.constant 0 : i32
    %424 = arith.sitofp %c0_i32_110 : i32 to bf16
    %425 = vector.shape_cast %402 : vector<1x256xi1> to vector<1x256xi1>
    %426 = vector.broadcast %425 : vector<1x256xi1> to vector<16x256xi1>
    %427 = vector.broadcast %424 : bf16 to vector<16x256xbf16>
    %428 = arith.select %426, %423, %427 : vector<16x256xi1>, vector<16x256xbf16>
    %429 = vector.extract_strided_slice %398 {offsets = [0, 128], sizes = [16, 256], strides = [1, 1]} : vector<16x392xbf16> to vector<16x256xbf16>
    %c0_i32_111 = arith.constant 0 : i32
    %430 = arith.sitofp %c0_i32_111 : i32 to bf16
    %431 = vector.shape_cast %400 : vector<1x256xi1> to vector<1x256xi1>
    %432 = vector.broadcast %431 : vector<1x256xi1> to vector<16x256xi1>
    %433 = vector.broadcast %430 : bf16 to vector<16x256xbf16>
    %434 = arith.select %432, %429, %433 : vector<16x256xi1>, vector<16x256xbf16>
    %435 = vector.extract_strided_slice %398 {offsets = [0, 132], sizes = [16, 256], strides = [1, 1]} : vector<16x392xbf16> to vector<16x256xbf16>
    %436 = vector.extract_strided_slice %398 {offsets = [0, 136], sizes = [16, 256], strides = [1, 1]} : vector<16x392xbf16> to vector<16x256xbf16>
    %c0_i32_112 = arith.constant 0 : i32
    %437 = arith.sitofp %c0_i32_112 : i32 to bf16
    %438 = vector.shape_cast %402 : vector<1x256xi1> to vector<1x256xi1>
    %439 = vector.broadcast %438 : vector<1x256xi1> to vector<16x256xi1>
    %440 = vector.broadcast %437 : bf16 to vector<16x256xbf16>
    %441 = arith.select %439, %436, %440 : vector<16x256xi1>, vector<16x256xbf16>
    %442 = tpu.concatenate %408, %409, %415, %421, %422, %428, %434, %435, %441 in 0 : vector<16x256xbf16>, vector<16x256xbf16>, vector<16x256xbf16>, vector<16x256xbf16>, vector<16x256xbf16>, vector<16x256xbf16>, vector<16x256xbf16>, vector<16x256xbf16>, vector<16x256xbf16> -> vector<144x256xbf16>
    %c0_113 = arith.constant 0 : index
    %c0_114 = arith.constant 0 : index
    %443 = vector.load %arg16[%c0_113, %c0_114] : memref<16x144xbf16, #tpu.memory_space<vmem>>, vector<16x144xbf16>
    %cst_115 = arith.constant dense<0.000000e+00> : vector<16x256xf32>
    %444 = tpu.matmul %443, %442, %cst_115 {dimension_numbers = #tpu.dot_dimension_numbers<[1], [0], [0], [1], [0, 0, 1, 1], [], []>} : vector<16x144xbf16>, vector<144x256xbf16>, vector<16x256xf32> -> vector<16x256xf32>
    %c0_116 = arith.constant 0 : index
    %c0_117 = arith.constant 0 : index
    %445 = vector.load %arg17[%c0_116, %c0_117] : memref<16x1xf32, #tpu.memory_space<vmem>>, vector<16x1xf32>
    %446 = vector.broadcast %445 : vector<16x1xf32> to vector<16x256xf32>
    %447 = arith.addf %444, %446 : vector<16x256xf32>
    %cst_118 = arith.constant 0.000000e+00 : f32
    %448 = vector.broadcast %cst_118 : f32 to vector<16x256xf32>
    %449 = arith.maximumf %447, %448 : vector<16x256xf32>
    %450 = arith.truncf %449 : vector<16x256xf32> to vector<16x256xbf16>
    %cst_119 = arith.constant 0.000000e+00 : bf16
    %451 = vector.broadcast %cst_119 : bf16 to vector<16x136xbf16>
    %452 = tpu.concatenate %451, %450, %451 in 1 : vector<16x136xbf16>, vector<16x256xbf16>, vector<16x136xbf16> -> vector<16x528xbf16>
    %c8_i32 = arith.constant 8 : i32
    %453 = vector.broadcast %c8_i32 : i32 to vector<1x256xi32>
    %454 = arith.cmpi sge, %16, %453 : vector<1x256xi32>
    %c8_i32_120 = arith.constant 8 : i32
    %455 = vector.broadcast %c8_i32_120 : i32 to vector<1x256xi32>
    %456 = arith.cmpi slt, %16, %455 : vector<1x256xi32>
    %457 = vector.extract_strided_slice %452 {offsets = [0, 0], sizes = [16, 256], strides = [1, 1]} : vector<16x528xbf16> to vector<16x256xbf16>
    %c0_i32_121 = arith.constant 0 : i32
    %458 = arith.sitofp %c0_i32_121 : i32 to bf16
    %459 = vector.shape_cast %454 : vector<1x256xi1> to vector<1x256xi1>
    %460 = vector.broadcast %459 : vector<1x256xi1> to vector<16x256xi1>
    %461 = vector.broadcast %458 : bf16 to vector<16x256xbf16>
    %462 = arith.select %460, %457, %461 : vector<16x256xi1>, vector<16x256xbf16>
    %463 = vector.extract_strided_slice %452 {offsets = [0, 8], sizes = [16, 256], strides = [1, 1]} : vector<16x528xbf16> to vector<16x256xbf16>
    %464 = vector.extract_strided_slice %452 {offsets = [0, 16], sizes = [16, 256], strides = [1, 1]} : vector<16x528xbf16> to vector<16x256xbf16>
    %c0_i32_122 = arith.constant 0 : i32
    %465 = arith.sitofp %c0_i32_122 : i32 to bf16
    %466 = vector.shape_cast %456 : vector<1x256xi1> to vector<1x256xi1>
    %467 = vector.broadcast %466 : vector<1x256xi1> to vector<16x256xi1>
    %468 = vector.broadcast %465 : bf16 to vector<16x256xbf16>
    %469 = arith.select %467, %464, %468 : vector<16x256xi1>, vector<16x256xbf16>
    %470 = vector.extract_strided_slice %452 {offsets = [0, 128], sizes = [16, 256], strides = [1, 1]} : vector<16x528xbf16> to vector<16x256xbf16>
    %c0_i32_123 = arith.constant 0 : i32
    %471 = arith.sitofp %c0_i32_123 : i32 to bf16
    %472 = vector.shape_cast %454 : vector<1x256xi1> to vector<1x256xi1>
    %473 = vector.broadcast %472 : vector<1x256xi1> to vector<16x256xi1>
    %474 = vector.broadcast %471 : bf16 to vector<16x256xbf16>
    %475 = arith.select %473, %470, %474 : vector<16x256xi1>, vector<16x256xbf16>
    %476 = vector.extract_strided_slice %452 {offsets = [0, 136], sizes = [16, 256], strides = [1, 1]} : vector<16x528xbf16> to vector<16x256xbf16>
    %477 = vector.extract_strided_slice %452 {offsets = [0, 144], sizes = [16, 256], strides = [1, 1]} : vector<16x528xbf16> to vector<16x256xbf16>
    %c0_i32_124 = arith.constant 0 : i32
    %478 = arith.sitofp %c0_i32_124 : i32 to bf16
    %479 = vector.shape_cast %456 : vector<1x256xi1> to vector<1x256xi1>
    %480 = vector.broadcast %479 : vector<1x256xi1> to vector<16x256xi1>
    %481 = vector.broadcast %478 : bf16 to vector<16x256xbf16>
    %482 = arith.select %480, %477, %481 : vector<16x256xi1>, vector<16x256xbf16>
    %483 = vector.extract_strided_slice %452 {offsets = [0, 256], sizes = [16, 256], strides = [1, 1]} : vector<16x528xbf16> to vector<16x256xbf16>
    %c0_i32_125 = arith.constant 0 : i32
    %484 = arith.sitofp %c0_i32_125 : i32 to bf16
    %485 = vector.shape_cast %454 : vector<1x256xi1> to vector<1x256xi1>
    %486 = vector.broadcast %485 : vector<1x256xi1> to vector<16x256xi1>
    %487 = vector.broadcast %484 : bf16 to vector<16x256xbf16>
    %488 = arith.select %486, %483, %487 : vector<16x256xi1>, vector<16x256xbf16>
    %489 = vector.extract_strided_slice %452 {offsets = [0, 264], sizes = [16, 256], strides = [1, 1]} : vector<16x528xbf16> to vector<16x256xbf16>
    %490 = vector.extract_strided_slice %452 {offsets = [0, 272], sizes = [16, 256], strides = [1, 1]} : vector<16x528xbf16> to vector<16x256xbf16>
    %c0_i32_126 = arith.constant 0 : i32
    %491 = arith.sitofp %c0_i32_126 : i32 to bf16
    %492 = vector.shape_cast %456 : vector<1x256xi1> to vector<1x256xi1>
    %493 = vector.broadcast %492 : vector<1x256xi1> to vector<16x256xi1>
    %494 = vector.broadcast %491 : bf16 to vector<16x256xbf16>
    %495 = arith.select %493, %490, %494 : vector<16x256xi1>, vector<16x256xbf16>
    %496 = tpu.concatenate %462, %463, %469, %475, %476, %482, %488, %489, %495 in 0 : vector<16x256xbf16>, vector<16x256xbf16>, vector<16x256xbf16>, vector<16x256xbf16>, vector<16x256xbf16>, vector<16x256xbf16>, vector<16x256xbf16>, vector<16x256xbf16>, vector<16x256xbf16> -> vector<144x256xbf16>
    %c0_127 = arith.constant 0 : index
    %c0_128 = arith.constant 0 : index
    %497 = vector.load %arg18[%c0_127, %c0_128] : memref<16x144xbf16, #tpu.memory_space<vmem>>, vector<16x144xbf16>
    %cst_129 = arith.constant dense<0.000000e+00> : vector<16x256xf32>
    %498 = tpu.matmul %497, %496, %cst_129 {dimension_numbers = #tpu.dot_dimension_numbers<[1], [0], [0], [1], [0, 0, 1, 1], [], []>} : vector<16x144xbf16>, vector<144x256xbf16>, vector<16x256xf32> -> vector<16x256xf32>
    %c0_130 = arith.constant 0 : index
    %c0_131 = arith.constant 0 : index
    %499 = vector.load %arg19[%c0_130, %c0_131] : memref<16x1xf32, #tpu.memory_space<vmem>>, vector<16x1xf32>
    %500 = vector.broadcast %499 : vector<16x1xf32> to vector<16x256xf32>
    %501 = arith.addf %498, %500 : vector<16x256xf32>
    %cst_132 = arith.constant 0.000000e+00 : f32
    %502 = vector.broadcast %cst_132 : f32 to vector<16x256xf32>
    %503 = arith.maximumf %501, %502 : vector<16x256xf32>
    %504 = arith.truncf %503 : vector<16x256xf32> to vector<16x256xbf16>
    %cst_133 = arith.constant 0.000000e+00 : bf16
    %505 = vector.broadcast %cst_133 : bf16 to vector<16x136xbf16>
    %506 = tpu.concatenate %505, %504, %505 in 1 : vector<16x136xbf16>, vector<16x256xbf16>, vector<16x136xbf16> -> vector<16x528xbf16>
    %c8_i32_134 = arith.constant 8 : i32
    %507 = vector.broadcast %c8_i32_134 : i32 to vector<1x256xi32>
    %508 = arith.cmpi sge, %16, %507 : vector<1x256xi32>
    %c8_i32_135 = arith.constant 8 : i32
    %509 = vector.broadcast %c8_i32_135 : i32 to vector<1x256xi32>
    %510 = arith.cmpi slt, %16, %509 : vector<1x256xi32>
    %511 = vector.extract_strided_slice %506 {offsets = [0, 0], sizes = [16, 256], strides = [1, 1]} : vector<16x528xbf16> to vector<16x256xbf16>
    %c0_i32_136 = arith.constant 0 : i32
    %512 = arith.sitofp %c0_i32_136 : i32 to bf16
    %513 = vector.shape_cast %508 : vector<1x256xi1> to vector<1x256xi1>
    %514 = vector.broadcast %513 : vector<1x256xi1> to vector<16x256xi1>
    %515 = vector.broadcast %512 : bf16 to vector<16x256xbf16>
    %516 = arith.select %514, %511, %515 : vector<16x256xi1>, vector<16x256xbf16>
    %517 = vector.extract_strided_slice %506 {offsets = [0, 8], sizes = [16, 256], strides = [1, 1]} : vector<16x528xbf16> to vector<16x256xbf16>
    %518 = vector.extract_strided_slice %506 {offsets = [0, 16], sizes = [16, 256], strides = [1, 1]} : vector<16x528xbf16> to vector<16x256xbf16>
    %c0_i32_137 = arith.constant 0 : i32
    %519 = arith.sitofp %c0_i32_137 : i32 to bf16
    %520 = vector.shape_cast %510 : vector<1x256xi1> to vector<1x256xi1>
    %521 = vector.broadcast %520 : vector<1x256xi1> to vector<16x256xi1>
    %522 = vector.broadcast %519 : bf16 to vector<16x256xbf16>
    %523 = arith.select %521, %518, %522 : vector<16x256xi1>, vector<16x256xbf16>
    %524 = vector.extract_strided_slice %506 {offsets = [0, 128], sizes = [16, 256], strides = [1, 1]} : vector<16x528xbf16> to vector<16x256xbf16>
    %c0_i32_138 = arith.constant 0 : i32
    %525 = arith.sitofp %c0_i32_138 : i32 to bf16
    %526 = vector.shape_cast %508 : vector<1x256xi1> to vector<1x256xi1>
    %527 = vector.broadcast %526 : vector<1x256xi1> to vector<16x256xi1>
    %528 = vector.broadcast %525 : bf16 to vector<16x256xbf16>
    %529 = arith.select %527, %524, %528 : vector<16x256xi1>, vector<16x256xbf16>
    %530 = vector.extract_strided_slice %506 {offsets = [0, 136], sizes = [16, 256], strides = [1, 1]} : vector<16x528xbf16> to vector<16x256xbf16>
    %531 = vector.extract_strided_slice %506 {offsets = [0, 144], sizes = [16, 256], strides = [1, 1]} : vector<16x528xbf16> to vector<16x256xbf16>
    %c0_i32_139 = arith.constant 0 : i32
    %532 = arith.sitofp %c0_i32_139 : i32 to bf16
    %533 = vector.shape_cast %510 : vector<1x256xi1> to vector<1x256xi1>
    %534 = vector.broadcast %533 : vector<1x256xi1> to vector<16x256xi1>
    %535 = vector.broadcast %532 : bf16 to vector<16x256xbf16>
    %536 = arith.select %534, %531, %535 : vector<16x256xi1>, vector<16x256xbf16>
    %537 = vector.extract_strided_slice %506 {offsets = [0, 256], sizes = [16, 256], strides = [1, 1]} : vector<16x528xbf16> to vector<16x256xbf16>
    %c0_i32_140 = arith.constant 0 : i32
    %538 = arith.sitofp %c0_i32_140 : i32 to bf16
    %539 = vector.shape_cast %508 : vector<1x256xi1> to vector<1x256xi1>
    %540 = vector.broadcast %539 : vector<1x256xi1> to vector<16x256xi1>
    %541 = vector.broadcast %538 : bf16 to vector<16x256xbf16>
    %542 = arith.select %540, %537, %541 : vector<16x256xi1>, vector<16x256xbf16>
    %543 = vector.extract_strided_slice %506 {offsets = [0, 264], sizes = [16, 256], strides = [1, 1]} : vector<16x528xbf16> to vector<16x256xbf16>
    %544 = vector.extract_strided_slice %506 {offsets = [0, 272], sizes = [16, 256], strides = [1, 1]} : vector<16x528xbf16> to vector<16x256xbf16>
    %c0_i32_141 = arith.constant 0 : i32
    %545 = arith.sitofp %c0_i32_141 : i32 to bf16
    %546 = vector.shape_cast %510 : vector<1x256xi1> to vector<1x256xi1>
    %547 = vector.broadcast %546 : vector<1x256xi1> to vector<16x256xi1>
    %548 = vector.broadcast %545 : bf16 to vector<16x256xbf16>
    %549 = arith.select %547, %544, %548 : vector<16x256xi1>, vector<16x256xbf16>
    %550 = tpu.concatenate %516, %517, %523, %529, %530, %536, %542, %543, %549 in 0 : vector<16x256xbf16>, vector<16x256xbf16>, vector<16x256xbf16>, vector<16x256xbf16>, vector<16x256xbf16>, vector<16x256xbf16>, vector<16x256xbf16>, vector<16x256xbf16>, vector<16x256xbf16> -> vector<144x256xbf16>
    %c0_142 = arith.constant 0 : index
    %c0_143 = arith.constant 0 : index
    %551 = vector.load %arg20[%c0_142, %c0_143] : memref<16x144xbf16, #tpu.memory_space<vmem>>, vector<16x144xbf16>
    %cst_144 = arith.constant dense<0.000000e+00> : vector<16x256xf32>
    %552 = tpu.matmul %551, %550, %cst_144 {dimension_numbers = #tpu.dot_dimension_numbers<[1], [0], [0], [1], [0, 0, 1, 1], [], []>} : vector<16x144xbf16>, vector<144x256xbf16>, vector<16x256xf32> -> vector<16x256xf32>
    %c0_145 = arith.constant 0 : index
    %c0_146 = arith.constant 0 : index
    %553 = vector.load %arg21[%c0_145, %c0_146] : memref<16x1xf32, #tpu.memory_space<vmem>>, vector<16x1xf32>
    %554 = vector.broadcast %553 : vector<16x1xf32> to vector<16x256xf32>
    %555 = arith.addf %552, %554 : vector<16x256xf32>
    %cst_147 = arith.constant 0.000000e+00 : f32
    %556 = vector.broadcast %cst_147 : f32 to vector<16x256xf32>
    %557 = arith.maximumf %555, %556 : vector<16x256xf32>
    %558 = arith.truncf %557 : vector<16x256xf32> to vector<16x256xbf16>
    %cst_148 = arith.constant 0.000000e+00 : bf16
    %559 = vector.broadcast %cst_148 : bf16 to vector<16x68xbf16>
    %560 = tpu.concatenate %559, %558, %559 in 1 : vector<16x68xbf16>, vector<16x256xbf16>, vector<16x68xbf16> -> vector<16x392xbf16>
    %c4_i32_149 = arith.constant 4 : i32
    %561 = vector.broadcast %c4_i32_149 : i32 to vector<1x256xi32>
    %562 = arith.cmpi sge, %16, %561 : vector<1x256xi32>
    %c12_i32_150 = arith.constant 12 : i32
    %563 = vector.broadcast %c12_i32_150 : i32 to vector<1x256xi32>
    %564 = arith.cmpi slt, %16, %563 : vector<1x256xi32>
    %565 = vector.extract_strided_slice %560 {offsets = [0, 0], sizes = [16, 256], strides = [1, 1]} : vector<16x392xbf16> to vector<16x256xbf16>
    %c0_i32_151 = arith.constant 0 : i32
    %566 = arith.sitofp %c0_i32_151 : i32 to bf16
    %567 = vector.shape_cast %562 : vector<1x256xi1> to vector<1x256xi1>
    %568 = vector.broadcast %567 : vector<1x256xi1> to vector<16x256xi1>
    %569 = vector.broadcast %566 : bf16 to vector<16x256xbf16>
    %570 = arith.select %568, %565, %569 : vector<16x256xi1>, vector<16x256xbf16>
    %571 = vector.extract_strided_slice %560 {offsets = [0, 4], sizes = [16, 256], strides = [1, 1]} : vector<16x392xbf16> to vector<16x256xbf16>
    %572 = vector.extract_strided_slice %560 {offsets = [0, 8], sizes = [16, 256], strides = [1, 1]} : vector<16x392xbf16> to vector<16x256xbf16>
    %c0_i32_152 = arith.constant 0 : i32
    %573 = arith.sitofp %c0_i32_152 : i32 to bf16
    %574 = vector.shape_cast %564 : vector<1x256xi1> to vector<1x256xi1>
    %575 = vector.broadcast %574 : vector<1x256xi1> to vector<16x256xi1>
    %576 = vector.broadcast %573 : bf16 to vector<16x256xbf16>
    %577 = arith.select %575, %572, %576 : vector<16x256xi1>, vector<16x256xbf16>
    %578 = vector.extract_strided_slice %560 {offsets = [0, 64], sizes = [16, 256], strides = [1, 1]} : vector<16x392xbf16> to vector<16x256xbf16>
    %c0_i32_153 = arith.constant 0 : i32
    %579 = arith.sitofp %c0_i32_153 : i32 to bf16
    %580 = vector.shape_cast %562 : vector<1x256xi1> to vector<1x256xi1>
    %581 = vector.broadcast %580 : vector<1x256xi1> to vector<16x256xi1>
    %582 = vector.broadcast %579 : bf16 to vector<16x256xbf16>
    %583 = arith.select %581, %578, %582 : vector<16x256xi1>, vector<16x256xbf16>
    %584 = vector.extract_strided_slice %560 {offsets = [0, 68], sizes = [16, 256], strides = [1, 1]} : vector<16x392xbf16> to vector<16x256xbf16>
    %585 = vector.extract_strided_slice %560 {offsets = [0, 72], sizes = [16, 256], strides = [1, 1]} : vector<16x392xbf16> to vector<16x256xbf16>
    %c0_i32_154 = arith.constant 0 : i32
    %586 = arith.sitofp %c0_i32_154 : i32 to bf16
    %587 = vector.shape_cast %564 : vector<1x256xi1> to vector<1x256xi1>
    %588 = vector.broadcast %587 : vector<1x256xi1> to vector<16x256xi1>
    %589 = vector.broadcast %586 : bf16 to vector<16x256xbf16>
    %590 = arith.select %588, %585, %589 : vector<16x256xi1>, vector<16x256xbf16>
    %591 = vector.extract_strided_slice %560 {offsets = [0, 128], sizes = [16, 256], strides = [1, 1]} : vector<16x392xbf16> to vector<16x256xbf16>
    %c0_i32_155 = arith.constant 0 : i32
    %592 = arith.sitofp %c0_i32_155 : i32 to bf16
    %593 = vector.shape_cast %562 : vector<1x256xi1> to vector<1x256xi1>
    %594 = vector.broadcast %593 : vector<1x256xi1> to vector<16x256xi1>
    %595 = vector.broadcast %592 : bf16 to vector<16x256xbf16>
    %596 = arith.select %594, %591, %595 : vector<16x256xi1>, vector<16x256xbf16>
    %597 = vector.extract_strided_slice %560 {offsets = [0, 132], sizes = [16, 256], strides = [1, 1]} : vector<16x392xbf16> to vector<16x256xbf16>
    %598 = vector.extract_strided_slice %560 {offsets = [0, 136], sizes = [16, 256], strides = [1, 1]} : vector<16x392xbf16> to vector<16x256xbf16>
    %c0_i32_156 = arith.constant 0 : i32
    %599 = arith.sitofp %c0_i32_156 : i32 to bf16
    %600 = vector.shape_cast %564 : vector<1x256xi1> to vector<1x256xi1>
    %601 = vector.broadcast %600 : vector<1x256xi1> to vector<16x256xi1>
    %602 = vector.broadcast %599 : bf16 to vector<16x256xbf16>
    %603 = arith.select %601, %598, %602 : vector<16x256xi1>, vector<16x256xbf16>
    %604 = tpu.concatenate %570, %571, %577, %583, %584, %590, %596, %597, %603 in 0 : vector<16x256xbf16>, vector<16x256xbf16>, vector<16x256xbf16>, vector<16x256xbf16>, vector<16x256xbf16>, vector<16x256xbf16>, vector<16x256xbf16>, vector<16x256xbf16>, vector<16x256xbf16> -> vector<144x256xbf16>
    %c0_157 = arith.constant 0 : index
    %c0_158 = arith.constant 0 : index
    %605 = vector.load %arg22[%c0_157, %c0_158] : memref<16x144xbf16, #tpu.memory_space<vmem>>, vector<16x144xbf16>
    %cst_159 = arith.constant dense<0.000000e+00> : vector<16x256xf32>
    %606 = tpu.matmul %605, %604, %cst_159 {dimension_numbers = #tpu.dot_dimension_numbers<[1], [0], [0], [1], [0, 0, 1, 1], [], []>} : vector<16x144xbf16>, vector<144x256xbf16>, vector<16x256xf32> -> vector<16x256xf32>
    %cst_160 = arith.constant 0.000000e+00 : bf16
    %607 = vector.broadcast %cst_160 : bf16 to vector<16x68xbf16>
    %608 = tpu.concatenate %607, %450, %607 in 1 : vector<16x68xbf16>, vector<16x256xbf16>, vector<16x68xbf16> -> vector<16x392xbf16>
    %c4_i32_161 = arith.constant 4 : i32
    %609 = vector.broadcast %c4_i32_161 : i32 to vector<1x256xi32>
    %610 = arith.cmpi sge, %16, %609 : vector<1x256xi32>
    %c12_i32_162 = arith.constant 12 : i32
    %611 = vector.broadcast %c12_i32_162 : i32 to vector<1x256xi32>
    %612 = arith.cmpi slt, %16, %611 : vector<1x256xi32>
    %613 = vector.extract_strided_slice %608 {offsets = [0, 0], sizes = [16, 256], strides = [1, 1]} : vector<16x392xbf16> to vector<16x256xbf16>
    %c0_i32_163 = arith.constant 0 : i32
    %614 = arith.sitofp %c0_i32_163 : i32 to bf16
    %615 = vector.shape_cast %610 : vector<1x256xi1> to vector<1x256xi1>
    %616 = vector.broadcast %615 : vector<1x256xi1> to vector<16x256xi1>
    %617 = vector.broadcast %614 : bf16 to vector<16x256xbf16>
    %618 = arith.select %616, %613, %617 : vector<16x256xi1>, vector<16x256xbf16>
    %619 = vector.extract_strided_slice %608 {offsets = [0, 4], sizes = [16, 256], strides = [1, 1]} : vector<16x392xbf16> to vector<16x256xbf16>
    %620 = vector.extract_strided_slice %608 {offsets = [0, 8], sizes = [16, 256], strides = [1, 1]} : vector<16x392xbf16> to vector<16x256xbf16>
    %c0_i32_164 = arith.constant 0 : i32
    %621 = arith.sitofp %c0_i32_164 : i32 to bf16
    %622 = vector.shape_cast %612 : vector<1x256xi1> to vector<1x256xi1>
    %623 = vector.broadcast %622 : vector<1x256xi1> to vector<16x256xi1>
    %624 = vector.broadcast %621 : bf16 to vector<16x256xbf16>
    %625 = arith.select %623, %620, %624 : vector<16x256xi1>, vector<16x256xbf16>
    %626 = vector.extract_strided_slice %608 {offsets = [0, 64], sizes = [16, 256], strides = [1, 1]} : vector<16x392xbf16> to vector<16x256xbf16>
    %c0_i32_165 = arith.constant 0 : i32
    %627 = arith.sitofp %c0_i32_165 : i32 to bf16
    %628 = vector.shape_cast %610 : vector<1x256xi1> to vector<1x256xi1>
    %629 = vector.broadcast %628 : vector<1x256xi1> to vector<16x256xi1>
    %630 = vector.broadcast %627 : bf16 to vector<16x256xbf16>
    %631 = arith.select %629, %626, %630 : vector<16x256xi1>, vector<16x256xbf16>
    %632 = vector.extract_strided_slice %608 {offsets = [0, 68], sizes = [16, 256], strides = [1, 1]} : vector<16x392xbf16> to vector<16x256xbf16>
    %633 = vector.extract_strided_slice %608 {offsets = [0, 72], sizes = [16, 256], strides = [1, 1]} : vector<16x392xbf16> to vector<16x256xbf16>
    %c0_i32_166 = arith.constant 0 : i32
    %634 = arith.sitofp %c0_i32_166 : i32 to bf16
    %635 = vector.shape_cast %612 : vector<1x256xi1> to vector<1x256xi1>
    %636 = vector.broadcast %635 : vector<1x256xi1> to vector<16x256xi1>
    %637 = vector.broadcast %634 : bf16 to vector<16x256xbf16>
    %638 = arith.select %636, %633, %637 : vector<16x256xi1>, vector<16x256xbf16>
    %639 = vector.extract_strided_slice %608 {offsets = [0, 128], sizes = [16, 256], strides = [1, 1]} : vector<16x392xbf16> to vector<16x256xbf16>
    %c0_i32_167 = arith.constant 0 : i32
    %640 = arith.sitofp %c0_i32_167 : i32 to bf16
    %641 = vector.shape_cast %610 : vector<1x256xi1> to vector<1x256xi1>
    %642 = vector.broadcast %641 : vector<1x256xi1> to vector<16x256xi1>
    %643 = vector.broadcast %640 : bf16 to vector<16x256xbf16>
    %644 = arith.select %642, %639, %643 : vector<16x256xi1>, vector<16x256xbf16>
    %645 = vector.extract_strided_slice %608 {offsets = [0, 132], sizes = [16, 256], strides = [1, 1]} : vector<16x392xbf16> to vector<16x256xbf16>
    %646 = vector.extract_strided_slice %608 {offsets = [0, 136], sizes = [16, 256], strides = [1, 1]} : vector<16x392xbf16> to vector<16x256xbf16>
    %c0_i32_168 = arith.constant 0 : i32
    %647 = arith.sitofp %c0_i32_168 : i32 to bf16
    %648 = vector.shape_cast %612 : vector<1x256xi1> to vector<1x256xi1>
    %649 = vector.broadcast %648 : vector<1x256xi1> to vector<16x256xi1>
    %650 = vector.broadcast %647 : bf16 to vector<16x256xbf16>
    %651 = arith.select %649, %646, %650 : vector<16x256xi1>, vector<16x256xbf16>
    %652 = tpu.concatenate %618, %619, %625, %631, %632, %638, %644, %645, %651 in 0 : vector<16x256xbf16>, vector<16x256xbf16>, vector<16x256xbf16>, vector<16x256xbf16>, vector<16x256xbf16>, vector<16x256xbf16>, vector<16x256xbf16>, vector<16x256xbf16>, vector<16x256xbf16> -> vector<144x256xbf16>
    %c0_169 = arith.constant 0 : index
    %c0_170 = arith.constant 0 : index
    %653 = vector.load %arg23[%c0_169, %c0_170] : memref<16x144xbf16, #tpu.memory_space<vmem>>, vector<16x144xbf16>
    %cst_171 = arith.constant dense<0.000000e+00> : vector<16x256xf32>
    %654 = tpu.matmul %653, %652, %cst_171 {dimension_numbers = #tpu.dot_dimension_numbers<[1], [0], [0], [1], [0, 0, 1, 1], [], []>} : vector<16x144xbf16>, vector<144x256xbf16>, vector<16x256xf32> -> vector<16x256xf32>
    %655 = arith.addf %606, %654 : vector<16x256xf32>
    %c0_172 = arith.constant 0 : index
    %c0_173 = arith.constant 0 : index
    %656 = vector.load %arg24[%c0_172, %c0_173] : memref<16x1xf32, #tpu.memory_space<vmem>>, vector<16x1xf32>
    %657 = vector.broadcast %656 : vector<16x1xf32> to vector<16x256xf32>
    %658 = arith.addf %655, %657 : vector<16x256xf32>
    %cst_174 = arith.constant 0.000000e+00 : f32
    %659 = vector.broadcast %cst_174 : f32 to vector<16x256xf32>
    %660 = arith.maximumf %658, %659 : vector<16x256xf32>
    %661 = arith.truncf %660 : vector<16x256xf32> to vector<16x256xbf16>
    %cst_175 = arith.constant 0.000000e+00 : bf16
    %662 = vector.broadcast %cst_175 : bf16 to vector<16x68xbf16>
    %663 = tpu.concatenate %662, %661, %662 in 1 : vector<16x68xbf16>, vector<16x256xbf16>, vector<16x68xbf16> -> vector<16x392xbf16>
    %c4_i32_176 = arith.constant 4 : i32
    %664 = vector.broadcast %c4_i32_176 : i32 to vector<1x256xi32>
    %665 = arith.cmpi sge, %16, %664 : vector<1x256xi32>
    %c12_i32_177 = arith.constant 12 : i32
    %666 = vector.broadcast %c12_i32_177 : i32 to vector<1x256xi32>
    %667 = arith.cmpi slt, %16, %666 : vector<1x256xi32>
    %668 = vector.extract_strided_slice %663 {offsets = [0, 0], sizes = [16, 256], strides = [1, 1]} : vector<16x392xbf16> to vector<16x256xbf16>
    %c0_i32_178 = arith.constant 0 : i32
    %669 = arith.sitofp %c0_i32_178 : i32 to bf16
    %670 = vector.shape_cast %665 : vector<1x256xi1> to vector<1x256xi1>
    %671 = vector.broadcast %670 : vector<1x256xi1> to vector<16x256xi1>
    %672 = vector.broadcast %669 : bf16 to vector<16x256xbf16>
    %673 = arith.select %671, %668, %672 : vector<16x256xi1>, vector<16x256xbf16>
    %674 = vector.extract_strided_slice %663 {offsets = [0, 4], sizes = [16, 256], strides = [1, 1]} : vector<16x392xbf16> to vector<16x256xbf16>
    %675 = vector.extract_strided_slice %663 {offsets = [0, 8], sizes = [16, 256], strides = [1, 1]} : vector<16x392xbf16> to vector<16x256xbf16>
    %c0_i32_179 = arith.constant 0 : i32
    %676 = arith.sitofp %c0_i32_179 : i32 to bf16
    %677 = vector.shape_cast %667 : vector<1x256xi1> to vector<1x256xi1>
    %678 = vector.broadcast %677 : vector<1x256xi1> to vector<16x256xi1>
    %679 = vector.broadcast %676 : bf16 to vector<16x256xbf16>
    %680 = arith.select %678, %675, %679 : vector<16x256xi1>, vector<16x256xbf16>
    %681 = vector.extract_strided_slice %663 {offsets = [0, 64], sizes = [16, 256], strides = [1, 1]} : vector<16x392xbf16> to vector<16x256xbf16>
    %c0_i32_180 = arith.constant 0 : i32
    %682 = arith.sitofp %c0_i32_180 : i32 to bf16
    %683 = vector.shape_cast %665 : vector<1x256xi1> to vector<1x256xi1>
    %684 = vector.broadcast %683 : vector<1x256xi1> to vector<16x256xi1>
    %685 = vector.broadcast %682 : bf16 to vector<16x256xbf16>
    %686 = arith.select %684, %681, %685 : vector<16x256xi1>, vector<16x256xbf16>
    %687 = vector.extract_strided_slice %663 {offsets = [0, 68], sizes = [16, 256], strides = [1, 1]} : vector<16x392xbf16> to vector<16x256xbf16>
    %688 = vector.extract_strided_slice %663 {offsets = [0, 72], sizes = [16, 256], strides = [1, 1]} : vector<16x392xbf16> to vector<16x256xbf16>
    %c0_i32_181 = arith.constant 0 : i32
    %689 = arith.sitofp %c0_i32_181 : i32 to bf16
    %690 = vector.shape_cast %667 : vector<1x256xi1> to vector<1x256xi1>
    %691 = vector.broadcast %690 : vector<1x256xi1> to vector<16x256xi1>
    %692 = vector.broadcast %689 : bf16 to vector<16x256xbf16>
    %693 = arith.select %691, %688, %692 : vector<16x256xi1>, vector<16x256xbf16>
    %694 = vector.extract_strided_slice %663 {offsets = [0, 128], sizes = [16, 256], strides = [1, 1]} : vector<16x392xbf16> to vector<16x256xbf16>
    %c0_i32_182 = arith.constant 0 : i32
    %695 = arith.sitofp %c0_i32_182 : i32 to bf16
    %696 = vector.shape_cast %665 : vector<1x256xi1> to vector<1x256xi1>
    %697 = vector.broadcast %696 : vector<1x256xi1> to vector<16x256xi1>
    %698 = vector.broadcast %695 : bf16 to vector<16x256xbf16>
    %699 = arith.select %697, %694, %698 : vector<16x256xi1>, vector<16x256xbf16>
    %700 = vector.extract_strided_slice %663 {offsets = [0, 132], sizes = [16, 256], strides = [1, 1]} : vector<16x392xbf16> to vector<16x256xbf16>
    %701 = vector.extract_strided_slice %663 {offsets = [0, 136], sizes = [16, 256], strides = [1, 1]} : vector<16x392xbf16> to vector<16x256xbf16>
    %c0_i32_183 = arith.constant 0 : i32
    %702 = arith.sitofp %c0_i32_183 : i32 to bf16
    %703 = vector.shape_cast %667 : vector<1x256xi1> to vector<1x256xi1>
    %704 = vector.broadcast %703 : vector<1x256xi1> to vector<16x256xi1>
    %705 = vector.broadcast %702 : bf16 to vector<16x256xbf16>
    %706 = arith.select %704, %701, %705 : vector<16x256xi1>, vector<16x256xbf16>
    %707 = tpu.concatenate %673, %674, %680, %686, %687, %693, %699, %700, %706 in 0 : vector<16x256xbf16>, vector<16x256xbf16>, vector<16x256xbf16>, vector<16x256xbf16>, vector<16x256xbf16>, vector<16x256xbf16>, vector<16x256xbf16>, vector<16x256xbf16>, vector<16x256xbf16> -> vector<144x256xbf16>
    %c0_184 = arith.constant 0 : index
    %c0_185 = arith.constant 0 : index
    %708 = vector.load %arg25[%c0_184, %c0_185] : memref<16x144xbf16, #tpu.memory_space<vmem>>, vector<16x144xbf16>
    %cst_186 = arith.constant dense<0.000000e+00> : vector<16x256xf32>
    %709 = tpu.matmul %708, %707, %cst_186 {dimension_numbers = #tpu.dot_dimension_numbers<[1], [0], [0], [1], [0, 0, 1, 1], [], []>} : vector<16x144xbf16>, vector<144x256xbf16>, vector<16x256xf32> -> vector<16x256xf32>
    %c0_187 = arith.constant 0 : index
    %c0_188 = arith.constant 0 : index
    %710 = vector.load %arg26[%c0_187, %c0_188] : memref<16x1xf32, #tpu.memory_space<vmem>>, vector<16x1xf32>
    %711 = vector.broadcast %710 : vector<16x1xf32> to vector<16x256xf32>
    %712 = arith.addf %709, %711 : vector<16x256xf32>
    %cst_189 = arith.constant 0.000000e+00 : f32
    %713 = vector.broadcast %cst_189 : f32 to vector<16x256xf32>
    %714 = arith.maximumf %712, %713 : vector<16x256xf32>
    %715 = arith.truncf %714 : vector<16x256xf32> to vector<16x256xbf16>
    %cst_190 = arith.constant 0.000000e+00 : bf16
    %716 = vector.broadcast %cst_190 : bf16 to vector<16x34xbf16>
    %717 = tpu.concatenate %716, %715, %716 in 1 : vector<16x34xbf16>, vector<16x256xbf16>, vector<16x34xbf16> -> vector<16x324xbf16>
    %c2_i32_191 = arith.constant 2 : i32
    %718 = vector.broadcast %c2_i32_191 : i32 to vector<1x256xi32>
    %719 = arith.cmpi sge, %16, %718 : vector<1x256xi32>
    %c14_i32_192 = arith.constant 14 : i32
    %720 = vector.broadcast %c14_i32_192 : i32 to vector<1x256xi32>
    %721 = arith.cmpi slt, %16, %720 : vector<1x256xi32>
    %722 = vector.extract_strided_slice %717 {offsets = [0, 0], sizes = [16, 256], strides = [1, 1]} : vector<16x324xbf16> to vector<16x256xbf16>
    %c0_i32_193 = arith.constant 0 : i32
    %723 = arith.sitofp %c0_i32_193 : i32 to bf16
    %724 = vector.shape_cast %719 : vector<1x256xi1> to vector<1x256xi1>
    %725 = vector.broadcast %724 : vector<1x256xi1> to vector<16x256xi1>
    %726 = vector.broadcast %723 : bf16 to vector<16x256xbf16>
    %727 = arith.select %725, %722, %726 : vector<16x256xi1>, vector<16x256xbf16>
    %728 = vector.extract_strided_slice %717 {offsets = [0, 2], sizes = [16, 256], strides = [1, 1]} : vector<16x324xbf16> to vector<16x256xbf16>
    %729 = vector.extract_strided_slice %717 {offsets = [0, 4], sizes = [16, 256], strides = [1, 1]} : vector<16x324xbf16> to vector<16x256xbf16>
    %c0_i32_194 = arith.constant 0 : i32
    %730 = arith.sitofp %c0_i32_194 : i32 to bf16
    %731 = vector.shape_cast %721 : vector<1x256xi1> to vector<1x256xi1>
    %732 = vector.broadcast %731 : vector<1x256xi1> to vector<16x256xi1>
    %733 = vector.broadcast %730 : bf16 to vector<16x256xbf16>
    %734 = arith.select %732, %729, %733 : vector<16x256xi1>, vector<16x256xbf16>
    %735 = vector.extract_strided_slice %717 {offsets = [0, 32], sizes = [16, 256], strides = [1, 1]} : vector<16x324xbf16> to vector<16x256xbf16>
    %c0_i32_195 = arith.constant 0 : i32
    %736 = arith.sitofp %c0_i32_195 : i32 to bf16
    %737 = vector.shape_cast %719 : vector<1x256xi1> to vector<1x256xi1>
    %738 = vector.broadcast %737 : vector<1x256xi1> to vector<16x256xi1>
    %739 = vector.broadcast %736 : bf16 to vector<16x256xbf16>
    %740 = arith.select %738, %735, %739 : vector<16x256xi1>, vector<16x256xbf16>
    %741 = vector.extract_strided_slice %717 {offsets = [0, 34], sizes = [16, 256], strides = [1, 1]} : vector<16x324xbf16> to vector<16x256xbf16>
    %742 = vector.extract_strided_slice %717 {offsets = [0, 36], sizes = [16, 256], strides = [1, 1]} : vector<16x324xbf16> to vector<16x256xbf16>
    %c0_i32_196 = arith.constant 0 : i32
    %743 = arith.sitofp %c0_i32_196 : i32 to bf16
    %744 = vector.shape_cast %721 : vector<1x256xi1> to vector<1x256xi1>
    %745 = vector.broadcast %744 : vector<1x256xi1> to vector<16x256xi1>
    %746 = vector.broadcast %743 : bf16 to vector<16x256xbf16>
    %747 = arith.select %745, %742, %746 : vector<16x256xi1>, vector<16x256xbf16>
    %748 = vector.extract_strided_slice %717 {offsets = [0, 64], sizes = [16, 256], strides = [1, 1]} : vector<16x324xbf16> to vector<16x256xbf16>
    %c0_i32_197 = arith.constant 0 : i32
    %749 = arith.sitofp %c0_i32_197 : i32 to bf16
    %750 = vector.shape_cast %719 : vector<1x256xi1> to vector<1x256xi1>
    %751 = vector.broadcast %750 : vector<1x256xi1> to vector<16x256xi1>
    %752 = vector.broadcast %749 : bf16 to vector<16x256xbf16>
    %753 = arith.select %751, %748, %752 : vector<16x256xi1>, vector<16x256xbf16>
    %754 = vector.extract_strided_slice %717 {offsets = [0, 66], sizes = [16, 256], strides = [1, 1]} : vector<16x324xbf16> to vector<16x256xbf16>
    %755 = vector.extract_strided_slice %717 {offsets = [0, 68], sizes = [16, 256], strides = [1, 1]} : vector<16x324xbf16> to vector<16x256xbf16>
    %c0_i32_198 = arith.constant 0 : i32
    %756 = arith.sitofp %c0_i32_198 : i32 to bf16
    %757 = vector.shape_cast %721 : vector<1x256xi1> to vector<1x256xi1>
    %758 = vector.broadcast %757 : vector<1x256xi1> to vector<16x256xi1>
    %759 = vector.broadcast %756 : bf16 to vector<16x256xbf16>
    %760 = arith.select %758, %755, %759 : vector<16x256xi1>, vector<16x256xbf16>
    %761 = tpu.concatenate %727, %728, %734, %740, %741, %747, %753, %754, %760 in 0 : vector<16x256xbf16>, vector<16x256xbf16>, vector<16x256xbf16>, vector<16x256xbf16>, vector<16x256xbf16>, vector<16x256xbf16>, vector<16x256xbf16>, vector<16x256xbf16>, vector<16x256xbf16> -> vector<144x256xbf16>
    %c0_199 = arith.constant 0 : index
    %c0_200 = arith.constant 0 : index
    %762 = vector.load %arg27[%c0_199, %c0_200] : memref<16x144xbf16, #tpu.memory_space<vmem>>, vector<16x144xbf16>
    %cst_201 = arith.constant dense<0.000000e+00> : vector<16x256xf32>
    %763 = tpu.matmul %762, %761, %cst_201 {dimension_numbers = #tpu.dot_dimension_numbers<[1], [0], [0], [1], [0, 0, 1, 1], [], []>} : vector<16x144xbf16>, vector<144x256xbf16>, vector<16x256xf32> -> vector<16x256xf32>
    %cst_202 = arith.constant 0.000000e+00 : bf16
    %764 = vector.broadcast %cst_202 : bf16 to vector<16x34xbf16>
    %765 = tpu.concatenate %764, %342, %764 in 1 : vector<16x34xbf16>, vector<16x256xbf16>, vector<16x34xbf16> -> vector<16x324xbf16>
    %c2_i32_203 = arith.constant 2 : i32
    %766 = vector.broadcast %c2_i32_203 : i32 to vector<1x256xi32>
    %767 = arith.cmpi sge, %16, %766 : vector<1x256xi32>
    %c14_i32_204 = arith.constant 14 : i32
    %768 = vector.broadcast %c14_i32_204 : i32 to vector<1x256xi32>
    %769 = arith.cmpi slt, %16, %768 : vector<1x256xi32>
    %770 = vector.extract_strided_slice %765 {offsets = [0, 0], sizes = [16, 256], strides = [1, 1]} : vector<16x324xbf16> to vector<16x256xbf16>
    %c0_i32_205 = arith.constant 0 : i32
    %771 = arith.sitofp %c0_i32_205 : i32 to bf16
    %772 = vector.shape_cast %767 : vector<1x256xi1> to vector<1x256xi1>
    %773 = vector.broadcast %772 : vector<1x256xi1> to vector<16x256xi1>
    %774 = vector.broadcast %771 : bf16 to vector<16x256xbf16>
    %775 = arith.select %773, %770, %774 : vector<16x256xi1>, vector<16x256xbf16>
    %776 = vector.extract_strided_slice %765 {offsets = [0, 2], sizes = [16, 256], strides = [1, 1]} : vector<16x324xbf16> to vector<16x256xbf16>
    %777 = vector.extract_strided_slice %765 {offsets = [0, 4], sizes = [16, 256], strides = [1, 1]} : vector<16x324xbf16> to vector<16x256xbf16>
    %c0_i32_206 = arith.constant 0 : i32
    %778 = arith.sitofp %c0_i32_206 : i32 to bf16
    %779 = vector.shape_cast %769 : vector<1x256xi1> to vector<1x256xi1>
    %780 = vector.broadcast %779 : vector<1x256xi1> to vector<16x256xi1>
    %781 = vector.broadcast %778 : bf16 to vector<16x256xbf16>
    %782 = arith.select %780, %777, %781 : vector<16x256xi1>, vector<16x256xbf16>
    %783 = vector.extract_strided_slice %765 {offsets = [0, 32], sizes = [16, 256], strides = [1, 1]} : vector<16x324xbf16> to vector<16x256xbf16>
    %c0_i32_207 = arith.constant 0 : i32
    %784 = arith.sitofp %c0_i32_207 : i32 to bf16
    %785 = vector.shape_cast %767 : vector<1x256xi1> to vector<1x256xi1>
    %786 = vector.broadcast %785 : vector<1x256xi1> to vector<16x256xi1>
    %787 = vector.broadcast %784 : bf16 to vector<16x256xbf16>
    %788 = arith.select %786, %783, %787 : vector<16x256xi1>, vector<16x256xbf16>
    %789 = vector.extract_strided_slice %765 {offsets = [0, 34], sizes = [16, 256], strides = [1, 1]} : vector<16x324xbf16> to vector<16x256xbf16>
    %790 = vector.extract_strided_slice %765 {offsets = [0, 36], sizes = [16, 256], strides = [1, 1]} : vector<16x324xbf16> to vector<16x256xbf16>
    %c0_i32_208 = arith.constant 0 : i32
    %791 = arith.sitofp %c0_i32_208 : i32 to bf16
    %792 = vector.shape_cast %769 : vector<1x256xi1> to vector<1x256xi1>
    %793 = vector.broadcast %792 : vector<1x256xi1> to vector<16x256xi1>
    %794 = vector.broadcast %791 : bf16 to vector<16x256xbf16>
    %795 = arith.select %793, %790, %794 : vector<16x256xi1>, vector<16x256xbf16>
    %796 = vector.extract_strided_slice %765 {offsets = [0, 64], sizes = [16, 256], strides = [1, 1]} : vector<16x324xbf16> to vector<16x256xbf16>
    %c0_i32_209 = arith.constant 0 : i32
    %797 = arith.sitofp %c0_i32_209 : i32 to bf16
    %798 = vector.shape_cast %767 : vector<1x256xi1> to vector<1x256xi1>
    %799 = vector.broadcast %798 : vector<1x256xi1> to vector<16x256xi1>
    %800 = vector.broadcast %797 : bf16 to vector<16x256xbf16>
    %801 = arith.select %799, %796, %800 : vector<16x256xi1>, vector<16x256xbf16>
    %802 = vector.extract_strided_slice %765 {offsets = [0, 66], sizes = [16, 256], strides = [1, 1]} : vector<16x324xbf16> to vector<16x256xbf16>
    %803 = vector.extract_strided_slice %765 {offsets = [0, 68], sizes = [16, 256], strides = [1, 1]} : vector<16x324xbf16> to vector<16x256xbf16>
    %c0_i32_210 = arith.constant 0 : i32
    %804 = arith.sitofp %c0_i32_210 : i32 to bf16
    %805 = vector.shape_cast %769 : vector<1x256xi1> to vector<1x256xi1>
    %806 = vector.broadcast %805 : vector<1x256xi1> to vector<16x256xi1>
    %807 = vector.broadcast %804 : bf16 to vector<16x256xbf16>
    %808 = arith.select %806, %803, %807 : vector<16x256xi1>, vector<16x256xbf16>
    %809 = tpu.concatenate %775, %776, %782, %788, %789, %795, %801, %802, %808 in 0 : vector<16x256xbf16>, vector<16x256xbf16>, vector<16x256xbf16>, vector<16x256xbf16>, vector<16x256xbf16>, vector<16x256xbf16>, vector<16x256xbf16>, vector<16x256xbf16>, vector<16x256xbf16> -> vector<144x256xbf16>
    %c0_211 = arith.constant 0 : index
    %c0_212 = arith.constant 0 : index
    %810 = vector.load %arg28[%c0_211, %c0_212] : memref<16x144xbf16, #tpu.memory_space<vmem>>, vector<16x144xbf16>
    %cst_213 = arith.constant dense<0.000000e+00> : vector<16x256xf32>
    %811 = tpu.matmul %810, %809, %cst_213 {dimension_numbers = #tpu.dot_dimension_numbers<[1], [0], [0], [1], [0, 0, 1, 1], [], []>} : vector<16x144xbf16>, vector<144x256xbf16>, vector<16x256xf32> -> vector<16x256xf32>
    %812 = arith.addf %763, %811 : vector<16x256xf32>
    %c0_214 = arith.constant 0 : index
    %c0_215 = arith.constant 0 : index
    %813 = vector.load %arg29[%c0_214, %c0_215] : memref<16x1xf32, #tpu.memory_space<vmem>>, vector<16x1xf32>
    %814 = vector.broadcast %813 : vector<16x1xf32> to vector<16x256xf32>
    %815 = arith.addf %812, %814 : vector<16x256xf32>
    %cst_216 = arith.constant 0.000000e+00 : f32
    %816 = vector.broadcast %cst_216 : f32 to vector<16x256xf32>
    %817 = arith.maximumf %815, %816 : vector<16x256xf32>
    %818 = arith.truncf %817 : vector<16x256xf32> to vector<16x256xbf16>
    %cst_217 = arith.constant 0.000000e+00 : bf16
    %819 = vector.broadcast %cst_217 : bf16 to vector<16x34xbf16>
    %820 = tpu.concatenate %819, %818, %819 in 1 : vector<16x34xbf16>, vector<16x256xbf16>, vector<16x34xbf16> -> vector<16x324xbf16>
    %c2_i32_218 = arith.constant 2 : i32
    %821 = vector.broadcast %c2_i32_218 : i32 to vector<1x256xi32>
    %822 = arith.cmpi sge, %16, %821 : vector<1x256xi32>
    %c14_i32_219 = arith.constant 14 : i32
    %823 = vector.broadcast %c14_i32_219 : i32 to vector<1x256xi32>
    %824 = arith.cmpi slt, %16, %823 : vector<1x256xi32>
    %825 = vector.extract_strided_slice %820 {offsets = [0, 0], sizes = [16, 256], strides = [1, 1]} : vector<16x324xbf16> to vector<16x256xbf16>
    %c0_i32_220 = arith.constant 0 : i32
    %826 = arith.sitofp %c0_i32_220 : i32 to bf16
    %827 = vector.shape_cast %822 : vector<1x256xi1> to vector<1x256xi1>
    %828 = vector.broadcast %827 : vector<1x256xi1> to vector<16x256xi1>
    %829 = vector.broadcast %826 : bf16 to vector<16x256xbf16>
    %830 = arith.select %828, %825, %829 : vector<16x256xi1>, vector<16x256xbf16>
    %831 = vector.extract_strided_slice %820 {offsets = [0, 2], sizes = [16, 256], strides = [1, 1]} : vector<16x324xbf16> to vector<16x256xbf16>
    %832 = vector.extract_strided_slice %820 {offsets = [0, 4], sizes = [16, 256], strides = [1, 1]} : vector<16x324xbf16> to vector<16x256xbf16>
    %c0_i32_221 = arith.constant 0 : i32
    %833 = arith.sitofp %c0_i32_221 : i32 to bf16
    %834 = vector.shape_cast %824 : vector<1x256xi1> to vector<1x256xi1>
    %835 = vector.broadcast %834 : vector<1x256xi1> to vector<16x256xi1>
    %836 = vector.broadcast %833 : bf16 to vector<16x256xbf16>
    %837 = arith.select %835, %832, %836 : vector<16x256xi1>, vector<16x256xbf16>
    %838 = vector.extract_strided_slice %820 {offsets = [0, 32], sizes = [16, 256], strides = [1, 1]} : vector<16x324xbf16> to vector<16x256xbf16>
    %c0_i32_222 = arith.constant 0 : i32
    %839 = arith.sitofp %c0_i32_222 : i32 to bf16
    %840 = vector.shape_cast %822 : vector<1x256xi1> to vector<1x256xi1>
    %841 = vector.broadcast %840 : vector<1x256xi1> to vector<16x256xi1>
    %842 = vector.broadcast %839 : bf16 to vector<16x256xbf16>
    %843 = arith.select %841, %838, %842 : vector<16x256xi1>, vector<16x256xbf16>
    %844 = vector.extract_strided_slice %820 {offsets = [0, 34], sizes = [16, 256], strides = [1, 1]} : vector<16x324xbf16> to vector<16x256xbf16>
    %845 = vector.extract_strided_slice %820 {offsets = [0, 36], sizes = [16, 256], strides = [1, 1]} : vector<16x324xbf16> to vector<16x256xbf16>
    %c0_i32_223 = arith.constant 0 : i32
    %846 = arith.sitofp %c0_i32_223 : i32 to bf16
    %847 = vector.shape_cast %824 : vector<1x256xi1> to vector<1x256xi1>
    %848 = vector.broadcast %847 : vector<1x256xi1> to vector<16x256xi1>
    %849 = vector.broadcast %846 : bf16 to vector<16x256xbf16>
    %850 = arith.select %848, %845, %849 : vector<16x256xi1>, vector<16x256xbf16>
    %851 = vector.extract_strided_slice %820 {offsets = [0, 64], sizes = [16, 256], strides = [1, 1]} : vector<16x324xbf16> to vector<16x256xbf16>
    %c0_i32_224 = arith.constant 0 : i32
    %852 = arith.sitofp %c0_i32_224 : i32 to bf16
    %853 = vector.shape_cast %822 : vector<1x256xi1> to vector<1x256xi1>
    %854 = vector.broadcast %853 : vector<1x256xi1> to vector<16x256xi1>
    %855 = vector.broadcast %852 : bf16 to vector<16x256xbf16>
    %856 = arith.select %854, %851, %855 : vector<16x256xi1>, vector<16x256xbf16>
    %857 = vector.extract_strided_slice %820 {offsets = [0, 66], sizes = [16, 256], strides = [1, 1]} : vector<16x324xbf16> to vector<16x256xbf16>
    %858 = vector.extract_strided_slice %820 {offsets = [0, 68], sizes = [16, 256], strides = [1, 1]} : vector<16x324xbf16> to vector<16x256xbf16>
    %c0_i32_225 = arith.constant 0 : i32
    %859 = arith.sitofp %c0_i32_225 : i32 to bf16
    %860 = vector.shape_cast %824 : vector<1x256xi1> to vector<1x256xi1>
    %861 = vector.broadcast %860 : vector<1x256xi1> to vector<16x256xi1>
    %862 = vector.broadcast %859 : bf16 to vector<16x256xbf16>
    %863 = arith.select %861, %858, %862 : vector<16x256xi1>, vector<16x256xbf16>
    %864 = tpu.concatenate %830, %831, %837, %843, %844, %850, %856, %857, %863 in 0 : vector<16x256xbf16>, vector<16x256xbf16>, vector<16x256xbf16>, vector<16x256xbf16>, vector<16x256xbf16>, vector<16x256xbf16>, vector<16x256xbf16>, vector<16x256xbf16>, vector<16x256xbf16> -> vector<144x256xbf16>
    %c0_226 = arith.constant 0 : index
    %c0_227 = arith.constant 0 : index
    %865 = vector.load %arg30[%c0_226, %c0_227] : memref<16x144xbf16, #tpu.memory_space<vmem>>, vector<16x144xbf16>
    %cst_228 = arith.constant dense<0.000000e+00> : vector<16x256xf32>
    %866 = tpu.matmul %865, %864, %cst_228 {dimension_numbers = #tpu.dot_dimension_numbers<[1], [0], [0], [1], [0, 0, 1, 1], [], []>} : vector<16x144xbf16>, vector<144x256xbf16>, vector<16x256xf32> -> vector<16x256xf32>
    %c0_229 = arith.constant 0 : index
    %c0_230 = arith.constant 0 : index
    %867 = vector.load %arg31[%c0_229, %c0_230] : memref<16x1xf32, #tpu.memory_space<vmem>>, vector<16x1xf32>
    %868 = vector.broadcast %867 : vector<16x1xf32> to vector<16x256xf32>
    %869 = arith.addf %866, %868 : vector<16x256xf32>
    %cst_231 = arith.constant 0.000000e+00 : f32
    %870 = vector.broadcast %cst_231 : f32 to vector<16x256xf32>
    %871 = arith.maximumf %869, %870 : vector<16x256xf32>
    %872 = arith.truncf %871 : vector<16x256xf32> to vector<16x256xbf16>
    %cst_232 = arith.constant 0.000000e+00 : bf16
    %873 = vector.broadcast %cst_232 : bf16 to vector<16x17xbf16>
    %874 = tpu.concatenate %873, %872, %873 in 1 : vector<16x17xbf16>, vector<16x256xbf16>, vector<16x17xbf16> -> vector<16x290xbf16>
    %c1_i32_233 = arith.constant 1 : i32
    %875 = vector.broadcast %c1_i32_233 : i32 to vector<1x256xi32>
    %876 = arith.cmpi sge, %16, %875 : vector<1x256xi32>
    %c15_i32_234 = arith.constant 15 : i32
    %877 = vector.broadcast %c15_i32_234 : i32 to vector<1x256xi32>
    %878 = arith.cmpi slt, %16, %877 : vector<1x256xi32>
    %879 = vector.extract_strided_slice %874 {offsets = [0, 0], sizes = [16, 256], strides = [1, 1]} : vector<16x290xbf16> to vector<16x256xbf16>
    %c0_i32_235 = arith.constant 0 : i32
    %880 = arith.sitofp %c0_i32_235 : i32 to bf16
    %881 = vector.shape_cast %876 : vector<1x256xi1> to vector<1x256xi1>
    %882 = vector.broadcast %881 : vector<1x256xi1> to vector<16x256xi1>
    %883 = vector.broadcast %880 : bf16 to vector<16x256xbf16>
    %884 = arith.select %882, %879, %883 : vector<16x256xi1>, vector<16x256xbf16>
    %885 = vector.extract_strided_slice %874 {offsets = [0, 1], sizes = [16, 256], strides = [1, 1]} : vector<16x290xbf16> to vector<16x256xbf16>
    %886 = vector.extract_strided_slice %874 {offsets = [0, 2], sizes = [16, 256], strides = [1, 1]} : vector<16x290xbf16> to vector<16x256xbf16>
    %c0_i32_236 = arith.constant 0 : i32
    %887 = arith.sitofp %c0_i32_236 : i32 to bf16
    %888 = vector.shape_cast %878 : vector<1x256xi1> to vector<1x256xi1>
    %889 = vector.broadcast %888 : vector<1x256xi1> to vector<16x256xi1>
    %890 = vector.broadcast %887 : bf16 to vector<16x256xbf16>
    %891 = arith.select %889, %886, %890 : vector<16x256xi1>, vector<16x256xbf16>
    %892 = vector.extract_strided_slice %874 {offsets = [0, 16], sizes = [16, 256], strides = [1, 1]} : vector<16x290xbf16> to vector<16x256xbf16>
    %c0_i32_237 = arith.constant 0 : i32
    %893 = arith.sitofp %c0_i32_237 : i32 to bf16
    %894 = vector.shape_cast %876 : vector<1x256xi1> to vector<1x256xi1>
    %895 = vector.broadcast %894 : vector<1x256xi1> to vector<16x256xi1>
    %896 = vector.broadcast %893 : bf16 to vector<16x256xbf16>
    %897 = arith.select %895, %892, %896 : vector<16x256xi1>, vector<16x256xbf16>
    %898 = vector.extract_strided_slice %874 {offsets = [0, 17], sizes = [16, 256], strides = [1, 1]} : vector<16x290xbf16> to vector<16x256xbf16>
    %899 = vector.extract_strided_slice %874 {offsets = [0, 18], sizes = [16, 256], strides = [1, 1]} : vector<16x290xbf16> to vector<16x256xbf16>
    %c0_i32_238 = arith.constant 0 : i32
    %900 = arith.sitofp %c0_i32_238 : i32 to bf16
    %901 = vector.shape_cast %878 : vector<1x256xi1> to vector<1x256xi1>
    %902 = vector.broadcast %901 : vector<1x256xi1> to vector<16x256xi1>
    %903 = vector.broadcast %900 : bf16 to vector<16x256xbf16>
    %904 = arith.select %902, %899, %903 : vector<16x256xi1>, vector<16x256xbf16>
    %905 = vector.extract_strided_slice %874 {offsets = [0, 32], sizes = [16, 256], strides = [1, 1]} : vector<16x290xbf16> to vector<16x256xbf16>
    %c0_i32_239 = arith.constant 0 : i32
    %906 = arith.sitofp %c0_i32_239 : i32 to bf16
    %907 = vector.shape_cast %876 : vector<1x256xi1> to vector<1x256xi1>
    %908 = vector.broadcast %907 : vector<1x256xi1> to vector<16x256xi1>
    %909 = vector.broadcast %906 : bf16 to vector<16x256xbf16>
    %910 = arith.select %908, %905, %909 : vector<16x256xi1>, vector<16x256xbf16>
    %911 = vector.extract_strided_slice %874 {offsets = [0, 33], sizes = [16, 256], strides = [1, 1]} : vector<16x290xbf16> to vector<16x256xbf16>
    %912 = vector.extract_strided_slice %874 {offsets = [0, 34], sizes = [16, 256], strides = [1, 1]} : vector<16x290xbf16> to vector<16x256xbf16>
    %c0_i32_240 = arith.constant 0 : i32
    %913 = arith.sitofp %c0_i32_240 : i32 to bf16
    %914 = vector.shape_cast %878 : vector<1x256xi1> to vector<1x256xi1>
    %915 = vector.broadcast %914 : vector<1x256xi1> to vector<16x256xi1>
    %916 = vector.broadcast %913 : bf16 to vector<16x256xbf16>
    %917 = arith.select %915, %912, %916 : vector<16x256xi1>, vector<16x256xbf16>
    %918 = tpu.concatenate %884, %885, %891, %897, %898, %904, %910, %911, %917 in 0 : vector<16x256xbf16>, vector<16x256xbf16>, vector<16x256xbf16>, vector<16x256xbf16>, vector<16x256xbf16>, vector<16x256xbf16>, vector<16x256xbf16>, vector<16x256xbf16>, vector<16x256xbf16> -> vector<144x256xbf16>
    %c0_241 = arith.constant 0 : index
    %c0_242 = arith.constant 0 : index
    %919 = vector.load %arg32[%c0_241, %c0_242] : memref<8x144xbf16, #tpu.memory_space<vmem>>, vector<8x144xbf16>
    %cst_243 = arith.constant dense<0.000000e+00> : vector<8x256xf32>
    %920 = tpu.matmul %919, %918, %cst_243 {dimension_numbers = #tpu.dot_dimension_numbers<[1], [0], [0], [1], [0, 0, 1, 1], [], []>} : vector<8x144xbf16>, vector<144x256xbf16>, vector<8x256xf32> -> vector<8x256xf32>
    %cst_244 = arith.constant 0.000000e+00 : bf16
    %921 = vector.broadcast %cst_244 : bf16 to vector<16x17xbf16>
    %922 = tpu.concatenate %921, %234, %921 in 1 : vector<16x17xbf16>, vector<16x256xbf16>, vector<16x17xbf16> -> vector<16x290xbf16>
    %c1_i32_245 = arith.constant 1 : i32
    %923 = vector.broadcast %c1_i32_245 : i32 to vector<1x256xi32>
    %924 = arith.cmpi sge, %16, %923 : vector<1x256xi32>
    %c15_i32_246 = arith.constant 15 : i32
    %925 = vector.broadcast %c15_i32_246 : i32 to vector<1x256xi32>
    %926 = arith.cmpi slt, %16, %925 : vector<1x256xi32>
    %927 = vector.extract_strided_slice %922 {offsets = [0, 0], sizes = [16, 256], strides = [1, 1]} : vector<16x290xbf16> to vector<16x256xbf16>
    %c0_i32_247 = arith.constant 0 : i32
    %928 = arith.sitofp %c0_i32_247 : i32 to bf16
    %929 = vector.shape_cast %924 : vector<1x256xi1> to vector<1x256xi1>
    %930 = vector.broadcast %929 : vector<1x256xi1> to vector<16x256xi1>
    %931 = vector.broadcast %928 : bf16 to vector<16x256xbf16>
    %932 = arith.select %930, %927, %931 : vector<16x256xi1>, vector<16x256xbf16>
    %933 = vector.extract_strided_slice %922 {offsets = [0, 1], sizes = [16, 256], strides = [1, 1]} : vector<16x290xbf16> to vector<16x256xbf16>
    %934 = vector.extract_strided_slice %922 {offsets = [0, 2], sizes = [16, 256], strides = [1, 1]} : vector<16x290xbf16> to vector<16x256xbf16>
    %c0_i32_248 = arith.constant 0 : i32
    %935 = arith.sitofp %c0_i32_248 : i32 to bf16
    %936 = vector.shape_cast %926 : vector<1x256xi1> to vector<1x256xi1>
    %937 = vector.broadcast %936 : vector<1x256xi1> to vector<16x256xi1>
    %938 = vector.broadcast %935 : bf16 to vector<16x256xbf16>
    %939 = arith.select %937, %934, %938 : vector<16x256xi1>, vector<16x256xbf16>
    %940 = vector.extract_strided_slice %922 {offsets = [0, 16], sizes = [16, 256], strides = [1, 1]} : vector<16x290xbf16> to vector<16x256xbf16>
    %c0_i32_249 = arith.constant 0 : i32
    %941 = arith.sitofp %c0_i32_249 : i32 to bf16
    %942 = vector.shape_cast %924 : vector<1x256xi1> to vector<1x256xi1>
    %943 = vector.broadcast %942 : vector<1x256xi1> to vector<16x256xi1>
    %944 = vector.broadcast %941 : bf16 to vector<16x256xbf16>
    %945 = arith.select %943, %940, %944 : vector<16x256xi1>, vector<16x256xbf16>
    %946 = vector.extract_strided_slice %922 {offsets = [0, 17], sizes = [16, 256], strides = [1, 1]} : vector<16x290xbf16> to vector<16x256xbf16>
    %947 = vector.extract_strided_slice %922 {offsets = [0, 18], sizes = [16, 256], strides = [1, 1]} : vector<16x290xbf16> to vector<16x256xbf16>
    %c0_i32_250 = arith.constant 0 : i32
    %948 = arith.sitofp %c0_i32_250 : i32 to bf16
    %949 = vector.shape_cast %926 : vector<1x256xi1> to vector<1x256xi1>
    %950 = vector.broadcast %949 : vector<1x256xi1> to vector<16x256xi1>
    %951 = vector.broadcast %948 : bf16 to vector<16x256xbf16>
    %952 = arith.select %950, %947, %951 : vector<16x256xi1>, vector<16x256xbf16>
    %953 = vector.extract_strided_slice %922 {offsets = [0, 32], sizes = [16, 256], strides = [1, 1]} : vector<16x290xbf16> to vector<16x256xbf16>
    %c0_i32_251 = arith.constant 0 : i32
    %954 = arith.sitofp %c0_i32_251 : i32 to bf16
    %955 = vector.shape_cast %924 : vector<1x256xi1> to vector<1x256xi1>
    %956 = vector.broadcast %955 : vector<1x256xi1> to vector<16x256xi1>
    %957 = vector.broadcast %954 : bf16 to vector<16x256xbf16>
    %958 = arith.select %956, %953, %957 : vector<16x256xi1>, vector<16x256xbf16>
    %959 = vector.extract_strided_slice %922 {offsets = [0, 33], sizes = [16, 256], strides = [1, 1]} : vector<16x290xbf16> to vector<16x256xbf16>
    %960 = vector.extract_strided_slice %922 {offsets = [0, 34], sizes = [16, 256], strides = [1, 1]} : vector<16x290xbf16> to vector<16x256xbf16>
    %c0_i32_252 = arith.constant 0 : i32
    %961 = arith.sitofp %c0_i32_252 : i32 to bf16
    %962 = vector.shape_cast %926 : vector<1x256xi1> to vector<1x256xi1>
    %963 = vector.broadcast %962 : vector<1x256xi1> to vector<16x256xi1>
    %964 = vector.broadcast %961 : bf16 to vector<16x256xbf16>
    %965 = arith.select %963, %960, %964 : vector<16x256xi1>, vector<16x256xbf16>
    %966 = tpu.concatenate %932, %933, %939, %945, %946, %952, %958, %959, %965 in 0 : vector<16x256xbf16>, vector<16x256xbf16>, vector<16x256xbf16>, vector<16x256xbf16>, vector<16x256xbf16>, vector<16x256xbf16>, vector<16x256xbf16>, vector<16x256xbf16>, vector<16x256xbf16> -> vector<144x256xbf16>
    %c0_253 = arith.constant 0 : index
    %c0_254 = arith.constant 0 : index
    %967 = vector.load %arg33[%c0_253, %c0_254] : memref<8x144xbf16, #tpu.memory_space<vmem>>, vector<8x144xbf16>
    %cst_255 = arith.constant dense<0.000000e+00> : vector<8x256xf32>
    %968 = tpu.matmul %967, %966, %cst_255 {dimension_numbers = #tpu.dot_dimension_numbers<[1], [0], [0], [1], [0, 0, 1, 1], [], []>} : vector<8x144xbf16>, vector<144x256xbf16>, vector<8x256xf32> -> vector<8x256xf32>
    %969 = arith.addf %920, %968 : vector<8x256xf32>
    %c0_256 = arith.constant 0 : index
    %c0_257 = arith.constant 0 : index
    %970 = vector.load %arg34[%c0_256, %c0_257] : memref<8x1xf32, #tpu.memory_space<vmem>>, vector<8x1xf32>
    %971 = vector.broadcast %970 : vector<8x1xf32> to vector<8x256xf32>
    %972 = arith.addf %969, %971 : vector<8x256xf32>
    %cst_258 = arith.constant 0.000000e+00 : f32
    %973 = vector.broadcast %cst_258 : f32 to vector<8x256xf32>
    %974 = arith.maximumf %972, %973 : vector<8x256xf32>
    %975 = arith.truncf %974 : vector<8x256xf32> to vector<8x256xbf16>
    %cst_259 = arith.constant 0.000000e+00 : bf16
    %976 = vector.broadcast %cst_259 : bf16 to vector<8x17xbf16>
    %977 = tpu.concatenate %976, %975, %976 in 1 : vector<8x17xbf16>, vector<8x256xbf16>, vector<8x17xbf16> -> vector<8x290xbf16>
    %c1_i32_260 = arith.constant 1 : i32
    %978 = vector.broadcast %c1_i32_260 : i32 to vector<1x256xi32>
    %979 = arith.cmpi sge, %16, %978 : vector<1x256xi32>
    %c15_i32_261 = arith.constant 15 : i32
    %980 = vector.broadcast %c15_i32_261 : i32 to vector<1x256xi32>
    %981 = arith.cmpi slt, %16, %980 : vector<1x256xi32>
    %982 = vector.extract_strided_slice %977 {offsets = [0, 0], sizes = [8, 256], strides = [1, 1]} : vector<8x290xbf16> to vector<8x256xbf16>
    %c0_i32_262 = arith.constant 0 : i32
    %983 = arith.sitofp %c0_i32_262 : i32 to bf16
    %984 = vector.shape_cast %979 : vector<1x256xi1> to vector<1x256xi1>
    %985 = vector.broadcast %984 : vector<1x256xi1> to vector<8x256xi1>
    %986 = vector.broadcast %983 : bf16 to vector<8x256xbf16>
    %987 = arith.select %985, %982, %986 : vector<8x256xi1>, vector<8x256xbf16>
    %988 = vector.extract_strided_slice %977 {offsets = [0, 1], sizes = [8, 256], strides = [1, 1]} : vector<8x290xbf16> to vector<8x256xbf16>
    %989 = vector.extract_strided_slice %977 {offsets = [0, 2], sizes = [8, 256], strides = [1, 1]} : vector<8x290xbf16> to vector<8x256xbf16>
    %c0_i32_263 = arith.constant 0 : i32
    %990 = arith.sitofp %c0_i32_263 : i32 to bf16
    %991 = vector.shape_cast %981 : vector<1x256xi1> to vector<1x256xi1>
    %992 = vector.broadcast %991 : vector<1x256xi1> to vector<8x256xi1>
    %993 = vector.broadcast %990 : bf16 to vector<8x256xbf16>
    %994 = arith.select %992, %989, %993 : vector<8x256xi1>, vector<8x256xbf16>
    %995 = vector.extract_strided_slice %977 {offsets = [0, 16], sizes = [8, 256], strides = [1, 1]} : vector<8x290xbf16> to vector<8x256xbf16>
    %c0_i32_264 = arith.constant 0 : i32
    %996 = arith.sitofp %c0_i32_264 : i32 to bf16
    %997 = vector.shape_cast %979 : vector<1x256xi1> to vector<1x256xi1>
    %998 = vector.broadcast %997 : vector<1x256xi1> to vector<8x256xi1>
    %999 = vector.broadcast %996 : bf16 to vector<8x256xbf16>
    %1000 = arith.select %998, %995, %999 : vector<8x256xi1>, vector<8x256xbf16>
    %1001 = vector.extract_strided_slice %977 {offsets = [0, 17], sizes = [8, 256], strides = [1, 1]} : vector<8x290xbf16> to vector<8x256xbf16>
    %1002 = vector.extract_strided_slice %977 {offsets = [0, 18], sizes = [8, 256], strides = [1, 1]} : vector<8x290xbf16> to vector<8x256xbf16>
    %c0_i32_265 = arith.constant 0 : i32
    %1003 = arith.sitofp %c0_i32_265 : i32 to bf16
    %1004 = vector.shape_cast %981 : vector<1x256xi1> to vector<1x256xi1>
    %1005 = vector.broadcast %1004 : vector<1x256xi1> to vector<8x256xi1>
    %1006 = vector.broadcast %1003 : bf16 to vector<8x256xbf16>
    %1007 = arith.select %1005, %1002, %1006 : vector<8x256xi1>, vector<8x256xbf16>
    %1008 = vector.extract_strided_slice %977 {offsets = [0, 32], sizes = [8, 256], strides = [1, 1]} : vector<8x290xbf16> to vector<8x256xbf16>
    %c0_i32_266 = arith.constant 0 : i32
    %1009 = arith.sitofp %c0_i32_266 : i32 to bf16
    %1010 = vector.shape_cast %979 : vector<1x256xi1> to vector<1x256xi1>
    %1011 = vector.broadcast %1010 : vector<1x256xi1> to vector<8x256xi1>
    %1012 = vector.broadcast %1009 : bf16 to vector<8x256xbf16>
    %1013 = arith.select %1011, %1008, %1012 : vector<8x256xi1>, vector<8x256xbf16>
    %1014 = vector.extract_strided_slice %977 {offsets = [0, 33], sizes = [8, 256], strides = [1, 1]} : vector<8x290xbf16> to vector<8x256xbf16>
    %1015 = vector.extract_strided_slice %977 {offsets = [0, 34], sizes = [8, 256], strides = [1, 1]} : vector<8x290xbf16> to vector<8x256xbf16>
    %c0_i32_267 = arith.constant 0 : i32
    %1016 = arith.sitofp %c0_i32_267 : i32 to bf16
    %1017 = vector.shape_cast %981 : vector<1x256xi1> to vector<1x256xi1>
    %1018 = vector.broadcast %1017 : vector<1x256xi1> to vector<8x256xi1>
    %1019 = vector.broadcast %1016 : bf16 to vector<8x256xbf16>
    %1020 = arith.select %1018, %1015, %1019 : vector<8x256xi1>, vector<8x256xbf16>
    %1021 = tpu.concatenate %987, %988, %994, %1000, %1001, %1007, %1013, %1014, %1020 in 0 : vector<8x256xbf16>, vector<8x256xbf16>, vector<8x256xbf16>, vector<8x256xbf16>, vector<8x256xbf16>, vector<8x256xbf16>, vector<8x256xbf16>, vector<8x256xbf16>, vector<8x256xbf16> -> vector<72x256xbf16>
    %c0_268 = arith.constant 0 : index
    %c0_269 = arith.constant 0 : index
    %1022 = vector.load %arg35[%c0_268, %c0_269] : memref<8x72xbf16, #tpu.memory_space<vmem>>, vector<8x72xbf16>
    %cst_270 = arith.constant dense<0.000000e+00> : vector<8x256xf32>
    %1023 = tpu.matmul %1022, %1021, %cst_270 {dimension_numbers = #tpu.dot_dimension_numbers<[1], [0], [0], [1], [0, 0, 1, 1], [], []>} : vector<8x72xbf16>, vector<72x256xbf16>, vector<8x256xf32> -> vector<8x256xf32>
    %c0_271 = arith.constant 0 : index
    %c0_272 = arith.constant 0 : index
    %1024 = vector.load %arg36[%c0_271, %c0_272] : memref<8x1xf32, #tpu.memory_space<vmem>>, vector<8x1xf32>
    %1025 = vector.broadcast %1024 : vector<8x1xf32> to vector<8x256xf32>
    %1026 = arith.addf %1023, %1025 : vector<8x256xf32>
    %cst_273 = arith.constant 0.000000e+00 : f32
    %1027 = vector.broadcast %cst_273 : f32 to vector<8x256xf32>
    %1028 = arith.maximumf %1026, %1027 : vector<8x256xf32>
    %1029 = arith.truncf %1028 : vector<8x256xf32> to vector<8x256xbf16>
    %1030 = arith.extf %1029 : vector<8x256xbf16> to vector<8x256xf32>
    %1031 = arith.extf %126 : vector<8x256xbf16> to vector<8x256xf32>
    %1032 = arith.addf %1030, %1031 : vector<8x256xf32>
    %c0_274 = arith.constant 0 : index
    %c0_275 = arith.constant 0 : index
    %c0_276 = arith.constant 0 : index
    %1033 = vector.load %arg37[%c0_274, %c0_275, %c0_276] : memref<1x8x256xf32, #tpu.memory_space<vmem>>, vector<1x8x256xf32>
    %1034 = vector.shape_cast %1033 : vector<1x8x256xf32> to vector<8x256xf32>
    %1035 = vector.shape_cast %1032 : vector<8x256xf32> to vector<1x8x256xf32>
    tpu.vector_store %arg37[%c0_274, %c0_275, %c0_276], %1035 {strides = array<i32>} : memref<1x8x256xf32, #tpu.memory_space<vmem>>, vector<1x8x256xf32>,
    return
  }
  func.func @transform_0(%arg0: i32) -> (i32, i32, i32) {
    %c0_i32 = arith.constant 0 : i32
    %c0_i32_0 = arith.constant 0 : i32
    %c0_i32_1 = arith.constant 0 : i32
    return %arg0, %c0_i32, %c0_i32_0 : i32, i32, i32
  }
  func.func @transform_1(%arg0: i32) -> (i32, i32) {
    %c0_i32 = arith.constant 0 : i32
    %c0_i32_0 = arith.constant 0 : i32
    %c0_i32_1 = arith.constant 0 : i32
    return %c0_i32, %c0_i32_0 : i32, i32
  }
  func.func @transform_2(%arg0: i32) -> (i32, i32) {
    %c0_i32 = arith.constant 0 : i32
    %c0_i32_0 = arith.constant 0 : i32
    %c0_i32_1 = arith.constant 0 : i32
    return %c0_i32, %c0_i32_0 : i32, i32
  }
  func.func @transform_3(%arg0: i32) -> (i32, i32) {
    %c0_i32 = arith.constant 0 : i32
    %c0_i32_0 = arith.constant 0 : i32
    %c0_i32_1 = arith.constant 0 : i32
    return %c0_i32, %c0_i32_0 : i32, i32
  }
  func.func @transform_4(%arg0: i32) -> (i32, i32) {
    %c0_i32 = arith.constant 0 : i32
    %c0_i32_0 = arith.constant 0 : i32
    %c0_i32_1 = arith.constant 0 : i32
    return %c0_i32, %c0_i32_0 : i32, i32
  }
  func.func @transform_5(%arg0: i32) -> (i32, i32) {
    %c0_i32 = arith.constant 0 : i32
    %c0_i32_0 = arith.constant 0 : i32
    %c0_i32_1 = arith.constant 0 : i32
    return %c0_i32, %c0_i32_0 : i32, i32
  }
  func.func @transform_6(%arg0: i32) -> (i32, i32) {
    %c0_i32 = arith.constant 0 : i32
    %c0_i32_0 = arith.constant 0 : i32
    %c0_i32_1 = arith.constant 0 : i32
    return %c0_i32, %c0_i32_0 : i32, i32
  }
  func.func @transform_7(%arg0: i32) -> (i32, i32) {
    %c0_i32 = arith.constant 0 : i32
    %c0_i32_0 = arith.constant 0 : i32
    %c0_i32_1 = arith.constant 0 : i32
    return %c0_i32, %c0_i32_0 : i32, i32
  }
  func.func @transform_8(%arg0: i32) -> (i32, i32) {
    %c0_i32 = arith.constant 0 : i32
    %c0_i32_0 = arith.constant 0 : i32
    %c0_i32_1 = arith.constant 0 : i32
    return %c0_i32, %c0_i32_0 : i32, i32
  }
  func.func @transform_9(%arg0: i32) -> (i32, i32) {
    %c0_i32 = arith.constant 0 : i32
    %c0_i32_0 = arith.constant 0 : i32
    %c0_i32_1 = arith.constant 0 : i32
    return %c0_i32, %c0_i32_0 : i32, i32
  }
  func.func @transform_10(%arg0: i32) -> (i32, i32) {
    %c0_i32 = arith.constant 0 : i32
    %c0_i32_0 = arith.constant 0 : i32
    %c0_i32_1 = arith.constant 0 : i32
    return %c0_i32, %c0_i32_0 : i32, i32
  }
  func.func @transform_11(%arg0: i32) -> (i32, i32) {
    %c0_i32 = arith.constant 0 : i32
    %c0_i32_0 = arith.constant 0 : i32
    %c0_i32_1 = arith.constant 0 : i32
    return %c0_i32, %c0_i32_0 : i32, i32
  }
  func.func @transform_12(%arg0: i32) -> (i32, i32) {
    %c0_i32 = arith.constant 0 : i32
    %c0_i32_0 = arith.constant 0 : i32
    %c0_i32_1 = arith.constant 0 : i32
    return %c0_i32, %c0_i32_0 : i32, i32
  }
  func.func @transform_13(%arg0: i32) -> (i32, i32) {
    %c0_i32 = arith.constant 0 : i32
    %c0_i32_0 = arith.constant 0 : i32
    %c0_i32_1 = arith.constant 0 : i32
    return %c0_i32, %c0_i32_0 : i32, i32
  }
  func.func @transform_14(%arg0: i32) -> (i32, i32) {
    %c0_i32 = arith.constant 0 : i32
    %c0_i32_0 = arith.constant 0 : i32
    %c0_i32_1 = arith.constant 0 : i32
    return %c0_i32, %c0_i32_0 : i32, i32
  }
  func.func @transform_15(%arg0: i32) -> (i32, i32) {
    %c0_i32 = arith.constant 0 : i32
    %c0_i32_0 = arith.constant 0 : i32
    %c0_i32_1 = arith.constant 0 : i32
    return %c0_i32, %c0_i32_0 : i32, i32
  }
  func.func @transform_16(%arg0: i32) -> (i32, i32) {
    %c0_i32 = arith.constant 0 : i32
    %c0_i32_0 = arith.constant 0 : i32
    %c0_i32_1 = arith.constant 0 : i32
    return %c0_i32, %c0_i32_0 : i32, i32
  }
  func.func @transform_17(%arg0: i32) -> (i32, i32) {
    %c0_i32 = arith.constant 0 : i32
    %c0_i32_0 = arith.constant 0 : i32
    %c0_i32_1 = arith.constant 0 : i32
    return %c0_i32, %c0_i32_0 : i32, i32
  }
  func.func @transform_18(%arg0: i32) -> (i32, i32) {
    %c0_i32 = arith.constant 0 : i32
    %c0_i32_0 = arith.constant 0 : i32
    %c0_i32_1 = arith.constant 0 : i32
    return %c0_i32, %c0_i32_0 : i32, i32
  }
  func.func @transform_19(%arg0: i32) -> (i32, i32) {
    %c0_i32 = arith.constant 0 : i32
    %c0_i32_0 = arith.constant 0 : i32
    %c0_i32_1 = arith.constant 0 : i32
    return %c0_i32, %c0_i32_0 : i32, i32
  }
  func.func @transform_20(%arg0: i32) -> (i32, i32) {
    %c0_i32 = arith.constant 0 : i32
    %c0_i32_0 = arith.constant 0 : i32
    %c0_i32_1 = arith.constant 0 : i32
    return %c0_i32, %c0_i32_0 : i32, i32
  }
  func.func @transform_21(%arg0: i32) -> (i32, i32) {
    %c0_i32 = arith.constant 0 : i32
    %c0_i32_0 = arith.constant 0 : i32
    %c0_i32_1 = arith.constant 0 : i32
    return %c0_i32, %c0_i32_0 : i32, i32
  }
  func.func @transform_22(%arg0: i32) -> (i32, i32) {
    %c0_i32 = arith.constant 0 : i32
    %c0_i32_0 = arith.constant 0 : i32
    %c0_i32_1 = arith.constant 0 : i32
    return %c0_i32, %c0_i32_0 : i32, i32
  }
  func.func @transform_23(%arg0: i32) -> (i32, i32) {
    %c0_i32 = arith.constant 0 : i32
    %c0_i32_0 = arith.constant 0 : i32
    %c0_i32_1 = arith.constant 0 : i32
    return %c0_i32, %c0_i32_0 : i32, i32
  }
  func.func @transform_24(%arg0: i32) -> (i32, i32) {
    %c0_i32 = arith.constant 0 : i32
    %c0_i32_0 = arith.constant 0 : i32
    %c0_i32_1 = arith.constant 0 : i32
    return %c0_i32, %c0_i32_0 : i32, i32
  }
  func.func @transform_25(%arg0: i32) -> (i32, i32) {
    %c0_i32 = arith.constant 0 : i32
    %c0_i32_0 = arith.constant 0 : i32
    %c0_i32_1 = arith.constant 0 : i32
    return %c0_i32, %c0_i32_0 : i32, i32
  }
  func.func @transform_26(%arg0: i32) -> (i32, i32) {
    %c0_i32 = arith.constant 0 : i32
    %c0_i32_0 = arith.constant 0 : i32
    %c0_i32_1 = arith.constant 0 : i32
    return %c0_i32, %c0_i32_0 : i32, i32
  }
  func.func @transform_27(%arg0: i32) -> (i32, i32) {
    %c0_i32 = arith.constant 0 : i32
    %c0_i32_0 = arith.constant 0 : i32
    %c0_i32_1 = arith.constant 0 : i32
    return %c0_i32, %c0_i32_0 : i32, i32
  }
  func.func @transform_28(%arg0: i32) -> (i32, i32) {
    %c0_i32 = arith.constant 0 : i32
    %c0_i32_0 = arith.constant 0 : i32
    %c0_i32_1 = arith.constant 0 : i32
    return %c0_i32, %c0_i32_0 : i32, i32
  }
  func.func @transform_29(%arg0: i32) -> (i32, i32) {
    %c0_i32 = arith.constant 0 : i32
    %c0_i32_0 = arith.constant 0 : i32
    %c0_i32_1 = arith.constant 0 : i32
    return %c0_i32, %c0_i32_0 : i32, i32
  }
  func.func @transform_30(%arg0: i32) -> (i32, i32) {
    %c0_i32 = arith.constant 0 : i32
    %c0_i32_0 = arith.constant 0 : i32
    %c0_i32_1 = arith.constant 0 : i32
    return %c0_i32, %c0_i32_0 : i32, i32
  }
  func.func @transform_31(%arg0: i32) -> (i32, i32) {
    %c0_i32 = arith.constant 0 : i32
    %c0_i32_0 = arith.constant 0 : i32
    %c0_i32_1 = arith.constant 0 : i32
    return %c0_i32, %c0_i32_0 : i32, i32
  }
  func.func @transform_32(%arg0: i32) -> (i32, i32) {
    %c0_i32 = arith.constant 0 : i32
    %c0_i32_0 = arith.constant 0 : i32
    %c0_i32_1 = arith.constant 0 : i32
    return %c0_i32, %c0_i32_0 : i32, i32
  }
  func.func @transform_33(%arg0: i32) -> (i32, i32) {
    %c0_i32 = arith.constant 0 : i32
    %c0_i32_0 = arith.constant 0 : i32
    %c0_i32_1 = arith.constant 0 : i32
    return %c0_i32, %c0_i32_0 : i32, i32
  }
  func.func @transform_34(%arg0: i32) -> (i32, i32) {
    %c0_i32 = arith.constant 0 : i32
    %c0_i32_0 = arith.constant 0 : i32
    %c0_i32_1 = arith.constant 0 : i32
    return %c0_i32, %c0_i32_0 : i32, i32
  }
  func.func @transform_35(%arg0: i32) -> (i32, i32) {
    %c0_i32 = arith.constant 0 : i32
    %c0_i32_0 = arith.constant 0 : i32
    %c0_i32_1 = arith.constant 0 : i32
    return %c0_i32, %c0_i32_0 : i32, i32
  }
  func.func @transform_36(%arg0: i32) -> (i32, i32, i32) {
    %c0_i32 = arith.constant 0 : i32
    %c0_i32_0 = arith.constant 0 : i32
    %c0_i32_1 = arith.constant 0 : i32
    return %arg0, %c0_i32, %c0_i32_0 : i32, i32, i32
  }
}

</mosaic_0001>

<bundles_post_ra>
// kernel: rsu4f_forward.1
= control target key start
LH: loop header
LB: loop body
LE: loop exit
PB: predicated region body
PF: predicated region fallthrough
CT: control target
= control target key end

     0   :  { %s5373_s6 = smov 1   ;;  %s5374_s10 = smov 2   ;;  %s7817_s0 = inlined_call_operand.smem [shape: u32[37], index: -1, kind: input, shape index: {}] }
   0x1   :  { %s5444_s5 = sld [smem:[%s7817_s0]]   ;;  %s5375_s14 = smov 3  }
   0x2   :  { %s5449_s9 = sld [smem:[%s7817_s0 + %s5373_s6]]   ;;  %s5376_s18 = smov 4  }
   0x3   :  { %s5454_s13 = sld [smem:[%s7817_s0 + %s5374_s10]]   ;;  %s5377_s22 = smov 5  }
   0x4   :  { %s5459_s17 = sld [smem:[%s7817_s0 + %s5375_s14]]   ;;  %s5378_s26 = smov 6  }
   0x5   :  { %s5464_s21 = sld [smem:[%s7817_s0 + %s5376_s18]]   ;;  %s5379_s30 = smov 7  }
   0x6   :  { %s5469_s25 = sld [smem:[%s7817_s0 + %s5377_s22]]   ;;  %s5380_s4 = smov 8  }
   0x7   :  { %7983 = sst [smem:[#allocation2_spill]] %s5444_s5  ;;  %s5381_s10 = smov 9  }
   0x8   :  { %7984 = sst [smem:[#allocation3_spill]] %s5449_s9  ;;  %s5382_s15 = smov 10  }
   0x9   :  { %7985 = sst [smem:[#allocation4_spill]] %s5454_s13  ;;  %s5383_s20 = smov 11  }
   0xa   :  { %s5474_s29 = sld [smem:[%s7817_s0 + %s5378_s26]]   ;;  %s5384_s26 = smov 12  }
   0xb   :  { %s5479_s3 = sld [smem:[%s7817_s0 + %s5379_s30]]   ;;  %s5385_s1 = smov 13  }
   0xc   :  { %s5484_s8 = sld [smem:[%s7817_s0 + %s5380_s4]]   ;;  %s5386_s7 = smov 14  }
   0xd   :  { %s5489_s14 = sld [smem:[%s7817_s0 + %s5381_s10]]   ;;  %s5388_s22 = smov 16  }
   0xe   :  { %s5494_s19 = sld [smem:[%s7817_s0 + %s5382_s15]]   ;;  %s5387_s15 = smov 15  }
   0xf   :  { %s5499_s24 = sld [smem:[%s7817_s0 + %s5383_s20]]   ;;  %s5389_s28 = smov 17  }
  0x10   :  { %s5504_s30 = sld [smem:[%s7817_s0 + %s5384_s26]]  }
  0x11   :  { %7986 = sst [smem:[#allocation5_spill]] %s5479_s3 }
  0x12   :  { %7987 = sst [smem:[#allocation6_spill]] %s5484_s8 }
  0x13   :  { %s5509_s6 = sld [smem:[%s7817_s0 + %s5385_s1]]  }
  0x14   :  { %s5514_s12 = sld [smem:[%s7817_s0 + %s5386_s7]]   ;;  %s5390_s7 = smov 18  }
  0x15   :  { %s5519_s20 = sld [smem:[%s7817_s0 + %s5387_s15]]   ;;  %s5391_s15 = smov 19  }
  0x16   :  { %s5524_s27 = sld [smem:[%s7817_s0 + %s5388_s22]]   ;;  %s5392_s22 = smov 20  }
  0x17   :  { %s5529_s4 = sld [smem:[%s7817_s0 + %s5389_s28]]   ;;  %s5393_s28 = smov 21  }
  0x19   :  { %7988 = sst [smem:[#allocation7_spill]] %s5509_s6 }
  0x1a   :  { %7989 = sst [smem:[#allocation8_spill]] %s5514_s12 }
  0x1b   :  { %7990 = sst [smem:[#allocation9_spill]] %s5519_s20 }
  0x1c   :  { %7991 = sst [smem:[#allocation10_spill]] %s5524_s27 }
  0x1d   :  { %7992 = sst [smem:[#allocation11_spill]] %s5529_s4 }
  0x1e   :  { %s5534_s12 = sld [smem:[%s7817_s0 + %s5390_s7]]   ;;  %s5394_s7 = smov 22  }
  0x1f   :  { %s5539_s20 = sld [smem:[%s7817_s0 + %s5391_s15]]   ;;  %s5395_s15 = smov 23  }
  0x20   :  { %s5544_s27 = sld [smem:[%s7817_s0 + %s5392_s22]]   ;;  %s5396_s22 = smov 24  }
  0x21   :  { %s5549_s4 = sld [smem:[%s7817_s0 + %s5393_s28]]   ;;  %s5397_s28 = smov 25  }
  0x24   :  { %7993 = sst [smem:[#allocation12_spill]] %s5534_s12 }
  0x25   :  { %7994 = sst [smem:[#allocation13_spill]] %s5539_s20 }
  0x26   :  { %7995 = sst [smem:[#allocation14_spill]] %s5544_s27 }
  0x27   :  { %7996 = sst [smem:[#allocation15_spill]] %s5549_s4 }
  0x28   :  { %s5554_s12 = sld [smem:[%s7817_s0 + %s5394_s7]]   ;;  %s5398_s7 = smov 26  }
  0x29   :  { %s5559_s20 = sld [smem:[%s7817_s0 + %s5395_s15]]   ;;  %s5399_s15 = smov 27  }
  0x2a   :  { %s5564_s27 = sld [smem:[%s7817_s0 + %s5396_s22]]   ;;  %s5400_s22 = smov 28  }
  0x2b   :  { %s5569_s4 = sld [smem:[%s7817_s0 + %s5397_s28]]   ;;  %s5401_s28 = smov 29  }
  0x2e   :  { %7997 = sst [smem:[#allocation16_spill]] %s5554_s12 }
  0x2f   :  { %7998 = sst [smem:[#allocation17_spill]] %s5559_s20 }
  0x30   :  { %7999 = sst [smem:[#allocation18_spill]] %s5564_s27 }
  0x31   :  { %8000 = sst [smem:[#allocation19_spill]] %s5569_s4 }
  0x32   :  { %s5574_s12 = sld [smem:[%s7817_s0 + %s5398_s7]]   ;;  %s5402_s7 = smov 30  }
  0x33   :  { %s5579_s20 = sld [smem:[%s7817_s0 + %s5399_s15]]   ;;  %s5403_s15 = smov 31  }
  0x34   :  { %s5584_s27 = sld [smem:[%s7817_s0 + %s5400_s22]]   ;;  %s5404_s22 = smov 32  }
  0x35   :  { %s5589_s4 = sld [smem:[%s7817_s0 + %s5401_s28]]   ;;  %s5405_s28 = smov 33  }
  0x38   :  { %8001 = sst [smem:[#allocation20_spill]] %s5574_s12 }
  0x39   :  { %8002 = sst [smem:[#allocation21_spill]] %s5579_s20 }
  0x3a   :  { %8003 = sst [smem:[#allocation22_spill]] %s5584_s27 }
  0x3b   :  { %8004 = sst [smem:[#allocation23_spill]] %s5589_s4 }
  0x3c   :  { %s5594_s12 = sld [smem:[%s7817_s0 + %s5402_s7]]   ;;  %s5406_s7 = smov 34  }
  0x3d   :  { %s5599_s20 = sld [smem:[%s7817_s0 + %s5403_s15]]   ;;  %s5407_s15 = smov 35  }
  0x3e   :  { %s5604_s27 = sld [smem:[%s7817_s0 + %s5404_s22]]   ;;  %s5408_s22 = smov 36  }
  0x3f   :  { %s5609_s4 = sld [smem:[%s7817_s0 + %s5405_s28]]   ;;  %s5626_s28 = smov 0  }
  0x42   :  { %8005 = sst [smem:[#allocation24_spill]] %s5594_s12 }
  0x43   :  { %8006 = sst [smem:[#allocation25_spill]] %s5599_s20 }
  0x44   :  { %8007 = sst [smem:[#allocation26_spill]] %s5604_s27 }
  0x45   :  { %s5614_s12 = sld [smem:[%s7817_s0 + %s5406_s7]]  }
  0x46   :  { %s5619_s20 = sld [smem:[%s7817_s0 + %s5407_s15]]  }
  0x47   :  { %s5624_s27 = sld [smem:[%s7817_s0 + %s5408_s22]]  }
  0x48 LB: > { %s8008_s8 = sld [smem:[#allocation6_spill]]  ;;  %s8009_s6 = sld [smem:[#allocation7_spill]]  ;;  %s5371_s28 = sphi %s5626_s28, %s83_s28  }
  0x49   : > { %s8010_s3 = sld [smem:[#allocation5_spill]]  ;;  %s5148_s1 = sadd.s32 4294967295, %s5371_s28  }
  0x4a   : > { %p5152_p0 = scmp.ge.s32.totalorder %s5371_s28, 1  ;;  %p999_p1 = scmp.lt.s32.totalorder %s5371_s28, 3 }
  0x4c   : > { %p1000_p2 = pnand %p5152_p0, %p999_p1 }
  0x4e   : > { %1003 = sbr.rel (%p1000_p2) target bundleno = 8080 (0x1f90), region = 164 }
  0x55   : > { %p1089_p3 = scmp.lt.s32.totalorder %s5148_s1, 1  ;;  %s8011_s5 = sld [smem:[#allocation2_spill]]  ;;  %v1102_v0 = vlaneseq  ;;  %v7911_v1 = vmov 0   ;;  %vm7870_vm6 = vcmask 138240   ;;  %vm1194_vm12 = vcmask 15360  }
  0x56   : > { %1441 = vmatprep.mubr.bf16.mxu0 %v7911_v1  ;;  %5319 = vset.pattern.permute.xlu0 %v7911_v1  ;;  %s7880_s7 = smov 17   ;;  %s5411_s10 = smov 2   ;;  %vm7836_vm14 = vcmask 130048  }
  0x57   : > { %s8494_s1 = smov (!%p1089_p3, %s5148_s1), 1  ;;  %v1103_v2 = vand.u32 127, %v1102_v0  ;;  %1656 = vmatprep.mubr.bf16.mxu1 %v7911_v1  ;;  %5320 = vset.pattern.permute.xlu1 %v7911_v1  ;;  %v1165_v3 = vshrl.u32 %v1102_v0, 7  ;;  %s7838_s11 = smov 16  }
  0x58   : > { %s5238_s0 = sshll.u32 %s8494_s1, 2  ;;  %s5413_s15 = smov 18  }
  0x59   : > { %v1104_v4 = vadd.s32 128, %v1103_v2  ;;  %v5641_v5 = vand.u32 15, %v1103_v2  ;;  %v5648_v9 = vsub.s32 0, %v1165_v3  ;;  %v5653_v10 = vsub.s32 4, %v1165_v3  ;;  %s5414_s16 = smov 32   ;;  %s7940_s18 = smov 34  }
  0x5a   : > { %s7863_s22 = smov 111   ;;  %s7874_s23 = smov 127  }
  0x5b   : > { %s1093_s2 = scalar_lea.vmem %s8011_s5, %s5238_s0  ;;  %v5644_v7 = vand.u32 15, %v1104_v4  ;;  %vm1156_vm0 = vcmp.lt.s32.totalorder %v5641_v5, 15  ;;  %vm1154_vm1 = vcmp.ge.s32.totalorder %v5641_v5, 1  ;;  %s7938_s26 = smov 126  }
  0x5c   : > { %v5157_v6 = vld.sshfl [vmem:[%s1093_s2] sm:$0x33 pattern:$0x76325410]  ;;  %s7961_s0 = smov 112   ;;  %s7861_s2 = smov 110  }
  0x5d   : > { %1139 = vrot.lane.b32.xlu1 %v5157_v6, %s7880_s7  ;;  %v1138_v8 = vcombine.high %v5157_v6, %v5157_v6  ;;  %vm1157_vm2 = vcmp.lt.s32.totalorder %v5644_v7, 15  ;;  %vm1155_vm3 = vcmp.ge.s32.totalorder %v5644_v7, 1  ;;  %s8026_s13 = sld [smem:[#allocation4_spill]]  ;;  %s8029_s9 = sld [smem:[#allocation3_spill]] }
  0x5e   : > { %vm1180_vm4 = vmpackc.low %vm1157_vm2, %vm1156_vm0  ;;  %vm1218_vm2 = vcmask 146432   ;;  %s8181_s5 = smov 124  }
  0x5f   : > { %v1181_v11 = vsel %vm1180_vm4, 65537, %v7911_v1  ;;  %vm1162_vm5 = vmpackc.low %vm1155_vm3, %vm1154_vm1  ;;  %vm7835_vm4 = vcmask 261120  }
  0x60   : > { %v1185_v12 = vrot.slane %v1181_v11, %v5648_v9  ;;  %v1163_v13 = vsel %vm1162_vm5, 65537, %v7911_v1  ;;  %v1189_v15 = vrot.slane %v1181_v11, %v5653_v10 }
  0x61   : > { %1141 = vrot.lane.b32.xlu1 %v1138_v8, %s7880_s7  ;;  %v5660_v14 = vrot.slane %v1163_v13, %v5653_v10  ;;  %v5666_v16 = vrot.slane %v1163_v13, %v5648_v9 }
  0x62   : > { %1190 = vrot.lane.b32.xlu0 %v1185_v12, %s5411_s10 }
  0x63   : > { %8012 = vst [vmem:[#allocation27_spill] sm:$0xff] %v5660_v14  ;;  %v1393_v8 = vld [vmem:[%s8026_s13] sm:$0xff]  ;;  %s8286_s13 = sld [smem:[#allocation22_spill]] }
  0x65   : > { %1204 = vrot.lane.b32.xlu1 %v5660_v14, %s7838_s11 }
  0x66   : > { %1192 = vrot.lane.b32.xlu0 %v1189_v15, %s5411_s10  ;;  %s7904_s10 = smov 96  }
  0x69   : > { %1216 = vrot.lane.b32.xlu1 %v1189_v15, %s5413_s15 }
  0x6a   : > { %1202 = vrot.lane.b32.xlu0 %v5666_v16, %s7838_s11  ;;  %s7902_s11 = smov 94  }
  0x6d   : > { %1228 = vrot.lane.b32.xlu1 %v5660_v14, %s5414_s16 }
  0x6e   : > { %1214 = vrot.lane.b32.xlu0 %v1185_v12, %s5413_s15  ;;  %s7859_s15 = smov 95  }
  0x71   : > { %1240 = vrot.lane.b32.xlu1 %v1189_v15, %s7940_s18 }
  0x72   : > { %1226 = vrot.lane.b32.xlu0 %v5666_v16, %s5414_s16 }
  0x76   : > { %1238 = vrot.lane.b32.xlu0 %v1185_v12, %s7940_s18 }
  0xcf   : > { %v1140_v17 = vpop.permute.xlu1 %1139 }
  0xd0   : > { %v5677_v18 = vsel %vm7870_vm6, 0, %v1140_v17 }
  0xd1   : > { %1294 = vrot.lane.b32.xlu1 %v5677_v18, %s7863_s22  ;;  %v1252_v19 = vrot.slane %v5677_v18, 6  ;;  %v1333_v3 = vrot.slane %v5677_v18, 2 }
  0xd3   : > { %1255 = vrot.lane.b32.xlu0 %v1252_v19, %s7874_s23  ;;  %v1142_v20 = vpop.permute.xlu1 %1141 }
  0xd4   : > { %v5684_v21 = vsel %vm7870_vm6, %v1140_v17, %v1142_v20  ;;  %v5687_v22 = vsel %vm7870_vm6, %v1142_v20, 0  ;;  %v5689_v23 = vpop.permute.xlu0 %1190 }
  0xd5   : > { %8013 = vst [vmem:[#allocation28_spill] sm:$0xff] %v5689_v23  ;;  %1296 = vrot.lane.b32.xlu1 %v5684_v21, %s7863_s22  ;;  %v1254_v24 = vrot.slane %v5687_v22, 6  ;;  %vm7867_vm7 = vcmp.ne.s16.totalorder %v5689_v23, 0  ;;  %v1253_v28 = vrot.slane %v5684_v21, 6  ;;  %v1335_v56 = vrot.slane %v5687_v22, 2 }
  0xd6   : > { %v1199_v26 = vsel %vm7867_vm7, %v5677_v18, 0  ;;  %v1334_v61 = vrot.slane %v5684_v21, 2 }
  0xd7   : > { %1298 = vrot.lane.b32.xlu0 %v5687_v22, %s7863_s22  ;;  %v5697_v25 = vpop.permute.xlu1 %1204  ;;  %v1267_v29 = vrot.slane %v1199_v26, 4 }
  0xd8   : > { %8014 = vst [vmem:[#allocation29_spill] sm:$0xff] %v5697_v25  ;;  %vm7846_vm8 = vcmp.ne.s16.totalorder %v5697_v25, 0  ;;  %v5703_v27 = vpop.permute.xlu0 %1192 }
  0xd9   : > { %8015 = vst [vmem:[#allocation30_spill] sm:$0xff] %v5703_v27  ;;  %1259 = vrot.lane.b32.xlu1 %v1254_v24, %s7874_s23  ;;  %vm7868_vm9 = vcmp.ne.s16.totalorder %v5703_v27, 0  ;;  %v1213_v33 = vsel %vm7846_vm8, %v5687_v22, 0  ;;  %v5734_v40 = vsel %vm1194_vm12, %v5689_v23, %v5703_v27  ;;  %vm7857_vm8 = vcmask 1043456  }
  0xda   : > { %v1201_v30 = vsel %vm7868_vm9, %v5687_v22, 0  ;;  %v1284_v35 = vrot.slane %v1213_v33, 2  ;;  %8019 = vst [vmem:[#allocation34_spill] sm:$0xff] %v5734_v40  ;;  %vm7869_vm15 = vcmp.ne.s16.totalorder %v5734_v40, 0 }
  0xdb   : > { %1257 = vrot.lane.b32.xlu0 %v1253_v28, %s7874_s23  ;;  %v5712_v31 = vpop.permute.xlu1 %1216  ;;  %v1269_v32 = vrot.slane %v1201_v30, 4  ;;  %v1200_v49 = vsel %vm7869_vm15, %v5684_v21, 0 }
  0xdc   : > { %8016 = vst [vmem:[#allocation31_spill] sm:$0xff] %v5712_v31  ;;  %v5717_v34 = vpop.permute.xlu0 %1202  ;;  %vm7844_vm11 = vcmp.ne.s16.totalorder %v5712_v31, 0  ;;  %v1268_v52 = vrot.slane %v1200_v49, 4 }
  0xdd   : > { %8017 = vst [vmem:[#allocation32_spill] sm:$0xff] %v5717_v34  ;;  %1270 = vrot.lane.b32.xlu1 %v1267_v29, %s7938_s26  ;;  %vm7865_vm10 = vcmp.ne.s16.totalorder %v5717_v34, 0  ;;  %v1225_v39 = vsel %vm7844_vm11, %v5687_v22, 0  ;;  %v5755_v46 = vsel %vm7836_vm14, %v5717_v34, %v5697_v25  ;;  %vm1357_vm11 = vcmask 1041408  }
  0xde   : > { %v1211_v36 = vsel %vm7865_vm10, %v5677_v18, 0  ;;  %v1308_v43 = vrot.slane %v1225_v39, 6  ;;  %8022 = vst [vmem:[#allocation37_spill] sm:$0xff] %v5755_v46  ;;  %vm7847_vm3 = vcmp.ne.s16.totalorder %v5755_v46, 0 }
  0xdf   : > { %1274 = vrot.lane.b32.xlu0 %v1269_v32, %s7938_s26  ;;  %v1282_v37 = vrot.slane %v1211_v36, 2  ;;  %v5738_v41 = vpop.permute.xlu1 %1228  ;;  %v1212_v54 = vsel %vm7847_vm3, %v5684_v21, 0  ;;  %vm1369_vm3 = vcmask 1045504  }
  0xe0   : > { %v5726_v38 = vpop.permute.xlu0 %1214  ;;  %8020 = vst [vmem:[#allocation35_spill] sm:$0xff] %v5738_v41  ;;  %vm7856_vm1 = vcmp.ne.s16.totalorder %v5738_v41, 0  ;;  %v1283_v57 = vrot.slane %v1212_v54, 2 }
  0xe1   : > { %8018 = vst [vmem:[#allocation33_spill] sm:$0xff] %v5726_v38  ;;  %1289 = vrot.lane.b32.xlu1 %v1284_v35, %s7961_s0  ;;  %vm7855_vm13 = vcmp.ne.s16.totalorder %v5726_v38, 0  ;;  %v1237_v50 = vsel %vm7856_vm1, %v5687_v22, 0  ;;  %v5767_v51 = vsel %vm1218_vm2, %v5726_v38, %v5712_v31  ;;  %vm7840_vm2 = vcmask 277504  }
  0xe2   : > { %v1223_v44 = vsel %vm7855_vm13, %v5677_v18, 0  ;;  %8023 = vst [vmem:[#allocation38_spill] sm:$0xff] %v5767_v51  ;;  %v1323_v53 = vrot.slane %v1237_v50, 4  ;;  %vm7845_vm5 = vcmp.ne.s16.totalorder %v5767_v51, 0 }
  0xe3   : > { %1285 = vrot.lane.b32.xlu0 %v1282_v37, %s7961_s0  ;;  %v1306_v48 = vrot.slane %v1223_v44, 6  ;;  %v1224_v58 = vsel %vm7845_vm5, %v5684_v21, 0  ;;  %v5795_v63 = vpop.permute.xlu1 %1240  ;;  %vm7871_vm5 = vcmask 916480  }
  0xe4   : > { %v5740_v42 = vpop.permute.xlu0 %1226  ;;  %v1307_v59 = vrot.slane %v1224_v58, 6  ;;  %8027 = vst [vmem:[#allocation41_spill] sm:$0xff] %v5795_v63 }
  0xe5   : > { %8021 = vst [vmem:[#allocation36_spill] sm:$0xff] %v5740_v42  ;;  %vm7837_vm0 = vcmp.ne.s16.totalorder %v5740_v42, 0  ;;  %v5778_v55 = vsel %vm7835_vm4, %v5740_v42, %v5738_v41 }
  0xe6   : > { %v1235_v45 = vsel %vm7837_vm0, %v5677_v18, 0  ;;  %8024 = vst [vmem:[#allocation39_spill] sm:$0xff] %v5778_v55  ;;  %vm7866_vm12 = vcmp.ne.s16.totalorder %v5778_v55, 0  ;;  %vm7842_vm0 = vcmp.ne.s16.totalorder %v5795_v63, 0 }
  0xe7   : > { %1313 = vrot.lane.b32.xlu0 %v1308_v43, %s7861_s2  ;;  %v1321_v47 = vrot.slane %v1235_v45, 4  ;;  %v1236_v62 = vsel %vm7866_vm12, %v5684_v21, 0  ;;  %v1249_v11 = vsel %vm7842_vm0, %v5687_v22, 0  ;;  %vm7850_vm0 = vcmp.ne.s16.totalorder %v5660_v14, 0 }
  0xe8   : > { %v5788_v60 = vpop.permute.xlu0 %1238  ;;  %v1322_v2 = vrot.slane %v1236_v62, 4  ;;  %v1175_v45 = vsel %vm7850_vm0, %v5684_v21, 0  ;;  %vm7896_vm0 = vcmask 785408  }
  0xe9   : > { %1324 = vrot.lane.b32.xlu1 %v1321_v47, %s7904_s10  ;;  %8025 = vst [vmem:[#allocation40_spill] sm:$0xff] %v5788_v60  ;;  %v5801_v0 = vsel %vm7840_vm2, %v5788_v60, %v5795_v63  ;;  %vm7843_vm4 = vcmp.ne.s16.totalorder %v5788_v60, 0  ;;  %vm7851_vm2 = vcmask 1039360  }
  0xea   : > { %8028 = vst [vmem:[#allocation42_spill] sm:$0xff] %v5801_v0  ;;  %vm7841_vm14 = vcmp.ne.s16.totalorder %v5801_v0, 0  ;;  %v1247_v4 = vsel %vm7843_vm4, %v5677_v18, 0  ;;  %vm7849_vm4 = vcmp.ne.s16.totalorder %v5666_v16, 0 }
  0xeb   : > { %1309 = vrot.lane.b32.xlu0 %v1306_v48, %s7861_s2  ;;  %v1248_v6 = vsel %vm7841_vm14, %v5684_v21, 0  ;;  %vm7848_vm14 = vcmask 1031168   ;;  %v1174_v47 = vsel %vm7849_vm4, %v5677_v18, 0  ;;  %vm7852_vm4 = vcmask 908288  }
  0xed   : > { %1272 = vrot.lane.b32.xlu1 %v1268_v52, %s7938_s26 }
  0xef   : > { %1328 = vrot.lane.b32.xlu0 %v1323_v53, %s7904_s10 }
  0xf1   : > { %1340 = vrot.lane.b32.xlu1 %v1335_v56, %s7859_s15 }
  0xf3   : > { %1287 = vrot.lane.b32.xlu0 %v1283_v57, %s7961_s0 }
  0xf5   : > { %1311 = vrot.lane.b32.xlu1 %v1307_v59, %s7861_s2 }
  0xf7   : > { %1338 = vrot.lane.b32.xlu0 %v1334_v61, %s7859_s15 }
  0xf9   : > { %1326 = vrot.lane.b32.xlu1 %v1322_v2, %s7904_s10 }
  0xfb   : > { %1336 = vrot.lane.b32.xlu0 %v1333_v3, %s7859_s15 }
  0xfd   : > { %1348 = vrot.lane.b32.xlu1 %v1247_v4, %s7902_s11 }
  0xff   : > { %1350 = vrot.lane.b32.xlu0 %v1248_v6, %s7902_s11 }
 0x101   : > { %1352 = vrot.lane.b32.xlu1 %v1249_v11, %s7902_s11 }
 0x103   : > { %1396 = vperm.xlu0 %5319, %v1393_v8  }
 0x143   : > { %v1295_v12 = vpop.permute.xlu1 %1294 }
 0x145   : > { %v1256_v13 = vpop.permute.xlu0 %1255 }
 0x147   : > { %v1297_v15 = vpop.permute.xlu1 %1296 }
 0x148   : > { %v1301_v62 = vsel %vm7852_vm4, %v1295_v12, %v1297_v15 }
 0x149   : > { %v1299_v17 = vpop.permute.xlu0 %1298 }
 0x14a   : > { %v1302_v2 = vsel %vm7852_vm4, %v1297_v15, %v1299_v17  ;;  %vm7891_vm4 = vcmask 769024  }
 0x14b   : > { %v1260_v19 = vpop.permute.xlu1 %1259 }
 0x14d   : > { %v1258_v20 = vpop.permute.xlu0 %1257 }
 0x14e   : > { %v1262_v36 = vsel %vm7851_vm2, %v1256_v13, %v1258_v20  ;;  %v1263_v37 = vsel %vm7851_vm2, %v1258_v20, %v1260_v19  ;;  %vm7853_vm2 = vcmask 777216  }
 0x14f   : > { %v1271_v26 = vpop.permute.xlu1 %1270  ;;  %v1363_v49 = vsel %vm1357_vm11, %v1175_v45, %v1263_v37  ;;  %v1360_v50 = vsel %vm1357_vm11, %v1174_v47, %v1262_v36 }
 0x151   : > { %v1275_v24 = vpop.permute.xlu0 %1274 }
 0x153   : > { %v1290_v29 = vpop.permute.xlu1 %1289 }
 0x155   : > { %v1286_v28 = vpop.permute.xlu0 %1285 }
 0x159   : > { %v1314_v30 = vpop.permute.xlu0 %1313 }
 0x15b   : > { %v1325_v32 = vpop.permute.xlu1 %1324 }
 0x15d   : > { %v1310_v33 = vpop.permute.xlu0 %1309 }
 0x15f   : > { %v1273_v35 = vpop.permute.xlu1 %1272 }
 0x160   : > { %v1277_v39 = vsel %vm7848_vm14, %v1271_v26, %v1273_v35  ;;  %v1278_v43 = vsel %vm7848_vm14, %v1273_v35, %v1275_v24  ;;  %vm7858_vm14 = vcmask 900096   ;;  %v1392_v35 = vld [vmem:[%s8029_s9] sm:$0xf]  ;;  %s8244_s9 = smov 92  }
 0x161   : > { %v1329_v22 = vpop.permute.xlu0 %1328  ;;  %v1368_v53 = vsel %vm7857_vm8, %v1363_v49, %v1278_v43  ;;  %v1366_v56 = vsel %vm7857_vm8, %v1360_v50, %v1277_v39 }
 0x163   : > { %v1341_v44 = vpop.permute.xlu1 %1340 }
 0x165   : > { %v1288_v48 = vpop.permute.xlu0 %1287 }
 0x166   : > { %v1293_v52 = vsel %vm7871_vm5, %v1288_v48, %v1290_v29  ;;  %v1292_v54 = vsel %vm7871_vm5, %v1286_v28, %v1288_v48 }
 0x167   : > { %v1374_v21 = vsel %vm1369_vm3, %v1368_v53, %v1293_v52  ;;  %v1371_v57 = vsel %vm1369_vm3, %v1366_v56, %v1292_v54  ;;  %v1312_v18 = vpop.permute.xlu1 %1311 }
 0x168   : > { %1409 = vmatprep.subr.bf16.mxu0 %v1374_v21  ;;  %v1316_v59 = vsel %vm7858_vm14, %v1310_v33, %v1312_v18  ;;  %v1317_v61 = vsel %vm7858_vm14, %v1312_v18, %v1314_v30 }
 0x169   : > { %v1339_v58 = vpop.permute.xlu0 %1338  ;;  %1410 = vmatpush1.bf16.msra.mxu0 %v1371_v57  ;;  %v1378_v4 = vsel %vm1357_vm11, %v1301_v62, %v1316_v59  ;;  %v1381_v6 = vsel %vm1357_vm11, %v1302_v2, %v1317_v61 }
 0x16a   : > { %v1344_v19 = vsel %vm7853_vm2, %v1339_v58, %v1341_v44 }
 0x16b   : > { %v1327_v3 = vpop.permute.xlu1 %1326 }
 0x16c   : > { %v1331_v8 = vsel %vm7896_vm0, %v1325_v32, %v1327_v3  ;;  %v1332_v11 = vsel %vm7896_vm0, %v1327_v3, %v1329_v22 }
 0x16d   : > { %v1337_v13 = vpop.permute.xlu0 %1336  ;;  %v1385_v24 = vsel %vm7857_vm8, %v1381_v6, %v1332_v11  ;;  %v1383_v12 = vsel %vm7857_vm8, %v1378_v4, %v1331_v8 }
 0x16e   : > { %v1343_v20 = vsel %vm7853_vm2, %v1337_v13, %v1339_v58  ;;  %v1390_v15 = vsel %vm1369_vm3, %v1385_v24, %v1344_v19  ;;  %vm7854_vm2 = vcmask 293888  }
 0x16f   : > { %v1387_v17 = vsel %vm1369_vm3, %v1383_v12, %v1343_v20  ;;  %1411 = vmatprep.subr.bf16.mxu0 %v1390_v15  ;;  %v1349_v26 = vpop.permute.xlu1 %1348  ;;  %vm8031_vm3 = vcmp.ne.s16.totalorder %v5697_v25, 0 }
 0x170   : > { %1412 = vmatpush1.bf16.msra.mxu0 %v1387_v17 }
 0x171   : > { %v1351_v28 = vpop.permute.xlu0 %1350 }
 0x172   : > { %v1355_v29 = vsel %vm7891_vm4, %v1349_v26, %v1351_v28 }
 0x173   : > { %v1353_v30 = vpop.permute.xlu1 %1352  ;;  %v1404_v33 = vsel %vm1357_vm11, %v1355_v29, 0 }
 0x174   : > { %v1356_v32 = vsel %vm7891_vm4, %v1351_v28, %v1353_v30 }
 0x175   : > { %5158 = vmatprep.subr.msk.bf16.mxu0 %vm1357_vm11, %v1356_v32  ;;  %vm8030_vm11 = vcmp.ne.s16.totalorder %v5755_v46, 0 }
 0x176   : > { %1414 = vmatpush1.bf16.msra.mxu0 %v1404_v33  ;;  %v1608_v33 = vld [vmem:[%s5464_s21] sm:$0xff] }
 0x179   : > { %5159 = vmatmul.mubr.msk.bf16.vlgmr.msra.gmra.mrb[0].mxu0 %vm7854_vm2, %v1392_v35  ;;  %vm8032_vm2 = vcmp.ne.s16.totalorder %v5767_v51, 0 }
 0x17a   : > { %1882 = vmatprep.mubr.bf16.mxu0 %v7911_v1 }
 0x182   : > { %v1397_v22 = vpop.permute.xlu0 %1396 }
 0x24c   : > { %v1443_v36 = vpop.f32.mrb[0].mxu0 }
 0x24d   : > { %v1444_v37 = vadd.f32 %v1443_v36, %v1397_v22  ;;  %v1445_v39 = vpop.f32.mrb[1].mxu0 }
 0x24e   : > { %v1446_v43 = vadd.f32 %v1445_v39, %v1397_v22  ;;  %v1447_v44 = vpop.f32.mrb[2].mxu0 }
 0x24f   : > { %v1450_v45 = vmax.f32 %v1444_v37, 0.0  ;;  %v1448_v47 = vpop.f32.mrb[3].mxu0 }
 0x250   : > { %v1451_v49 = vmax.f32 %v1446_v43, 0.0 }
 0x251   : > { %v1452_v48 = vpack.c.bf16 %v1450_v45, %v1450_v45 }
 0x252   : > { %v1453_v50 = vpack.c.bf16 %v1451_v49, %v1451_v49 }
 0x253   : > { %1456 = vrot.lane.b32.xlu1 %v1452_v48, %s7880_s7 }
 0x257   : > { %1458 = vrot.lane.b32.xlu1 %v1453_v50, %s7880_s7 }
 0x2c5   : > { %v1457_v52 = vpop.permute.xlu1 %1456 }
 0x2c6   : > { %v5866_v53 = vsel %vm7870_vm6, 0, %v1457_v52 }
 0x2c7   : > { %1523 = vrot.lane.b32.xlu1 %v5866_v53, %s7863_s22  ;;  %v1470_v21 = vsel %vm7867_vm7, %v5866_v53, 0  ;;  %v1487_v57 = vrot.slane %v5866_v53, 4  ;;  %v1473_v4 = vsel %vm7865_vm10, %v5866_v53, 0  ;;  %v1476_v8 = vsel %vm7855_vm13, %v5866_v53, 0 }
 0x2c8   : > { %v1512_v6 = vrot.slane %v1473_v4, 4  ;;  %v1534_v13 = vrot.slane %v1476_v8, 4 }
 0x2c9   : > { %v1459_v54 = vpop.permute.xlu1 %1458 }
 0x2ca   : > { %v1466_v56 = vsel %vm7870_vm6, %v1459_v54, 0  ;;  %v1460_v18 = vsel %vm7870_vm6, %v1457_v52, %v1459_v54 }
 0x2cb   : > { %1501 = vrot.lane.b32.xlu1 %v1470_v21, %s7938_s26  ;;  %1527 = vrot.lane.b32.xlu0 %v1466_v56, %s7863_s22  ;;  %v1472_v58 = vsel %vm7868_vm9, %v1466_v56, 0  ;;  %v1471_v59 = vsel %vm7869_vm15, %v1460_v18, 0  ;;  %v1481_v61 = vsel %vm7856_vm1, %v1466_v56, 0  ;;  %v1480_v62 = vsel %vm7866_vm12, %v1460_v18, 0 }
 0x2cc   : > { %v1488_v2 = vrot.slane %v1460_v18, 4  ;;  %v1489_v3 = vrot.slane %v1466_v56, 4  ;;  %v1474_v11 = vsel %vm8030_vm11, %v1460_v18, 0  ;;  %v1475_v20 = vsel %vm8031_vm3, %v1466_v56, 0 }
 0x2cd   : > { %v1513_v19 = vrot.slane %v1474_v11, 4  ;;  %v1477_v24 = vsel %vm8032_vm2, %v1460_v18, 0  ;;  %v1514_v12 = vrot.slane %v1475_v20, 4  ;;  %vm8033_vm11 = vcmp.ne.s16.totalorder %v5712_v31, 0 }
 0x2ce   : > { %v1535_v15 = vrot.slane %v1477_v24, 4  ;;  %v1478_v17 = vsel %vm8033_vm11, %v1466_v56, 0  ;;  %vm8034_vm3 = vcmp.ne.s16.totalorder %v5740_v42, 0  ;;  %vm8035_vm2 = vcmp.ne.s16.totalorder %v5788_v60, 0 }
 0x2cf   : > { %1490 = vrot.lane.b32.xlu0 %v1487_v57, %s7874_s23  ;;  %1525 = vrot.lane.b32.xlu1 %v1460_v18, %s7863_s22  ;;  %v1536_v26 = vrot.slane %v1478_v17, 4  ;;  %v1479_v28 = vsel %vm8034_vm3, %v5866_v53, 0  ;;  %v1482_v29 = vsel %vm8035_vm2, %v5866_v53, 0  ;;  %vm8036_vm11 = vcmp.ne.s16.totalorder %v5795_v63, 0 }
 0x2d0   : > { %v1484_v30 = vsel %vm8036_vm11, %v1466_v56, 0  ;;  %vm8037_vm3 = vcmp.ne.s16.totalorder %v5801_v0, 0  ;;  %vm8038_vm2 = vcmask 1039360   ;;  %vm8039_vm11 = vcmp.ne.s16.totalorder %v5660_v14, 0 }
 0x2d1   : > { %v1483_v32 = vsel %vm8037_vm3, %v1460_v18, 0  ;;  %v1469_v52 = vsel %vm8039_vm11, %v1460_v18, 0  ;;  %vm8040_vm3 = vcmp.ne.s16.totalorder %v5666_v16, 0  ;;  %vm8041_vm13 = vmmov %vm8038_vm2 }
 0x2d2   : > { %v1468_v54 = vsel %vm8040_vm3, %v5866_v53, 0 }
 0x2d3   : > { %1505 = vrot.lane.b32.xlu0 %v1472_v58, %s7938_s26  ;;  %1503 = vrot.lane.b32.xlu1 %v1471_v59, %s7938_s26 }
 0x2d7   : > { %1552 = vrot.lane.b32.xlu0 %v1481_v61, %s7904_s10  ;;  %1550 = vrot.lane.b32.xlu1 %v1480_v62, %s7904_s10 }
 0x2db   : > { %1492 = vrot.lane.b32.xlu0 %v1488_v2, %s7874_s23  ;;  %1494 = vrot.lane.b32.xlu1 %v1489_v3, %s7874_s23 }
 0x2df   : > { %1515 = vrot.lane.b32.xlu0 %v1512_v6, %s7961_s0  ;;  %1558 = vrot.lane.b32.xlu1 %v1488_v2, %s7859_s15 }
 0x2e3   : > { %1537 = vrot.lane.b32.xlu0 %v1534_v13, %s7861_s2  ;;  %1517 = vrot.lane.b32.xlu1 %v1513_v19, %s7961_s0 }
 0x2e7   : > { %1519 = vrot.lane.b32.xlu0 %v1514_v12, %s7961_s0  ;;  %1539 = vrot.lane.b32.xlu1 %v1535_v15, %s7861_s2 }
 0x2eb   : > { %1541 = vrot.lane.b32.xlu0 %v1536_v26, %s7861_s2  ;;  %1548 = vrot.lane.b32.xlu1 %v1479_v28, %s7904_s10 }
 0x2ef   : > { %1560 = vrot.lane.b32.xlu0 %v1489_v3, %s7859_s15  ;;  %1567 = vrot.lane.b32.xlu1 %v1482_v29, %s7902_s11 }
 0x2f3   : > { %1556 = vrot.lane.b32.xlu0 %v1487_v57, %s7859_s15  ;;  %1571 = vrot.lane.b32.xlu1 %v1484_v30, %s7902_s11 }
 0x2f7   : > { %1569 = vrot.lane.b32.xlu0 %v1483_v32, %s7902_s11 }
 0x2fb   : > { %1611 = vperm.xlu0 %5319, %v1608_v33  }
 0x339   : > { %v1524_v35 = vpop.permute.xlu1 %1523 }
 0x33d   : > { %v1528_v22 = vpop.permute.xlu0 %1527  ;;  %v1502_v36 = vpop.permute.xlu1 %1501 }
 0x341   : > { %v1491_v37 = vpop.permute.xlu0 %1490  ;;  %v1526_v39 = vpop.permute.xlu1 %1525 }
 0x345   : > { %v1506_v43 = vpop.permute.xlu0 %1505  ;;  %v1504_v44 = vpop.permute.xlu1 %1503 }
 0x349   : > { %v1553_v45 = vpop.permute.xlu0 %1552  ;;  %v1551_v47 = vpop.permute.xlu1 %1550 }
 0x34a   : > { %v1555_v29 = vsel %vm7896_vm0, %v1551_v47, %v1553_v45 }
 0x34d   : > { %v1493_v48 = vpop.permute.xlu0 %1492  ;;  %v1495_v49 = vpop.permute.xlu1 %1494 }
 0x34e   : > { %v1497_v50 = vsel %vm8038_vm2, %v1493_v48, %v1495_v49  ;;  %v1496_v56 = vsel %vm8041_vm13, %v1491_v37, %v1493_v48  ;;  %vm8042_vm2 = vcmask 1031168   ;;  %vm8044_vm13 = vcmask 908288   ;;  %v1607_v49 = vld [vmem:[%s5459_s17] sm:$0xf] }
 0x34f   : > { %v1581_v21 = vsel %vm7857_vm8, %v1469_v52, %v1497_v50  ;;  %v1577_v57 = vsel %vm7857_vm8, %v1468_v54, %v1496_v56  ;;  %v1508_v4 = vsel %vm8042_vm2, %v1504_v44, %v1506_v43  ;;  %vm8043_vm11 = vmmov %vm8042_vm2  ;;  %v1530_v24 = vsel %vm8044_vm13, %v1526_v39, %v1528_v22 }
 0x350   : > { %1624 = vmatprep.subr.bf16.mxu1 %v1581_v21  ;;  %v1507_v6 = vsel %vm8043_vm11, %v1502_v36, %v1504_v44  ;;  %vm8045_vm3 = vmmov %vm8044_vm13  ;;  %vm8046_vm2 = vcmask 777216   ;;  %vm7872_vm13 = vcmask 588800  }
 0x351   : > { %v1516_v58 = vpop.permute.xlu0 %1515  ;;  %1625 = vmatpush1.bf16.msra.mxu1 %v1577_v57  ;;  %v1559_v59 = vpop.permute.xlu1 %1558  ;;  %v1529_v15 = vsel %vm8045_vm3, %v1524_v35, %v1526_v39  ;;  %vm8047_vm11 = vmmov %vm8046_vm2  ;;  %vm8050_vm3 = vcmp.ne.s16.totalorder %v5726_v38, 0 }
 0x355   : > { %v1538_v61 = vpop.permute.xlu0 %1537  ;;  %v1518_v62 = vpop.permute.xlu1 %1517 }
 0x356   : > { %v1521_v2 = vsel %vm7871_vm5, %v1516_v58, %v1518_v62 }
 0x357   : > { %v1585_v11 = vsel %vm7857_vm8, %v1507_v6, %v1521_v2 }
 0x359   : > { %v1520_v3 = vpop.permute.xlu0 %1519  ;;  %v1540_v18 = vpop.permute.xlu1 %1539 }
 0x35a   : > { %v1522_v53 = vsel %vm7871_vm5, %v1518_v62, %v1520_v3  ;;  %v1543_v13 = vsel %vm7858_vm14, %v1538_v61, %v1540_v18 }
 0x35b   : > { %v1589_v8 = vsel %vm7857_vm8, %v1508_v4, %v1522_v53  ;;  %v1593_v26 = vsel %vm7857_vm8, %v1529_v15, %v1543_v13 }
 0x35c   : > { %1626 = vmatprep.subr.bf16.mxu1 %v1589_v8 }
 0x35d   : > { %v1542_v19 = vpop.permute.xlu0 %1541  ;;  %1627 = vmatpush1.bf16.msra.mxu1 %v1585_v11  ;;  %v1549_v20 = vpop.permute.xlu1 %1548 }
 0x35e   : > { %v1544_v12 = vsel %vm7858_vm14, %v1540_v18, %v1542_v19  ;;  %v1554_v36 = vsel %vm7896_vm0, %v1549_v20, %v1551_v47 }
 0x35f   : > { %v1597_v17 = vsel %vm7857_vm8, %v1530_v24, %v1544_v12 }
 0x360   : > { %1628 = vmatprep.subr.bf16.mxu1 %v1597_v17 }
 0x361   : > { %v1561_v28 = vpop.permute.xlu0 %1560  ;;  %1629 = vmatpush1.bf16.msra.mxu1 %v1593_v26  ;;  %v1568_v32 = vpop.permute.xlu1 %1567 }
 0x362   : > { %v1563_v30 = vsel %vm8046_vm2, %v1559_v59, %v1561_v28  ;;  %vm8051_vm2 = vcmp.ne.s16.totalorder %v5755_v46, 0 }
 0x363   : > { %v1605_v33 = vsel %vm7857_vm8, %v1555_v29, %v1563_v30 }
 0x364   : > { %1630 = vmatprep.subr.bf16.mxu1 %v1605_v33 }
 0x365   : > { %v1557_v22 = vpop.permute.xlu0 %1556  ;;  %v1572_v39 = vpop.permute.xlu1 %1571 }
 0x366   : > { %v1562_v35 = vsel %vm8047_vm11, %v1557_v22, %v1559_v59  ;;  %vm8052_vm11 = vcmp.ne.s16.totalorder %v5697_v25, 0 }
 0x367   : > { %v1601_v37 = vsel %vm7857_vm8, %v1554_v36, %v1562_v35 }
 0x368   : > { %1631 = vmatpush1.bf16.msra.mxu1 %v1601_v37 }
 0x369   : > { %v1570_v43 = vpop.permute.xlu0 %1569 }
 0x36a   : > { %v1574_v44 = vsel %vm7891_vm4, %v1570_v43, %v1572_v39  ;;  %v1573_v45 = vsel %vm7891_vm4, %v1568_v32, %v1570_v43 }
 0x36b   : > { %5160 = vmatprep.subr.msk.bf16.mxu1 %vm7857_vm8, %v1574_v44  ;;  %v1619_v48 = vsel %vm7857_vm8, %v1573_v45, 0 }
 0x36c   : > { %1633 = vmatpush1.bf16.msra.mxu1 %v1619_v48  ;;  %v1825_v48 = vld [vmem:[%s5474_s29 + $0x8] sm:$0xff] }
 0x36f   : > { %5161 = vmatmul.mubr.msk.bf16.vlgmr.msra.gmra.mrb[0].mxu1 %vm7872_vm13, %v1607_v49  ;;  %v1824_v49 = vld [vmem:[%s5474_s29] sm:$0xff] }
 0x37a   : > { %v1612_v47 = vpop.permute.xlu0 %1611 }
 0x442   : > { %v1658_v50 = vpop.f32.mrb[0].mxu1 }
 0x443   : > { %v1659_v52 = vadd.f32 %v1658_v50, %v1612_v47  ;;  %v1660_v54 = vpop.f32.mrb[1].mxu1 }
 0x444   : > { %v1661_v56 = vadd.f32 %v1660_v54, %v1612_v47  ;;  %v1662_v21 = vpop.f32.mrb[2].mxu1 }
 0x445   : > { %v1665_v57 = vmax.f32 %v1659_v52, 0.0  ;;  %v1663_v58 = vpop.f32.mrb[3].mxu1 }
 0x446   : > { %v1666_v59 = vmax.f32 %v1661_v56, 0.0 }
 0x447   : > { %v5965_v61 = vpack.c.bf16 %v1665_v57, %v1665_v57 }
 0x448   : > { %v5967_v62 = vpack.c.bf16 %v1666_v59, %v1666_v59 }
 0x449   : > { %8048 = vst [vmem:[#allocation43_spill] sm:$0xff] %v5965_v61  ;;  %1671 = vrot.lane.b32.xlu1 %v5965_v61, %s7880_s7 }
 0x44a   : > { %8049 = vst [vmem:[#allocation44_spill] sm:$0xff] %v5967_v62  ;;  %1673 = vrot.lane.b32.xlu0 %v5967_v62, %s7880_s7 }
 0x4bb   : > { %v1672_v2 = vpop.permute.xlu1 %1671 }
 0x4bc   : > { %v5974_v3 = vsel %vm7870_vm6, 0, %v1672_v2  ;;  %v1674_v18 = vpop.permute.xlu0 %1673 }
 0x4bd   : > { %v1681_v4 = vsel %vm7870_vm6, %v1674_v18, 0  ;;  %1738 = vrot.lane.b32.xlu0 %v5974_v3, %s7863_s22  ;;  %v1685_v53 = vsel %vm7867_vm7, %v5974_v3, 0  ;;  %v1702_v6 = vrot.slane %v5974_v3, 4  ;;  %v1675_v8 = vsel %vm7870_vm6, %v1672_v2, %v1674_v18 }
 0x4be   : > { %1742 = vrot.lane.b32.xlu1 %v1681_v4, %s7863_s22  ;;  %v1687_v11 = vsel %vm7868_vm9, %v1681_v4, 0  ;;  %v1686_v13 = vsel %vm7869_vm15, %v1675_v8, 0  ;;  %v1696_v19 = vsel %vm7856_vm1, %v1681_v4, 0  ;;  %v1695_v20 = vsel %vm7866_vm12, %v1675_v8, 0 }
 0x4bf   : > { %v1703_v24 = vrot.slane %v1675_v8, 4  ;;  %v1688_v12 = vsel %vm7865_vm10, %v5974_v3, 0  ;;  %v1704_v15 = vrot.slane %v1681_v4, 4  ;;  %v1691_v26 = vsel %vm8050_vm3, %v5974_v3, 0 }
 0x4c0   : > { %v1727_v17 = vrot.slane %v1688_v12, 4  ;;  %v1749_v28 = vrot.slane %v1691_v26, 4  ;;  %v1689_v29 = vsel %vm8051_vm2, %v1675_v8, 0  ;;  %v1690_v30 = vsel %vm8052_vm11, %v1681_v4, 0 }
 0x4c1   : > { %1716 = vrot.lane.b32.xlu0 %v1685_v53, %s7938_s26  ;;  %v1728_v32 = vrot.slane %v1689_v29, 4  ;;  %v1729_v33 = vrot.slane %v1690_v30, 4  ;;  %vm8053_vm1 = vcmp.ne.s16.totalorder %v5767_v51, 0  ;;  %vm8054_vm3 = vcmp.ne.s16.totalorder %v5712_v31, 0 }
 0x4c2   : > { %1705 = vrot.lane.b32.xlu1 %v1702_v6, %s7874_s23  ;;  %v1692_v22 = vsel %vm8053_vm1, %v1675_v8, 0  ;;  %v1693_v36 = vsel %vm8054_vm3, %v1681_v4, 0  ;;  %vm8055_vm2 = vcmp.ne.s16.totalorder %v5740_v42, 0  ;;  %vm8056_vm1 = vcmp.ne.s16.totalorder %v5788_v60, 0 }
 0x4c3   : > { %v1750_v35 = vrot.slane %v1692_v22, 4  ;;  %v1751_v37 = vrot.slane %v1693_v36, 4  ;;  %v1694_v39 = vsel %vm8055_vm2, %v5974_v3, 0  ;;  %v1697_v43 = vsel %vm8056_vm1, %v5974_v3, 0 }
 0x4c4   : > { %vm8057_vm11 = vcmp.ne.s16.totalorder %v5795_v63, 0  ;;  %vm8058_vm3 = vcmp.ne.s16.totalorder %v5801_v0, 0  ;;  %vm8059_vm2 = vcmask 1039360  }
 0x4c5   : > { %1740 = vrot.lane.b32.xlu0 %v1675_v8, %s7863_s22  ;;  %v1699_v44 = vsel %vm8057_vm11, %v1681_v4, 0  ;;  %v1698_v45 = vsel %vm8058_vm3, %v1675_v8, 0  ;;  %vm8060_vm1 = vmmov %vm8059_vm2  ;;  %vm8061_vm11 = vcmp.ne.s16.totalorder %v5660_v14, 0  ;;  %vm8062_vm3 = vcmp.ne.s16.totalorder %v5666_v16, 0 }
 0x4c6   : > { %1720 = vrot.lane.b32.xlu1 %v1687_v11, %s7938_s26  ;;  %v1684_v11 = vsel %vm8061_vm11, %v1675_v8, 0  ;;  %vm8065_vm11 = vcmask 908288  }
 0x4c9   : > { %1718 = vrot.lane.b32.xlu0 %v1686_v13, %s7938_s26 }
 0x4ca   : > { %1767 = vrot.lane.b32.xlu1 %v1696_v19, %s7904_s10  ;;  %v1683_v19 = vsel %vm8062_vm3, %v5974_v3, 0  ;;  %vm8066_vm3 = vmmov %vm8065_vm11 }
 0x4cd   : > { %1765 = vrot.lane.b32.xlu0 %v1695_v20, %s7904_s10 }
 0x4ce   : > { %1707 = vrot.lane.b32.xlu1 %v1703_v24, %s7874_s23 }
 0x4d1   : > { %1709 = vrot.lane.b32.xlu0 %v1704_v15, %s7874_s23 }
 0x4d2   : > { %1730 = vrot.lane.b32.xlu1 %v1727_v17, %s7961_s0 }
 0x4d5   : > { %1773 = vrot.lane.b32.xlu0 %v1703_v24, %s7859_s15 }
 0x4d6   : > { %1752 = vrot.lane.b32.xlu1 %v1749_v28, %s7861_s2 }
 0x4d9   : > { %1732 = vrot.lane.b32.xlu0 %v1728_v32, %s7961_s0 }
 0x4da   : > { %1734 = vrot.lane.b32.xlu1 %v1729_v33, %s7961_s0 }
 0x4dd   : > { %1754 = vrot.lane.b32.xlu0 %v1750_v35, %s7861_s2 }
 0x4de   : > { %1756 = vrot.lane.b32.xlu1 %v1751_v37, %s7861_s2 }
 0x4e1   : > { %1763 = vrot.lane.b32.xlu0 %v1694_v39, %s7904_s10 }
 0x4e2   : > { %1775 = vrot.lane.b32.xlu1 %v1704_v15, %s7859_s15 }
 0x4e5   : > { %1782 = vrot.lane.b32.xlu0 %v1697_v43, %s7902_s11 }
 0x4e6   : > { %1771 = vrot.lane.b32.xlu1 %v1702_v6, %s7859_s15 }
 0x4e9   : > { %1786 = vrot.lane.b32.xlu0 %v1699_v44, %s7902_s11 }
 0x4ea   : > { %1784 = vrot.lane.b32.xlu1 %v1698_v45, %s7902_s11 }
 0x4ed   : > { %1833 = vperm.xlu0 %5319, %v1825_v48  }
 0x4ee   : > { %1828 = vperm.xlu1 %5320, %v1824_v49  }
 0x52f   : > { %v1739_v47 = vpop.permute.xlu0 %1738 }
 0x530   : > { %v1743_v50 = vpop.permute.xlu1 %1742 }
 0x533   : > { %v1717_v52 = vpop.permute.xlu0 %1716 }
 0x534   : > { %v1706_v54 = vpop.permute.xlu1 %1705 }
 0x537   : > { %v1741_v56 = vpop.permute.xlu0 %1740 }
 0x538   : > { %v1721_v21 = vpop.permute.xlu1 %1720  ;;  %v1745_v36 = vsel %vm8065_vm11, %v1741_v56, %v1743_v50  ;;  %v1744_v37 = vsel %vm8066_vm3, %v1739_v47, %v1741_v56  ;;  %vm8069_vm11 = vcmp.ne.s16.totalorder %v5666_v16, 0  ;;  %vm8070_vm3 = vcmp.ne.s16.totalorder %v5660_v14, 0 }
 0x53b   : > { %v1719_v57 = vpop.permute.xlu0 %1718 }
 0x53c   : > { %v1768_v58 = vpop.permute.xlu1 %1767 }
 0x53f   : > { %v1766_v59 = vpop.permute.xlu0 %1765 }
 0x540   : > { %v1708_v2 = vpop.permute.xlu1 %1707  ;;  %v1770_v48 = vsel %vm7896_vm0, %v1766_v59, %v1768_v58 }
 0x541   : > { %v1711_v18 = vsel %vm8059_vm2, %v1706_v54, %v1708_v2  ;;  %vm8063_vm2 = vcmask 1031168  }
 0x542   : > { %v1792_v20 = vsel %vm7857_vm8, %v1683_v19, %v1711_v18  ;;  %v1723_v28 = vsel %vm8063_vm2, %v1719_v57, %v1721_v21 }
 0x543   : > { %v1710_v4 = vpop.permute.xlu0 %1709 }
 0x544   : > { %v1712_v53 = vsel %vm8060_vm1, %v1708_v2, %v1710_v4  ;;  %v1731_v6 = vpop.permute.xlu1 %1730  ;;  %vm8064_vm1 = vmmov %vm8063_vm2  ;;  %vm8067_vm2 = vcmask 777216  }
 0x545   : > { %v1796_v13 = vsel %vm7857_vm8, %v1684_v11, %v1712_v53  ;;  %v1722_v29 = vsel %vm8064_vm1, %v1717_v52, %v1719_v57  ;;  %vm8068_vm1 = vmmov %vm8067_vm2  ;;  %v5321_v53 = vld [vmem:[%s5469_s25] sm:$0xff]  }
 0x546   : > { %1850 = vmatprep.subr.bf16.mxu0 %v1796_v13 }
 0x547   : > { %v1774_v24 = vpop.permute.xlu0 %1773  ;;  %1851 = vmatpush1.bf16.msra.mxu0 %v1792_v20 }
 0x548   : > { %v1753_v12 = vpop.permute.xlu1 %1752 }
 0x54b   : > { %v1733_v15 = vpop.permute.xlu0 %1732 }
 0x54c   : > { %v1736_v17 = vsel %vm7871_vm5, %v1731_v6, %v1733_v15  ;;  %v1735_v26 = vpop.permute.xlu1 %1734 }
 0x54d   : > { %v1737_v8 = vsel %vm7871_vm5, %v1733_v15, %v1735_v26  ;;  %v1800_v3 = vsel %vm7857_vm8, %v1722_v29, %v1736_v17 }
 0x54e   : > { %v1804_v30 = vsel %vm7857_vm8, %v1723_v28, %v1737_v8 }
 0x54f   : > { %v1755_v32 = vpop.permute.xlu0 %1754  ;;  %1852 = vmatprep.subr.bf16.mxu0 %v1804_v30 }
 0x550   : > { %v1758_v33 = vsel %vm7858_vm14, %v1753_v12, %v1755_v32  ;;  %1853 = vmatpush1.bf16.msra.mxu0 %v1800_v3  ;;  %v1757_v22 = vpop.permute.xlu1 %1756 }
 0x551   : > { %v1759_v35 = vsel %vm7858_vm14, %v1755_v32, %v1757_v22  ;;  %v1808_v44 = vsel %vm7857_vm8, %v1744_v37, %v1758_v33 }
 0x552   : > { %v1812_v39 = vsel %vm7857_vm8, %v1745_v36, %v1759_v35 }
 0x553   : > { %v1764_v43 = vpop.permute.xlu0 %1763  ;;  %1854 = vmatprep.subr.bf16.mxu0 %v1812_v39 }
 0x554   : > { %1855 = vmatpush1.bf16.msra.mxu0 %v1808_v44  ;;  %v1776_v45 = vpop.permute.xlu1 %1775  ;;  %v1769_v47 = vsel %vm7896_vm0, %v1764_v43, %v1766_v59 }
 0x555   : > { %v1778_v49 = vsel %vm8067_vm2, %v1774_v24, %v1776_v45  ;;  %vm8071_vm2 = vcmp.ne.s16.totalorder %v5726_v38, 0 }
 0x556   : > { %v1820_v52 = vsel %vm7857_vm8, %v1770_v48, %v1778_v49 }
 0x557   : > { %v1783_v50 = vpop.permute.xlu0 %1782  ;;  %1856 = vmatprep.subr.bf16.mxu0 %v1820_v52 }
 0x558   : > { %v1772_v54 = vpop.permute.xlu1 %1771 }
 0x559   : > { %v1777_v56 = vsel %vm8068_vm1, %v1772_v54, %v1774_v24  ;;  %vm8072_vm1 = vcmp.ne.s16.totalorder %v5697_v25, 0 }
 0x55a   : > { %v1816_v21 = vsel %vm7857_vm8, %v1769_v47, %v1777_v56 }
 0x55b   : > { %v1787_v57 = vpop.permute.xlu0 %1786  ;;  %1857 = vmatpush1.bf16.msra.mxu0 %v1816_v21  ;;  %v5322_v21 = vld [vmem:[%s8010_s3 + $0x4] ss:$8 sps:$4 sm:$0xff]  }
 0x55c   : > { %v1785_v2 = vpop.permute.xlu1 %1784 }
 0x55d   : > { %v1788_v18 = vsel %vm7891_vm4, %v1783_v50, %v1785_v2  ;;  %v1789_v58 = vsel %vm7891_vm4, %v1785_v2, %v1787_v57 }
 0x55e   : > { %5163 = vmatprep.subr.msk.bf16.mxu0 %vm7857_vm8, %v1789_v58  ;;  %v1845_v4 = vsel %vm7857_vm8, %v1788_v18, 0  ;;  %vm8081_vm8 = vcmp.ne.s16.totalorder %v5788_v60, 0 }
 0x55f   : > { %1859 = vmatpush1.bf16.msra.mxu0 %v1845_v4  ;;  %v2029_v4 = vld [vmem:[%s8008_s8] sm:$0xff] }
 0x562   : > { %5164 = vmatmul.mubr.msk.bf16.vlgmr.msra.gmra.mrb[4].mxu0 %vm7872_vm13, %v5321_v53  ;;  %v2030_v53 = vld [vmem:[%s8008_s8 + $0x8] sm:$0xff]  ;;  %s8242_s8 = sld [smem:[#allocation21_spill]] }
 0x56c   : > { %v1834_v19 = vpop.permute.xlu0 %1833 }
 0x56d   : > { %v1829_v59 = vpop.permute.xlu1 %1828 }
 0x635   : > { %v1884_v6 = vpop.f32.mrb[4].mxu0 }
 0x636   : > { %v1885_v11 = vadd.f32 %v1884_v6, %v1829_v59  ;;  %v1886_v13 = vpop.f32.mrb[5].mxu0 }
 0x637   : > { %v1887_v20 = vadd.f32 %v1886_v13, %v1829_v59  ;;  %v1888_v24 = vpop.f32.mrb[6].mxu0 }
 0x638   : > { %v1889_v12 = vadd.f32 %v1888_v24, %v1834_v19  ;;  %v1890_v15 = vpop.f32.mrb[7].mxu0  ;;  %v1893_v26 = vmax.f32 %v1885_v11, 0.0 }
 0x639   : > { %v1891_v17 = vadd.f32 %v1890_v15, %v1834_v19  ;;  %v1894_v8 = vmax.f32 %v1887_v20, 0.0 }
 0x63a   : > { %v1895_v28 = vmax.f32 %v1889_v12, 0.0 }
 0x63b   : > { %v1896_v29 = vmax.f32 %v1891_v17, 0.0 }
 0x63c   : > { %v1897_v30 = vpack.c.bf16 %v1895_v28, %v1893_v26 }
 0x63d   : > { %v1898_v32 = vpack.c.bf16 %v1896_v29, %v1894_v8 }
 0x63e   : > { %1901 = vrot.lane.b32.xlu1 %v1897_v30, %s7880_s7 }
 0x63f   : > { %1903 = vrot.lane.b32.xlu0 %v1898_v32, %s7880_s7  ;;  %s7946_s7 = smov 60  }
 0x6b0   : > { %v1902_v3 = vpop.permute.xlu1 %1901 }
 0x6b1   : > { %v1908_v33 = vsel %vm7870_vm6, 0, %v1902_v3  ;;  %v1904_v22 = vpop.permute.xlu0 %1903 }
 0x6b2   : > { %v1905_v36 = vsel %vm7870_vm6, %v1902_v3, %v1904_v22  ;;  %1968 = vrot.lane.b32.xlu0 %v1908_v33, %s7863_s22  ;;  %1932 = vrot.lane.b32.xlu1 %v1908_v33, %s7874_s23  ;;  %v1913_v35 = vsel %vm8069_vm11, %v1908_v33, 0  ;;  %v1911_v37 = vsel %vm7870_vm6, %v1904_v22, 0  ;;  %v1915_v39 = vsel %vm7867_vm7, %v1908_v33, 0 }
 0x6b3   : > { %5167 = vmatprep.subr.msk.bf16.mxu1 %vm8070_vm3, %v1905_v36  ;;  %v1918_v43 = vsel %vm7865_vm10, %v1908_v33, 0  ;;  %v1921_v44 = vsel %vm8071_vm2, %v1908_v33, 0  ;;  %v1916_v45 = vsel %vm7869_vm15, %v1905_v36, 0  ;;  %v1917_v48 = vsel %vm7868_vm9, %v1911_v37, 0 }
 0x6b4   : > { %2055 = vmatpush1.bf16.msra.mxu1 %v1913_v35  ;;  %v1920_v49 = vsel %vm8072_vm1, %v1911_v37, 0  ;;  %vm8073_vm11 = vcmp.ne.s16.totalorder %v5755_v46, 0  ;;  %vm8074_vm3 = vcmp.ne.s16.totalorder %v5740_v42, 0  ;;  %vm8075_vm2 = vcmp.ne.s16.totalorder %v5712_v31, 0 }
 0x6b5   : > { %v1919_v52 = vsel %vm8073_vm11, %v1905_v36, 0  ;;  %v1924_v50 = vsel %vm8074_vm3, %v1908_v33, 0  ;;  %v1923_v54 = vsel %vm8075_vm2, %v1911_v37, 0  ;;  %vm8076_vm1 = vcmp.ne.s16.totalorder %v5767_v51, 0 }
 0x6b6   : > { %1936 = vrot.lane.b32.xlu0 %v1911_v37, %s7874_s23  ;;  %1934 = vrot.lane.b32.xlu1 %v1905_v36, %s7874_s23  ;;  %v1922_v47 = vsel %vm8076_vm1, %v1905_v36, 0  ;;  %v1925_v56 = vsel %vm7866_vm12, %v1905_v36, 0  ;;  %vm8077_vm11 = vcmp.ne.s16.totalorder %v5738_v41, 0  ;;  %vm8078_vm3 = vcmask 130048   ;;  %s7892_s23 = smov 62  }
 0x6b7   : > { %v1926_v57 = vsel %vm8077_vm11, %v1911_v37, 0  ;;  %5168 = vmatprep.mubr.msk.bf16.mxu1 %vm8078_vm3, %v5322_v21  ;;  %vm8079_vm2 = vcmp.ne.s16.totalorder %v5801_v0, 0  ;;  %vm8080_vm1 = vcmp.ne.s16.totalorder %v5795_v63, 0  ;;  %v1927_v58 = vsel %vm8081_vm8, %v1908_v33, 0 }
 0x6b8   : > { %v1928_v2 = vsel %vm8079_vm2, %v1905_v36, 0  ;;  %v1929_v18 = vsel %vm8080_vm1, %v1911_v37, 0  ;;  %vm8082_vm11 = vcmask 1039360   ;;  %vm8084_vm8 = vcmask 1031168  }
 0x6b9   : > { %vm8083_vm3 = vmmov %vm8082_vm11  ;;  %vm8086_vm1 = vcmask 908288   ;;  %vm8093_vm7 = vcmask 261120   ;;  %vm7888_vm6 = vcmask 523264  }
 0x6ba   : > { %1945 = vrot.lane.b32.xlu0 %v1915_v39, %s7938_s26  ;;  %1958 = vrot.lane.b32.xlu1 %v1918_v43, %s7961_s0  ;;  %vm8085_vm2 = vmmov %vm8084_vm8 }
 0x6be   : > { %1970 = vrot.lane.b32.xlu0 %v1905_v36, %s7863_s22  ;;  %1972 = vrot.lane.b32.xlu1 %v1911_v37, %s7863_s22  ;;  %s7959_s22 = smov 64  }
 0x6c2   : > { %1981 = vrot.lane.b32.xlu1 %v1921_v44, %s7861_s2  ;;  %1947 = vrot.lane.b32.xlu0 %v1916_v45, %s7938_s26 }
 0x6c6   : > { %1949 = vrot.lane.b32.xlu1 %v1917_v48, %s7938_s26  ;;  %1962 = vrot.lane.b32.xlu0 %v1920_v49, %s7961_s0 }
 0x6ca   : > { %1960 = vrot.lane.b32.xlu1 %v1919_v52, %s7961_s0  ;;  %1994 = vrot.lane.b32.xlu0 %v1924_v50, %s7904_s10 }
 0x6ce   : > { %2006 = vrot.lane.b32.xlu1 %v1905_v36, %s7859_s15  ;;  %1985 = vrot.lane.b32.xlu0 %v1923_v54, %s7861_s2 }
 0x6d2   : > { %1983 = vrot.lane.b32.xlu1 %v1922_v47, %s7861_s2  ;;  %1996 = vrot.lane.b32.xlu0 %v1925_v56, %s7904_s10  ;;  %s5425_s2 = smov 36  }
 0x6d6   : > { %1998 = vrot.lane.b32.xlu1 %v1926_v57, %s7904_s10  ;;  %2008 = vrot.lane.b32.xlu0 %v1911_v37, %s7859_s15 }
 0x6da   : > { %2004 = vrot.lane.b32.xlu1 %v1908_v33, %s7859_s15  ;;  %2019 = vrot.lane.b32.xlu0 %v1928_v2, %s7902_s11  ;;  %s5424_s15 = smov 4  }
 0x6de   : > { %2021 = vrot.lane.b32.xlu1 %v1929_v18, %s7902_s11  ;;  %2017 = vrot.lane.b32.xlu0 %v1927_v58, %s7902_s11 }
 0x6e2   : > { %2033 = vperm.xlu1 %5320, %v2029_v4   ;;  %2038 = vperm.xlu0 %5319, %v2030_v53  }
 0x724   : > { %v1969_v59 = vpop.permute.xlu0 %1968  ;;  %v1933_v6 = vpop.permute.xlu1 %1932 }
 0x728   : > { %v1937_v11 = vpop.permute.xlu0 %1936  ;;  %v1935_v13 = vpop.permute.xlu1 %1934 }
 0x729   : > { %v1939_v19 = vsel %vm8082_vm11, %v1935_v13, %v1937_v11  ;;  %v1938_v20 = vsel %vm8083_vm3, %v1933_v6, %v1935_v13  ;;  %vm8087_vm11 = vmmov %vm8086_vm1  ;;  %vm8088_vm3 = vcmask 777216  }
 0x72a   : > { %2056 = vmatprep.subr.bf16.mxu1 %v1939_v19 }
 0x72b   : > { %2057 = vmatpush1.bf16.msra.mxu1 %v1938_v20 }
 0x72c   : > { %v1946_v24 = vpop.permute.xlu0 %1945  ;;  %v1959_v12 = vpop.permute.xlu1 %1958 }
 0x730   : > { %v1971_v15 = vpop.permute.xlu0 %1970  ;;  %v1973_v17 = vpop.permute.xlu1 %1972 }
 0x731   : > { %v1975_v35 = vsel %vm8086_vm1, %v1971_v15, %v1973_v17  ;;  %v1974_v43 = vsel %vm8087_vm11, %v1969_v59, %v1971_v15  ;;  %v5324_v59 = vld [vmem:[%s8010_s3] ss:$8 sps:$4 sm:$0xff]   ;;  %vm2121_vm1 = vcmp.lt.s32.totalorder %v5644_v7, 14  ;;  %s8178_s3 = smov 120  }
 0x734   : > { %v1982_v26 = vpop.permute.xlu1 %1981  ;;  %v1948_v28 = vpop.permute.xlu0 %1947 }
 0x735   : > { %v1951_v32 = vsel %vm8085_vm2, %v1946_v24, %v1948_v28  ;;  %vm2120_vm2 = vcmp.lt.s32.totalorder %v5641_v5, 14 }
 0x736   : > { %vm2144_vm11 = vmpackc.low %vm2121_vm1, %vm2120_vm2  ;;  %vm8090_vm1 = vcmask 277504  }
 0x738   : > { %v1950_v8 = vpop.permute.xlu1 %1949  ;;  %v1963_v29 = vpop.permute.xlu0 %1962 }
 0x739   : > { %v1952_v30 = vsel %vm8084_vm8, %v1948_v28, %v1950_v8  ;;  %vm8089_vm8 = vmmov %vm8088_vm3 }
 0x73a   : > { %2058 = vmatprep.subr.bf16.mxu1 %v1952_v30 }
 0x73b   : > { %2059 = vmatpush1.bf16.msra.mxu1 %v1951_v32  ;;  %v2145_v32 = vsel %vm2144_vm11, 65537, %v7911_v1  ;;  %vm8091_vm11 = vmmov %vm8090_vm1 }
 0x73c   : > { %v1961_v3 = vpop.permute.xlu1 %1960  ;;  %v1995_v33 = vpop.permute.xlu0 %1994 }
 0x73d   : > { %v1965_v22 = vsel %vm7871_vm5, %v1961_v3, %v1963_v29  ;;  %v1964_v36 = vsel %vm7871_vm5, %v1959_v12, %v1961_v3  ;;  %vm8094_vm5 = vcmask 293888  }
 0x73e   : > { %2060 = vmatprep.subr.bf16.mxu1 %v1965_v22  ;;  %v2149_v22 = vrot.slane %v2145_v32, %v5648_v9 }
 0x73f   : > { %2061 = vmatpush1.bf16.msra.mxu1 %v1964_v36  ;;  %v2153_v36 = vrot.slane %v2145_v32, %v5653_v10  ;;  %v5325_v32 = vld [vmem:[%s5489_s14 + $0x4] ss:$8 sps:$4 sm:$0xff]  }
 0x740   : > { %v2007_v37 = vpop.permute.xlu1 %2006  ;;  %2062 = vmatprep.subr.bf16.mxu1 %v1975_v35  ;;  %v1986_v39 = vpop.permute.xlu0 %1985 }
 0x743   : > { %2063 = vmatpush1.bf16.msra.mxu1 %v1974_v43 }
 0x744   : > { %v1984_v44 = vpop.permute.xlu1 %1983  ;;  %v1997_v45 = vpop.permute.xlu0 %1996 }
 0x745   : > { %v1988_v48 = vsel %vm7858_vm14, %v1984_v44, %v1986_v39  ;;  %v1987_v49 = vsel %vm7858_vm14, %v1982_v26, %v1984_v44  ;;  %v2000_v47 = vsel %vm7896_vm0, %v1995_v33, %v1997_v45 }
 0x746   : > { %2064 = vmatprep.subr.bf16.mxu1 %v1988_v48 }
 0x747   : > { %2065 = vmatpush1.bf16.msra.mxu1 %v1987_v49 }
 0x748   : > { %v1999_v52 = vpop.permute.xlu1 %1998  ;;  %v2009_v50 = vpop.permute.xlu0 %2008 }
 0x749   : > { %v2001_v54 = vsel %vm7896_vm0, %v1997_v45, %v1999_v52  ;;  %v2011_v56 = vsel %vm8088_vm3, %v2007_v37, %v2009_v50  ;;  %vm2118_vm3 = vcmp.ge.s32.totalorder %v5641_v5, 2 }
 0x74a   : > { %2066 = vmatprep.subr.bf16.mxu1 %v2001_v54 }
 0x74b   : > { %2067 = vmatpush1.bf16.msra.mxu1 %v2000_v47 }
 0x74c   : > { %v2005_v21 = vpop.permute.xlu1 %2004  ;;  %2068 = vmatprep.subr.bf16.mxu1 %v2011_v56  ;;  %v2020_v57 = vpop.permute.xlu0 %2019 }
 0x74d   : > { %v2010_v2 = vsel %vm8089_vm8, %v2005_v21, %v2007_v37  ;;  %vm2119_vm8 = vcmp.ge.s32.totalorder %v5644_v7, 2 }
 0x74e   : > { %vm2126_vm14 = vmpackc.low %vm2119_vm8, %vm2118_vm3 }
 0x74f   : > { %2069 = vmatpush1.bf16.msra.mxu1 %v2010_v2  ;;  %v2127_v35 = vsel %vm2126_vm14, 65537, %v7911_v1  ;;  %vm8092_vm3 = vmmov %vm8090_vm1 }
 0x750   : > { %v2022_v18 = vpop.permute.xlu1 %2021  ;;  %v2018_v58 = vpop.permute.xlu0 %2017  ;;  %v6175_v37 = vrot.slane %v2127_v35, %v5648_v9  ;;  %v6178_v39 = vrot.slane %v2127_v35, %v5653_v10 }
 0x751   : > { %v2023_v4 = vsel %vm7891_vm4, %v2018_v58, %v2020_v57  ;;  %v2024_v53 = vsel %vm7891_vm4, %v2020_v57, %v2022_v18 }
 0x752   : > { %2070 = vmatprep.subr.bf16.mxu1 %v2024_v53  ;;  %vm7921_vm14 = vcmp.ne.s16.totalorder %v6175_v37, 0  ;;  %vm7924_vm2 = vcmp.ne.s16.totalorder %v6178_v39, 0 }
 0x753   : > { %2071 = vmatpush1.bf16.msra.mxu1 %v2023_v4 }
 0x756   : > { %2087 = vmatmul.mubr.bf16.vlgmr.msra.gmra.mrb[4].mxu1 %v5324_v59 }
 0x761   : > { %v2034_v6 = vpop.permute.xlu1 %2033  ;;  %v2039_v20 = vpop.permute.xlu0 %2038 }
 0x829   : > { %v2088_v11 = vpop.f32.mrb[4].mxu1 }
 0x82a   : > { %v2089_v13 = vadd.f32 %v2088_v11, %v2034_v6  ;;  %v2090_v19 = vpop.f32.mrb[5].mxu1 }
 0x82b   : > { %v2091_v24 = vadd.f32 %v2090_v19, %v2034_v6  ;;  %v2092_v12 = vpop.f32.mrb[6].mxu1 }
 0x82c   : > { %v2093_v15 = vadd.f32 %v2092_v12, %v2039_v20  ;;  %v2094_v17 = vpop.f32.mrb[7].mxu1  ;;  %v2097_v28 = vmax.f32 %v2089_v13, 0.0 }
 0x82d   : > { %v2095_v26 = vadd.f32 %v2094_v17, %v2039_v20  ;;  %v2098_v29 = vmax.f32 %v2091_v24, 0.0 }
 0x82e   : > { %v2099_v8 = vmax.f32 %v2093_v15, 0.0 }
 0x82f   : > { %v2100_v30 = vmax.f32 %v2095_v26, 0.0 }
 0x830   : > { %v6163_v3 = vpack.c.bf16 %v2099_v8, %v2097_v28 }
 0x831   : > { %v6165_v33 = vpack.c.bf16 %v2100_v30, %v2098_v29 }
 0x832   : > { %2105 = vrot.lane.b32.xlu1 %v6163_v3, %s7940_s18 }
 0x833   : > { %2107 = vrot.lane.b32.xlu0 %v6165_v33, %s7940_s18 }
 0x836   : > { %2154 = vrot.lane.b32.xlu1 %v2149_v22, %s5424_s15 }
 0x837   : > { %2156 = vrot.lane.b32.xlu0 %v2153_v36, %s5424_s15  ;;  %s7963_s15 = smov 68  }
 0x83a   : > { %2166 = vrot.lane.b32.xlu1 %v6175_v37, %s5414_s16 }
 0x83b   : > { %2168 = vrot.lane.b32.xlu0 %v6178_v39, %s5414_s16  ;;  %s7965_s16 = smov 124  }
 0x83e   : > { %2177 = vrot.lane.b32.xlu1 %v2149_v22, %s5425_s2 }
 0x83f   : > { %2179 = vrot.lane.b32.xlu0 %v2153_v36, %s5425_s2  ;;  %s7894_s2 = smov 92  }
 0x842   : > { %2189 = vrot.lane.b32.xlu1 %v6175_v37, %s7959_s22 }
 0x843   : > { %2191 = vrot.lane.b32.xlu0 %v6178_v39, %s7959_s22 }
 0x846   : > { %2201 = vrot.lane.b32.xlu1 %v2149_v22, %s7963_s15 }
 0x847   : > { %2203 = vrot.lane.b32.xlu0 %v2153_v36, %s7963_s15 }
 0x8a4   : > { %v2106_v43 = vpop.permute.xlu1 %2105 }
 0x8a5   : > { %v6193_v44 = vsel %vm8090_vm1, 0, %v2106_v43  ;;  %v2108_v45 = vpop.permute.xlu0 %2107  ;;  %vm2158_vm1 = vcmask 31744  }
 0x8a6   : > { %v6196_v48 = vsel %vm8091_vm11, %v2106_v43, %v2108_v45  ;;  %2252 = vrot.lane.b32.xlu0 %v6193_v44, %s7902_s11  ;;  %2215 = vrot.lane.b32.xlu1 %v6193_v44, %s7938_s26  ;;  %v2138_v49 = vsel %vm7921_vm14, %v6193_v44, 0  ;;  %v6211_v50 = vsel %vm8092_vm3, %v2108_v45, 0  ;;  %v2317_v45 = vld [vmem:[%s5494_s19 + $0x8] sm:$0xff] }
 0x8a7   : > { %5171 = vmatprep.subr.msk.bf16.mxu0 %vm7924_vm2, %v6196_v48 }
 0x8a8   : > { %2341 = vmatpush1.bf16.msra.mxu0 %v2138_v49  ;;  %v6208_v52 = vpop.permute.xlu1 %2154 }
 0x8a9   : > { %vm7900_vm8 = vcmp.ne.s16.totalorder %v6208_v52, 0  ;;  %v6214_v54 = vpop.permute.xlu0 %2156 }
 0x8aa   : > { %2219 = vrot.lane.b32.xlu0 %v6211_v50, %s7938_s26  ;;  %2217 = vrot.lane.b32.xlu1 %v6196_v48, %s7938_s26  ;;  %v2163_v56 = vsel %vm7900_vm8, %v6193_v44, 0  ;;  %v6232_v57 = vsel %vm2158_vm1, %v6208_v52, %v6214_v54  ;;  %vm7901_vm12 = vcmp.ne.s16.totalorder %v6214_v54, 0 }
 0x8ab   : > { %vm7906_vm3 = vcmp.ne.s16.totalorder %v6232_v57, 0  ;;  %v2165_v13 = vsel %vm7901_vm12, %v6211_v50, 0 }
 0x8ac   : > { %v6220_v47 = vpop.permute.xlu1 %2166  ;;  %v2164_v58 = vsel %vm7906_vm3, %v6196_v48, 0 }
 0x8ad   : > { %vm7890_vm11 = vcmp.ne.s16.totalorder %v6220_v47, 0  ;;  %v6235_v2 = vpop.permute.xlu0 %2168 }
 0x8ae   : > { %2228 = vrot.lane.b32.xlu0 %v2163_v56, %s7965_s16  ;;  %v2174_v21 = vsel %vm7890_vm11, %v6193_v44, 0  ;;  %vm7899_vm1 = vcmp.ne.s16.totalorder %v6235_v2, 0  ;;  %v6262_v6 = vsel %vm8093_vm7, %v6220_v47, %v6235_v2 }
 0x8af   : > { %2242 = vrot.lane.b32.xlu1 %v2174_v21, %s7904_s10  ;;  %v2176_v11 = vsel %vm7899_vm1, %v6211_v50, 0  ;;  %vm7876_vm15 = vcmp.ne.s16.totalorder %v6262_v6, 0 }
 0x8b0   : > { %v6237_v18 = vpop.permute.xlu1 %2177  ;;  %v2175_v24 = vsel %vm7876_vm15, %v6196_v48, 0  ;;  %vm7879_vm15 = vcmask 556032  }
 0x8b1   : > { %vm7889_vm10 = vcmp.ne.s16.totalorder %v6237_v18, 0  ;;  %v6249_v4 = vpop.permute.xlu0 %2179 }
 0x8b2   : > { %2254 = vrot.lane.b32.xlu0 %v6196_v48, %s7902_s11  ;;  %v2186_v53 = vsel %vm7889_vm10, %v6193_v44, 0  ;;  %vm7877_vm7 = vcmp.ne.s16.totalorder %v6249_v4, 0  ;;  %v6293_v15 = vsel %vm8094_vm5, %v6237_v18, %v6249_v4 }
 0x8b3   : > { %2256 = vrot.lane.b32.xlu1 %v6211_v50, %s7902_s11  ;;  %v2188_v17 = vsel %vm7877_vm7, %v6211_v50, 0 }
 0x8b4   : > { %v6256_v59 = vpop.permute.xlu1 %2189 }
 0x8b5   : > { %vm7873_vm9 = vcmp.ne.s16.totalorder %v6256_v59, 0  ;;  %v6274_v19 = vpop.permute.xlu0 %2191 }
 0x8b6   : > { %2230 = vrot.lane.b32.xlu0 %v2164_v58, %s7965_s16  ;;  %v2198_v20 = vsel %vm7873_vm9, %v6193_v44, 0  ;;  %v6287_v12 = vsel %vm7888_vm6, %v6256_v59, %v6274_v19  ;;  %vm7882_vm9 = vcmp.ne.s16.totalorder %v6293_v15, 0  ;;  %vm7898_vm5 = vcmp.ne.s16.totalorder %v6274_v19, 0 }
 0x8b7   : > { %2265 = vrot.lane.b32.xlu1 %v2186_v53, %s7894_s2  ;;  %vm7878_vm13 = vcmp.ne.s16.totalorder %v6287_v12, 0  ;;  %v2187_v29 = vsel %vm7882_vm9, %v6196_v48, 0  ;;  %v2200_v22 = vsel %vm7898_vm5, %v6211_v50, 0 }
 0x8b8   : > { %v6303_v26 = vpop.permute.xlu1 %2201  ;;  %v2199_v8 = vsel %vm7878_vm13, %v6196_v48, 0  ;;  %vm8095_vm13 = vcmask 130048  }
 0x8b9   : > { %v6305_v28 = vpop.permute.xlu0 %2203  ;;  %5172 = vmatprep.mubr.msk.bf16.mxu0 %vm8095_vm13, %v5325_v32  ;;  %vm8096_vm13 = vcmask 1031168  }
 0x8ba   : > { %2246 = vrot.lane.b32.xlu0 %v2176_v11, %s7904_s10  ;;  %v6318_v30 = vsel %vm7879_vm15, %v6303_v26, %v6305_v28  ;;  %vm7884_vm15 = vcmp.ne.s16.totalorder %v6303_v26, 0  ;;  %vm7897_vm9 = vcmp.ne.s16.totalorder %v6305_v28, 0 }
 0x8bb   : > { %2232 = vrot.lane.b32.xlu1 %v2165_v13, %s7965_s16  ;;  %vm7883_vm7 = vcmp.ne.s16.totalorder %v6318_v30, 0  ;;  %v2210_v35 = vsel %vm7884_vm15, %v6193_v44, 0  ;;  %v2212_v43 = vsel %vm7897_vm9, %v6211_v50, 0  ;;  %vm7945_vm15 = vcmask 1014784  }
 0x8bc   : > { %v2211_v36 = vsel %vm7883_vm7, %v6196_v48, 0  ;;  %vm8097_vm7 = vmmov %vm8096_vm13 }
 0x8be   : > { %2279 = vrot.lane.b32.xlu0 %v2198_v20, %s7959_s22 }
 0x8bf   : > { %2244 = vrot.lane.b32.xlu1 %v2175_v24, %s7904_s10 }
 0x8c2   : > { %2269 = vrot.lane.b32.xlu0 %v2188_v17, %s7894_s2 }
 0x8c3   : > { %2291 = vrot.lane.b32.xlu1 %v6196_v48, %s7892_s23  ;;  %v2316_v48 = vld [vmem:[%s5494_s19] sm:$0xff] }
 0x8c6   : > { %2281 = vrot.lane.b32.xlu0 %v2199_v8, %s7959_s22 }
 0x8c7   : > { %2267 = vrot.lane.b32.xlu1 %v2187_v29, %s7894_s2 }
 0x8ca   : > { %2293 = vrot.lane.b32.xlu0 %v6211_v50, %s7892_s23 }
 0x8cb   : > { %2283 = vrot.lane.b32.xlu1 %v2200_v22, %s7959_s22 }
 0x8ce   : > { %2305 = vrot.lane.b32.xlu0 %v2211_v36, %s7946_s7 }
 0x8cf   : > { %2289 = vrot.lane.b32.xlu1 %v6193_v44, %s7892_s23 }
 0x8d2   : > { %2303 = vrot.lane.b32.xlu0 %v2210_v35, %s7946_s7 }
 0x8d3   : > { %2307 = vrot.lane.b32.xlu1 %v2212_v43, %s7946_s7 }
 0x8d6   : > { %2325 = vperm.xlu0 %5319, %v2317_v45  }
 0x8d7   : > { %2320 = vperm.xlu1 %5320, %v2316_v48  }
 0x918   : > { %v2253_v49 = vpop.permute.xlu0 %2252  ;;  %v2216_v56 = vpop.permute.xlu1 %2215 }
 0x91c   : > { %v2220_v21 = vpop.permute.xlu0 %2219  ;;  %v2218_v58 = vpop.permute.xlu1 %2217 }
 0x91d   : > { %v2222_v53 = vsel %vm8096_vm13, %v2218_v58, %v2220_v21  ;;  %v2221_v44 = vsel %vm8097_vm7, %v2216_v56, %v2218_v58  ;;  %vm7885_vm7 = vcmask 752640   ;;  %vm7887_vm13 = vcmask 506880  }
 0x91e   : > { %2342 = vmatprep.subr.bf16.mxu0 %v2222_v53 }
 0x91f   : > { %2343 = vmatpush1.bf16.msra.mxu0 %v2221_v44 }
 0x920   : > { %v2229_v11 = vpop.permute.xlu0 %2228 }
 0x921   : > { %v2243_v13 = vpop.permute.xlu1 %2242 }
 0x924   : > { %v2255_v20 = vpop.permute.xlu0 %2254 }
 0x925   : > { %v2257_v50 = vpop.permute.xlu1 %2256  ;;  %v2258_v58 = vsel %vm7891_vm4, %v2253_v49, %v2255_v20 }
 0x926   : > { %v2259_v56 = vsel %vm7891_vm4, %v2255_v20, %v2257_v50 }
 0x928   : > { %v2231_v24 = vpop.permute.xlu0 %2230 }
 0x929   : > { %v2266_v17 = vpop.permute.xlu1 %2265  ;;  %v2235_v22 = vsel %vm7945_vm15, %v2229_v11, %v2231_v24 }
 0x92c   : > { %v2247_v8 = vpop.permute.xlu0 %2246 }
 0x92d   : > { %v2233_v29 = vpop.permute.xlu1 %2232 }
 0x92e   : > { %v2236_v32 = vsel %vm7945_vm15, %v2231_v24, %v2233_v29 }
 0x92f   : > { %2344 = vmatprep.subr.bf16.mxu0 %v2236_v32 }
 0x930   : > { %v2280_v36 = vpop.permute.xlu0 %2279  ;;  %2345 = vmatpush1.bf16.msra.mxu0 %v2235_v22 }
 0x931   : > { %v2245_v35 = vpop.permute.xlu1 %2244 }
 0x932   : > { %v2249_v43 = vsel %vm7896_vm0, %v2245_v35, %v2247_v8  ;;  %v2248_v45 = vsel %vm7896_vm0, %v2243_v13, %v2245_v35 }
 0x933   : > { %2346 = vmatprep.subr.bf16.mxu0 %v2249_v43 }
 0x934   : > { %v2270_v48 = vpop.permute.xlu0 %2269  ;;  %2347 = vmatpush1.bf16.msra.mxu0 %v2248_v45 }
 0x935   : > { %2348 = vmatprep.subr.bf16.mxu0 %v2259_v56  ;;  %v2292_v21 = vpop.permute.xlu1 %2291 }
 0x938   : > { %v2282_v53 = vpop.permute.xlu0 %2281  ;;  %2349 = vmatpush1.bf16.msra.mxu0 %v2258_v58 }
 0x939   : > { %v2268_v44 = vpop.permute.xlu1 %2267  ;;  %v2285_v50 = vsel %vm7888_vm6, %v2280_v36, %v2282_v53 }
 0x93a   : > { %v2273_v11 = vsel %vm7885_vm7, %v2268_v44, %v2270_v48  ;;  %v2272_v24 = vsel %vm7885_vm7, %v2266_v17, %v2268_v44  ;;  %vm7886_vm7 = vcmask 490496   ;;  %v5327_v48 = vld [vmem:[%s5489_s14] ss:$8 sps:$4 sm:$0xff]  }
 0x93b   : > { %2350 = vmatprep.subr.bf16.mxu0 %v2273_v11 }
 0x93c   : > { %v2294_v8 = vpop.permute.xlu0 %2293  ;;  %2351 = vmatpush1.bf16.msra.mxu0 %v2272_v24 }
 0x93d   : > { %v2284_v13 = vpop.permute.xlu1 %2283  ;;  %v2297_v20 = vsel %vm7887_vm13, %v2292_v21, %v2294_v8 }
 0x93e   : > { %v2286_v29 = vsel %vm7888_vm6, %v2282_v53, %v2284_v13 }
 0x93f   : > { %2352 = vmatprep.subr.bf16.mxu0 %v2286_v29 }
 0x940   : > { %v2306_v49 = vpop.permute.xlu0 %2305  ;;  %2353 = vmatpush1.bf16.msra.mxu0 %v2285_v50 }
 0x941   : > { %2354 = vmatprep.subr.bf16.mxu0 %v2297_v20  ;;  %v2290_v32 = vpop.permute.xlu1 %2289 }
 0x942   : > { %v2296_v22 = vsel %vm7887_vm13, %v2290_v32, %v2292_v21 }
 0x944   : > { %v2304_v17 = vpop.permute.xlu0 %2303  ;;  %2355 = vmatpush1.bf16.msra.mxu0 %v2296_v22 }
 0x945   : > { %v2308_v35 = vpop.permute.xlu1 %2307  ;;  %v2310_v45 = vsel %vm7886_vm7, %v2304_v17, %v2306_v49 }
 0x946   : > { %v2311_v43 = vsel %vm7886_vm7, %v2306_v49, %v2308_v35  ;;  %vm8098_vm7 = vcmask 277504  }
 0x947   : > { %2356 = vmatprep.subr.bf16.mxu0 %v2311_v43  ;;  %vm8099_vm13 = vmmov %vm8098_vm7 }
 0x948   : > { %2357 = vmatpush1.bf16.msra.mxu0 %v2310_v45  ;;  %vm8100_vm6 = vmmov %vm8098_vm7 }
 0x94b   : > { %2373 = vmatmul.mubr.bf16.vlgmr.msra.gmra.mrb[8].mxu0 %v5327_v48 }
 0x955   : > { %v2326_v44 = vpop.permute.xlu0 %2325 }
 0x956   : > { %v2321_v36 = vpop.permute.xlu1 %2320 }
 0xa1e   : > { %v2374_v56 = vpop.f32.mrb[8].mxu0 }
 0xa1f   : > { %v2375_v58 = vadd.f32 %v2374_v56, %v2321_v36  ;;  %v2376_v53 = vpop.f32.mrb[9].mxu0 }
 0xa20   : > { %v2377_v11 = vadd.f32 %v2376_v53, %v2321_v36  ;;  %v2378_v24 = vpop.f32.mrb[10].mxu0 }
 0xa21   : > { %v2379_v21 = vadd.f32 %v2378_v24, %v2326_v44  ;;  %v2380_v8 = vpop.f32.mrb[11].mxu0  ;;  %v2383_v29 = vmax.f32 %v2375_v58, 0.0 }
 0xa22   : > { %v2381_v13 = vadd.f32 %v2380_v8, %v2326_v44  ;;  %v2384_v20 = vmax.f32 %v2377_v11, 0.0 }
 0xa23   : > { %v2385_v50 = vmax.f32 %v2379_v21, 0.0 }
 0xa24   : > { %v2386_v32 = vmax.f32 %v2381_v13, 0.0 }
 0xa25   : > { %v2387_v22 = vpack.c.bf16 %v2385_v50, %v2383_v29 }
 0xa26   : > { %v2388_v49 = vpack.c.bf16 %v2386_v32, %v2384_v20  ;;  %v5328_v20 = vld [vmem:[%s5499_s24 + $0x4] ss:$8 sps:$4 sm:$0xff]  }
 0xa27   : > { %2391 = vrot.lane.b32.xlu1 %v2387_v22, %s7940_s18 }
 0xa28   : > { %2393 = vrot.lane.b32.xlu0 %v2388_v49, %s7940_s18  ;;  %s8134_s18 = sld [smem:[#allocation10_spill]] }
 0xa99   : > { %v2392_v17 = vpop.permute.xlu1 %2391 }
 0xa9a   : > { %v2398_v35 = vsel %vm8098_vm7, 0, %v2392_v17  ;;  %v2394_v43 = vpop.permute.xlu0 %2393  ;;  %vm8102_vm7 = vcmp.ne.s16.totalorder %v6256_v59, 0 }
 0xa9b   : > { %v2395_v45 = vsel %vm8099_vm13, %v2392_v17, %v2394_v43  ;;  %2458 = vrot.lane.b32.xlu0 %v2398_v35, %s7902_s11  ;;  %2422 = vrot.lane.b32.xlu1 %v2398_v35, %s7938_s26  ;;  %v2403_v48 = vsel %vm7921_vm14, %v2398_v35, 0  ;;  %v2401_v36 = vsel %vm8100_vm6, %v2394_v43, 0  ;;  %v2405_v56 = vsel %vm7900_vm8, %v2398_v35, 0  ;;  %v2519_v43 = vld [vmem:[%s5504_s30] sm:$0xff] }
 0xa9c   : > { %5175 = vmatprep.subr.msk.bf16.mxu1 %vm7924_vm2, %v2395_v45  ;;  %v2408_v58 = vsel %vm7890_vm11, %v2398_v35, 0  ;;  %v2411_v53 = vsel %vm7889_vm10, %v2398_v35, 0  ;;  %v2406_v44 = vsel %vm7906_vm3, %v2395_v45, 0  ;;  %v2407_v11 = vsel %vm7901_vm12, %v2401_v36, 0 }
 0xa9d   : > { %2544 = vmatpush1.bf16.msra.mxu1 %v2403_v48  ;;  %v2410_v24 = vsel %vm7899_vm1, %v2401_v36, 0  ;;  %vm8101_vm6 = vcmp.ne.s16.totalorder %v6262_v6, 0  ;;  %v2414_v8 = vsel %vm8102_vm7, %v2398_v35, 0  ;;  %vm8103_vm13 = vcmp.ne.s16.totalorder %v6249_v4, 0  ;;  %v2520_v48 = vld [vmem:[%s5504_s30 + $0x8] sm:$0xff] }
 0xa9e   : > { %v2409_v21 = vsel %vm8101_vm6, %v2395_v45, 0  ;;  %v2413_v13 = vsel %vm8103_vm13, %v2401_v36, 0  ;;  %vm8104_vm10 = vcmp.ne.s16.totalorder %v6293_v15, 0  ;;  %vm8105_vm11 = vcmp.ne.s16.totalorder %v6287_v12, 0 }
 0xa9f   : > { %2426 = vrot.lane.b32.xlu0 %v2401_v36, %s7938_s26  ;;  %2424 = vrot.lane.b32.xlu1 %v2395_v45, %s7938_s26  ;;  %v2412_v29 = vsel %vm8104_vm10, %v2395_v45, 0  ;;  %v2415_v50 = vsel %vm8105_vm11, %v2395_v45, 0  ;;  %v2416_v32 = vsel %vm7898_vm5, %v2401_v36, 0  ;;  %vm8106_vm6 = vcmask 130048   ;;  %s8133_s26 = sld [smem:[#allocation9_spill]] }
 0xaa0   : > { %5176 = vmatprep.mubr.msk.bf16.mxu1 %vm8106_vm6, %v5328_v20  ;;  %vm8107_vm10 = vcmp.ne.s16.totalorder %v6318_v30, 0  ;;  %v2419_v49 = vsel %vm7897_vm9, %v2401_v36, 0  ;;  %vm8108_vm11 = vcmp.ne.s16.totalorder %v6303_v26, 0  ;;  %vm8109_vm7 = vcmask 1031168  }
 0xaa1   : > { %v2418_v22 = vsel %vm8107_vm10, %v2395_v45, 0  ;;  %v2417_v17 = vsel %vm8108_vm11, %v2398_v35, 0  ;;  %vm8110_vm13 = vmmov %vm8109_vm7  ;;  %vm8111_vm6 = vcmask 752640   ;;  %vm8113_vm11 = vcmask 523264  }
 0xaa2   : > { %vm8112_vm10 = vmmov %vm8111_vm6  ;;  %vm8122_vm9 = vcmask 523264   ;;  %vm8125_vm3 = vcmask 130048   ;;  %vm8126_vm14 = vcmask 523264  }
 0xaa3   : > { %2435 = vrot.lane.b32.xlu0 %v2405_v56, %s7965_s16  ;;  %2448 = vrot.lane.b32.xlu1 %v2408_v58, %s7904_s10  ;;  %vm8127_vm2 = vmmov %vm8126_vm14 }
 0xaa7   : > { %2460 = vrot.lane.b32.xlu0 %v2395_v45, %s7902_s11  ;;  %2462 = vrot.lane.b32.xlu1 %v2401_v36, %s7902_s11  ;;  %s8124_s11 = sld [smem:[#allocation8_spill]] }
 0xaab   : > { %2471 = vrot.lane.b32.xlu1 %v2411_v53, %s7894_s2  ;;  %2437 = vrot.lane.b32.xlu0 %v2406_v44, %s7965_s16 }
 0xaaf   : > { %2439 = vrot.lane.b32.xlu1 %v2407_v11, %s7965_s16  ;;  %2452 = vrot.lane.b32.xlu0 %v2410_v24, %s7904_s10 }
 0xab3   : > { %2450 = vrot.lane.b32.xlu1 %v2409_v21, %s7904_s10  ;;  %2484 = vrot.lane.b32.xlu0 %v2414_v8, %s7959_s22  ;;  %s7942_s10 = smov 56  }
 0xab7   : > { %2496 = vrot.lane.b32.xlu1 %v2395_v45, %s7892_s23  ;;  %2475 = vrot.lane.b32.xlu0 %v2413_v13, %s7894_s2 }
 0xabb   : > { %2473 = vrot.lane.b32.xlu1 %v2412_v29, %s7894_s2  ;;  %2486 = vrot.lane.b32.xlu0 %v2415_v50, %s7959_s22  ;;  %s5433_s2 = smov 72  }
 0xabf   : > { %2488 = vrot.lane.b32.xlu1 %v2416_v32, %s7959_s22  ;;  %2498 = vrot.lane.b32.xlu0 %v2401_v36, %s7892_s23 }
 0xac3   : > { %2494 = vrot.lane.b32.xlu1 %v2398_v35, %s7892_s23  ;;  %2509 = vrot.lane.b32.xlu0 %v2418_v22, %s7946_s7  ;;  %s5432_s23 = smov 8  }
 0xac7   : > { %2511 = vrot.lane.b32.xlu1 %v2419_v49, %s7946_s7  ;;  %2507 = vrot.lane.b32.xlu0 %v2417_v17, %s7946_s7 }
 0xacb   : > { %2523 = vperm.xlu1 %5320, %v2519_v43   ;;  %2528 = vperm.xlu0 %5319, %v2520_v48  }
 0xb0d   : > { %v2459_v56 = vpop.permute.xlu0 %2458  ;;  %v2423_v45 = vpop.permute.xlu1 %2422 }
 0xb11   : > { %v2427_v58 = vpop.permute.xlu0 %2426  ;;  %v2425_v53 = vpop.permute.xlu1 %2424 }
 0xb12   : > { %v2429_v44 = vsel %vm8109_vm7, %v2425_v53, %v2427_v58  ;;  %v2428_v11 = vsel %vm8110_vm13, %v2423_v45, %v2425_v53  ;;  %vm8114_vm7 = vmmov %vm8113_vm11  ;;  %vm8115_vm13 = vcmask 506880  }
 0xb13   : > { %2545 = vmatprep.subr.bf16.mxu1 %v2429_v44 }
 0xb14   : > { %2546 = vmatpush1.bf16.msra.mxu1 %v2428_v11 }
 0xb15   : > { %v2436_v36 = vpop.permute.xlu0 %2435  ;;  %v2449_v35 = vpop.permute.xlu1 %2448 }
 0xb19   : > { %v2461_v24 = vpop.permute.xlu0 %2460  ;;  %v2463_v21 = vpop.permute.xlu1 %2462 }
 0xb1a   : > { %v2465_v48 = vsel %vm7891_vm4, %v2461_v24, %v2463_v21  ;;  %v2464_v53 = vsel %vm7891_vm4, %v2459_v56, %v2461_v24  ;;  %vm8116_vm4 = vmmov %vm8115_vm13 }
 0xb1d   : > { %v2472_v8 = vpop.permute.xlu1 %2471  ;;  %v2438_v13 = vpop.permute.xlu0 %2437 }
 0xb1e   : > { %v2441_v32 = vsel %vm7945_vm15, %v2436_v36, %v2438_v13 }
 0xb21   : > { %v2440_v29 = vpop.permute.xlu1 %2439  ;;  %v2453_v50 = vpop.permute.xlu0 %2452 }
 0xb22   : > { %v2442_v20 = vsel %vm7945_vm15, %v2438_v13, %v2440_v29 }
 0xb23   : > { %2547 = vmatprep.subr.bf16.mxu1 %v2442_v20 }
 0xb24   : > { %2548 = vmatpush1.bf16.msra.mxu1 %v2441_v32 }
 0xb25   : > { %v2451_v22 = vpop.permute.xlu1 %2450  ;;  %v2485_v49 = vpop.permute.xlu0 %2484 }
 0xb26   : > { %v2455_v17 = vsel %vm7896_vm0, %v2451_v22, %v2453_v50  ;;  %v2454_v43 = vsel %vm7896_vm0, %v2449_v35, %v2451_v22 }
 0xb27   : > { %2549 = vmatprep.subr.bf16.mxu1 %v2455_v17 }
 0xb28   : > { %2550 = vmatpush1.bf16.msra.mxu1 %v2454_v43 }
 0xb29   : > { %v2497_v45 = vpop.permute.xlu1 %2496  ;;  %2551 = vmatprep.subr.bf16.mxu1 %v2465_v48  ;;  %v2476_v58 = vpop.permute.xlu0 %2475  ;;  %v5330_v48 = vld [vmem:[%s5499_s24] ss:$8 sps:$4 sm:$0xff]  }
 0xb2c   : > { %2552 = vmatpush1.bf16.msra.mxu1 %v2464_v53 }
 0xb2d   : > { %v2474_v44 = vpop.permute.xlu1 %2473  ;;  %v2487_v11 = vpop.permute.xlu0 %2486 }
 0xb2e   : > { %v2478_v36 = vsel %vm8111_vm6, %v2474_v44, %v2476_v58  ;;  %v2477_v13 = vsel %vm8112_vm10, %v2472_v8, %v2474_v44  ;;  %v2490_v21 = vsel %vm8114_vm7, %v2485_v49, %v2487_v11  ;;  %vm8117_vm6 = vcmask 490496  }
 0xb2f   : > { %2553 = vmatprep.subr.bf16.mxu1 %v2478_v36  ;;  %vm8118_vm10 = vmmov %vm8117_vm6  ;;  %vm2610_vm7 = vcmp.lt.s32.totalorder %v5644_v7, 12 }
 0xb30   : > { %2554 = vmatpush1.bf16.msra.mxu1 %v2477_v13 }
 0xb31   : > { %v2489_v29 = vpop.permute.xlu1 %2488  ;;  %v2499_v35 = vpop.permute.xlu0 %2498 }
 0xb32   : > { %v2491_v50 = vsel %vm8113_vm11, %v2487_v11, %v2489_v29  ;;  %v2501_v56 = vsel %vm8115_vm13, %v2497_v45, %v2499_v35  ;;  %vm2609_vm11 = vcmp.lt.s32.totalorder %v5641_v5, 12  ;;  %vm2607_vm13 = vcmp.ge.s32.totalorder %v5641_v5, 4 }
 0xb33   : > { %2555 = vmatprep.subr.bf16.mxu1 %v2491_v50 }
 0xb34   : > { %2556 = vmatpush1.bf16.msra.mxu1 %v2490_v21 }
 0xb35   : > { %v2495_v24 = vpop.permute.xlu1 %2494  ;;  %2557 = vmatprep.subr.bf16.mxu1 %v2501_v56  ;;  %v2510_v20 = vpop.permute.xlu0 %2509 }
 0xb36   : > { %v2500_v32 = vsel %vm8116_vm4, %v2495_v24, %v2497_v45  ;;  %vm2633_vm4 = vmpackc.low %vm2610_vm7, %vm2609_vm11 }
 0xb38   : > { %2558 = vmatpush1.bf16.msra.mxu1 %v2500_v32 }
 0xb39   : > { %v2512_v8 = vpop.permute.xlu1 %2511  ;;  %v2508_v22 = vpop.permute.xlu0 %2507 }
 0xb3a   : > { %v2513_v17 = vsel %vm8117_vm6, %v2508_v22, %v2510_v20  ;;  %v2514_v43 = vsel %vm8118_vm10, %v2510_v20, %v2512_v8  ;;  %vm2608_vm6 = vcmp.ge.s32.totalorder %v5644_v7, 4  ;;  %v2634_v20 = vsel %vm2633_vm4, 65537, %v7911_v1 }
 0xb3b   : > { %2559 = vmatprep.subr.bf16.mxu1 %v2514_v43  ;;  %vm2615_vm10 = vmpackc.low %vm2608_vm6, %vm2607_vm13  ;;  %v2638_v22 = vrot.slane %v2634_v20, %v5648_v9  ;;  %vm8119_vm4 = vcmask 556032  }
 0xb3c   : > { %2560 = vmatpush1.bf16.msra.mxu1 %v2513_v17  ;;  %v2642_v17 = vrot.slane %v2634_v20, %v5653_v10  ;;  %v2616_v43 = vsel %vm2615_vm10, 65537, %v7911_v1  ;;  %vm8120_vm13 = vmmov %vm8119_vm4 }
 0xb3d   : > { %vm8121_vm6 = vmmov %vm8119_vm4 }
 0xb3f   : > { %2576 = vmatmul.mubr.bf16.vlgmr.msra.gmra.mrb[8].mxu1 %v5330_v48  ;;  %v6467_v48 = vrot.slane %v2616_v43, %v5648_v9 }
 0xb41   : > { %vm2625_vm11 = vcmp.ne.s16.totalorder %v6467_v48, 0 }
 0xb4a   : > { %v2524_v49 = vpop.permute.xlu1 %2523  ;;  %v2529_v45 = vpop.permute.xlu0 %2528 }
 0xc12   : > { %v2577_v58 = vpop.f32.mrb[8].mxu1 }
 0xc13   : > { %v2578_v53 = vadd.f32 %v2577_v58, %v2524_v49  ;;  %v2579_v44 = vpop.f32.mrb[9].mxu1 }
 0xc14   : > { %v2580_v11 = vadd.f32 %v2579_v44, %v2524_v49  ;;  %v2581_v36 = vpop.f32.mrb[10].mxu1  ;;  %v6471_v49 = vrot.slane %v2616_v43, %v5653_v10 }
 0xc15   : > { %v2582_v13 = vadd.f32 %v2581_v36, %v2529_v45  ;;  %v2583_v29 = vpop.f32.mrb[11].mxu1  ;;  %v2586_v50 = vmax.f32 %v2578_v53, 0.0 }
 0xc16   : > { %v2584_v35 = vadd.f32 %v2583_v29, %v2529_v45  ;;  %v2587_v56 = vmax.f32 %v2580_v11, 0.0  ;;  %vm2626_vm7 = vcmp.ne.s16.totalorder %v6471_v49, 0 }
 0xc17   : > { %v2588_v21 = vmax.f32 %v2582_v13, 0.0 }
 0xc18   : > { %v2589_v24 = vmax.f32 %v2584_v35, 0.0 }
 0xc19   : > { %v6454_v32 = vpack.c.bf16 %v2588_v21, %v2586_v50 }
 0xc1a   : > { %v6456_v8 = vpack.c.bf16 %v2589_v24, %v2587_v56 }
 0xc1b   : > { %2594 = vrot.lane.b32.xlu1 %v6454_v32, %s7963_s15 }
 0xc1c   : > { %2596 = vrot.lane.b32.xlu0 %v6456_v8, %s7963_s15 }
 0xc1f   : > { %2643 = vrot.lane.b32.xlu1 %v2638_v22, %s5432_s23 }
 0xc20   : > { %2645 = vrot.lane.b32.xlu0 %v2642_v17, %s5432_s23 }
 0xc23   : > { %2655 = vrot.lane.b32.xlu1 %v6467_v48, %s7959_s22 }
 0xc24   : > { %2657 = vrot.lane.b32.xlu0 %v6471_v49, %s7959_s22 }
 0xc27   : > { %2666 = vrot.lane.b32.xlu1 %v2638_v22, %s5433_s2 }
 0xc28   : > { %2668 = vrot.lane.b32.xlu0 %v2642_v17, %s5433_s2  ;;  %s7967_s2 = smov 120  }
 0xc8d   : > { %v2595_v58 = vpop.permute.xlu1 %2594 }
 0xc8e   : > { %v2602_v53 = vsel %vm8119_vm4, 0, %v2595_v58  ;;  %v2597_v44 = vpop.permute.xlu0 %2596  ;;  %vm7927_vm4 = vcmask 64512  }
 0xc8f   : > { %v6481_v45 = vsel %vm8120_vm13, %v2595_v58, %v2597_v44  ;;  %v6484_v11 = vsel %vm8121_vm6, %v2597_v44, 0  ;;  %2684 = vrot.lane.b32.xlu1 %v2602_v53, %s7965_s16  ;;  %v2627_v36 = vsel %vm2625_vm11, %v2602_v53, 0 }
 0xc90   : > { %2688 = vrot.lane.b32.xlu0 %v6484_v11, %s7965_s16  ;;  %5179 = vmatprep.subr.msk.bf16.mxu0 %vm2626_vm7, %v6481_v45 }
 0xc91   : > { %2789 = vmatpush1.bf16.msra.mxu0 %v2627_v36  ;;  %v6494_v13 = vpop.permute.xlu1 %2643 }
 0xc92   : > { %vm2649_vm10 = vcmp.ne.s16.totalorder %v6494_v13, 0  ;;  %v6497_v29 = vpop.permute.xlu0 %2645 }
 0xc93   : > { %2686 = vrot.lane.b32.xlu1 %v6481_v45, %s7965_s16  ;;  %v2652_v35 = vsel %vm2649_vm10, %v2602_v53, 0  ;;  %v6507_v50 = vsel %vm7927_vm4, %v6494_v13, %v6497_v29  ;;  %vm2651_vm0 = vcmp.ne.s16.totalorder %v6497_v29, 0  ;;  %vm8128_vm4 = vcmask 490496  }
 0xc94   : > { %2697 = vrot.lane.b32.xlu0 %v2652_v35, %s7967_s2  ;;  %vm2650_vm6 = vcmp.ne.s16.totalorder %v6507_v50, 0  ;;  %v2654_v17 = vsel %vm2651_vm0, %v6484_v11, 0 }
 0xc95   : > { %v6509_v21 = vpop.permute.xlu1 %2655  ;;  %v2653_v22 = vsel %vm2650_vm6, %v6481_v45, 0 }
 0xc96   : > { %vm2660_vm13 = vcmp.ne.s16.totalorder %v6509_v21, 0  ;;  %v6512_v56 = vpop.permute.xlu0 %2657 }
 0xc97   : > { %v2663_v24 = vsel %vm2660_vm13, %v2602_v53, 0  ;;  %v6524_v20 = vsel %vm8122_vm9, %v6509_v21, %v6512_v56  ;;  %vm2662_vm1 = vcmp.ne.s16.totalorder %v6512_v56, 0  ;;  %vm8123_vm9 = vcmask 588800  }
 0xc98   : > { %2723 = vrot.lane.b32.xlu0 %v6481_v45, %s7946_s7  ;;  %2711 = vrot.lane.b32.xlu1 %v2663_v24, %s7959_s22  ;;  %vm2661_vm5 = vcmp.ne.s16.totalorder %v6524_v20, 0  ;;  %v2665_v44 = vsel %vm2662_vm1, %v6484_v11, 0 }
 0xc99   : > { %v6536_v43 = vpop.permute.xlu1 %2666  ;;  %v2664_v36 = vsel %vm2661_vm5, %v6481_v45, 0 }
 0xc9a   : > { %v6538_v58 = vpop.permute.xlu0 %2668 }
 0xc9b   : > { %v6551_v35 = vsel %vm8123_vm9, %v6536_v43, %v6538_v58  ;;  %vm7931_vm12 = vcmp.ne.s16.totalorder %v6538_v58, 0  ;;  %vm7928_vm9 = vcmp.ne.s16.totalorder %v6536_v43, 0 }
 0xc9c   : > { %2699 = vrot.lane.b32.xlu0 %v2653_v22, %s7967_s2  ;;  %2701 = vrot.lane.b32.xlu1 %v2654_v17, %s7967_s2  ;;  %vm7948_vm8 = vcmp.ne.s16.totalorder %v6551_v35, 0  ;;  %v2677_v24 = vsel %vm7931_vm12, %v6484_v11, 0  ;;  %v2675_v17 = vsel %vm7928_vm9, %v2602_v53, 0  ;;  %vm8129_vm9 = vmmov %vm8128_vm4  ;;  %vm7944_vm12 = vcmask 457728  }
 0xc9d   : > { %v2676_v22 = vsel %vm7948_vm8, %v6481_v45, 0 }
 0xca0   : > { %2715 = vrot.lane.b32.xlu0 %v2665_v44, %s7959_s22  ;;  %2713 = vrot.lane.b32.xlu1 %v2664_v36, %s7959_s22  ;;  %v5331_v44 = vld [vmem:[%s8009_s6 + $0x4] ss:$8 sps:$4 sm:$0xff]   ;;  %v2681_v36 = vsel %vm2650_vm6, %v6484_v11, 0 }
 0xca1   : > { %5181 = vmatprep.mubr.msk.bf16.mxu0 %vm8125_vm3, %v5331_v44  ;;  %vm2703_vm3 = vcmask 982016  }
 0xca4   : > { %2721 = vrot.lane.b32.xlu0 %v2602_v53, %s7946_s7  ;;  %2725 = vrot.lane.b32.xlu1 %v6484_v11, %s7946_s7  ;;  %v2680_v53 = vsel %vm2649_vm10, %v6481_v45, 0 }
 0xca8   : > { %2738 = vrot.lane.b32.xlu0 %v2677_v24, %s7942_s10  ;;  %2736 = vrot.lane.b32.xlu1 %v2676_v22, %s7942_s10  ;;  %v2764_v24 = vld [vmem:[%s8124_s11] sm:$0xff]  ;;  %v2765_v22 = vld [vmem:[%s8124_s11 + $0x8] sm:$0xff]  ;;  %s8282_s11 = sld [smem:[#allocation20_spill]] }
 0xcac   : > { %2746 = vrot.lane.b32.xlu0 %v7911_v1, %s7965_s16  ;;  %2734 = vrot.lane.b32.xlu1 %v2675_v17, %s7942_s10 }
 0xcb0   : > { %2756 = vrot.lane.b32.xlu0 %v7911_v1, %s7967_s2  ;;  %2754 = vrot.lane.b32.xlu1 %v2681_v36, %s7967_s2 }
 0xcb4   : > { %2768 = vperm.xlu0 %5319, %v2764_v24   ;;  %2752 = vrot.lane.b32.xlu1 %v2680_v53, %s7967_s2 }
 0xcb8   : > { %2773 = vperm.xlu1 %5320, %v2765_v22  }
 0xd01   : > { %v2685_v17 = vpop.permute.xlu1 %2684 }
 0xd02   : > { %v2689_v44 = vpop.permute.xlu0 %2688 }
 0xd05   : > { %v2687_v62 = vpop.permute.xlu1 %2686 }
 0xd06   : > { %v2698_v61 = vpop.permute.xlu0 %2697  ;;  %v2691_v0 = vsel %vm7945_vm15, %v2687_v62, %v2689_v44  ;;  %v2690_v1 = vsel %vm7945_vm15, %v2685_v17, %v2687_v62 }
 0xd07   : > { %2790 = vmatprep.subr.bf16.mxu0 %v2691_v0 }
 0xd08   : > { %2791 = vmatpush1.bf16.msra.mxu0 %v2690_v1 }
 0xd0a   : > { %v2724_v36 = vpop.permute.xlu0 %2723  ;;  %v2712_v60 = vpop.permute.xlu1 %2711 }
 0xd0e   : > { %v2700_v63 = vpop.permute.xlu0 %2699  ;;  %v2702_v42 = vpop.permute.xlu1 %2701 }
 0xd0f   : > { %v2705_v24 = vsel %vm2703_vm3, %v2700_v63, %v2702_v42  ;;  %v2704_v53 = vsel %vm2703_vm3, %v2698_v61, %v2700_v63 }
 0xd10   : > { %2792 = vmatprep.subr.bf16.mxu0 %v2705_v24 }
 0xd11   : > { %2793 = vmatpush1.bf16.msra.mxu0 %v2704_v53 }
 0xd12   : > { %v2716_v22 = vpop.permute.xlu0 %2715  ;;  %v2714_v41 = vpop.permute.xlu1 %2713 }
 0xd13   : > { %v2718_v38 = vsel %vm8126_vm14, %v2714_v41, %v2716_v22  ;;  %v2717_v31 = vsel %vm8127_vm2, %v2712_v60, %v2714_v41  ;;  %vm8130_vm14 = vcmask 556032  }
 0xd14   : > { %2794 = vmatprep.subr.bf16.mxu0 %v2718_v38  ;;  %vm8131_vm2 = vmmov %vm8130_vm14 }
 0xd15   : > { %2795 = vmatpush1.bf16.msra.mxu0 %v2717_v31 }
 0xd16   : > { %v2722_v1 = vpop.permute.xlu0 %2721  ;;  %v2726_v62 = vpop.permute.xlu1 %2725 }
 0xd17   : > { %v2727_v17 = vsel %vm8128_vm4, %v2722_v1, %v2724_v36  ;;  %v2728_v34 = vsel %vm8129_vm9, %v2724_v36, %v2726_v62  ;;  %v5333_v1 = vld [vmem:[%s8009_s6] ss:$8 sps:$4 sm:$0xff]   ;;  %vm8132_vm4 = vmmov %vm8131_vm2  ;;  %vm8135_vm9 = vcmp.ne.s16.totalorder %v6538_v58, 0  ;;  %s8190_s6 = sld [smem:[#allocation17_spill]] }
 0xd18   : > { %2796 = vmatprep.subr.bf16.mxu0 %v2728_v34  ;;  %v2678_v34 = vsel %vm2625_vm11, %v6481_v45, 0 }
 0xd19   : > { %2797 = vmatpush1.bf16.msra.mxu0 %v2727_v17 }
 0xd1a   : > { %v2739_v42 = vpop.permute.xlu0 %2738  ;;  %v2737_v63 = vpop.permute.xlu1 %2736 }
 0xd1b   : > { %v2742_v61 = vsel %vm7944_vm12, %v2737_v63, %v2739_v42 }
 0xd1c   : > { %2798 = vmatprep.subr.bf16.mxu0 %v2742_v61 }
 0xd1e   : > { %v2735_v24 = vpop.permute.xlu1 %2734  ;;  %v6595_v53 = vpop.permute.xlu0 %2746 }
 0xd1f   : > { %v2741_v31 = vsel %vm7944_vm12, %v2735_v24, %v2737_v63  ;;  %v2748_v41 = vsel %vm7945_vm15, %v2689_v44, %v6595_v53 }
 0xd20   : > { %2799 = vmatpush1.bf16.msra.mxu0 %v2741_v31 }
 0xd21   : > { %5180 = vmatprep.subr.msk.bf16.mxu0 %vm2626_vm7, %v6484_v11 }
 0xd22   : > { %v2755_v38 = vpop.permute.xlu1 %2754  ;;  %v6606_v60 = vpop.permute.xlu0 %2756 }
 0xd23   : > { %v2759_v22 = vsel %vm2703_vm3, %v2755_v38, %v6606_v60 }
 0xd24   : > { %2801 = vmatpush1.bf16.msra.mxu0 %v2678_v34 }
 0xd25   : > { %2802 = vmatprep.subr.bf16.mxu0 %v2748_v41 }
 0xd26   : > { %v2753_v36 = vpop.permute.xlu1 %2752 }
 0xd27   : > { %v2758_v11 = vsel %vm2703_vm3, %v2753_v36, %v2755_v38 }
 0xd28   : > { %2803 = vmatpush1.bf16.msra.mxu0 %v2691_v0 }
 0xd29   : > { %2804 = vmatprep.subr.bf16.mxu0 %v2759_v22 }
 0xd2c   : > { %2805 = vmatpush1.bf16.msra.mxu0 %v2758_v11 }
 0xd2f   : > { %2821 = vmatmul.mubr.bf16.vlgmr.msra.gmra.mrb[12].mxu0 %v5333_v1 }
 0xd33   : > { %v2769_v62 = vpop.permute.xlu0 %2768 }
 0xd37   : > { %v2774_v63 = vpop.permute.xlu1 %2773 }
 0xe02   : > { %v2822_v45 = vpop.f32.mrb[12].mxu0 }
 0xe03   : > { %v2823_v17 = vadd.f32 %v2822_v45, %v2769_v62  ;;  %v2824_v42 = vpop.f32.mrb[13].mxu0 }
 0xe04   : > { %v2825_v44 = vadd.f32 %v2824_v42, %v2769_v62  ;;  %v2826_v61 = vpop.f32.mrb[14].mxu0 }
 0xe05   : > { %v2827_v24 = vadd.f32 %v2826_v61, %v2774_v63  ;;  %v2828_v31 = vpop.f32.mrb[15].mxu0  ;;  %v2831_v0 = vmax.f32 %v2823_v17, 0.0 }
 0xe06   : > { %v2829_v34 = vadd.f32 %v2828_v31, %v2774_v63  ;;  %v2832_v55 = vmax.f32 %v2825_v44, 0.0 }
 0xe07   : > { %v2833_v41 = vmax.f32 %v2827_v24, 0.0 }
 0xe08   : > { %v2834_v25 = vmax.f32 %v2829_v34, 0.0  ;;  %v5334_v34 = vld [vmem:[%s8133_s26 + $0x4] ss:$8 sps:$4 sm:$0xff]  }
 0xe09   : > { %v2835_v22 = vpack.c.bf16 %v2833_v41, %v2831_v0  ;;  %v2941_v0 = vld [vmem:[%s8134_s18] sm:$0xff] }
 0xe0a   : > { %v2836_v51 = vpack.c.bf16 %v2834_v25, %v2832_v55 }
 0xe0b   : > { %2839 = vrot.lane.b32.xlu0 %v2835_v22, %s7963_s15  ;;  %v2942_v22 = vld [vmem:[%s8134_s18 + $0x8] sm:$0xff] }
 0xe0c   : > { %2841 = vrot.lane.b32.xlu1 %v2836_v51, %s7963_s15 }
 0xe7d   : > { %v2840_v38 = vpop.permute.xlu0 %2839 }
 0xe7e   : > { %v2846_v36 = vsel %vm8130_vm14, 0, %v2840_v38  ;;  %v2842_v11 = vpop.permute.xlu1 %2841  ;;  %vm8136_vm14 = vcmp.ne.s16.totalorder %v6536_v43, 0 }
 0xe7f   : > { %v6616_v1 = vsel %vm8131_vm2, %v2840_v38, %v2842_v11  ;;  %v6619_v62 = vsel %vm8132_vm4, %v2842_v11, 0  ;;  %2868 = vrot.lane.b32.xlu0 %v2846_v36, %s7965_s16  ;;  %v2851_v45 = vsel %vm2625_vm11, %v2846_v36, 0  ;;  %v2853_v25 = vsel %vm2649_vm10, %v2846_v36, 0 }
 0xe80   : > { %2872 = vrot.lane.b32.xlu1 %v6619_v62, %s7965_s16  ;;  %5184 = vmatprep.subr.msk.bf16.mxu1 %vm2626_vm7, %v6616_v1  ;;  %v2856_v51 = vsel %vm2660_vm13, %v2846_v36, 0  ;;  %v2855_v55 = vsel %vm2651_vm0, %v6619_v62, 0  ;;  %v2854_v17 = vsel %vm2650_vm6, %v6616_v1, 0  ;;  %v2857_v42 = vsel %vm2661_vm5, %v6616_v1, 0 }
 0xe81   : > { %2966 = vmatpush1.bf16.msra.mxu1 %v2851_v45  ;;  %v2858_v63 = vsel %vm2662_vm1, %v6619_v62, 0  ;;  %v2860_v44 = vsel %vm7948_vm8, %v6616_v1, 0  ;;  %v2861_v61 = vsel %vm8135_vm9, %v6619_v62, 0  ;;  %v2859_v24 = vsel %vm8136_vm14, %v2846_v36, 0 }
 0xe82   : > { %v2865_v31 = vsel %vm2650_vm6, %v6619_v62, 0  ;;  %vm8137_vm2 = vcmask 130048   ;;  %v2864_v41 = vsel %vm2649_vm10, %v6616_v1, 0  ;;  %vm8138_vm4 = vcmask 523264  }
 0xe83   : > { %2870 = vrot.lane.b32.xlu0 %v6616_v1, %s7965_s16  ;;  %5186 = vmatprep.mubr.msk.bf16.mxu1 %vm8137_vm2, %v5334_v34  ;;  %vm8139_vm9 = vmmov %vm8138_vm4  ;;  %vm8140_vm14 = vcmask 490496  }
 0xe84   : > { %2881 = vrot.lane.b32.xlu1 %v2853_v25, %s7967_s2  ;;  %vm8141_vm2 = vmmov %vm8140_vm14 }
 0xe87   : > { %2894 = vrot.lane.b32.xlu0 %v2856_v51, %s7959_s22 }
 0xe88   : > { %2906 = vrot.lane.b32.xlu1 %v6616_v1, %s7946_s7 }
 0xe8b   : > { %2885 = vrot.lane.b32.xlu0 %v2855_v55, %s7967_s2 }
 0xe8c   : > { %2883 = vrot.lane.b32.xlu1 %v2854_v17, %s7967_s2 }
 0xe8f   : > { %2896 = vrot.lane.b32.xlu0 %v2857_v42, %s7959_s22 }
 0xe90   : > { %2898 = vrot.lane.b32.xlu1 %v2858_v63, %s7959_s22  ;;  %s8161_s22 = sld [smem:[#allocation13_spill]] }
 0xe93   : > { %2908 = vrot.lane.b32.xlu0 %v6619_v62, %s7946_s7 }
 0xe94   : > { %2904 = vrot.lane.b32.xlu1 %v2846_v36, %s7946_s7  ;;  %s8151_s7 = sld [smem:[#allocation11_spill]] }
 0xe97   : > { %2919 = vrot.lane.b32.xlu0 %v2860_v44, %s7942_s10 }
 0xe98   : > { %2921 = vrot.lane.b32.xlu1 %v2861_v61, %s7942_s10 }
 0xe9b   : > { %2917 = vrot.lane.b32.xlu0 %v2859_v24, %s7942_s10  ;;  %s8143_s10 = smov 16  }
 0xe9c   : > { %2933 = vrot.lane.b32.xlu1 %v2865_v31, %s7967_s2 }
 0xe9f   : > { %2931 = vrot.lane.b32.xlu0 %v2864_v41, %s7967_s2 }
 0xea0   : > { %2945 = vperm.xlu1 %5320, %v2941_v0  }
 0xea3   : > { %2950 = vperm.xlu0 %5319, %v2942_v22  }
 0xef1   : > { %v2869_v38 = vpop.permute.xlu0 %2868 }
 0xef2   : > { %v2873_v36 = vpop.permute.xlu1 %2872 }
 0xef5   : > { %v2871_v11 = vpop.permute.xlu0 %2870 }
 0xef6   : > { %v2882_v45 = vpop.permute.xlu1 %2881  ;;  %v2875_v25 = vsel %vm7945_vm15, %v2871_v11, %v2873_v36  ;;  %v2874_v51 = vsel %vm7945_vm15, %v2869_v38, %v2871_v11 }
 0xef7   : > { %2967 = vmatprep.subr.bf16.mxu1 %v2875_v25 }
 0xef8   : > { %2968 = vmatpush1.bf16.msra.mxu1 %v2874_v51 }
 0xef9   : > { %v2895_v55 = vpop.permute.xlu0 %2894 }
 0xefa   : > { %v2907_v17 = vpop.permute.xlu1 %2906 }
 0xefd   : > { %v2886_v42 = vpop.permute.xlu0 %2885 }
 0xefe   : > { %v2884_v63 = vpop.permute.xlu1 %2883 }
 0xeff   : > { %v2888_v44 = vsel %vm2703_vm3, %v2884_v63, %v2886_v42  ;;  %v2887_v61 = vsel %vm2703_vm3, %v2882_v45, %v2884_v63 }
 0xf00   : > { %2969 = vmatprep.subr.bf16.mxu1 %v2888_v44 }
 0xf01   : > { %v2897_v24 = vpop.permute.xlu0 %2896  ;;  %2970 = vmatpush1.bf16.msra.mxu1 %v2887_v61 }
 0xf02   : > { %v2899_v31 = vpop.permute.xlu1 %2898  ;;  %v2900_v0 = vsel %vm8139_vm9, %v2895_v55, %v2897_v24  ;;  %v2862_v55 = vsel %vm2625_vm11, %v6616_v1, 0  ;;  %vm3032_vm9 = vcmp.lt.s32.totalorder %v5644_v7, 8 }
 0xf03   : > { %v2901_v34 = vsel %vm8138_vm4, %v2897_v24, %v2899_v31  ;;  %vm3031_vm4 = vcmp.lt.s32.totalorder %v5641_v5, 8 }
 0xf04   : > { %2971 = vmatprep.subr.bf16.mxu1 %v2901_v34 }
 0xf05   : > { %v2909_v41 = vpop.permute.xlu0 %2908  ;;  %2972 = vmatpush1.bf16.msra.mxu1 %v2900_v0  ;;  %v5336_v0 = vld [vmem:[%s8133_s26] ss:$8 sps:$4 sm:$0xff]  }
 0xf06   : > { %v2905_v22 = vpop.permute.xlu1 %2904  ;;  %v2911_v38 = vsel %vm8140_vm14, %v2907_v17, %v2909_v41  ;;  %vm3049_vm14 = vmpackc.low %vm3032_vm9, %vm3031_vm4  ;;  %vm3030_vm4 = vcmp.ge.s32.totalorder %v5644_v7, 8 }
 0xf07   : > { %v2910_v11 = vsel %vm8141_vm2, %v2905_v22, %v2907_v17  ;;  %2973 = vmatprep.subr.bf16.mxu1 %v2911_v38  ;;  %v2927_v17 = vsel %vm7945_vm15, %v2873_v36, %v6595_v53  ;;  %vm3029_vm2 = vcmp.ge.s32.totalorder %v5641_v5, 8 }
 0xf08   : > { %vm3037_vm9 = vmpackc.low %vm3030_vm4, %vm3029_vm2  ;;  %vm8150_vm4 = vcmask 64512  }
 0xf09   : > { %v2920_v51 = vpop.permute.xlu0 %2919  ;;  %2974 = vmatpush1.bf16.msra.mxu1 %v2910_v11 }
 0xf0a   : > { %v2922_v45 = vpop.permute.xlu1 %2921 }
 0xf0b   : > { %v2924_v42 = vsel %vm7944_vm12, %v2920_v51, %v2922_v45 }
 0xf0c   : > { %2975 = vmatprep.subr.bf16.mxu1 %v2924_v42 }
 0xf0d   : > { %v2918_v63 = vpop.permute.xlu0 %2917 }
 0xf0e   : > { %v2923_v44 = vsel %vm7944_vm12, %v2918_v63, %v2920_v51  ;;  %v2934_v61 = vpop.permute.xlu1 %2933  ;;  %vm8146_vm12 = vcmask 64512  }
 0xf0f   : > { %2976 = vmatpush1.bf16.msra.mxu1 %v2923_v44  ;;  %v2936_v31 = vsel %vm2703_vm3, %v2934_v61, %v6606_v60  ;;  %vm8147_vm15 = vmmov %vm8146_vm12 }
 0xf10   : > { %5185 = vmatprep.subr.msk.bf16.mxu1 %vm2626_vm7, %v6619_v62 }
 0xf11   : > { %v2932_v24 = vpop.permute.xlu0 %2931 }
 0xf12   : > { %v2935_v34 = vsel %vm2703_vm3, %v2932_v24, %v2934_v61 }
 0xf13   : > { %2978 = vmatpush1.bf16.msra.mxu1 %v2862_v55 }
 0xf14   : > { %2979 = vmatprep.subr.bf16.mxu1 %v2927_v17  ;;  %v8142_v17 = vmov 0  }
 0xf15   : > { %v3050_v61 = vsel %vm3049_vm14, 65537, %v8142_v17 }
 0xf17   : > { %2980 = vmatpush1.bf16.msra.mxu1 %v2875_v25 }
 0xf18   : > { %2981 = vmatprep.subr.bf16.mxu1 %v2936_v31 }
 0xf1b   : > { %2982 = vmatpush1.bf16.msra.mxu1 %v2935_v34  ;;  %v3054_v34 = vrot.slane %v3050_v61, %v5648_v9 }
 0xf1e   : > { %2998 = vmatmul.mubr.bf16.vlgmr.msra.gmra.mrb[12].mxu1 %v5336_v0  ;;  %v3058_v0 = vrot.slane %v3050_v61, %v5653_v10 }
 0xf1f   : > { %v2946_v62 = vpop.permute.xlu1 %2945 }
 0xf22   : > { %v2951_v22 = vpop.permute.xlu0 %2950 }
 0xff1   : > { %v2999_v41 = vpop.f32.mrb[12].mxu1 }
 0xff2   : > { %v3000_v1 = vadd.f32 %v2999_v41, %v2946_v62  ;;  %v3001_v36 = vpop.f32.mrb[13].mxu1 }
 0xff3   : > { %v3002_v38 = vadd.f32 %v3001_v36, %v2946_v62  ;;  %v3003_v25 = vpop.f32.mrb[14].mxu1  ;;  %v3038_v62 = vsel %vm3037_vm9, 65537, %v8142_v17 }
 0xff4   : > { %v3004_v11 = vadd.f32 %v3003_v25, %v2951_v22  ;;  %v3005_v51 = vpop.f32.mrb[15].mxu1  ;;  %v3008_v42 = vmax.f32 %v3000_v1, 0.0  ;;  %v3042_v41 = vrot.slane %v3038_v62, %v5653_v10 }
 0xff5   : > { %v3006_v45 = vadd.f32 %v3005_v51, %v2951_v22  ;;  %v3009_v44 = vmax.f32 %v3002_v38, 0.0 }
 0xff6   : > { %v3010_v63 = vmax.f32 %v3004_v11, 0.0  ;;  %vm6722_vm14 = vcmp.ne.s16.totalorder %v3042_v41, 0 }
 0xff7   : > { %v3011_v55 = vmax.f32 %v3006_v45, 0.0 }
 0xff8   : > { %v6706_v24 = vpack.c.bf16 %v3010_v63, %v3008_v42 }
 0xff9   : > { %v6708_v31 = vpack.c.bf16 %v3011_v55, %v3009_v44 }
 0xffa   : > { %3016 = vrot.lane.b32.xlu1 %v6706_v24, %s5432_s23 }
 0xffb   : > { %3018 = vrot.lane.b32.xlu0 %v6708_v31, %s5432_s23 }
 0xffe   : > { %3059 = vrot.lane.b32.xlu1 %v3054_v34, %s8143_s10 }
 0xfff   : > { %3061 = vrot.lane.b32.xlu0 %v3058_v0, %s8143_s10  ;;  %s8149_s10 = sld [smem:[#allocation12_spill]]  ;;  %v5337_v0 = vld [vmem:[%s8151_s7 + $0x4] ss:$8 sps:$4 sm:$0xff]  }
0x1005   : > { %v3136_v61 = vld [vmem:[%s8149_s10] sm:$0xff]  ;;  %v3137_v41 = vld [vmem:[%s8149_s10 + $0x8] sm:$0xff]  ;;  %s8250_s10 = smov 62  }
0x106c   : > { %v3017_v36 = vpop.permute.xlu1 %3016 }
0x106d   : > { %v3024_v22 = vsel %vm8146_vm12, 0, %v3017_v36  ;;  %v3019_v38 = vpop.permute.xlu0 %3018  ;;  %vm8148_vm12 = vcmask 130048  }
0x106e   : > { %v6728_v25 = vsel %vm8147_vm15, %v3017_v36, %v3019_v38  ;;  %3084 = vrot.lane.b32.xlu1 %v3024_v22, %s7967_s2  ;;  %5189 = vmatprep.subr.msk.bf16.mxu0 %vm6722_vm14, %v3024_v22  ;;  %v3027_v45 = vsel %vm8150_vm4, %v3019_v38, 0  ;;  %vm8152_vm4 = vcmask 916480  }
0x106f   : > { %3086 = vrot.lane.b32.xlu0 %v6728_v25, %s7967_s2  ;;  %3161 = vmatpush1.bf16.msra.mxu0 %v8142_v17 }
0x1070   : > { %v6736_v5 = vpop.permute.xlu1 %3059  ;;  %5192 = vmatprep.mubr.msk.bf16.mxu0 %vm8148_vm12, %v5337_v0 }
0x1071   : > { %v6738_v7 = vpop.permute.xlu0 %3061  ;;  %vm3075_vm9 = vcmp.ne.s16.totalorder %v6736_v5, 0 }
0x1072   : > { %v6743_v10 = vsel %vm8148_vm12, %v6736_v5, %v6738_v7  ;;  %vm3065_vm15 = vcmp.ne.s16.totalorder %v6738_v7, 0  ;;  %v3076_v55 = vsel %vm3075_vm9, %v3024_v22, 0  ;;  %v3081_v34 = vsel %vm3075_vm9, %v6728_v25, 0  ;;  %vm8153_vm12 = vmmov %vm8152_vm4 }
0x1073   : > { %vm3064_vm2 = vcmp.ne.s16.totalorder %v6743_v10, 0  ;;  %v3067_v11 = vsel %vm3065_vm15, %v6728_v25, 0  ;;  %v3078_v42 = vsel %vm3065_vm15, %v3027_v45, 0 }
0x1074   : > { %3098 = vrot.lane.b32.xlu0 %v3067_v11, %s7961_s0  ;;  %v3066_v51 = vsel %vm3064_vm2, %v3024_v22, 0  ;;  %v3077_v63 = vsel %vm3064_vm2, %v6728_v25, 0  ;;  %v3082_v44 = vsel %vm3064_vm2, %v3027_v45, 0 }
0x1075   : > { %3096 = vrot.lane.b32.xlu1 %v3066_v51, %s7961_s0 }
0x1078   : > { %3105 = vrot.lane.b32.xlu0 %v3027_v45, %s7967_s2 }
0x1079   : > { %3094 = vrot.lane.b32.xlu1 %v8142_v17, %s7961_s0 }
0x107c   : > { %3116 = vrot.lane.b32.xlu0 %v3078_v42, %s7961_s0 }
0x107d   : > { %3114 = vrot.lane.b32.xlu1 %v3077_v63, %s7961_s0 }
0x1080   : > { %3128 = vrot.lane.b32.xlu0 %v3082_v44, %s7961_s0 }
0x1081   : > { %3112 = vrot.lane.b32.xlu1 %v3076_v55, %s7961_s0  ;;  %v3071_v55 = vrot.slane %v3038_v62, %v5648_v9 }
0x1083   : > { %vm6789_vm8 = vcmp.ne.s16.totalorder %v3071_v55, 0 }
0x1084   : > { %3140 = vperm.xlu0 %5319, %v3136_v61  }
0x1085   : > { %3126 = vrot.lane.b32.xlu1 %v3081_v34, %s7961_s0 }
0x1089   : > { %3145 = vperm.xlu1 %5320, %v3137_v41  }
0x10e0   : > { %v3085_v36 = vpop.permute.xlu1 %3084 }
0x10e1   : > { %v3087_v38 = vpop.permute.xlu0 %3086  ;;  %v3088_v51 = vsel %vm2703_vm3, %v6606_v60, %v3085_v36 }
0x10e2   : > { %v3089_v11 = vsel %vm2703_vm3, %v3085_v36, %v3087_v38 }
0x10e3   : > { %3162 = vmatprep.subr.bf16.mxu0 %v3089_v11 }
0x10e4   : > { %3163 = vmatpush1.bf16.msra.mxu0 %v3088_v51  ;;  %v3073_v51 = vsel %vm6789_vm8, %v3024_v22, 0  ;;  %v3079_v22 = vsel %vm6789_vm8, %v6728_v25, 0 }
0x10e6   : > { %v3099_v42 = vpop.permute.xlu0 %3098 }
0x10e7   : > { %v3097_v63 = vpop.permute.xlu1 %3096 }
0x10e8   : > { %v3101_v44 = vsel %vm8152_vm4, %v3097_v63, %v3099_v42 }
0x10e9   : > { %3164 = vmatprep.subr.bf16.mxu0 %v3101_v44 }
0x10ea   : > { %v3106_v34 = vpop.permute.xlu0 %3105 }
0x10eb   : > { %v6785_v61 = vpop.permute.xlu1 %3094  ;;  %v3107_v9 = vsel %vm2703_vm3, %v3087_v38, %v3106_v34  ;;  %v3122_v38 = vsel %vm2703_vm3, %v3106_v34, %v6606_v60 }
0x10ec   : > { %v3100_v0 = vsel %vm8153_vm12, %v6785_v61, %v3097_v63  ;;  %vm8156_vm12 = vmmov %vm8152_vm4 }
0x10ed   : > { %3165 = vmatpush1.bf16.msra.mxu0 %v3100_v0 }
0x10ee   : > { %5190 = vmatprep.subr.msk.bf16.mxu0 %vm6722_vm14, %v6728_v25  ;;  %v3117_v62 = vpop.permute.xlu0 %3116 }
0x10ef   : > { %v3115_v36 = vpop.permute.xlu1 %3114 }
0x10f0   : > { %v3119_v63 = vsel %vm8152_vm4, %v3115_v36, %v3117_v62 }
0x10f1   : > { %3167 = vmatpush1.bf16.msra.mxu0 %v3073_v51  ;;  %v5339_v51 = vld [vmem:[%s8151_s7] ss:$8 sps:$4 sm:$0xff]   ;;  %s8195_s7 = sld [smem:[#allocation15_spill]] }
0x10f2   : > { %3168 = vmatprep.subr.bf16.mxu0 %v3107_v9  ;;  %v3129_v55 = vpop.permute.xlu0 %3128 }
0x10f3   : > { %v3113_v42 = vpop.permute.xlu1 %3112  ;;  %v3131_v0 = vsel %vm8152_vm4, %v3129_v55, %v6785_v61 }
0x10f4   : > { %v3118_v44 = vsel %vm8156_vm12, %v3113_v42, %v3115_v36  ;;  %vm8157_vm12 = vmmov %vm8152_vm4  ;;  %vm8158_vm4 = vcmask 64512  }
0x10f5   : > { %3169 = vmatpush1.bf16.msra.mxu0 %v3089_v11 }
0x10f6   : > { %3170 = vmatprep.subr.bf16.mxu0 %v3119_v63 }
0x10f7   : > { %v3127_v11 = vpop.permute.xlu1 %3126 }
0x10f8   : > { %v3130_v36 = vsel %vm8157_vm12, %v3127_v11, %v3129_v55  ;;  %vm8159_vm12 = vmmov %vm8158_vm4 }
0x10f9   : > { %3171 = vmatpush1.bf16.msra.mxu0 %v3118_v44 }
0x10fa   : > { %5191 = vmatprep.subr.msk.bf16.mxu0 %vm6722_vm14, %v3027_v45 }
0x10fd   : > { %3173 = vmatpush1.bf16.msra.mxu0 %v3079_v22 }
0x10fe   : > { %3174 = vmatprep.subr.bf16.mxu0 %v3122_v38 }
0x1101   : > { %3175 = vmatpush1.bf16.msra.mxu0 %v3107_v9 }
0x1102   : > { %3176 = vmatprep.subr.bf16.mxu0 %v3131_v0 }
0x1103   : > { %v3141_v45 = vpop.permute.xlu0 %3140 }
0x1105   : > { %3177 = vmatpush1.bf16.msra.mxu0 %v3130_v36 }
0x1108   : > { %3193 = vmatmul.mubr.bf16.vlgmr.msra.gmra.mrb[16].mxu0 %v5339_v51  ;;  %v3146_v63 = vpop.permute.xlu1 %3145 }
0x11db   : > { %v3194_v62 = vpop.f32.mrb[16].mxu0 }
0x11dc   : > { %v3195_v25 = vadd.f32 %v3194_v62, %v3141_v45  ;;  %v3196_v42 = vpop.f32.mrb[17].mxu0 }
0x11dd   : > { %v3197_v44 = vadd.f32 %v3196_v42, %v3141_v45  ;;  %v3198_v34 = vpop.f32.mrb[18].mxu0 }
0x11de   : > { %v3199_v22 = vadd.f32 %v3198_v34, %v3146_v63  ;;  %v3200_v38 = vpop.f32.mrb[19].mxu0  ;;  %v3203_v9 = vmax.f32 %v3195_v25, 0.0 }
0x11df   : > { %v3201_v23 = vadd.f32 %v3200_v38, %v3146_v63  ;;  %v3204_v46 = vmax.f32 %v3197_v44, 0.0  ;;  %v5340_v63 = vld [vmem:[%s8161_s22 + $0x4] ss:$8 sps:$4 sm:$0xff]  }
0x11e0   : > { %v3205_v27 = vmax.f32 %v3199_v22, 0.0 }
0x11e1   : > { %v3206_v40 = vmax.f32 %v3201_v23, 0.0 }
0x11e2   : > { %v3207_v0 = vpack.c.bf16 %v3205_v27, %v3203_v9 }
0x11e3   : > { %v3208_v14 = vpack.c.bf16 %v3206_v40, %v3204_v46 }
0x11e4   : > { %3211 = vrot.lane.b32.xlu0 %v3207_v0, %s5432_s23 }
0x11e5   : > { %3213 = vrot.lane.b32.xlu1 %v3208_v14, %s5432_s23  ;;  %s8160_s23 = sld [smem:[#allocation14_spill]] }
0x11eb   : > { %v3286_v42 = vld [vmem:[%s8160_s23] sm:$0xff]  ;;  %v3287_v7 = vld [vmem:[%s8160_s23 + $0x8] sm:$0xff] }
0x1256   : > { %v3212_v55 = vpop.permute.xlu0 %3211 }
0x1257   : > { %v3218_v11 = vsel %vm8158_vm4, 0, %v3212_v55  ;;  %v3214_v36 = vpop.permute.xlu1 %3213 }
0x1258   : > { %v3215_v51 = vsel %vm8159_vm12, %v3212_v55, %v3214_v36  ;;  %3236 = vrot.lane.b32.xlu0 %v3218_v11, %s7967_s2  ;;  %5195 = vmatprep.subr.msk.bf16.mxu1 %vm6722_vm14, %v3218_v11  ;;  %v3224_v23 = vsel %vm3064_vm2, %v3218_v11, 0  ;;  %v3221_v27 = vsel %vm8158_vm4, %v3214_v36, 0  ;;  %v3228_v45 = vsel %vm3075_vm9, %v3218_v11, 0 }
0x1259   : > { %3238 = vrot.lane.b32.xlu1 %v3215_v51, %s7967_s2  ;;  %3311 = vmatpush1.bf16.msra.mxu1 %v8142_v17  ;;  %v3225_v14 = vsel %vm3065_vm15, %v3215_v51, 0  ;;  %v3229_v40 = vsel %vm3064_vm2, %v3215_v51, 0  ;;  %v3230_v46 = vsel %vm3065_vm15, %v3221_v27, 0  ;;  %v3234_v62 = vsel %vm3064_vm2, %v3221_v27, 0 }
0x125a   : > { %v3233_v25 = vsel %vm3075_vm9, %v3215_v51, 0  ;;  %vm8162_vm15 = vcmask 130048   ;;  %vm8163_vm2 = vcmask 916480   ;;  %v3226_v55 = vsel %vm6789_vm8, %v3218_v11, 0 }
0x125b   : > { %5198 = vmatprep.mubr.msk.bf16.mxu1 %vm8162_vm15, %v5340_v63  ;;  %vm8164_vm9 = vmmov %vm8163_vm2  ;;  %v3231_v11 = vsel %vm6789_vm8, %v3215_v51, 0  ;;  %v5342_v63 = vld [vmem:[%s8161_s22] ss:$8 sps:$4 sm:$0xff]   ;;  %vm8168_vm8 = vcmask 556032  }
0x125c   : > { %3246 = vrot.lane.b32.xlu0 %v3224_v23, %s7961_s0  ;;  %vm8165_vm12 = vmmov %vm8163_vm2 }
0x125d   : > { %3248 = vrot.lane.b32.xlu1 %v3225_v14, %s7961_s0  ;;  %vm8166_vm4 = vmmov %vm8163_vm2 }
0x125e   : > { %vm8167_vm15 = vmmov %vm8163_vm2 }
0x1260   : > { %3255 = vrot.lane.b32.xlu0 %v3221_v27, %s7967_s2 }
0x1261   : > { %3264 = vrot.lane.b32.xlu1 %v3229_v40, %s7961_s0 }
0x1264   : > { %3266 = vrot.lane.b32.xlu0 %v3230_v46, %s7961_s0 }
0x1265   : > { %3262 = vrot.lane.b32.xlu1 %v3228_v45, %s7961_s0 }
0x1268   : > { %3278 = vrot.lane.b32.xlu0 %v3234_v62, %s7961_s0 }
0x1269   : > { %3276 = vrot.lane.b32.xlu1 %v3233_v25, %s7961_s0  ;;  %s8171_s0 = smov 64  }
0x126c   : > { %3290 = vperm.xlu0 %5319, %v3286_v42  }
0x126d   : > { %3295 = vperm.xlu1 %5320, %v3287_v7  }
0x1270   : > { %3463 = vrot.lane.b32.xlu0 %v6706_v24, %s7963_s15 }
0x1271   : > { %3465 = vrot.lane.b32.xlu1 %v6708_v31, %s7963_s15 }
0x12ca   : > { %v3237_v10 = vpop.permute.xlu0 %3236 }
0x12cb   : > { %v3239_v44 = vpop.permute.xlu1 %3238  ;;  %v3240_v34 = vsel %vm2703_vm3, %v6606_v60, %v3237_v10 }
0x12cc   : > { %v3241_v5 = vsel %vm2703_vm3, %v3237_v10, %v3239_v44 }
0x12cd   : > { %3312 = vmatprep.subr.bf16.mxu1 %v3241_v5 }
0x12ce   : > { %v3247_v22 = vpop.permute.xlu0 %3246  ;;  %3313 = vmatpush1.bf16.msra.mxu1 %v3240_v34 }
0x12cf   : > { %v3249_v38 = vpop.permute.xlu1 %3248  ;;  %v3250_v24 = vsel %vm8164_vm9, %v6785_v61, %v3247_v22  ;;  %vm8170_vm9 = vmmov %vm8168_vm8 }
0x12d0   : > { %v3251_v9 = vsel %vm8163_vm2, %v3247_v22, %v3249_v38 }
0x12d1   : > { %3314 = vmatprep.subr.bf16.mxu1 %v3251_v9 }
0x12d2   : > { %v3256_v0 = vpop.permute.xlu0 %3255  ;;  %3315 = vmatpush1.bf16.msra.mxu1 %v3250_v24 }
0x12d3   : > { %5196 = vmatprep.subr.msk.bf16.mxu1 %vm6722_vm14, %v3215_v51  ;;  %v3265_v31 = vpop.permute.xlu1 %3264  ;;  %v3257_v36 = vsel %vm2703_vm3, %v3239_v44, %v3256_v0  ;;  %v3272_v45 = vsel %vm2703_vm3, %v3256_v0, %v6606_v60 }
0x12d6   : > { %3317 = vmatpush1.bf16.msra.mxu1 %v3226_v55  ;;  %v3267_v23 = vpop.permute.xlu0 %3266 }
0x12d7   : > { %3318 = vmatprep.subr.bf16.mxu1 %v3257_v36  ;;  %v3263_v14 = vpop.permute.xlu1 %3262  ;;  %v3269_v40 = vsel %vm8165_vm12, %v3265_v31, %v3267_v23  ;;  %vm8174_vm12 = vcmp.ne.s16.totalorder %v6551_v35, 0 }
0x12d8   : > { %v3268_v46 = vsel %vm8166_vm4, %v3263_v14, %v3265_v31  ;;  %vm8176_vm4 = vcmp.ne.s16.totalorder %v6538_v58, 0 }
0x12da   : > { %3319 = vmatpush1.bf16.msra.mxu1 %v3241_v5  ;;  %v3279_v62 = vpop.permute.xlu0 %3278 }
0x12db   : > { %3320 = vmatprep.subr.bf16.mxu1 %v3269_v40  ;;  %v3277_v25 = vpop.permute.xlu1 %3276  ;;  %v3281_v42 = vsel %vm8167_vm15, %v3279_v62, %v6785_v61  ;;  %vm8177_vm15 = vcmp.ne.s16.totalorder %v6536_v43, 0 }
0x12dc   : > { %v3280_v7 = vsel %vm8163_vm2, %v3277_v25, %v3279_v62  ;;  %vm8179_vm2 = vcmask 130048  }
0x12de   : > { %3321 = vmatpush1.bf16.msra.mxu1 %v3268_v46 }
0x12df   : > { %5197 = vmatprep.subr.msk.bf16.mxu1 %vm6722_vm14, %v3221_v27  ;;  %vm8169_vm14 = vmmov %vm8168_vm8 }
0x12e2   : > { %3323 = vmatpush1.bf16.msra.mxu1 %v3231_v11 }
0x12e3   : > { %3324 = vmatprep.subr.bf16.mxu1 %v3272_v45 }
0x12e6   : > { %3325 = vmatpush1.bf16.msra.mxu1 %v3257_v36 }
0x12e7   : > { %3326 = vmatprep.subr.bf16.mxu1 %v3281_v42 }
0x12ea   : > { %3327 = vmatpush1.bf16.msra.mxu1 %v3280_v7 }
0x12eb   : > { %v3291_v1 = vpop.permute.xlu0 %3290 }
0x12ec   : > { %v3296_v27 = vpop.permute.xlu1 %3295 }
0x12ed   : > { %3343 = vmatmul.mubr.bf16.vlgmr.msra.gmra.mrb[16].mxu1 %v5342_v63 }
0x12ef   : > { %v3464_v41 = vpop.permute.xlu0 %3463 }
0x12f0   : > { %v3470_v51 = vsel %vm8168_vm8, 0, %v3464_v41  ;;  %v3466_v10 = vpop.permute.xlu1 %3465 }
0x12f1   : > { %v6877_v44 = vsel %vm8169_vm14, %v3464_v41, %v3466_v10  ;;  %v3475_v5 = vsel %vm2625_vm11, %v3470_v51, 0  ;;  %v6887_v11 = vsel %vm8170_vm9, %v3466_v10, 0  ;;  %v3477_v25 = vsel %vm2649_vm10, %v3470_v51, 0  ;;  %vm8180_vm14 = vmmov %vm8168_vm8 }
0x12f2   : > { %5201 = vmatprep.subr.msk.bf16.mxu0 %vm2626_vm7, %v6877_v44  ;;  %v3478_v45 = vsel %vm2650_vm6, %v6877_v44, 0  ;;  %v3479_v62 = vsel %vm2651_vm0, %v6887_v11, 0  ;;  %v3481_v42 = vsel %vm2661_vm5, %v6877_v44, 0  ;;  %v3482_v7 = vsel %vm2662_vm1, %v6887_v11, 0  ;;  %vm8182_vm9 = vmmov %vm8168_vm8 }
0x12f3   : > { %3578 = vmatpush1.bf16.msra.mxu0 %v3475_v5  ;;  %v3480_v63 = vsel %vm2660_vm13, %v3470_v51, 0  ;;  %v3483_v41 = vsel %vm8177_vm15, %v3470_v51, 0  ;;  %v3489_v10 = vsel %vm2650_vm6, %v6887_v11, 0  ;;  %vm8185_vm15 = vcmask 523264  }
0x13c0   : > { %v3344_v61 = vpop.f32.mrb[16].mxu1 }
0x13c1   : > { %v3345_v34 = vadd.f32 %v3344_v61, %v3291_v1  ;;  %v3346_v22 = vpop.f32.mrb[17].mxu1  ;;  %v3488_v61 = vsel %vm2649_vm10, %v6877_v44, 0 }
0x13c2   : > { %v3347_v38 = vadd.f32 %v3346_v22, %v3291_v1  ;;  %v3348_v9 = vpop.f32.mrb[18].mxu1  ;;  %v3484_v1 = vsel %vm8174_vm12, %v6877_v44, 0  ;;  %vm8183_vm12 = vcmask 1014784  }
0x13c3   : > { %v3349_v24 = vadd.f32 %v3348_v9, %v3296_v27  ;;  %v3350_v0 = vpop.f32.mrb[19].mxu1  ;;  %v3353_v55 = vmax.f32 %v3345_v34, 0.0 }
0x13c4   : > { %v3351_v31 = vadd.f32 %v3350_v0, %v3296_v27  ;;  %v3354_v23 = vmax.f32 %v3347_v38, 0.0  ;;  %v3485_v27 = vsel %vm8176_vm4, %v6887_v11, 0  ;;  %vm8184_vm4 = vmmov %vm8183_vm12 }
0x13c5   : > { %v3355_v36 = vmax.f32 %v3349_v24, 0.0 }
0x13c6   : > { %v3356_v14 = vmax.f32 %v3351_v31, 0.0 }
0x13c7   : > { %v3357_v40 = vpack.c.bf16 %v3355_v36, %v3353_v55 }
0x13c8   : > { %v3358_v46 = vpack.c.bf16 %v3356_v14, %v3354_v23 }
0x13c9   : > { %3361 = vrot.lane.b32.xlu0 %v3357_v40, %s7963_s15 }
0x13ca   : > { %3363 = vrot.lane.b32.xlu1 %v3358_v46, %s7963_s15  ;;  %s8172_s15 = sld [smem:[#allocation16_spill]] }
0x13cd   : > { %3494 = vrot.lane.b32.xlu0 %v6877_v44, %s7965_s16 }
0x13ce   : > { %3496 = vrot.lane.b32.xlu1 %v6887_v11, %s7965_s16 }
0x13d0   : > { %v5343_v5 = vld [vmem:[%s8172_s15 + $0x4] ss:$8 sps:$4 sm:$0xff]  }
0x13d1   : > { %3492 = vrot.lane.b32.xlu0 %v3470_v51, %s7965_s16  ;;  %s8173_s16 = smov 60   ;;  %5203 = vmatprep.mubr.msk.bf16.mxu0 %vm8179_vm2, %v5343_v5  ;;  %vm8186_vm2 = vmmov %vm8185_vm15 }
0x13d2   : > { %3507 = vrot.lane.b32.xlu1 %v3478_v45, %s7967_s2 }
0x13d5   : > { %3509 = vrot.lane.b32.xlu0 %v3479_v62, %s7967_s2 }
0x13d6   : > { %3505 = vrot.lane.b32.xlu1 %v3477_v25, %s7967_s2  ;;  %s8175_s2 = smov 56  }
0x13d9   : > { %3520 = vrot.lane.b32.xlu0 %v3481_v42, %s8171_s0 }
0x13da   : > { %3522 = vrot.lane.b32.xlu1 %v3482_v7, %s8171_s0 }
0x13dd   : > { %3518 = vrot.lane.b32.xlu0 %v3480_v63, %s8171_s0 }
0x13de   : > { %3530 = vrot.lane.b32.xlu1 %v6877_v44, %s8173_s16 }
0x13e1   : > { %3532 = vrot.lane.b32.xlu0 %v6887_v11, %s8173_s16 }
0x13e2   : > { %3528 = vrot.lane.b32.xlu1 %v3470_v51, %s8173_s16 }
0x13e5   : > { %3543 = vrot.lane.b32.xlu0 %v3484_v1, %s8175_s2 }
0x13e6   : > { %3545 = vrot.lane.b32.xlu1 %v3485_v27, %s8175_s2 }
0x13e9   : > { %3541 = vrot.lane.b32.xlu0 %v3483_v41, %s8175_s2 }
0x13ea   : > { %3557 = vrot.lane.b32.xlu1 %v3489_v10, %s8178_s3 }
0x13ed   : > { %3555 = vrot.lane.b32.xlu0 %v3488_v61, %s8178_s3 }
0x143b   : > { %v3362_v34 = vpop.permute.xlu0 %3361 }
0x143c   : > { %v6943_v51 = vsel %vm8168_vm8, 0, %v3362_v34  ;;  %v3364_v22 = vpop.permute.xlu1 %3363  ;;  %vm8187_vm8 = vcmp.ne.s16.totalorder %v6551_v35, 0 }
0x143d   : > { %v6946_v38 = vsel %vm8180_vm14, %v3364_v22, 0  ;;  %3390 = vrot.lane.b32.xlu1 %v6943_v51, %s8181_s5  ;;  %v6953_v24 = vsel %vm8182_vm9, %v3362_v34, %v3364_v22  ;;  %v3375_v31 = vsel %vm2649_vm10, %v6943_v51, 0  ;;  %v3378_v40 = vsel %vm2660_vm13, %v6943_v51, 0 }
0x143e   : > { %3394 = vrot.lane.b32.xlu0 %v6946_v38, %s8181_s5  ;;  %v3377_v62 = vsel %vm2651_vm0, %v6946_v38, 0  ;;  %v3376_v7 = vsel %vm2650_vm6, %v6953_v24, 0  ;;  %v3379_v27 = vsel %vm2661_vm5, %v6953_v24, 0  ;;  %v3380_v41 = vsel %vm2662_vm1, %v6946_v38, 0 }
0x143f   : > { %v3495_v9 = vpop.permute.xlu0 %3494  ;;  %vm8188_vm14 = vcmask 490496  }
0x1440   : > { %v6955_v0 = vpop.permute.xlu1 %3496  ;;  %vm8189_vm9 = vmmov %vm8188_vm14 }
0x1441   : > { %3392 = vrot.lane.b32.xlu1 %v6953_v24, %s8181_s5  ;;  %v6964_v55 = vsel %vm8183_vm12, %v3495_v9, %v6955_v0  ;;  %vm8191_vm12 = vcmp.ne.s16.totalorder %v6538_v58, 0 }
0x1442   : > { %3403 = vrot.lane.b32.xlu0 %v3375_v31, %s8178_s3  ;;  %3579 = vmatprep.subr.bf16.mxu0 %v6964_v55  ;;  %v3382_v31 = vsel %vm8187_vm8, %v6953_v24, 0  ;;  %vm8196_vm8 = vcmask 1014784  }
0x1443   : > { %v3493_v36 = vpop.permute.xlu0 %3492 }
0x1444   : > { %v3498_v23 = vsel %vm8184_vm4, %v3493_v36, %v3495_v9  ;;  %v3508_v14 = vpop.permute.xlu1 %3507  ;;  %vm8192_vm4 = vcmp.ne.s16.totalorder %v6536_v43, 0 }
0x1445   : > { %3416 = vrot.lane.b32.xlu1 %v3378_v40, %s8171_s0  ;;  %3580 = vmatpush1.bf16.msra.mxu0 %v3498_v23 }
0x1446   : > { %3428 = vrot.lane.b32.xlu0 %v6953_v24, %s8173_s16 }
0x1447   : > { %v3510_v46 = vpop.permute.xlu0 %3509 }
0x1448   : > { %v3506_v45 = vpop.permute.xlu1 %3505  ;;  %v3512_v25 = vsel %vm2703_vm3, %v3508_v14, %v3510_v46 }
0x1449   : > { %v3511_v42 = vsel %vm2703_vm3, %v3506_v45, %v3508_v14  ;;  %3407 = vrot.lane.b32.xlu1 %v3377_v62, %s8178_s3  ;;  %3581 = vmatprep.subr.bf16.mxu0 %v3512_v25  ;;  %v3383_v14 = vsel %vm8191_vm12, %v6946_v38, 0  ;;  %v3381_v45 = vsel %vm8192_vm4, %v6943_v51, 0  ;;  %v3387_v62 = vsel %vm2650_vm6, %v6946_v38, 0  ;;  %vm8199_vm12 = vmmov %vm8196_vm8 }
0x144a   : > { %3405 = vrot.lane.b32.xlu0 %v3376_v7, %s8178_s3  ;;  %3582 = vmatpush1.bf16.msra.mxu0 %v3511_v42  ;;  %v3675_v7 = vld [vmem:[%s8190_s6] sm:$0xff]  ;;  %vm8200_vm4 = vcmask 523264  }
0x144b   : > { %v3521_v63 = vpop.permute.xlu0 %3520 }
0x144c   : > { %v3523_v1 = vpop.permute.xlu1 %3522 }
0x144d   : > { %3418 = vrot.lane.b32.xlu1 %v3379_v27, %s8171_s0  ;;  %v3525_v10 = vsel %vm8185_vm15, %v3521_v63, %v3523_v1  ;;  %vm8193_vm15 = vcmask 457728   ;;  %v3386_v1 = vsel %vm2649_vm10, %v6953_v24, 0  ;;  %v3676_v27 = vld [vmem:[%s8190_s6 + $0x8] sm:$0xff]  ;;  %s8206_s6 = smov 68  }
0x144e   : > { %3420 = vrot.lane.b32.xlu0 %v3380_v41, %s8171_s0  ;;  %3583 = vmatprep.subr.bf16.mxu0 %v3525_v10  ;;  %v3486_v41 = vsel %vm2625_vm11, %v6877_v44, 0  ;;  %v3551_v10 = vsel %vm8196_vm8, %v6955_v0, %v6595_v53  ;;  %v5346_v44 = vld [vmem:[%s8195_s7 + $0x4] ss:$8 sps:$4 sm:$0xff]   ;;  %v3373_v0 = vsel %vm2625_vm11, %v6943_v51, 0 }
0x144f   : > { %v3519_v5 = vpop.permute.xlu0 %3518 }
0x1450   : > { %v3524_v61 = vsel %vm8186_vm2, %v3519_v5, %v3521_v63  ;;  %v3531_v34 = vpop.permute.xlu1 %3530  ;;  %vm8194_vm2 = vmmov %vm8193_vm15 }
0x1451   : > { %3430 = vrot.lane.b32.xlu1 %v6946_v38, %s8173_s16  ;;  %3584 = vmatpush1.bf16.msra.mxu0 %v3524_v61 }
0x1452   : > { %3426 = vrot.lane.b32.xlu0 %v6943_v51, %s8173_s16 }
0x1453   : > { %v3533_v22 = vpop.permute.xlu0 %3532 }
0x1454   : > { %v3529_v9 = vpop.permute.xlu1 %3528  ;;  %v3535_v36 = vsel %vm8188_vm14, %v3531_v34, %v3533_v22  ;;  %v5345_v22 = vld [vmem:[%s8172_s15] ss:$8 sps:$4 sm:$0xff]   ;;  %vm8197_vm14 = vcmask 130048  }
0x1455   : > { %v3534_v23 = vsel %vm8189_vm9, %v3529_v9, %v3531_v34  ;;  %3441 = vrot.lane.b32.xlu1 %v3382_v31, %s8175_s2  ;;  %3585 = vmatprep.subr.bf16.mxu0 %v3535_v36  ;;  %vm8198_vm9 = vmmov %vm8196_vm8 }
0x1456   : > { %3443 = vrot.lane.b32.xlu0 %v3383_v14, %s8175_s2  ;;  %3586 = vmatpush1.bf16.msra.mxu0 %v3534_v23 }
0x1457   : > { %v3544_v40 = vpop.permute.xlu0 %3543 }
0x1458   : > { %v3546_v46 = vpop.permute.xlu1 %3545 }
0x1459   : > { %3439 = vrot.lane.b32.xlu1 %v3381_v45, %s8175_s2  ;;  %v3548_v25 = vsel %vm8193_vm15, %v3544_v40, %v3546_v46  ;;  %vm8201_vm15 = vmmov %vm8200_vm4 }
0x145a   : > { %3455 = vrot.lane.b32.xlu0 %v3387_v62, %s8178_s3  ;;  %3587 = vmatprep.subr.bf16.mxu0 %v3548_v25 }
0x145b   : > { %v3542_v42 = vpop.permute.xlu0 %3541 }
0x145c   : > { %v3547_v63 = vsel %vm8194_vm2, %v3542_v42, %v3544_v40  ;;  %v3558_v5 = vpop.permute.xlu1 %3557  ;;  %vm8202_vm2 = vcmask 490496  }
0x145d   : > { %3453 = vrot.lane.b32.xlu1 %v3386_v1, %s8178_s3  ;;  %3588 = vmatpush1.bf16.msra.mxu0 %v3547_v63  ;;  %v3560_v34 = vsel %vm2703_vm3, %v3558_v5, %v6606_v60  ;;  %vm8203_vm8 = vmmov %vm8202_vm2 }
0x145e   : > { %3679 = vperm.xlu0 %5319, %v3675_v7   ;;  %5202 = vmatprep.subr.msk.bf16.mxu0 %vm2626_vm7, %v6887_v11 }
0x145f   : > { %v3556_v61 = vpop.permute.xlu0 %3555 }
0x1460   : > { %v3559_v11 = vsel %vm2703_vm3, %v3556_v61, %v3558_v5 }
0x1461   : > { %3684 = vperm.xlu1 %5320, %v3676_v27   ;;  %3590 = vmatpush1.bf16.msra.mxu0 %v3486_v41 }
0x1462   : > { %3591 = vmatprep.subr.bf16.mxu0 %v3551_v10 }
0x1465   : > { %3592 = vmatpush1.bf16.msra.mxu0 %v6964_v55 }
0x1466   : > { %3593 = vmatprep.subr.bf16.mxu0 %v3560_v34 }
0x1469   : > { %3594 = vmatpush1.bf16.msra.mxu0 %v3559_v11 }
0x146a   : > { %5206 = vmatprep.subr.msk.bf16.mxu0 %vm2626_vm7, %v6953_v24 }
0x146c   : > { %3610 = vmatmul.mubr.bf16.vlgmr.msra.gmra.mrb[20].mxu0 %v5345_v22 }
0x146d   : > { %3633 = vmatpush1.bf16.msra.mxu0 %v3373_v0  ;;  %5208 = vmatprep.mubr.msk.bf16.mxu0 %vm8197_vm14, %v5346_v44  ;;  %vm8204_vm14 = vcmask 457728   ;;  %v3384_v0 = vsel %vm2625_vm11, %v6953_v24, 0 }
0x14af   : > { %v3391_v55 = vpop.permute.xlu1 %3390 }
0x14b0   : > { %v3395_v9 = vpop.permute.xlu0 %3394 }
0x14b3   : > { %v3393_v31 = vpop.permute.xlu1 %3392 }
0x14b4   : > { %v3404_v36 = vpop.permute.xlu0 %3403  ;;  %v3397_v23 = vsel %vm8198_vm9, %v3393_v31, %v3395_v9  ;;  %v3396_v14 = vsel %vm8199_vm12, %v3391_v55, %v3393_v31  ;;  %vm8205_vm9 = vmmov %vm8204_vm14  ;;  %v3449_v55 = vsel %vm8199_vm12, %v3395_v9, %v6595_v53 }
0x14b5   : > { %3634 = vmatprep.subr.bf16.mxu0 %v3397_v23 }
0x14b6   : > { %3635 = vmatpush1.bf16.msra.mxu0 %v3396_v14 }
0x14b7   : > { %v3417_v40 = vpop.permute.xlu1 %3416 }
0x14b8   : > { %v3429_v46 = vpop.permute.xlu0 %3428 }
0x14bb   : > { %v3408_v45 = vpop.permute.xlu1 %3407 }
0x14bc   : > { %v3406_v62 = vpop.permute.xlu0 %3405 }
0x14bd   : > { %v3410_v25 = vsel %vm2703_vm3, %v3406_v62, %v3408_v45  ;;  %v3409_v51 = vsel %vm2703_vm3, %v3404_v36, %v3406_v62 }
0x14be   : > { %3636 = vmatprep.subr.bf16.mxu0 %v3410_v25 }
0x14bf   : > { %3637 = vmatpush1.bf16.msra.mxu0 %v3409_v51  ;;  %v3419_v42 = vpop.permute.xlu1 %3418 }
0x14c0   : > { %v3421_v7 = vpop.permute.xlu0 %3420  ;;  %v3422_v1 = vsel %vm8201_vm15, %v3417_v40, %v3419_v42 }
0x14c1   : > { %v3423_v63 = vsel %vm8200_vm4, %v3419_v42, %v3421_v7  ;;  %vm8207_vm4 = vcmask 556032  }
0x14c2   : > { %3638 = vmatprep.subr.bf16.mxu0 %v3423_v63  ;;  %vm8208_vm15 = vmmov %vm8207_vm4 }
0x14c3   : > { %3639 = vmatpush1.bf16.msra.mxu0 %v3422_v1  ;;  %v3431_v27 = vpop.permute.xlu1 %3430 }
0x14c4   : > { %v3427_v41 = vpop.permute.xlu0 %3426  ;;  %v3433_v10 = vsel %vm8202_vm2, %v3429_v46, %v3431_v27  ;;  %vm8209_vm2 = vmmov %vm8207_vm4 }
0x14c5   : > { %v3432_v5 = vsel %vm8203_vm8, %v3427_v41, %v3429_v46  ;;  %3640 = vmatprep.subr.bf16.mxu0 %v3433_v10  ;;  %v5348_v46 = vld [vmem:[%s8195_s7] ss:$8 sps:$4 sm:$0xff]   ;;  %s8211_s7 = sld [smem:[#allocation19_spill]] }
0x14c7   : > { %3641 = vmatpush1.bf16.msra.mxu0 %v3432_v5  ;;  %v3442_v61 = vpop.permute.xlu1 %3441 }
0x14c8   : > { %v3444_v34 = vpop.permute.xlu0 %3443 }
0x14c9   : > { %v3446_v11 = vsel %vm8204_vm14, %v3442_v61, %v3444_v34 }
0x14ca   : > { %3642 = vmatprep.subr.bf16.mxu0 %v3446_v11 }
0x14cb   : > { %v3440_v22 = vpop.permute.xlu1 %3439 }
0x14cc   : > { %v3445_v44 = vsel %vm8205_vm9, %v3440_v22, %v3442_v61  ;;  %v3456_v31 = vpop.permute.xlu0 %3455  ;;  %vm8221_vm9 = vcmask 490496  }
0x14cd   : > { %3643 = vmatpush1.bf16.msra.mxu0 %v3445_v44  ;;  %v3458_v14 = vsel %vm2703_vm3, %v3456_v31, %v6606_v60 }
0x14ce   : > { %5207 = vmatprep.subr.msk.bf16.mxu0 %vm2626_vm7, %v6946_v38 }
0x14cf   : > { %v3454_v36 = vpop.permute.xlu1 %3453 }
0x14d0   : > { %v3457_v40 = vsel %vm2703_vm3, %v3454_v36, %v3456_v31 }
0x14d1   : > { %3645 = vmatpush1.bf16.msra.mxu0 %v3384_v0 }
0x14d2   : > { %3646 = vmatprep.subr.bf16.mxu0 %v3449_v55 }
0x14d5   : > { %3647 = vmatpush1.bf16.msra.mxu0 %v3397_v23 }
0x14d6   : > { %3648 = vmatprep.subr.bf16.mxu0 %v3458_v14 }
0x14d9   : > { %3649 = vmatpush1.bf16.msra.mxu0 %v3457_v40 }
0x14dc   : > { %3665 = vmatmul.mubr.bf16.vlgmr.msra.gmra.mrb[20].mxu0 %v5348_v46 }
0x14dd   : > { %v3680_v38 = vpop.permute.xlu0 %3679 }
0x14e0   : > { %v3685_v25 = vpop.permute.xlu1 %3684 }
0x15af   : > { %v3666_v45 = vpop.f32.mrb[20].mxu0 }
0x15b0   : > { %v3687_v24 = vadd.f32 %v3680_v38, %v3666_v45  ;;  %v3668_v62 = vpop.f32.mrb[21].mxu0 }
0x15b1   : > { %v3688_v51 = vadd.f32 %v3680_v38, %v3668_v62  ;;  %v3670_v9 = vpop.f32.mrb[22].mxu0 }
0x15b2   : > { %v3689_v42 = vadd.f32 %v3685_v25, %v3670_v9  ;;  %v3672_v7 = vpop.f32.mrb[23].mxu0  ;;  %v3691_v23 = vmax.f32 %v3687_v24, 0.0 }
0x15b3   : > { %v3690_v63 = vadd.f32 %v3685_v25, %v3672_v7  ;;  %v3692_v27 = vmax.f32 %v3688_v51, 0.0 }
0x15b4   : > { %v3693_v1 = vmax.f32 %v3689_v42, 0.0 }
0x15b5   : > { %v3694_v41 = vmax.f32 %v3690_v63, 0.0 }
0x15b6   : > { %v3695_v10 = vpack.c.bf16 %v3693_v1, %v3691_v23 }
0x15b7   : > { %v3696_v5 = vpack.c.bf16 %v3694_v41, %v3692_v27 }
0x15b8   : > { %3699 = vrot.lane.b32.xlu0 %v3695_v10, %s8206_s6 }
0x15b9   : > { %3701 = vrot.lane.b32.xlu1 %v3696_v5, %s8206_s6  ;;  %s8210_s6 = sld [smem:[#allocation18_spill]] }
0x15bf   : > { %v5349_v38 = vld [vmem:[%s8210_s6 + $0x4] ss:$8 sps:$4 sm:$0xff]   ;;  %v5351_v49 = vld [vmem:[%s8210_s6] ss:$8 sps:$4 sm:$0xff]   ;;  %s8238_s6 = smov 96  }
0x162a   : > { %v3700_v61 = vpop.permute.xlu0 %3699 }
0x162b   : > { %v3706_v34 = vsel %vm8207_vm4, 0, %v3700_v61  ;;  %v3702_v11 = vpop.permute.xlu1 %3701  ;;  %vm8223_vm4 = vcmask 457728  }
0x162c   : > { %v7073_v22 = vsel %vm8208_vm15, %v3700_v61, %v3702_v11  ;;  %v7076_v44 = vsel %vm8209_vm2, %v3702_v11, 0  ;;  %3728 = vrot.lane.b32.xlu0 %v3706_v34, %s8181_s5  ;;  %v3711_v0 = vsel %vm2625_vm11, %v3706_v34, 0  ;;  %v3713_v55 = vsel %vm2649_vm10, %v3706_v34, 0  ;;  %vm8224_vm15 = vmmov %vm8223_vm4 }
0x162d   : > { %3732 = vrot.lane.b32.xlu1 %v7076_v44, %s8181_s5  ;;  %5211 = vmatprep.subr.msk.bf16.mxu1 %vm2626_vm7, %v7073_v22  ;;  %v3716_v31 = vsel %vm2660_vm13, %v3706_v34, 0  ;;  %v3715_v36 = vsel %vm2651_vm0, %v7076_v44, 0  ;;  %v3714_v14 = vsel %vm2650_vm6, %v7073_v22, 0  ;;  %v3717_v21 = vsel %vm2661_vm5, %v7073_v22, 0 }
0x162e   : > { %3826 = vmatpush1.bf16.msra.mxu1 %v3711_v0  ;;  %v3718_v29 = vsel %vm2662_vm1, %v7076_v44, 0  ;;  %vm8212_vm0 = vcmp.ne.s16.totalorder %v6551_v35, 0  ;;  %vm8213_vm5 = vcmp.ne.s16.totalorder %v6538_v58, 0  ;;  %vm8214_vm1 = vcmp.ne.s16.totalorder %v6536_v43, 0  ;;  %v3801_v35 = vld [vmem:[%s8211_s7] sm:$0xff]  ;;  %v3802_v43 = vld [vmem:[%s8211_s7 + $0x8] sm:$0xff] }
0x162f   : > { %v3720_v20 = vsel %vm8212_vm0, %v7073_v22, 0  ;;  %v3721_v40 = vsel %vm8213_vm5, %v7076_v44, 0  ;;  %v3719_v56 = vsel %vm8214_vm1, %v3706_v34, 0  ;;  %v3725_v46 = vsel %vm2650_vm6, %v7076_v44, 0  ;;  %vm8217_vm6 = vmmov %vm8199_vm12  ;;  %s8241_s7 = smov 94  }
0x1630   : > { %3730 = vrot.lane.b32.xlu0 %v7073_v22, %s8181_s5  ;;  %vm8215_vm13 = vcmask 130048   ;;  %v3724_v58 = vsel %vm2649_vm10, %v7073_v22, 0  ;;  %vm8218_vm8 = vmmov %vm8217_vm6  ;;  %vm8219_vm10 = vcmask 523264   ;;  %vm8231_vm5 = vcmp.ne.s16.totalorder %v6175_v37, 0 }
0x1631   : > { %3741 = vrot.lane.b32.xlu1 %v3713_v55, %s8178_s3  ;;  %5213 = vmatprep.mubr.msk.bf16.mxu1 %vm8215_vm13, %v5349_v38  ;;  %vm8220_vm14 = vmmov %vm8219_vm10  ;;  %vm8232_vm1 = vcmp.ne.s16.totalorder %v6232_v57, 0  ;;  %vm8233_vm13 = vcmask 1031168  }
0x1632   : > { %vm8222_vm12 = vmmov %vm8221_vm9 }
0x1633   : > { %vm8225_vm2 = vmmov %vm8217_vm6 }
0x1634   : > { %3754 = vrot.lane.b32.xlu0 %v3716_v31, %s8171_s0 }
0x1635   : > { %3766 = vrot.lane.b32.xlu1 %v7073_v22, %s8173_s16 }
0x1638   : > { %3745 = vrot.lane.b32.xlu0 %v3715_v36, %s8178_s3  ;;  %v3722_v36 = vsel %vm2625_vm11, %v7073_v22, 0  ;;  %vm8226_vm11 = vcmask 277504  }
0x1639   : > { %3743 = vrot.lane.b32.xlu1 %v3714_v14, %s8178_s3 }
0x163c   : > { %3756 = vrot.lane.b32.xlu0 %v3717_v21, %s8171_s0 }
0x163d   : > { %3758 = vrot.lane.b32.xlu1 %v3718_v29, %s8171_s0 }
0x1640   : > { %3768 = vrot.lane.b32.xlu0 %v7076_v44, %s8173_s16 }
0x1641   : > { %3764 = vrot.lane.b32.xlu1 %v3706_v34, %s8173_s16 }
0x1644   : > { %3779 = vrot.lane.b32.xlu0 %v3720_v20, %s8175_s2 }
0x1645   : > { %3781 = vrot.lane.b32.xlu1 %v3721_v40, %s8175_s2 }
0x1648   : > { %3777 = vrot.lane.b32.xlu0 %v3719_v56, %s8175_s2  ;;  %s8216_s2 = smov 34  }
0x1649   : > { %3793 = vrot.lane.b32.xlu1 %v3725_v46, %s8178_s3 }
0x164c   : > { %3791 = vrot.lane.b32.xlu0 %v3724_v58, %s8178_s3  ;;  %s8229_s3 = smov 126  }
0x164d   : > { %3805 = vperm.xlu1 %5320, %v3801_v35  }
0x1650   : > { %3810 = vperm.xlu0 %5319, %v3802_v43  }
0x1651   : > { %4004 = vrot.lane.b32.xlu1 %v6454_v32, %s8216_s2 }
0x1654   : > { %4006 = vrot.lane.b32.xlu0 %v6456_v8, %s8216_s2 }
0x169e   : > { %v3729_v50 = vpop.permute.xlu0 %3728 }
0x169f   : > { %v3733_v45 = vpop.permute.xlu1 %3732 }
0x16a0   : > { %v3787_v14 = vsel %vm8225_vm2, %v3733_v45, %v6595_v53  ;;  %vm8246_vm2 = vcmp.ne.s16.totalorder %v6237_v18, 0 }
0x16a2   : > { %v3731_v24 = vpop.permute.xlu0 %3730 }
0x16a3   : > { %v3742_v62 = vpop.permute.xlu1 %3741  ;;  %v3735_v25 = vsel %vm8217_vm6, %v3731_v24, %v3733_v45  ;;  %v3734_v13 = vsel %vm8218_vm8, %v3729_v50, %v3731_v24  ;;  %vm8234_vm6 = vmmov %vm8233_vm13  ;;  %vm8235_vm8 = vcmp.ne.s16.totalorder %v6214_v54, 0 }
0x16a4   : > { %3827 = vmatprep.subr.bf16.mxu1 %v3735_v25 }
0x16a5   : > { %3828 = vmatpush1.bf16.msra.mxu1 %v3734_v13 }
0x16a6   : > { %v3755_v51 = vpop.permute.xlu0 %3754 }
0x16a7   : > { %v3767_v9 = vpop.permute.xlu1 %3766 }
0x16aa   : > { %v3746_v42 = vpop.permute.xlu0 %3745 }
0x16ab   : > { %v3744_v7 = vpop.permute.xlu1 %3743 }
0x16ac   : > { %v3748_v63 = vsel %vm2703_vm3, %v3744_v7, %v3746_v42  ;;  %v3747_v32 = vsel %vm2703_vm3, %v3742_v62, %v3744_v7 }
0x16ad   : > { %3829 = vmatprep.subr.bf16.mxu1 %v3748_v63 }
0x16ae   : > { %v3757_v8 = vpop.permute.xlu0 %3756  ;;  %3830 = vmatpush1.bf16.msra.mxu1 %v3747_v32 }
0x16af   : > { %v3759_v23 = vpop.permute.xlu1 %3758  ;;  %v3760_v27 = vsel %vm8220_vm14, %v3755_v51, %v3757_v8  ;;  %vm8237_vm14 = vcmp.ne.s16.totalorder %v6262_v6, 0 }
0x16b0   : > { %v3761_v1 = vsel %vm8219_vm10, %v3757_v8, %v3759_v23  ;;  %vm8236_vm10 = vcmp.ne.s16.totalorder %v6208_v52, 0 }
0x16b1   : > { %3831 = vmatprep.subr.bf16.mxu1 %v3761_v1 }
0x16b2   : > { %v3769_v41 = vpop.permute.xlu0 %3768  ;;  %3832 = vmatpush1.bf16.msra.mxu1 %v3760_v27 }
0x16b3   : > { %v3765_v10 = vpop.permute.xlu1 %3764  ;;  %v3771_v5 = vsel %vm8221_vm9, %v3767_v9, %v3769_v41  ;;  %vm8239_vm9 = vcmp.ne.s16.totalorder %v6235_v2, 0 }
0x16b4   : > { %v3770_v61 = vsel %vm8222_vm12, %v3765_v10, %v3767_v9  ;;  %3833 = vmatprep.subr.bf16.mxu1 %v3771_v5  ;;  %vm8240_vm12 = vcmp.ne.s16.totalorder %v6220_v47, 0 }
0x16b6   : > { %v3780_v34 = vpop.permute.xlu0 %3779  ;;  %3834 = vmatpush1.bf16.msra.mxu1 %v3770_v61 }
0x16b7   : > { %v3782_v11 = vpop.permute.xlu1 %3781 }
0x16b8   : > { %v3784_v0 = vsel %vm8223_vm4, %v3780_v34, %v3782_v11  ;;  %vm8243_vm4 = vcmp.ne.s16.totalorder %v6293_v15, 0 }
0x16b9   : > { %3835 = vmatprep.subr.bf16.mxu1 %v3784_v0 }
0x16ba   : > { %v3778_v55 = vpop.permute.xlu0 %3777 }
0x16bb   : > { %v3783_v31 = vsel %vm8224_vm15, %v3778_v55, %v3780_v34  ;;  %v3794_v21 = vpop.permute.xlu1 %3793  ;;  %vm8245_vm15 = vcmp.ne.s16.totalorder %v6249_v4, 0 }
0x16bc   : > { %3836 = vmatpush1.bf16.msra.mxu1 %v3783_v31  ;;  %v3796_v20 = vsel %vm2703_vm3, %v3794_v21, %v6606_v60 }
0x16bd   : > { %5212 = vmatprep.subr.msk.bf16.mxu1 %vm2626_vm7, %v7076_v44  ;;  %vm8227_vm7 = vmmov %vm8226_vm11 }
0x16be   : > { %v3792_v29 = vpop.permute.xlu0 %3791  ;;  %vm8228_vm0 = vmmov %vm8227_vm7 }
0x16bf   : > { %v3795_v40 = vsel %vm2703_vm3, %v3792_v29, %v3794_v21  ;;  %vm8230_vm3 = vcmp.ne.s16.totalorder %v6178_v39, 0  ;;  %v5352_v29 = vld [vmem:[%s8242_s8 + $0x4] ss:$8 sps:$4 sm:$0xff]  }
0x16c0   : > { %3838 = vmatpush1.bf16.msra.mxu1 %v3722_v36 }
0x16c1   : > { %3839 = vmatprep.subr.bf16.mxu1 %v3787_v14 }
0x16c4   : > { %3840 = vmatpush1.bf16.msra.mxu1 %v3735_v25 }
0x16c5   : > { %3841 = vmatprep.subr.bf16.mxu1 %v3796_v20 }
0x16c8   : > { %3842 = vmatpush1.bf16.msra.mxu1 %v3795_v40 }
0x16cb   : > { %3858 = vmatmul.mubr.bf16.vlgmr.msra.gmra.mrb[20].mxu1 %v5351_v49 }
0x16cc   : > { %v3806_v44 = vpop.permute.xlu1 %3805 }
0x16cf   : > { %v3811_v48 = vpop.permute.xlu0 %3810 }
0x16d0   : > { %v4005_v22 = vpop.permute.xlu1 %4004 }
0x16d1   : > { %v7165_v56 = vsel %vm8226_vm11, 0, %v4005_v22  ;;  %vm8247_vm11 = vcmp.ne.s16.totalorder %v6287_v12, 0 }
0x16d2   : > { %v4016_v60 = vsel %vm8231_vm5, %v7165_v56, 0  ;;  %v4018_v5 = vsel %vm8236_vm10, %v7165_v56, 0  ;;  %v4021_v11 = vsel %vm8240_vm12, %v7165_v56, 0  ;;  %v4024_v31 = vsel %vm8246_vm2, %v7165_v56, 0 }
0x16d3   : > { %v4007_v53 = vpop.permute.xlu0 %4006  ;;  %vm8252_vm5 = vcmp.ne.s16.totalorder %v6318_v30, 0  ;;  %vm8257_vm10 = vcmask 1014784   ;;  %vm8260_vm12 = vcmp.ne.s16.totalorder %v6208_v52, 0 }
0x16d4   : > { %v7168_v46 = vsel %vm8227_vm7, %v4005_v22, %v4007_v53  ;;  %v7171_v38 = vsel %vm8228_vm0, %v4007_v53, 0  ;;  %vm8248_vm7 = vcmp.ne.s16.totalorder %v6274_v19, 0  ;;  %vm8249_vm0 = vcmp.ne.s16.totalorder %v6256_v59, 0 }
0x16d5   : > { %4039 = vrot.lane.b32.xlu0 %v7171_v38, %s8229_s3  ;;  %4037 = vrot.lane.b32.xlu1 %v7168_v46, %s8229_s3  ;;  %v4019_v35 = vsel %vm8232_vm1, %v7168_v46, 0  ;;  %v4020_v10 = vsel %vm8235_vm8, %v7171_v38, 0  ;;  %v4022_v61 = vsel %vm8237_vm14, %v7168_v46, 0  ;;  %v4023_v34 = vsel %vm8239_vm9, %v7171_v38, 0  ;;  %vm8259_vm9 = vmmov %vm8257_vm10 }
0x16d6   : > { %5216 = vmatprep.subr.msk.bf16.mxu1 %vm8230_vm3, %v7168_v46  ;;  %v4025_v0 = vsel %vm8243_vm4, %v7168_v46, 0  ;;  %v4026_v55 = vsel %vm8245_vm15, %v7171_v38, 0  ;;  %v4028_v36 = vsel %vm8247_vm11, %v7168_v46, 0  ;;  %v4029_v14 = vsel %vm8248_vm7, %v7171_v38, 0 }
0x16d7   : > { %4145 = vmatpush1.bf16.msra.mxu1 %v4016_v60  ;;  %v4027_v21 = vsel %vm8249_vm0, %v7165_v56, 0  ;;  %vm8251_vm3 = vcmask 130048   ;;  %v4031_v20 = vsel %vm8252_vm5, %v7168_v46, 0  ;;  %vm8253_vm1 = vcmp.ne.s16.totalorder %v6305_v28, 0 }
0x16d8   : > { %5217 = vmatprep.mubr.msk.bf16.mxu1 %vm8251_vm3, %v5352_v29  ;;  %v4032_v40 = vsel %vm8253_vm1, %v7171_v38, 0  ;;  %vm8261_vm4 = vcmp.ne.s16.totalorder %v6220_v47, 0  ;;  %vm8262_vm15 = vcmask 785408   ;;  %vm8264_vm11 = vcmp.ne.s16.totalorder %v6232_v57, 0 }
0x16d9   : > { %4035 = vrot.lane.b32.xlu1 %v7165_v56, %s8229_s3  ;;  %4050 = vrot.lane.b32.xlu0 %v4019_v35, %s8181_s5  ;;  %vm8263_vm2 = vmmov %vm8262_vm15  ;;  %vm8265_vm7 = vcmask 769024   ;;  %vm8267_vm3 = vcmp.ne.s16.totalorder %v6237_v18, 0  ;;  %vm8268_vm5 = vcmp.ne.s16.totalorder %v6235_v2, 0  ;;  %vm8269_vm1 = vcmp.ne.s16.totalorder %v6214_v54, 0 }
0x16da   : > { %vm8266_vm0 = vmmov %vm8265_vm7 }
0x1747   : > { %v4040_v58 = vpop.permute.xlu0 %4039  ;;  %v4038_v43 = vpop.permute.xlu1 %4037 }
0x1748   : > { %v4042_v50 = vsel %vm8233_vm13, %v4038_v43, %v4040_v58  ;;  %vm8254_vm13 = vcmp.ne.s16.totalorder %v6303_v26, 0 }
0x1749   : > { %4146 = vmatprep.subr.bf16.mxu1 %v4042_v50  ;;  %v4030_v49 = vsel %vm8254_vm13, %v7165_v56, 0  ;;  %vm8270_vm13 = vcmask 752640  }
0x174b   : > { %v4036_v45 = vpop.permute.xlu1 %4035 }
0x174c   : > { %v4041_v24 = vsel %vm8234_vm6, %v4036_v45, %v4038_v43  ;;  %vm8255_vm6 = vcmask 277504  }
0x174d   : > { %4147 = vmatpush1.bf16.msra.mxu1 %v4041_v24  ;;  %vm8256_vm8 = vmmov %vm8255_vm6 }
0x174e   : > { %vm8258_vm14 = vmmov %vm8255_vm6 }
0x179e   : > { %v3859_v62 = vpop.f32.mrb[20].mxu1 }
0x179f   : > { %v3860_v25 = vadd.f32 %v3859_v62, %v3806_v44  ;;  %v3861_v13 = vpop.f32.mrb[21].mxu1 }
0x17a0   : > { %v3862_v51 = vadd.f32 %v3861_v13, %v3806_v44  ;;  %v3863_v9 = vpop.f32.mrb[22].mxu1  ;;  %v4051_v44 = vpop.permute.xlu0 %4050 }
0x17a1   : > { %v3864_v42 = vadd.f32 %v3863_v9, %v3811_v48  ;;  %v3865_v7 = vpop.f32.mrb[23].mxu1  ;;  %v3868_v32 = vmax.f32 %v3860_v25, 0.0 }
0x17a2   : > { %v3866_v63 = vadd.f32 %v3865_v7, %v3811_v48  ;;  %v3869_v23 = vmax.f32 %v3862_v51, 0.0 }
0x17a3   : > { %v3870_v8 = vmax.f32 %v3864_v42, 0.0 }
0x17a4   : > { %v3871_v1 = vmax.f32 %v3866_v63, 0.0 }
0x17a5   : > { %v3872_v27 = vpack.c.bf16 %v3870_v8, %v3868_v32 }
0x17a6   : > { %v3873_v41 = vpack.c.bf16 %v3871_v1, %v3869_v23 }
0x17a7   : > { %3876 = vrot.lane.b32.xlu1 %v3872_v27, %s8216_s2 }
0x17a8   : > { %3878 = vrot.lane.b32.xlu0 %v3873_v41, %s8216_s2 }
0x17ab   : > { %4052 = vrot.lane.b32.xlu1 %v4020_v10, %s8181_s5 }
0x17ac   : > { %4048 = vrot.lane.b32.xlu0 %v4018_v5, %s8181_s5 }
0x17af   : > { %4063 = vrot.lane.b32.xlu1 %v4022_v61, %s8238_s6 }
0x17b0   : > { %4065 = vrot.lane.b32.xlu0 %v4023_v34, %s8238_s6 }
0x17b3   : > { %4061 = vrot.lane.b32.xlu1 %v4021_v11, %s8238_s6 }
0x17b4   : > { %4073 = vrot.lane.b32.xlu0 %v7168_v46, %s8241_s7 }
0x17b7   : > { %4075 = vrot.lane.b32.xlu1 %v7171_v38, %s8241_s7 }
0x17b8   : > { %4071 = vrot.lane.b32.xlu0 %v7165_v56, %s8241_s7 }
0x17bb   : > { %4086 = vrot.lane.b32.xlu1 %v4025_v0, %s8244_s9 }
0x17bc   : > { %4088 = vrot.lane.b32.xlu0 %v4026_v55, %s8244_s9 }
0x17bf   : > { %4084 = vrot.lane.b32.xlu1 %v4024_v31, %s8244_s9 }
0x17c0   : > { %4099 = vrot.lane.b32.xlu0 %v4028_v36, %s8171_s0 }
0x17c3   : > { %4101 = vrot.lane.b32.xlu1 %v4029_v14, %s8171_s0 }
0x17c4   : > { %4097 = vrot.lane.b32.xlu0 %v4027_v21, %s8171_s0 }
0x17c7   : > { %4109 = vrot.lane.b32.xlu1 %v7168_v46, %s8250_s10 }
0x17c8   : > { %4111 = vrot.lane.b32.xlu0 %v7171_v38, %s8250_s10 }
0x17cb   : > { %4107 = vrot.lane.b32.xlu1 %v7165_v56, %s8250_s10 }
0x17cc   : > { %4122 = vrot.lane.b32.xlu0 %v4031_v20, %s8173_s16 }
0x17cf   : > { %4124 = vrot.lane.b32.xlu1 %v4032_v40, %s8173_s16 }
0x17d0   : > { %4120 = vrot.lane.b32.xlu0 %v4030_v49, %s8173_s16 }
0x1819   : > { %v3877_v48 = vpop.permute.xlu1 %3876 }
0x181a   : > { %v7264_v22 = vsel %vm8255_vm6, 0, %v3877_v48  ;;  %v3879_v53 = vpop.permute.xlu0 %3878  ;;  %vm8271_vm6 = vmmov %vm8270_vm13 }
0x181b   : > { %3907 = vrot.lane.b32.xlu1 %v7264_v22, %s8229_s3  ;;  %3943 = vrot.lane.b32.xlu0 %v7264_v22, %s8241_s7  ;;  %v7271_v38 = vsel %vm8256_vm8, %v3879_v53, 0  ;;  %v7275_v35 = vsel %vm8258_vm14, %v3877_v48, %v3879_v53  ;;  %v3890_v45 = vsel %vm8260_vm12, %v7264_v22, 0  ;;  %v3893_v24 = vsel %vm8261_vm4, %v7264_v22, 0 }
0x181c   : > { %v3891_v7 = vsel %vm8264_vm11, %v7275_v35, 0  ;;  %v3896_v8 = vsel %vm8267_vm3, %v7264_v22, 0  ;;  %v3895_v27 = vsel %vm8268_vm5, %v7271_v38, 0  ;;  %v3892_v41 = vsel %vm8269_vm1, %v7271_v38, 0 }
0x181d   : > { %v4053_v46 = vpop.permute.xlu1 %4052  ;;  %vm8272_vm8 = vcmp.ne.s16.totalorder %v6256_v59, 0  ;;  %vm8274_vm14 = vcmp.ne.s16.totalorder %v6249_v4, 0  ;;  %vm8277_vm4 = vcmp.ne.s16.totalorder %v6287_v12, 0  ;;  %vm8284_vm3 = vcmask 490496  }
0x181e   : > { %v4049_v60 = vpop.permute.xlu0 %4048  ;;  %v4055_v56 = vsel %vm8257_vm10, %v4051_v44, %v4053_v46  ;;  %v3899_v11 = vsel %vm8272_vm8, %v7264_v22, 0  ;;  %vm8273_vm10 = vcmp.ne.s16.totalorder %v6262_v6, 0  ;;  %v3898_v36 = vsel %vm8274_vm14, %v7271_v38, 0  ;;  %vm8285_vm5 = vmmov %vm8284_vm3 }
0x181f   : > { %v4054_v58 = vsel %vm8259_vm9, %v4049_v60, %v4051_v44  ;;  %4148 = vmatprep.subr.bf16.mxu1 %v4055_v56  ;;  %3911 = vrot.lane.b32.xlu0 %v7271_v38, %s8229_s3  ;;  %v3894_v0 = vsel %vm8273_vm10, %v7275_v35, 0  ;;  %vm8275_vm9 = vcmask 523264   ;;  %v3900_v40 = vsel %vm8277_vm4, %v7275_v35, 0 }
0x1820   : > { %3909 = vrot.lane.b32.xlu1 %v7275_v35, %s8229_s3  ;;  %4149 = vmatpush1.bf16.msra.mxu1 %v4054_v58  ;;  %vm8276_vm12 = vmmov %vm8275_vm9  ;;  %vm8287_vm1 = vcmp.ne.s16.totalorder %v6178_v39, 0  ;;  %vm8290_vm8 = vcmp.ne.s16.totalorder %v6175_v37, 0  ;;  %vm8291_vm10 = vcmask 130048   ;;  %vm8292_vm14 = vcmask 1031168  }
0x1821   : > { %v4064_v43 = vpop.permute.xlu1 %4063 }
0x1822   : > { %v4066_v50 = vpop.permute.xlu0 %4065 }
0x1823   : > { %3920 = vrot.lane.b32.xlu0 %v3890_v45, %s8181_s5  ;;  %v4068_v62 = vsel %vm8262_vm15, %v4064_v43, %v4066_v50  ;;  %vm8278_vm15 = vcmp.ne.s16.totalorder %v6293_v15, 0 }
0x1824   : > { %3933 = vrot.lane.b32.xlu1 %v3893_v24, %s8238_s6  ;;  %4150 = vmatprep.subr.bf16.mxu1 %v4068_v62  ;;  %v3897_v49 = vsel %vm8278_vm15, %v7275_v35, 0  ;;  %v5354_v24 = vld [vmem:[%s8242_s8] ss:$8 sps:$4 sm:$0xff]   ;;  %v5355_v62 = vld [vmem:[%s8282_s11 + $0x4] ss:$8 sps:$4 sm:$0xff]   ;;  %vm8296_vm15 = vcmask 785408  }
0x1825   : > { %v4062_v25 = vpop.permute.xlu1 %4061  ;;  %s8410_s8 = sld [smem:[#allocation26_spill]] }
0x1826   : > { %v4067_v13 = vsel %vm8263_vm2, %v4062_v25, %v4064_v43  ;;  %v4074_v51 = vpop.permute.xlu0 %4073  ;;  %vm8279_vm2 = vcmask 506880  }
0x1827   : > { %3945 = vrot.lane.b32.xlu0 %v7275_v35, %s8241_s7  ;;  %4151 = vmatpush1.bf16.msra.mxu1 %v4067_v13  ;;  %vm8280_vm11 = vmmov %vm8279_vm2 }
0x1828   : > { %3947 = vrot.lane.b32.xlu1 %v7271_v38, %s8241_s7 }
0x1829   : > { %v4076_v9 = vpop.permute.xlu1 %4075 }
0x182a   : > { %v4072_v42 = vpop.permute.xlu0 %4071  ;;  %v4078_v63 = vsel %vm8265_vm7, %v4074_v51, %v4076_v9  ;;  %vm8281_vm7 = vcmp.ne.s16.totalorder %v6274_v19, 0  ;;  %v4242_v9 = vld [vmem:[%s8286_s13] sm:$0xff] }
0x182b   : > { %v4077_v32 = vsel %vm8266_vm0, %v4072_v42, %v4074_v51  ;;  %3922 = vrot.lane.b32.xlu0 %v3891_v7, %s8181_s5  ;;  %4152 = vmatprep.subr.bf16.mxu1 %v4078_v63  ;;  %v3901_v60 = vsel %vm8281_vm7, %v7271_v38, 0  ;;  %vm8283_vm0 = vcmp.ne.s16.totalorder %v6318_v30, 0  ;;  %v3888_v51 = vsel %vm8290_vm8, %v7264_v22, 0 }
0x182c   : > { %3956 = vrot.lane.b32.xlu1 %v3896_v8, %s8244_s9  ;;  %4153 = vmatpush1.bf16.msra.mxu1 %v4077_v32  ;;  %v3903_v43 = vsel %vm8283_vm0, %v7275_v35, 0  ;;  %vm8300_vm0 = vcmask 752640   ;;  %vm8306_vm8 = vcmask 490496  }
0x182d   : > { %v4087_v23 = vpop.permute.xlu1 %4086 }
0x182e   : > { %v4089_v1 = vpop.permute.xlu0 %4088 }
0x182f   : > { %3937 = vrot.lane.b32.xlu0 %v3895_v27, %s8238_s6  ;;  %v4091_v10 = vsel %vm8270_vm13, %v4087_v23, %v4089_v1  ;;  %vm8288_vm13 = vcmp.ne.s16.totalorder %v6303_v26, 0 }
0x1830   : > { %3924 = vrot.lane.b32.xlu1 %v3892_v41, %s8181_s5  ;;  %4154 = vmatprep.subr.bf16.mxu1 %v4091_v10  ;;  %v3902_v25 = vsel %vm8288_vm13, %v7264_v22, 0  ;;  %vm8304_vm13 = vcmask 506880  }
0x1831   : > { %v4085_v5 = vpop.permute.xlu1 %4084 }
0x1832   : > { %v4090_v61 = vsel %vm8271_vm6, %v4085_v5, %v4087_v23  ;;  %v4100_v34 = vpop.permute.xlu0 %4099  ;;  %vm8289_vm6 = vcmp.ne.s16.totalorder %v6305_v28, 0 }
0x1833   : > { %3969 = vrot.lane.b32.xlu0 %v3899_v11, %s8171_s0  ;;  %4155 = vmatpush1.bf16.msra.mxu1 %v4090_v61  ;;  %v3904_v13 = vsel %vm8289_vm6, %v7271_v38, 0  ;;  %vm8305_vm6 = vmmov %vm8304_vm13 }
0x1834   : > { %3935 = vrot.lane.b32.xlu1 %v3894_v0, %s8238_s6 }
0x1835   : > { %v4102_v55 = vpop.permute.xlu1 %4101 }
0x1836   : > { %v4098_v31 = vpop.permute.xlu0 %4097  ;;  %v4104_v14 = vsel %vm8275_vm9, %v4100_v34, %v4102_v55  ;;  %vm8293_vm9 = vmmov %vm8292_vm14 }
0x1837   : > { %v4103_v21 = vsel %vm8276_vm12, %v4098_v31, %v4100_v34  ;;  %3960 = vrot.lane.b32.xlu0 %v3898_v36, %s8244_s9  ;;  %4156 = vmatprep.subr.bf16.mxu1 %v4104_v14  ;;  %vm8294_vm12 = vcmask 1014784  }
0x1838   : > { %3981 = vrot.lane.b32.xlu1 %v7275_v35, %s8250_s10  ;;  %4157 = vmatpush1.bf16.msra.mxu1 %v4103_v21  ;;  %vm8295_vm4 = vmmov %vm8294_vm12 }
0x1839   : > { %v4110_v29 = vpop.permute.xlu1 %4109 }
0x183a   : > { %v4112_v20 = vpop.permute.xlu0 %4111 }
0x183b   : > { %3971 = vrot.lane.b32.xlu0 %v3900_v40, %s8171_s0  ;;  %v4114_v44 = vsel %vm8279_vm2, %v4110_v29, %v4112_v20  ;;  %vm8297_vm2 = vmmov %vm8296_vm15 }
0x183c   : > { %3958 = vrot.lane.b32.xlu1 %v3897_v49, %s8244_s9  ;;  %4158 = vmatprep.subr.bf16.mxu1 %v4114_v44 }
0x183d   : > { %v4108_v48 = vpop.permute.xlu1 %4107 }
0x183e   : > { %v4113_v53 = vsel %vm8280_vm11, %v4108_v48, %v4110_v29  ;;  %v4123_v46 = vpop.permute.xlu0 %4122  ;;  %vm8298_vm11 = vcmask 769024  }
0x183f   : > { %3983 = vrot.lane.b32.xlu0 %v7271_v38, %s8250_s10  ;;  %4159 = vmatpush1.bf16.msra.mxu1 %v4113_v53  ;;  %vm8299_vm7 = vmmov %vm8298_vm11 }
0x1840   : > { %3973 = vrot.lane.b32.xlu1 %v3901_v60, %s8171_s0 }
0x1841   : > { %v4125_v56 = vpop.permute.xlu1 %4124 }
0x1842   : > { %v4121_v58 = vpop.permute.xlu0 %4120  ;;  %v4127_v50 = vsel %vm8284_vm3, %v4123_v46, %v4125_v56  ;;  %vm8301_vm3 = vmmov %vm8300_vm0 }
0x1843   : > { %v4126_v45 = vsel %vm8285_vm5, %v4121_v58, %v4123_v46  ;;  %3994 = vrot.lane.b32.xlu0 %v3903_v43, %s8173_s16  ;;  %4160 = vmatprep.subr.bf16.mxu1 %v4127_v50  ;;  %vm8302_vm5 = vcmask 523264  }
0x1844   : > { %3979 = vrot.lane.b32.xlu1 %v7264_v22, %s8250_s10  ;;  %4161 = vmatpush1.bf16.msra.mxu1 %v4126_v45 }
0x1845   : > { %5220 = vmatprep.subr.msk.bf16.mxu1 %vm8287_vm1, %v7275_v35  ;;  %v4243_v35 = vld [vmem:[%s8286_s13 + $0x8] sm:$0xff]  ;;  %vm8303_vm1 = vmmov %vm8302_vm5 }
0x1847   : > { %3992 = vrot.lane.b32.xlu0 %v3902_v25, %s8173_s16  ;;  %4177 = vmatmul.mubr.bf16.vlgmr.msra.gmra.mrb[24].mxu1 %v5354_v24 }
0x1848   : > { %3996 = vrot.lane.b32.xlu1 %v3904_v13, %s8173_s16  ;;  %4200 = vmatpush1.bf16.msra.mxu1 %v3888_v51  ;;  %v5357_v51 = vld [vmem:[%s8282_s11] ss:$8 sps:$4 sm:$0xff]   ;;  %s8413_s11 = sld [smem:[#allocation25_spill]] }
0x1849   : > { %5221 = vmatprep.mubr.msk.bf16.mxu1 %vm8291_vm10, %v5355_v62  ;;  %vm8307_vm10 = vmmov %vm8306_vm8 }
0x184b   : > { %4251 = vperm.xlu0 %5319, %v4243_v35  }
0x184c   : > { %4246 = vperm.xlu1 %5320, %v4242_v9  }
0x188d   : > { %v3908_v42 = vpop.permute.xlu1 %3907  ;;  %v3944_v7 = vpop.permute.xlu0 %3943 }
0x1891   : > { %v3912_v63 = vpop.permute.xlu0 %3911 }
0x1892   : > { %v3910_v38 = vpop.permute.xlu1 %3909 }
0x1893   : > { %v3914_v32 = vsel %vm8292_vm14, %v3910_v38, %v3912_v63  ;;  %v3913_v8 = vsel %vm8293_vm9, %v3908_v42, %v3910_v38  ;;  %vm8308_vm14 = vcmask 277504  }
0x1894   : > { %4201 = vmatprep.subr.bf16.mxu1 %v3914_v32  ;;  %vm8309_vm9 = vmmov %vm8308_vm14 }
0x1895   : > { %4202 = vmatpush1.bf16.msra.mxu1 %v3913_v8  ;;  %v3921_v22 = vpop.permute.xlu0 %3920 }
0x1896   : > { %v3934_v23 = vpop.permute.xlu1 %3933 }
0x1899   : > { %v3946_v1 = vpop.permute.xlu0 %3945 }
0x189a   : > { %v3948_v27 = vpop.permute.xlu1 %3947  ;;  %v3949_v20 = vsel %vm8299_vm7, %v3944_v7, %v3946_v1  ;;  %vm8315_vm7 = vcmp.ne.s16.totalorder %v6237_v18, 0 }
0x189b   : > { %v3950_v14 = vsel %vm8298_vm11, %v3946_v1, %v3948_v27  ;;  %vm8314_vm11 = vcmp.ne.s16.totalorder %v6220_v47, 0 }
0x189d   : > { %v3923_v41 = vpop.permute.xlu0 %3922 }
0x189e   : > { %v3957_v10 = vpop.permute.xlu1 %3956  ;;  %v3926_v11 = vsel %vm8295_vm4, %v3921_v22, %v3923_v41  ;;  %vm8311_vm4 = vcmp.ne.s16.totalorder %v6178_v39, 0 }
0x18a1   : > { %v3938_v5 = vpop.permute.xlu0 %3937 }
0x18a2   : > { %v3925_v61 = vpop.permute.xlu1 %3924 }
0x18a3   : > { %v3927_v34 = vsel %vm8294_vm12, %v3923_v41, %v3925_v61  ;;  %vm8310_vm12 = vcmp.ne.s16.totalorder %v6175_v37, 0 }
0x18a4   : > { %4203 = vmatprep.subr.bf16.mxu1 %v3927_v34 }
0x18a5   : > { %4204 = vmatpush1.bf16.msra.mxu1 %v3926_v11  ;;  %v3970_v0 = vpop.permute.xlu0 %3969 }
0x18a6   : > { %v3936_v55 = vpop.permute.xlu1 %3935 }
0x18a7   : > { %v3940_v31 = vsel %vm8296_vm15, %v3936_v55, %v3938_v5  ;;  %v3939_v36 = vsel %vm8297_vm2, %v3934_v23, %v3936_v55  ;;  %vm8312_vm15 = vmmov %vm8309_vm9  ;;  %vm8313_vm2 = vcmp.ne.s16.totalorder %v6208_v52, 0 }
0x18a8   : > { %4205 = vmatprep.subr.bf16.mxu1 %v3940_v31 }
0x18a9   : > { %4206 = vmatpush1.bf16.msra.mxu1 %v3939_v36  ;;  %v3961_v21 = vpop.permute.xlu0 %3960 }
0x18aa   : > { %v3982_v29 = vpop.permute.xlu1 %3981  ;;  %4207 = vmatprep.subr.bf16.mxu1 %v3950_v14 }
0x18ad   : > { %4208 = vmatpush1.bf16.msra.mxu1 %v3949_v20  ;;  %v3972_v40 = vpop.permute.xlu0 %3971 }
0x18ae   : > { %v3959_v49 = vpop.permute.xlu1 %3958  ;;  %v3975_v56 = vsel %vm8303_vm1, %v3970_v0, %v3972_v40  ;;  %vm8320_vm1 = vcmp.ne.s16.totalorder %v6262_v6, 0 }
0x18af   : > { %v3963_v44 = vsel %vm8300_vm0, %v3959_v49, %v3961_v21  ;;  %v3962_v48 = vsel %vm8301_vm3, %v3957_v10, %v3959_v49  ;;  %vm8316_vm0 = vcmp.ne.s16.totalorder %v6232_v57, 0  ;;  %vm8317_vm3 = vcmp.ne.s16.totalorder %v6214_v54, 0 }
0x18b0   : > { %4209 = vmatprep.subr.bf16.mxu1 %v3963_v44 }
0x18b1   : > { %4210 = vmatpush1.bf16.msra.mxu1 %v3962_v48  ;;  %v3984_v53 = vpop.permute.xlu0 %3983 }
0x18b2   : > { %v3974_v46 = vpop.permute.xlu1 %3973  ;;  %v3986_v58 = vsel %vm8304_vm13, %v3982_v29, %v3984_v53  ;;  %vm8321_vm13 = vcmp.ne.s16.totalorder %v6256_v59, 0 }
0x18b3   : > { %v3976_v60 = vsel %vm8302_vm5, %v3972_v40, %v3974_v46  ;;  %vm8319_vm5 = vcmp.ne.s16.totalorder %v6235_v2, 0 }
0x18b4   : > { %4211 = vmatprep.subr.bf16.mxu1 %v3976_v60 }
0x18b5   : > { %4212 = vmatpush1.bf16.msra.mxu1 %v3975_v56  ;;  %v3995_v43 = vpop.permute.xlu0 %3994 }
0x18b6   : > { %v3980_v50 = vpop.permute.xlu1 %3979  ;;  %4213 = vmatprep.subr.bf16.mxu1 %v3986_v58 }
0x18b7   : > { %v3985_v45 = vsel %vm8305_vm6, %v3980_v50, %v3982_v29  ;;  %vm8322_vm6 = vcmp.ne.s16.totalorder %v6249_v4, 0 }
0x18b9   : > { %4214 = vmatpush1.bf16.msra.mxu1 %v3985_v45  ;;  %v3993_v24 = vpop.permute.xlu0 %3992 }
0x18ba   : > { %v3997_v62 = vpop.permute.xlu1 %3996  ;;  %v3998_v25 = vsel %vm8306_vm8, %v3993_v24, %v3995_v43  ;;  %vm8323_vm8 = vcmp.ne.s16.totalorder %v6293_v15, 0 }
0x18bb   : > { %v3999_v13 = vsel %vm8307_vm10, %v3995_v43, %v3997_v62  ;;  %vm8324_vm10 = vcmp.ne.s16.totalorder %v6287_v12, 0 }
0x18bc   : > { %4215 = vmatprep.subr.bf16.mxu1 %v3999_v13 }
0x18bd   : > { %4216 = vmatpush1.bf16.msra.mxu1 %v3998_v25 }
0x18c0   : > { %4232 = vmatmul.mubr.bf16.vlgmr.msra.gmra.mrb[24].mxu1 %v5357_v51 }
0x18ca   : > { %v4252_v63 = vpop.permute.xlu0 %4251 }
0x18cb   : > { %v4247_v35 = vpop.permute.xlu1 %4246 }
0x1993   : > { %v4233_v9 = vpop.f32.mrb[24].mxu1 }
0x1994   : > { %v4254_v42 = vadd.f32 %v4247_v35, %v4233_v9  ;;  %v4235_v7 = vpop.f32.mrb[25].mxu1 }
0x1995   : > { %v4255_v38 = vadd.f32 %v4247_v35, %v4235_v7  ;;  %v4237_v32 = vpop.f32.mrb[26].mxu1 }
0x1996   : > { %v4256_v8 = vadd.f32 %v4252_v63, %v4237_v32  ;;  %v4239_v22 = vpop.f32.mrb[27].mxu1  ;;  %v4258_v1 = vmax.f32 %v4254_v42, 0.0 }
0x1997   : > { %v4257_v23 = vadd.f32 %v4252_v63, %v4239_v22  ;;  %v4259_v41 = vmax.f32 %v4255_v38, 0.0 }
0x1998   : > { %v4260_v27 = vmax.f32 %v4256_v8, 0.0 }
0x1999   : > { %v4261_v10 = vmax.f32 %v4257_v23, 0.0 }
0x199a   : > { %v4262_v5 = vpack.c.bf16 %v4260_v27, %v4258_v1 }
0x199b   : > { %v4263_v61 = vpack.c.bf16 %v4261_v10, %v4259_v41 }
0x199c   : > { %4266 = vrot.lane.b32.xlu1 %v4262_v5, %s8216_s2 }
0x199d   : > { %4268 = vrot.lane.b32.xlu0 %v4263_v61, %s8216_s2  ;;  %s8318_s2 = sld [smem:[#allocation23_spill]] }
0x19a3   : > { %v5358_v59 = vld [vmem:[%s8318_s2 + $0x4] ss:$8 sps:$4 sm:$0xff]  }
0x1a0e   : > { %v4267_v34 = vpop.permute.xlu1 %4266 }
0x1a0f   : > { %v4273_v11 = vsel %vm8308_vm14, 0, %v4267_v34  ;;  %v4269_v0 = vpop.permute.xlu0 %4268  ;;  %vm8326_vm14 = vcmp.ne.s16.totalorder %v6274_v19, 0 }
0x1a10   : > { %v4270_v55 = vsel %vm8309_vm9, %v4267_v34, %v4269_v0  ;;  %4333 = vrot.lane.b32.xlu0 %v4273_v11, %s8241_s7  ;;  %4297 = vrot.lane.b32.xlu1 %v4273_v11, %s8229_s3  ;;  %v4278_v31 = vsel %vm8310_vm12, %v4273_v11, 0  ;;  %v4276_v36 = vsel %vm8312_vm15, %v4269_v0, 0  ;;  %v4280_v14 = vsel %vm8313_vm2, %v4273_v11, 0  ;;  %v5360_v0 = vld [vmem:[%s8318_s2] ss:$8 sps:$4 sm:$0xff]   ;;  %s8369_s2 = smov 110  }
0x1a11   : > { %5224 = vmatprep.subr.msk.bf16.mxu0 %vm8311_vm4, %v4270_v55  ;;  %v4283_v21 = vsel %vm8314_vm11, %v4273_v11, 0  ;;  %v4286_v37 = vsel %vm8315_vm7, %v4273_v11, 0  ;;  %v4281_v39 = vsel %vm8316_vm0, %v4270_v55, 0  ;;  %v4282_v52 = vsel %vm8317_vm3, %v4276_v36, 0 }
0x1a12   : > { %4419 = vmatpush1.bf16.msra.mxu0 %v4278_v31  ;;  %v4285_v47 = vsel %vm8319_vm5, %v4276_v36, 0  ;;  %v4284_v18 = vsel %vm8320_vm1, %v4270_v55, 0  ;;  %v4289_v57 = vsel %vm8321_vm13, %v4273_v11, 0  ;;  %v4288_v54 = vsel %vm8322_vm6, %v4276_v36, 0 }
0x1a13   : > { %v4287_v2 = vsel %vm8323_vm8, %v4270_v55, 0  ;;  %v4290_v6 = vsel %vm8324_vm10, %v4270_v55, 0  ;;  %v4291_v4 = vsel %vm8326_vm14, %v4276_v36, 0  ;;  %vm8327_vm9 = vcmask 130048  }
0x1a14   : > { %4301 = vrot.lane.b32.xlu0 %v4276_v36, %s8229_s3  ;;  %4299 = vrot.lane.b32.xlu1 %v4270_v55, %s8229_s3  ;;  %vm8328_vm12 = vcmp.ne.s16.totalorder %v6318_v30, 0  ;;  %vm8329_vm4 = vcmp.ne.s16.totalorder %v6305_v28, 0  ;;  %vm8330_vm15 = vcmp.ne.s16.totalorder %v6303_v26, 0  ;;  %vm8332_vm2 = vcmask 1031168  }
0x1a15   : > { %5225 = vmatprep.mubr.msk.bf16.mxu0 %vm8327_vm9, %v5358_v59  ;;  %v4293_v12 = vsel %vm8328_vm12, %v4270_v55, 0  ;;  %v4294_v15 = vsel %vm8329_vm4, %v4276_v36, 0  ;;  %v4292_v19 = vsel %vm8330_vm15, %v4273_v11, 0  ;;  %vm8333_vm11 = vmmov %vm8332_vm2  ;;  %vm8334_vm7 = vcmask 1014784  }
0x1a16   : > { %vm8335_vm0 = vmmov %vm8334_vm7  ;;  %vm8336_vm3 = vcmask 785408   ;;  %vm8338_vm1 = vcmask 769024   ;;  %vm8340_vm6 = vcmask 752640   ;;  %vm8342_vm10 = vcmask 523264  }
0x1a17   : > { %vm8337_vm5 = vmmov %vm8336_vm3  ;;  %vm8344_vm9 = vcmask 506880   ;;  %vm8346_vm4 = vcmask 490496  }
0x1a18   : > { %4310 = vrot.lane.b32.xlu0 %v4280_v14, %s8181_s5  ;;  %4323 = vrot.lane.b32.xlu1 %v4283_v21, %s8238_s6  ;;  %vm8339_vm13 = vmmov %vm8338_vm1 }
0x1a19   : > { %vm8341_vm8 = vmmov %vm8340_vm6 }
0x1a1a   : > { %vm8343_vm14 = vmmov %vm8342_vm10 }
0x1a1b   : > { %vm8345_vm12 = vmmov %vm8344_vm9 }
0x1a1c   : > { %4335 = vrot.lane.b32.xlu0 %v4270_v55, %s8241_s7  ;;  %4337 = vrot.lane.b32.xlu1 %v4276_v36, %s8241_s7  ;;  %vm8347_vm15 = vmmov %vm8346_vm4 }
0x1a20   : > { %4346 = vrot.lane.b32.xlu1 %v4286_v37, %s8244_s9  ;;  %4312 = vrot.lane.b32.xlu0 %v4281_v39, %s8181_s5 }
0x1a24   : > { %4314 = vrot.lane.b32.xlu1 %v4282_v52, %s8181_s5  ;;  %4327 = vrot.lane.b32.xlu0 %v4285_v47, %s8238_s6  ;;  %s8325_s5 = sld [smem:[#allocation24_spill]]  ;;  %v8353_v47 = vld [vmem:[#allocation27_spill] sm:$0xff] }
0x1a28   : > { %4325 = vrot.lane.b32.xlu1 %v4284_v18, %s8238_s6  ;;  %4359 = vrot.lane.b32.xlu0 %v4289_v57, %s8171_s0  ;;  %v8355_v18 = vld [vmem:[#allocation34_spill] sm:$0xff] }
0x1a2a   : > { %v4394_v29 = vld [vmem:[%s8325_s5] sm:$0xff]  ;;  %v4395_v20 = vld [vmem:[%s8325_s5 + $0x8] sm:$0xff]  ;;  %s8376_s5 = smov 95  }
0x1a2c   : > { %4371 = vrot.lane.b32.xlu1 %v4270_v55, %s8250_s10  ;;  %4350 = vrot.lane.b32.xlu0 %v4288_v54, %s8244_s9 }
0x1a30   : > { %4348 = vrot.lane.b32.xlu1 %v4287_v2, %s8244_s9  ;;  %4361 = vrot.lane.b32.xlu0 %v4290_v6, %s8171_s0  ;;  %s8331_s9 = smov 17  }
0x1a34   : > { %4363 = vrot.lane.b32.xlu1 %v4291_v4, %s8171_s0  ;;  %4373 = vrot.lane.b32.xlu0 %v4276_v36, %s8250_s10  ;;  %s8351_s0 = smov 127  }
0x1a38   : > { %4369 = vrot.lane.b32.xlu1 %v4273_v11, %s8250_s10  ;;  %4384 = vrot.lane.b32.xlu0 %v4293_v12, %s8173_s16  ;;  %s8364_s10 = smov 111  }
0x1a3c   : > { %4386 = vrot.lane.b32.xlu1 %v4294_v15, %s8173_s16  ;;  %4382 = vrot.lane.b32.xlu0 %v4292_v19, %s8173_s16  ;;  %s8361_s16 = smov 112  }
0x1a40   : > { %4398 = vperm.xlu1 %5320, %v4394_v29   ;;  %4403 = vperm.xlu0 %5319, %v4395_v20  }
0x1a44   : > { %4596 = vrot.lane.b32.xlu1 %v6163_v3, %s8331_s9  ;;  %4598 = vrot.lane.b32.xlu0 %v6165_v33, %s8331_s9 }
0x1a82   : > { %v4334_v30 = vpop.permute.xlu0 %4333  ;;  %v4298_v28 = vpop.permute.xlu1 %4297 }
0x1a86   : > { %v4302_v40 = vpop.permute.xlu0 %4301  ;;  %v4300_v49 = vpop.permute.xlu1 %4299 }
0x1a87   : > { %v4304_v26 = vsel %vm8332_vm2, %v4300_v49, %v4302_v40  ;;  %v4303_v44 = vsel %vm8333_vm11, %v4298_v28, %v4300_v49  ;;  %vm8348_vm2 = vcmask 138240  }
0x1a88   : > { %4420 = vmatprep.subr.bf16.mxu0 %v4304_v26  ;;  %vm8349_vm11 = vmmov %vm8348_vm2 }
0x1a89   : > { %4421 = vmatpush1.bf16.msra.mxu0 %v4303_v44 }
0x1a8a   : > { %v4311_v48 = vpop.permute.xlu0 %4310  ;;  %v4324_v53 = vpop.permute.xlu1 %4323 }
0x1a8e   : > { %v4336_v46 = vpop.permute.xlu0 %4335  ;;  %v4338_v60 = vpop.permute.xlu1 %4337 }
0x1a8f   : > { %v4340_v13 = vsel %vm8338_vm1, %v4336_v46, %v4338_v60  ;;  %v4339_v9 = vsel %vm8339_vm13, %v4334_v30, %v4336_v46  ;;  %vm8357_vm1 = vcmask 1039360   ;;  %v8359_v60 = vld [vmem:[#allocation37_spill] sm:$0xff] }
0x1a90   : > { %vm8358_vm13 = vmmov %vm8357_vm1 }
0x1a92   : > { %v4347_v56 = vpop.permute.xlu1 %4346  ;;  %v4313_v58 = vpop.permute.xlu0 %4312 }
0x1a93   : > { %v4316_v50 = vsel %vm8335_vm0, %v4311_v48, %v4313_v58  ;;  %vm8352_vm0 = vcmp.ne.s16.totalorder %v5666_v16, 0 }
0x1a96   : > { %v4315_v3 = vpop.permute.xlu1 %4314  ;;  %v4328_v43 = vpop.permute.xlu0 %4327 }
0x1a97   : > { %v4317_v33 = vsel %vm8334_vm7, %v4313_v58, %v4315_v3  ;;  %vm8350_vm7 = vmmov %vm8348_vm2  ;;  %v8362_v58 = vld [vmem:[#allocation30_spill] sm:$0xff] }
0x1a98   : > { %4422 = vmatprep.subr.bf16.mxu0 %v4317_v33 }
0x1a99   : > { %4423 = vmatpush1.bf16.msra.mxu0 %v4316_v50  ;;  %v8367_v50 = vld [vmem:[#allocation38_spill] sm:$0xff] }
0x1a9a   : > { %v4326_v45 = vpop.permute.xlu1 %4325  ;;  %v4360_v24 = vpop.permute.xlu0 %4359 }
0x1a9b   : > { %v4329_v62 = vsel %vm8336_vm3, %v4324_v53, %v4326_v45  ;;  %v4330_v25 = vsel %vm8337_vm5, %v4326_v45, %v4328_v43  ;;  %vm8354_vm3 = vcmp.ne.s16.totalorder %v8353_v47, 0  ;;  %vm8356_vm5 = vcmp.ne.s16.totalorder %v8355_v18, 0  ;;  %v8365_v43 = vld [vmem:[#allocation28_spill] sm:$0xff] }
0x1a9c   : > { %4424 = vmatprep.subr.bf16.mxu0 %v4330_v25  ;;  %v8372_v25 = vld [vmem:[#allocation39_spill] sm:$0xff] }
0x1a9d   : > { %4425 = vmatpush1.bf16.msra.mxu0 %v4329_v62 }
0x1a9e   : > { %v4372_v51 = vpop.permute.xlu1 %4371  ;;  %4426 = vmatprep.subr.bf16.mxu0 %v4340_v13  ;;  %v4351_v35 = vpop.permute.xlu0 %4350 }
0x1aa1   : > { %4427 = vmatpush1.bf16.msra.mxu0 %v4339_v9  ;;  %v8377_v9 = vld [vmem:[#allocation31_spill] sm:$0xff] }
0x1aa2   : > { %v4349_v42 = vpop.permute.xlu1 %4348  ;;  %v4362_v7 = vpop.permute.xlu0 %4361 }
0x1aa3   : > { %v4352_v63 = vsel %vm8340_vm6, %v4347_v56, %v4349_v42  ;;  %v4353_v38 = vsel %vm8341_vm8, %v4349_v42, %v4351_v35  ;;  %v4365_v23 = vsel %vm8343_vm14, %v4360_v24, %v4362_v7  ;;  %vm8360_vm6 = vcmp.ne.s16.totalorder %v8359_v60, 0  ;;  %v8370_v24 = vld [vmem:[#allocation29_spill] sm:$0xff] }
0x1aa4   : > { %4428 = vmatprep.subr.bf16.mxu0 %v4353_v38  ;;  %vm8363_vm8 = vcmp.ne.s16.totalorder %v8362_v58, 0  ;;  %vm8368_vm14 = vcmp.ne.s16.totalorder %v8367_v50, 0  ;;  %v8381_v38 = vld [vmem:[#allocation35_spill] sm:$0xff] }
0x1aa5   : > { %4429 = vmatpush1.bf16.msra.mxu0 %v4352_v63 }
0x1aa6   : > { %v4364_v32 = vpop.permute.xlu1 %4363  ;;  %v4374_v8 = vpop.permute.xlu0 %4373 }
0x1aa7   : > { %v4366_v22 = vsel %vm8342_vm10, %v4362_v7, %v4364_v32  ;;  %v4376_v1 = vsel %vm8344_vm9, %v4372_v51, %v4374_v8  ;;  %vm8366_vm10 = vcmp.ne.s16.totalorder %v8365_v43, 0  ;;  %vm8371_vm9 = vcmp.ne.s16.totalorder %v8370_v24, 0  ;;  %v8379_v7 = vld [vmem:[#allocation33_spill] sm:$0xff]  ;;  %v8383_v8 = vld [vmem:[#allocation36_spill] sm:$0xff] }
0x1aa8   : > { %4430 = vmatprep.subr.bf16.mxu0 %v4366_v22 }
0x1aa9   : > { %4431 = vmatpush1.bf16.msra.mxu0 %v4365_v23 }
0x1aaa   : > { %v4370_v27 = vpop.permute.xlu1 %4369  ;;  %4432 = vmatprep.subr.bf16.mxu0 %v4376_v1  ;;  %v4385_v41 = vpop.permute.xlu0 %4384 }
0x1aab   : > { %v4375_v10 = vsel %vm8345_vm12, %v4370_v27, %v4372_v51  ;;  %vm8373_vm12 = vcmp.ne.s16.totalorder %v8372_v25, 0  ;;  %v8374_v51 = vld [vmem:[#allocation32_spill] sm:$0xff] }
0x1aad   : > { %4433 = vmatpush1.bf16.msra.mxu0 %v4375_v10 }
0x1aae   : > { %v4387_v5 = vpop.permute.xlu1 %4386  ;;  %v4383_v61 = vpop.permute.xlu0 %4382 }
0x1aaf   : > { %v4388_v34 = vsel %vm8346_vm4, %v4383_v61, %v4385_v41  ;;  %v4389_v11 = vsel %vm8347_vm15, %v4385_v41, %v4387_v5  ;;  %vm8375_vm4 = vcmp.ne.s16.totalorder %v8374_v51, 0  ;;  %vm8378_vm15 = vcmp.ne.s16.totalorder %v8377_v9, 0 }
0x1ab0   : > { %4434 = vmatprep.subr.bf16.mxu0 %v4389_v11 }
0x1ab1   : > { %4435 = vmatpush1.bf16.msra.mxu0 %v4388_v34 }
0x1ab4   : > { %4451 = vmatmul.mubr.bf16.vlgmr.msra.gmra.mrb[24].mxu0 %v5360_v0 }
0x1abf   : > { %v4399_v55 = vpop.permute.xlu1 %4398  ;;  %v4404_v31 = vpop.permute.xlu0 %4403 }
0x1ac3   : > { %v4597_v36 = vpop.permute.xlu1 %4596  ;;  %v4599_v14 = vpop.permute.xlu0 %4598 }
0x1ac4   : > { %v7481_v21 = vsel %vm8348_vm2, 0, %v4597_v36  ;;  %v7484_v37 = vsel %vm8349_vm11, %v4597_v36, %v4599_v14  ;;  %v7487_v39 = vsel %vm8350_vm7, %v4599_v14, 0  ;;  %vm8380_vm2 = vcmp.ne.s16.totalorder %v8379_v7, 0 }
0x1ac5   : > { %4631 = vrot.lane.b32.xlu0 %v7487_v39, %s8351_s0  ;;  %4629 = vrot.lane.b32.xlu1 %v7484_v37, %s8351_s0  ;;  %v4608_v52 = vsel %vm8352_vm0, %v7481_v21, 0  ;;  %v4611_v57 = vsel %vm8356_vm5, %v7484_v37, 0  ;;  %v4614_v56 = vsel %vm8360_vm6, %v7484_v37, 0  ;;  %v4612_v3 = vsel %vm8363_vm8, %v7487_v39, 0 }
0x1ac6   : > { %5228 = vmatprep.subr.msk.bf16.mxu0 %vm8354_vm3, %v7484_v37  ;;  %v4610_v33 = vsel %vm8366_vm10, %v7481_v21, 0  ;;  %v4617_v45 = vsel %vm8368_vm14, %v7484_v37, 0  ;;  %v4615_v62 = vsel %vm8371_vm9, %v7487_v39, 0  ;;  %v4620_v13 = vsel %vm8373_vm12, %v7484_v37, 0  ;;  %vm8394_vm12 = vmmov %vm8375_vm4 }
0x1ac7   : > { %4733 = vmatpush1.bf16.msra.mxu0 %v4608_v52  ;;  %v4613_v35 = vsel %vm8375_vm4, %v7481_v21, 0  ;;  %v4618_v42 = vsel %vm8378_vm15, %v7487_v39, 0  ;;  %v4616_v63 = vsel %vm8380_vm2, %v7481_v21, 0  ;;  %vm8382_vm11 = vcmp.ne.s16.totalorder %v8381_v38, 0 }
0x1ac8   : > { %v4621_v32 = vsel %vm8382_vm11, %v7487_v39, 0  ;;  %vm8384_vm7 = vcmp.ne.s16.totalorder %v8383_v8, 0  ;;  %vm8385_vm0 = vcmask 138240   ;;  %vm8390_vm6 = vcmask 1031168  }
0x1ac9   : > { %4627 = vrot.lane.b32.xlu0 %v7481_v21, %s8351_s0  ;;  %4642 = vrot.lane.b32.xlu1 %v4611_v57, %s8229_s3  ;;  %v4619_v22 = vsel %vm8384_vm7, %v7481_v21, 0  ;;  %vm8386_vm3 = vmmov %vm8385_vm0  ;;  %vm8392_vm14 = vcmp.ne.s16.totalorder %v8362_v58, 0  ;;  %vm8393_vm9 = vcmask 916480   ;;  %vm8396_vm15 = vcmp.ne.s16.totalorder %v8370_v24, 0 }
0x1aca   : > { %vm8387_vm5 = vmmov %vm8385_vm0  ;;  %vm8397_vm2 = vcmask 908288   ;;  %vm8398_vm11 = vcmp.ne.s16.totalorder %v8379_v7, 0 }
0x1acb   : > { %vm8391_vm8 = vmmov %vm8390_vm6 }
0x1acc   : > { %vm8395_vm4 = vmmov %vm8393_vm9 }
0x1acd   : > { %vm8399_vm7 = vmmov %vm8397_vm2 }
0x1b37   : > { %v4632_v54 = vpop.permute.xlu0 %4631  ;;  %v4630_v2 = vpop.permute.xlu1 %4629 }
0x1b38   : > { %v4634_v6 = vsel %vm8357_vm1, %v4630_v2, %v4632_v54  ;;  %vm8388_vm1 = vcmp.ne.s16.totalorder %v5666_v16, 0 }
0x1b39   : > { %4734 = vmatprep.subr.bf16.mxu0 %v4634_v6 }
0x1b3b   : > { %v4628_v59 = vpop.permute.xlu0 %4627  ;;  %v4643_v23 = vpop.permute.xlu1 %4642 }
0x1b3c   : > { %v4633_v4 = vsel %vm8358_vm13, %v4628_v59, %v4630_v2  ;;  %vm8389_vm13 = vcmp.ne.s16.totalorder %v8353_v47, 0 }
0x1b3d   : > { %4735 = vmatpush1.bf16.msra.mxu0 %v4633_v4 }
0x1b87   : > { %v4452_v12 = vpop.f32.mrb[24].mxu0 }
0x1b88   : > { %v4453_v15 = vadd.f32 %v4452_v12, %v4399_v55  ;;  %v4454_v19 = vpop.f32.mrb[25].mxu0 }
0x1b89   : > { %v4455_v29 = vadd.f32 %v4454_v19, %v4399_v55  ;;  %v4456_v20 = vpop.f32.mrb[26].mxu0 }
0x1b8a   : > { %v4457_v30 = vadd.f32 %v4456_v20, %v4404_v31  ;;  %v4458_v28 = vpop.f32.mrb[27].mxu0  ;;  %v4461_v49 = vmax.f32 %v4453_v15, 0.0 }
0x1b8b   : > { %v4459_v40 = vadd.f32 %v4458_v28, %v4404_v31  ;;  %v4462_v44 = vmax.f32 %v4455_v29, 0.0 }
0x1b8c   : > { %v4463_v26 = vmax.f32 %v4457_v30, 0.0 }
0x1b8d   : > { %v4464_v48 = vmax.f32 %v4459_v40, 0.0 }
0x1b8e   : > { %v4465_v53 = vpack.c.bf16 %v4463_v26, %v4461_v49 }
0x1b8f   : > { %v4466_v46 = vpack.c.bf16 %v4464_v48, %v4462_v44 }
0x1b90   : > { %4469 = vrot.lane.b32.xlu1 %v4465_v53, %s8331_s9 }
0x1b91   : > { %4471 = vrot.lane.b32.xlu0 %v4466_v46, %s8331_s9  ;;  %v8405_v46 = vld [vmem:[#allocation41_spill] sm:$0xff] }
0x1b94   : > { %4655 = vrot.lane.b32.xlu1 %v4614_v56, %s8361_s16 }
0x1b95   : > { %4644 = vrot.lane.b32.xlu0 %v4612_v3, %s8229_s3 }
0x1b98   : > { %4665 = vrot.lane.b32.xlu1 %v7484_v37, %s8364_s10 }
0x1b99   : > { %4640 = vrot.lane.b32.xlu0 %v4610_v33, %s8229_s3 }
0x1b9c   : > { %4678 = vrot.lane.b32.xlu1 %v4617_v45, %s8369_s2 }
0x1b9d   : > { %4657 = vrot.lane.b32.xlu0 %v4615_v62, %s8361_s16 }
0x1ba0   : > { %4691 = vrot.lane.b32.xlu1 %v4620_v13, %s8238_s6 }
0x1ba1   : > { %4653 = vrot.lane.b32.xlu0 %v4613_v35, %s8361_s16 }
0x1ba4   : > { %4701 = vrot.lane.b32.xlu1 %v7484_v37, %s8376_s5 }
0x1ba5   : > { %4667 = vrot.lane.b32.xlu0 %v7487_v39, %s8364_s10 }
0x1ba9   : > { %4663 = vrot.lane.b32.xlu0 %v7481_v21, %s8364_s10 }
0x1bad   : > { %4680 = vrot.lane.b32.xlu0 %v4618_v42, %s8369_s2 }
0x1bb1   : > { %4676 = vrot.lane.b32.xlu0 %v4616_v63, %s8369_s2  ;;  %v8414_v63 = vld [vmem:[#allocation40_spill] sm:$0xff] }
0x1bb5   : > { %4693 = vrot.lane.b32.xlu0 %v4621_v32, %s8238_s6 }
0x1bb9   : > { %4689 = vrot.lane.b32.xlu0 %v4619_v22, %s8238_s6 }
0x1bbd   : > { %4703 = vrot.lane.b32.xlu0 %v7487_v39, %s8376_s5 }
0x1c02   : > { %v4470_v1 = vpop.permute.xlu1 %4469 }
0x1c03   : > { %v7564_v27 = vsel %vm8385_vm0, 0, %v4470_v1  ;;  %v4472_v41 = vpop.permute.xlu0 %4471  ;;  %vm8400_vm0 = vcmp.ne.s16.totalorder %v8377_v9, 0 }
0x1c04   : > { %v7567_v10 = vsel %vm8386_vm3, %v4470_v1, %v4472_v41  ;;  %v4479_v5 = vsel %vm8387_vm5, %v4472_v41, 0  ;;  %4500 = vrot.lane.b32.xlu1 %v7564_v27, %s8351_s0  ;;  %v4481_v61 = vsel %vm8388_vm1, %v7564_v27, 0  ;;  %v4483_v14 = vsel %vm8366_vm10, %v7564_v27, 0 }
0x1c05   : > { %4504 = vrot.lane.b32.xlu0 %v4479_v5, %s8351_s0  ;;  %5232 = vmatprep.subr.msk.bf16.mxu1 %vm8389_vm13, %v7567_v10  ;;  %v4485_v52 = vsel %vm8392_vm14, %v4479_v5, 0  ;;  %v4486_v2 = vsel %vm8394_vm12, %v7564_v27, 0  ;;  %v4488_v59 = vsel %vm8396_vm15, %v4479_v5, 0  ;;  %v4489_v29 = vsel %vm8398_vm11, %v7564_v27, 0 }
0x1c06   : > { %4783 = vmatpush1.bf16.msra.mxu1 %v4481_v61  ;;  %v4656_v31 = vpop.permute.xlu1 %4655  ;;  %v4491_v30 = vsel %vm8400_vm0, %v4479_v5, 0  ;;  %vm8401_vm3 = vcmp.ne.s16.totalorder %v8383_v8, 0  ;;  %vm8402_vm5 = vcmp.ne.s16.totalorder %v8381_v38, 0  ;;  %vm8403_vm1 = vcmask 900096  }
0x1c07   : > { %v4645_v34 = vpop.permute.xlu0 %4644  ;;  %v4492_v49 = vsel %vm8401_vm3, %v7564_v27, 0  ;;  %v4494_v26 = vsel %vm8402_vm5, %v4479_v5, 0  ;;  %vm8404_vm13 = vmmov %vm8403_vm1  ;;  %vm8409_vm14 = vcmask 785408   ;;  %vm8416_vm15 = vcmask 777216  }
0x1c08   : > { %4536 = vrot.lane.b32.xlu1 %v7564_v27, %s8364_s10  ;;  %v4647_v11 = vsel %vm8390_vm6, %v4643_v23, %v4645_v34  ;;  %vm8406_vm6 = vcmp.ne.s16.totalorder %v8405_v46, 0  ;;  %vm8412_vm12 = vmmov %vm8409_vm14  ;;  %vm8418_vm11 = vcmp.ne.s16.totalorder %v8372_v25, 0  ;;  %v7665_v34 = vld [vmem:[%s8413_s11] sm:$0xff] }
0x1c09   : > { %4540 = vrot.lane.b32.xlu0 %v4479_v5, %s8364_s10  ;;  %4736 = vmatprep.subr.bf16.mxu0 %v4647_v11  ;;  %v4624_v56 = vsel %vm8406_vm6, %v7487_v39, 0  ;;  %vm8408_vm10 = vmmov %vm8406_vm6  ;;  %v5231_v11 = vcombine.high %v7665_v34, %v7665_v34 }
0x1c0a   : > { %v4666_v4 = vpop.permute.xlu1 %4665  ;;  %v4497_v62 = vsel %vm8408_vm10, %v4479_v5, 0  ;;  %vm8428_vm10 = vcmask 1031168  }
0x1c0b   : > { %v4641_v0 = vpop.permute.xlu0 %4640 }
0x1c0c   : > { %v4646_v55 = vsel %vm8391_vm8, %v4641_v0, %v4643_v23  ;;  %4502 = vrot.lane.b32.xlu1 %v7567_v10, %s8351_s0  ;;  %vm8407_vm8 = vcmp.ne.s16.totalorder %v8355_v18, 0  ;;  %v8420_v0 = vld [vmem:[#allocation42_spill] sm:$0xff] }
0x1c0d   : > { %4576 = vrot.lane.b32.xlu0 %v4479_v5, %s8376_s5  ;;  %4737 = vmatpush1.bf16.msra.mxu0 %v4646_v55  ;;  %v4484_v45 = vsel %vm8407_vm8, %v7567_v10, 0  ;;  %v7659_v5 = vld [vmem:[%s8410_s8] sm:$0xff]  ;;  %vm8421_vm0 = vcmp.ne.s16.totalorder %v8420_v0, 0  ;;  %vm8427_vm8 = vmmov %vm8416_vm15  ;;  %s5239_s8 = sshll.u32 %s8494_s1, 4 }
0x1c0e   : > { %v4679_v28 = vpop.permute.xlu1 %4678  ;;  %v5227_v61 = vcombine.high %v7659_v5, %v7659_v5  ;;  %v4623_v55 = vsel %vm8421_vm0, %v7484_v37, 0  ;;  %vm8423_vm5 = vmmov %vm8421_vm0 }
0x1c0f   : > { %v4658_v36 = vpop.permute.xlu0 %4657 }
0x1c10   : > { %4513 = vrot.lane.b32.xlu1 %v4483_v14, %s8229_s3  ;;  %v4660_v57 = vsel %vm8393_vm9, %v4656_v31, %v4658_v36  ;;  %vm8411_vm9 = vcmp.ne.s16.totalorder %v8359_v60, 0  ;;  %v4823_v14 = vld [vmem:[%s5609_s4] sm:$0xff] }
0x1c11   : > { %4517 = vrot.lane.b32.xlu0 %v4485_v52, %s8229_s3  ;;  %4738 = vmatprep.subr.bf16.mxu0 %v4660_v57  ;;  %v4487_v35 = vsel %vm8411_vm9, %v7567_v10, 0  ;;  %vm8430_vm9 = vcmask 916480  }
0x1c12   : > { %v4692_v3 = vpop.permute.xlu1 %4691 }
0x1c13   : > { %v4654_v54 = vpop.permute.xlu0 %4653 }
0x1c14   : > { %v4659_v6 = vsel %vm8395_vm4, %v4654_v54, %v4656_v31  ;;  %4526 = vrot.lane.b32.xlu1 %v4486_v2, %s8361_s16  ;;  %vm8415_vm4 = vcmp.ne.s16.totalorder %v8414_v63, 0  ;;  %v4496_v31 = vsel %vm8423_vm5, %v7567_v10, 0  ;;  %vm8439_vm5 = vcmask 769024  }
0x1c15   : > { %4530 = vrot.lane.b32.xlu0 %v4488_v59, %s8361_s16  ;;  %4739 = vmatpush1.bf16.msra.mxu0 %v4659_v6  ;;  %v4622_v32 = vsel %vm8415_vm4, %v7481_v21, 0 }
0x1c16   : > { %v4702_v22 = vpop.permute.xlu1 %4701 }
0x1c17   : > { %v4668_v12 = vpop.permute.xlu0 %4667 }
0x1c18   : > { %4538 = vrot.lane.b32.xlu1 %v7567_v10, %s8364_s10  ;;  %v4670_v15 = vsel %vm8397_vm2, %v4666_v4, %v4668_v12  ;;  %vm8417_vm2 = vcmp.ne.s16.totalorder %v8367_v50, 0 }
0x1c19   : > { %4699 = vrot.lane.b32.xlu0 %v7481_v21, %s8376_s5  ;;  %4740 = vmatprep.subr.bf16.mxu0 %v4670_v15  ;;  %v4490_v41 = vsel %vm8417_vm2, %v7567_v10, 0  ;;  %v4493_v21 = vsel %vm8418_vm11, %v7567_v10, 0  ;;  %vm8434_vm2 = vcmask 900096  }
0x1c1a   : > { %vm8435_vm11 = vmmov %vm8434_vm2 }
0x1c1b   : > { %v4664_v19 = vpop.permute.xlu0 %4663 }
0x1c1c   : > { %v4669_v20 = vsel %vm8399_vm7, %v4664_v19, %v4666_v4  ;;  %4549 = vrot.lane.b32.xlu1 %v4489_v29, %s8369_s2  ;;  %vm8419_vm7 = vcmask 130048  }
0x1c1d   : > { %4553 = vrot.lane.b32.xlu0 %v4491_v30, %s8369_s2  ;;  %4741 = vmatpush1.bf16.msra.mxu0 %v4669_v20  ;;  %vm8422_vm3 = vmmov %vm8419_vm7 }
0x1c1e   : > { %5229 = vmatprep.mubr.msk.bf16.mxu0 %vm8419_vm7, %v5227_v61  ;;  %5233 = vmatprep.mubr.msk.bf16.mxu1 %vm8422_vm3, %v5231_v11  ;;  %vm8436_vm7 = vcmask 785408   ;;  %vm8438_vm3 = vmmov %vm8427_vm8 }
0x1c1f   : > { %v4681_v40 = vpop.permute.xlu0 %4680  ;;  %vm8437_vm0 = vmmov %vm8436_vm7 }
0x1c20   : > { %4562 = vrot.lane.b32.xlu1 %v4492_v49, %s8238_s6  ;;  %v4683_v44 = vsel %vm8403_vm1, %v4679_v28, %v4681_v40  ;;  %vm8424_vm1 = vmmov %vm8415_vm4  ;;  %vm8432_vm4 = vcmask 908288  }
0x1c21   : > { %4566 = vrot.lane.b32.xlu0 %v4494_v26, %s8238_s6  ;;  %4742 = vmatprep.subr.bf16.mxu0 %v4683_v44  ;;  %v4495_v36 = vsel %vm8424_vm1, %v7564_v27, 0  ;;  %vm8440_vm1 = vmmov %vm8439_vm5 }
0x1c23   : > { %v4677_v48 = vpop.permute.xlu0 %4676 }
0x1c24   : > { %v4682_v53 = vsel %vm8404_vm13, %v4677_v48, %v4679_v28  ;;  %4574 = vrot.lane.b32.xlu1 %v7567_v10, %s8376_s5  ;;  %vm8425_vm13 = vcmask 1039360  }
0x1c25   : > { %4716 = vrot.lane.b32.xlu0 %v4624_v56, %s8241_s7  ;;  %4743 = vmatpush1.bf16.msra.mxu0 %v4682_v53  ;;  %vm8426_vm6 = vmmov %vm8425_vm13 }
0x1c27   : > { %v4694_v33 = vpop.permute.xlu0 %4693 }
0x1c28   : > { %4515 = vrot.lane.b32.xlu1 %v4484_v45, %s8229_s3  ;;  %v4696_v13 = vsel %vm8409_vm14, %v4692_v3, %v4694_v33  ;;  %vm8429_vm14 = vmmov %vm8428_vm10 }
0x1c29   : > { %4589 = vrot.lane.b32.xlu0 %v4497_v62, %s8241_s7  ;;  %4744 = vmatprep.subr.bf16.mxu0 %v4696_v13 }
0x1c2b   : > { %v4690_v39 = vpop.permute.xlu0 %4689 }
0x1c2c   : > { %v4695_v42 = vsel %vm8412_vm12, %v4690_v39, %v4692_v3  ;;  %4528 = vrot.lane.b32.xlu1 %v4487_v35, %s8361_s16  ;;  %vm8431_vm12 = vmmov %vm8430_vm9 }
0x1c2d   : > { %4712 = vrot.lane.b32.xlu0 %v4622_v32, %s8241_s7  ;;  %4745 = vmatpush1.bf16.msra.mxu0 %v4695_v42 }
0x1c2f   : > { %v4704_v23 = vpop.permute.xlu0 %4703 }
0x1c30   : > { %4572 = vrot.lane.b32.xlu1 %v7564_v27, %s8376_s5  ;;  %v4706_v1 = vsel %vm8416_vm15, %v4702_v22, %v4704_v23  ;;  %vm8433_vm15 = vmmov %vm8432_vm4 }
0x1c31   : > { %4746 = vmatprep.subr.bf16.mxu0 %v4706_v1 }
0x1c34   : > { %4551 = vrot.lane.b32.xlu1 %v4490_v41, %s8369_s2 }
0x1c38   : > { %4564 = vrot.lane.b32.xlu1 %v4493_v21, %s8238_s6 }
0x1c3c   : > { %4714 = vrot.lane.b32.xlu1 %v4623_v55, %s8241_s7 }
0x1c40   : > { %4587 = vrot.lane.b32.xlu1 %v4496_v31, %s8241_s7 }
0x1c44   : > { %4585 = vrot.lane.b32.xlu1 %v4495_v36, %s8241_s7 }
0x1c48   : > { %4826 = vperm.xlu1 %5320, %v4823_v14   ;;  %v5226_v14 = vcombine.low %v7659_v5, %v7659_v5 }
0x1c76   : > { %v4501_v52 = vpop.permute.xlu1 %4500 }
0x1c77   : > { %v4505_v37 = vpop.permute.xlu0 %4504 }
0x1c7a   : > { %v4537_v57 = vpop.permute.xlu1 %4536 }
0x1c7b   : > { %v4541_v54 = vpop.permute.xlu0 %4540 }
0x1c7e   : > { %v4503_v2 = vpop.permute.xlu1 %4502 }
0x1c7f   : > { %v4506_v6 = vsel %vm8425_vm13, %v4501_v52, %v4503_v2  ;;  %v4577_v59 = vpop.permute.xlu0 %4576  ;;  %v4507_v10 = vsel %vm8426_vm6, %v4503_v2, %v4505_v37  ;;  %vm8441_vm13 = vmmov %vm8438_vm3  ;;  %v5230_v2 = vcombine.low %v7665_v34, %v7665_v34 }
0x1c80   : > { %4784 = vmatprep.subr.bf16.mxu1 %v4507_v10  ;;  %vm8442_vm6 = vmmov %vm8440_vm1 }
0x1c81   : > { %4785 = vmatpush1.bf16.msra.mxu1 %v4506_v6 }
0x1c82   : > { %v4514_v4 = vpop.permute.xlu1 %4513 }
0x1c83   : > { %v4518_v12 = vpop.permute.xlu0 %4517 }
0x1c86   : > { %v4527_v15 = vpop.permute.xlu1 %4526 }
0x1c87   : > { %v4531_v27 = vpop.permute.xlu0 %4530 }
0x1c8a   : > { %v4539_v19 = vpop.permute.xlu1 %4538 }
0x1c8b   : > { %v4700_v29 = vpop.permute.xlu0 %4699  ;;  %v4543_v45 = vsel %vm8432_vm4, %v4539_v19, %v4541_v54  ;;  %v4542_v39 = vsel %vm8433_vm15, %v4537_v57, %v4539_v19  ;;  %vm8448_vm4 = vcmp.ne.s16.totalorder %v8362_v58, 0  ;;  %vm8449_vm15 = vcmp.ne.s16.totalorder %v8355_v18, 0 }
0x1c8c   : > { %v4705_v20 = vsel %vm8427_vm8, %v4700_v29, %v4702_v22  ;;  %vm8443_vm8 = vmmov %vm8440_vm1 }
0x1c8d   : > { %4747 = vmatpush1.bf16.msra.mxu0 %v4705_v20 }
0x1c8e   : > { %v4550_v30 = vpop.permute.xlu1 %4549 }
0x1c8f   : > { %v4554_v40 = vpop.permute.xlu0 %4553 }
0x1c92   : > { %v4563_v28 = vpop.permute.xlu1 %4562 }
0x1c93   : > { %v4567_v53 = vpop.permute.xlu0 %4566 }
0x1c96   : > { %v4575_v49 = vpop.permute.xlu1 %4574 }
0x1c97   : > { %v4717_v62 = vpop.permute.xlu0 %4716  ;;  %v4579_v21 = vsel %vm8438_vm3, %v4575_v49, %v4577_v59  ;;  %vm8454_vm3 = vcmp.ne.s16.totalorder %v8359_v60, 0 }
0x1c9a   : > { %v4516_v26 = vpop.permute.xlu1 %4515 }
0x1c9b   : > { %v4519_v44 = vsel %vm8428_vm10, %v4514_v4, %v4516_v26  ;;  %v4520_v48 = vsel %vm8429_vm14, %v4516_v26, %v4518_v12  ;;  %v4590_v22 = vpop.permute.xlu0 %4589  ;;  %vm8444_vm10 = vcmask 138240  }
0x1c9c   : > { %4786 = vmatprep.subr.bf16.mxu1 %v4520_v48  ;;  %vm8445_vm14 = vmmov %vm8444_vm10 }
0x1c9d   : > { %4787 = vmatpush1.bf16.msra.mxu1 %v4519_v44 }
0x1c9e   : > { %v4529_v56 = vpop.permute.xlu1 %4528 }
0x1c9f   : > { %v4532_v3 = vsel %vm8430_vm9, %v4527_v15, %v4529_v56  ;;  %v4533_v33 = vsel %vm8431_vm12, %v4529_v56, %v4531_v27  ;;  %v4713_v61 = vpop.permute.xlu0 %4712  ;;  %vm8446_vm9 = vcmp.ne.s16.totalorder %v8365_v43, 0  ;;  %vm8447_vm12 = vmmov %vm8444_vm10 }
0x1ca0   : > { %4788 = vmatprep.subr.bf16.mxu1 %v4533_v33 }
0x1ca1   : > { %4789 = vmatpush1.bf16.msra.mxu1 %v4532_v3 }
0x1ca2   : > { %4790 = vmatprep.subr.bf16.mxu1 %v4543_v45  ;;  %v4573_v13 = vpop.permute.xlu1 %4572 }
0x1ca3   : > { %v4578_v36 = vsel %vm8441_vm13, %v4573_v13, %v4575_v49  ;;  %vm8457_vm13 = vcmp.ne.s16.totalorder %v8377_v9, 0 }
0x1ca5   : > { %4791 = vmatpush1.bf16.msra.mxu1 %v4542_v39 }
0x1ca6   : > { %v4552_v35 = vpop.permute.xlu1 %4551 }
0x1ca7   : > { %v4555_v42 = vsel %vm8434_vm2, %v4550_v30, %v4552_v35  ;;  %v4556_v32 = vsel %vm8435_vm11, %v4552_v35, %v4554_v40  ;;  %vm8450_vm2 = vcmp.ne.s16.totalorder %v8381_v38, 0  ;;  %vm8451_vm11 = vcmp.ne.s16.totalorder %v8372_v25, 0 }
0x1ca8   : > { %4792 = vmatprep.subr.bf16.mxu1 %v4556_v32 }
0x1ca9   : > { %4793 = vmatpush1.bf16.msra.mxu1 %v4555_v42 }
0x1caa   : > { %v4565_v23 = vpop.permute.xlu1 %4564 }
0x1cab   : > { %v4568_v1 = vsel %vm8436_vm7, %v4563_v28, %v4565_v23  ;;  %v4569_v41 = vsel %vm8437_vm0, %v4565_v23, %v4567_v53  ;;  %vm8452_vm7 = vcmp.ne.s16.totalorder %v8374_v51, 0  ;;  %vm8453_vm0 = vcmp.ne.s16.totalorder %v8379_v7, 0 }
0x1cac   : > { %4794 = vmatprep.subr.bf16.mxu1 %v4569_v41  ;;  %v4989_v41 = vld [vmem:[%s5619_s20] sm:$0xff] }
0x1cad   : > { %4795 = vmatpush1.bf16.msra.mxu1 %v4568_v1 }
0x1cae   : > { %4796 = vmatprep.subr.bf16.mxu1 %v4579_v21  ;;  %v4715_v11 = vpop.permute.xlu1 %4714 }
0x1caf   : > { %v4718_v55 = vsel %vm8439_vm5, %v4713_v61, %v4715_v11  ;;  %v4719_v31 = vsel %vm8440_vm1, %v4715_v11, %v4717_v62  ;;  %vm8455_vm5 = vcmp.ne.s16.totalorder %v8370_v24, 0  ;;  %vm8456_vm1 = vcmp.ne.s16.totalorder %v8367_v50, 0 }
0x1cb0   : > { %4748 = vmatprep.subr.bf16.mxu0 %v4719_v31 }
0x1cb1   : > { %4749 = vmatpush1.bf16.msra.mxu0 %v4718_v55  ;;  %4797 = vmatpush1.bf16.msra.mxu1 %v4578_v36 }
0x1cb2   : > { %v4588_v52 = vpop.permute.xlu1 %4587 }
0x1cb3   : > { %v4592_v37 = vsel %vm8442_vm6, %v4588_v52, %v4590_v22  ;;  %vm8458_vm6 = vcmp.ne.s16.totalorder %v8383_v8, 0 }
0x1cb4   : > { %4798 = vmatprep.subr.bf16.mxu1 %v4592_v37  ;;  %4765 = vmatmul.mubr.bf16.vlgmr.msra.gmra.mrb[28].mxu0 %v5226_v14 }
0x1cb5   : > { %5036 = vmatprep.mubr.bf16.mxu0 %v8142_v17 }
0x1cb6   : > { %v4586_v57 = vpop.permute.xlu1 %4585 }
0x1cb7   : > { %v4591_v54 = vsel %vm8443_vm8, %v4586_v57, %v4588_v52  ;;  %vm8459_vm8 = vcmp.ne.s16.totalorder %v8414_v63, 0 }
0x1cb8   : > { %4799 = vmatpush1.bf16.msra.mxu1 %v4591_v54 }
0x1cbb   : > { %4815 = vmatmul.mubr.bf16.vlgmr.msra.gmra.mrb[28].mxu1 %v5230_v2 }
0x1cc7   : > { %v4827_v27 = vpop.permute.xlu1 %4826 }
0x1d87   : > { %v4766_v6 = vpop.f32.mrb[28].mxu0 }
0x1d88   : > { %v4768_v59 = vpop.f32.mrb[29].mxu0 }
0x1d89   : > { %v4770_v5 = vpop.f32.mrb[30].mxu0 }
0x1d8a   : > { %v4771_v10 = vpop.f32.mrb[31].mxu0 }
0x1d8e   : > { %v4816_v4 = vpop.f32.mrb[28].mxu1 }
0x1d8f   : > { %v4817_v12 = vadd.f32 %v4816_v4, %v4766_v6  ;;  %v4818_v15 = vpop.f32.mrb[29].mxu1 }
0x1d90   : > { %v4819_v19 = vadd.f32 %v4818_v15, %v4768_v59  ;;  %v4820_v29 = vpop.f32.mrb[30].mxu1 }
0x1d91   : > { %v4829_v20 = vadd.f32 %v4827_v27, %v4817_v12  ;;  %v4821_v17 = vpop.f32.mrb[31].mxu1 }
0x1d92   : > { %v4830_v30 = vadd.f32 %v4827_v27, %v4819_v19 }
0x1d93   : > { %v4831_v28 = vmax.f32 %v4829_v20, 0.0 }
0x1d94   : > { %v4832_v40 = vmax.f32 %v4830_v30, 0.0 }
0x1d95   : > { %v4833_v49 = vpack.c.bf16 %v4831_v28, %v4831_v28 }
0x1d96   : > { %v4834_v26 = vpack.c.bf16 %v4832_v40, %v4832_v40 }
0x1d97   : > { %4837 = vrot.lane.b32.xlu0 %v4833_v49, %s8331_s9 }
0x1d98   : > { %4839 = vrot.lane.b32.xlu1 %v4834_v26, %s8331_s9 }
0x1e09   : > { %v4838_v34 = vpop.permute.xlu0 %4837 }
0x1e0a   : > { %v7711_v44 = vsel %vm8444_vm10, 0, %v4838_v34  ;;  %v4840_v48 = vpop.permute.xlu1 %4839  ;;  %vm8460_vm10 = vcmp.ne.s16.totalorder %v8405_v46, 0 }
0x1e0b   : > { %v4847_v53 = vsel %vm8445_vm14, %v4840_v48, 0  ;;  %4904 = vrot.lane.b32.xlu1 %v7711_v44, %s8364_s10  ;;  %v4851_v56 = vsel %vm8446_vm9, %v7711_v44, 0  ;;  %v4868_v3 = vrot.slane %v7711_v44, 4  ;;  %v4841_v33 = vsel %vm8447_vm12, %v4838_v34, %v4840_v48 }
0x1e0c   : > { %4908 = vrot.lane.b32.xlu0 %v4847_v53, %s8364_s10  ;;  %v4853_v45 = vsel %vm8448_vm4, %v4847_v53, 0  ;;  %v4852_v62 = vsel %vm8449_vm15, %v4841_v33, 0  ;;  %v4862_v43 = vsel %vm8450_vm2, %v4847_v53, 0  ;;  %v4861_v13 = vsel %vm8451_vm11, %v4841_v33, 0 }
0x1e0d   : > { %v4869_v39 = vrot.slane %v4841_v33, 4  ;;  %v4854_v58 = vsel %vm8452_vm7, %v7711_v44, 0  ;;  %v4870_v18 = vrot.slane %v4847_v53, 4  ;;  %v4857_v38 = vsel %vm8453_vm0, %v7711_v44, 0 }
0x1e0e   : > { %v4893_v35 = vrot.slane %v4854_v58, 4  ;;  %v4915_v25 = vrot.slane %v4857_v38, 4  ;;  %v4855_v42 = vsel %vm8454_vm3, %v4841_v33, 0  ;;  %v4856_v51 = vsel %vm8455_vm5, %v4847_v53, 0 }
0x1e0f   : > { %4882 = vrot.lane.b32.xlu1 %v4851_v56, %s8229_s3  ;;  %v4894_v32 = vrot.slane %v4855_v42, 4  ;;  %v4895_v22 = vrot.slane %v4856_v51, 4  ;;  %v4858_v23 = vsel %vm8456_vm1, %v4841_v33, 0  ;;  %v4859_v7 = vsel %vm8457_vm13, %v4847_v53, 0  ;;  %v4988_v42 = vld [vmem:[%s5614_s12] sm:$0xf] }
0x1e10   : > { %4871 = vrot.lane.b32.xlu0 %v4868_v3, %s8351_s0  ;;  %v4916_v60 = vrot.slane %v4858_v23, 4  ;;  %v4917_v1 = vrot.slane %v4859_v7, 4  ;;  %v4860_v24 = vsel %vm8458_vm6, %v7711_v44, 0  ;;  %v4863_v50 = vsel %vm8459_vm8, %v7711_v44, 0 }
0x1e11   : > { %v4865_v9 = vsel %vm8460_vm10, %v4847_v53, 0  ;;  %vm8461_vm14 = vcmp.ne.s16.totalorder %v8420_v0, 0  ;;  %vm8462_vm9 = vcmask 1039360   ;;  %vm8464_vm4 = vcmp.ne.s16.totalorder %v8353_v47, 0 }
0x1e12   : > { %v4864_v8 = vsel %vm8461_vm14, %v4841_v33, 0  ;;  %vm8463_vm12 = vmmov %vm8462_vm9  ;;  %v4850_v2 = vsel %vm8464_vm4, %v4841_v33, 0  ;;  %vm8465_vm15 = vcmask 1043456   ;;  %vm8466_vm2 = vcmp.ne.s16.totalorder %v5666_v16, 0 }
0x1e13   : > { %4906 = vrot.lane.b32.xlu1 %v4841_v33, %s8364_s10  ;;  %v4849_v59 = vsel %vm8466_vm2, %v7711_v44, 0  ;;  %vm8467_vm11 = vmmov %vm8465_vm15  ;;  %vm8468_vm7 = vcmask 916480   ;;  %vm8469_vm0 = vcmask 1031168   ;;  %vm8474_vm6 = vcmask 900096  }
0x1e14   : > { %4886 = vrot.lane.b32.xlu0 %v4853_v45, %s8229_s3  ;;  %vm8470_vm3 = vmmov %vm8468_vm7  ;;  %vm8475_vm8 = vcmask 908288   ;;  %vm8480_vm4 = vcmask 785408  }
0x1e15   : > { %vm8471_vm5 = vmmov %vm8469_vm0 }
0x1e16   : > { %vm8472_vm1 = vmmov %vm8467_vm11 }
0x1e17   : > { %4884 = vrot.lane.b32.xlu1 %v4852_v62, %s8229_s3  ;;  %vm8473_vm13 = vmmov %vm8472_vm1 }
0x1e18   : > { %4933 = vrot.lane.b32.xlu0 %v4862_v43, %s8238_s6  ;;  %vm8476_vm10 = vmmov %vm8474_vm6 }
0x1e19   : > { %vm8477_vm14 = vmmov %vm8475_vm8 }
0x1e1a   : > { %vm8482_vm2 = vmmov %vm8472_vm1 }
0x1e1b   : > { %4931 = vrot.lane.b32.xlu1 %v4861_v13, %s8238_s6 }
0x1e1c   : > { %4873 = vrot.lane.b32.xlu0 %v4869_v39, %s8351_s0 }
0x1e1f   : > { %4875 = vrot.lane.b32.xlu1 %v4870_v18, %s8351_s0 }
0x1e20   : > { %4896 = vrot.lane.b32.xlu0 %v4893_v35, %s8361_s16 }
0x1e23   : > { %4939 = vrot.lane.b32.xlu1 %v4869_v39, %s8376_s5 }
0x1e24   : > { %4918 = vrot.lane.b32.xlu0 %v4915_v25, %s8369_s2 }
0x1e27   : > { %4898 = vrot.lane.b32.xlu1 %v4894_v32, %s8361_s16 }
0x1e28   : > { %4900 = vrot.lane.b32.xlu0 %v4895_v22, %s8361_s16 }
0x1e2b   : > { %4920 = vrot.lane.b32.xlu1 %v4916_v60, %s8369_s2 }
0x1e2c   : > { %4922 = vrot.lane.b32.xlu0 %v4917_v1, %s8369_s2 }
0x1e2f   : > { %4929 = vrot.lane.b32.xlu1 %v4860_v24, %s8238_s6 }
0x1e30   : > { %4941 = vrot.lane.b32.xlu0 %v4870_v18, %s8376_s5 }
0x1e33   : > { %4948 = vrot.lane.b32.xlu1 %v4863_v50, %s8241_s7 }
0x1e34   : > { %4937 = vrot.lane.b32.xlu0 %v4868_v3, %s8376_s5 }
0x1e37   : > { %4952 = vrot.lane.b32.xlu1 %v4865_v9, %s8241_s7 }
0x1e38   : > { %4950 = vrot.lane.b32.xlu0 %v4864_v8, %s8241_s7  ;;  %s1098_s7 = scalar_lea.vmem %s5624_s27, %s5239_s8 }
0x1e3c   : > { %4992 = vperm.xlu0 %5319, %v4989_v41   ;;  %v8491_v41 = vld [vmem:[#allocation43_spill] sm:$0xff] }
0x1e7d   : > { %v4905_v21 = vpop.permute.xlu1 %4904 }
0x1e7e   : > { %v4909_v61 = vpop.permute.xlu0 %4908 }
0x1e81   : > { %v4883_v63 = vpop.permute.xlu1 %4882 }
0x1e82   : > { %v4872_v11 = vpop.permute.xlu0 %4871 }
0x1e85   : > { %v4907_v55 = vpop.permute.xlu1 %4906 }
0x1e86   : > { %v4887_v31 = vpop.permute.xlu0 %4886  ;;  %v4911_v40 = vsel %vm8475_vm8, %v4907_v55, %v4909_v61  ;;  %v4910_v26 = vsel %vm8477_vm14, %v4905_v21, %v4907_v55  ;;  %v5051_v21 = vunpack.c.l.bf16 %v8491_v41 }
0x1e89   : > { %v4885_v36 = vpop.permute.xlu1 %4884 }
0x1e8a   : > { %v4934_v14 = vpop.permute.xlu0 %4933  ;;  %v4889_v19 = vsel %vm8469_vm0, %v4885_v36, %v4887_v31  ;;  %v4888_v29 = vsel %vm8471_vm5, %v4883_v63, %v4885_v36  ;;  %vm8485_vm0 = vmmov %vm8472_vm1  ;;  %v8492_v63 = vld [vmem:[#allocation44_spill] sm:$0xff] }
0x1e8d   : > { %v4932_v52 = vpop.permute.xlu1 %4931 }
0x1e8e   : > { %v4874_v46 = vpop.permute.xlu0 %4873  ;;  %v4936_v56 = vsel %vm8480_vm4, %v4932_v52, %v4934_v14 }
0x1e8f   : > { %v4877_v37 = vsel %vm8462_vm9, %v4872_v11, %v4874_v46  ;;  %vm8478_vm9 = vmmov %vm8472_vm1  ;;  %v5052_v11 = vunpack.c.l.bf16 %v8492_v63 }
0x1e90   : > { %v4958_v5 = vsel %vm8467_vm11, %v4849_v59, %v4877_v37  ;;  %vm8483_vm11 = vmmov %vm8480_vm4 }
0x1e91   : > { %v4876_v57 = vpop.permute.xlu1 %4875 }
0x1e92   : > { %v4878_v0 = vsel %vm8463_vm12, %v4874_v46, %v4876_v57  ;;  %v4897_v54 = vpop.permute.xlu0 %4896  ;;  %vm8479_vm12 = vmmov %vm8472_vm1 }
0x1e93   : > { %v4962_v6 = vsel %vm8465_vm15, %v4850_v2, %v4878_v0  ;;  %vm8481_vm15 = vcmask 777216  }
0x1e94   : > { %5004 = vmatprep.subr.bf16.mxu0 %v4962_v6 }
0x1e95   : > { %v4940_v10 = vpop.permute.xlu1 %4939  ;;  %5005 = vmatpush1.bf16.msra.mxu0 %v4958_v5 }
0x1e96   : > { %v4919_v4 = vpop.permute.xlu0 %4918 }
0x1e99   : > { %v4899_v12 = vpop.permute.xlu1 %4898 }
0x1e9a   : > { %v4902_v15 = vsel %vm8468_vm7, %v4897_v54, %v4899_v12  ;;  %v4901_v27 = vpop.permute.xlu0 %4900  ;;  %vm8484_vm7 = vmmov %vm8481_vm15 }
0x1e9b   : > { %v4903_v47 = vsel %vm8470_vm3, %v4899_v12, %v4901_v27  ;;  %v4966_v17 = vsel %vm8473_vm13, %v4888_v29, %v4902_v15  ;;  %vm8486_vm3 = vcmask 769024   ;;  %vm8489_vm13 = vmmov %vm8485_vm0 }
0x1e9c   : > { %v4970_v20 = vsel %vm8472_vm1, %v4889_v19, %v4903_v47  ;;  %vm8487_vm5 = vmmov %vm8486_vm3 }
0x1e9d   : > { %v4921_v16 = vpop.permute.xlu1 %4920  ;;  %5006 = vmatprep.subr.bf16.mxu0 %v4970_v20  ;;  %vm8488_vm1 = vmmov %vm8485_vm0 }
0x1e9e   : > { %v4924_v30 = vsel %vm8474_vm6, %v4919_v4, %v4921_v16  ;;  %5007 = vmatpush1.bf16.msra.mxu0 %v4966_v17  ;;  %v4923_v28 = vpop.permute.xlu0 %4922  ;;  %vm8490_vm6 = vcmask 588800  }
0x1e9f   : > { %v4925_v49 = vsel %vm8476_vm10, %v4921_v16, %v4923_v28  ;;  %v4974_v48 = vsel %vm8479_vm12, %v4910_v26, %v4924_v30 }
0x1ea0   : > { %v4978_v34 = vsel %vm8478_vm9, %v4911_v40, %v4925_v49 }
0x1ea1   : > { %v4930_v44 = vpop.permute.xlu1 %4929  ;;  %5008 = vmatprep.subr.bf16.mxu0 %v4978_v34 }
0x1ea2   : > { %5009 = vmatpush1.bf16.msra.mxu0 %v4974_v48  ;;  %v4942_v53 = vpop.permute.xlu0 %4941  ;;  %v4935_v43 = vsel %vm8483_vm11, %v4930_v44, %v4932_v52 }
0x1ea3   : > { %v4944_v3 = vsel %vm8481_vm15, %v4940_v10, %v4942_v53 }
0x1ea4   : > { %v4986_v33 = vsel %vm8482_vm2, %v4936_v56, %v4944_v3 }
0x1ea5   : > { %v4949_v45 = vpop.permute.xlu1 %4948  ;;  %5010 = vmatprep.subr.bf16.mxu0 %v4986_v33 }
0x1ea6   : > { %v4938_v62 = vpop.permute.xlu0 %4937 }
0x1ea7   : > { %v4943_v13 = vsel %vm8484_vm7, %v4938_v62, %v4940_v10 }
0x1ea8   : > { %v4982_v39 = vsel %vm8485_vm0, %v4935_v43, %v4943_v13 }
0x1ea9   : > { %v4953_v58 = vpop.permute.xlu1 %4952  ;;  %5011 = vmatpush1.bf16.msra.mxu0 %v4982_v39 }
0x1eaa   : > { %v4951_v18 = vpop.permute.xlu0 %4950 }
0x1eab   : > { %v4954_v35 = vsel %vm8486_vm3, %v4949_v45, %v4951_v18  ;;  %v4955_v38 = vsel %vm8487_vm5, %v4951_v18, %v4953_v58 }
0x1eac   : > { %v4999_v25 = vsel %vm8488_vm1, %v4954_v35, 0  ;;  %5234 = vmatprep.subr.msk.bf16.mxu0 %vm8489_vm13, %v4955_v38 }
0x1ead   : > { %5013 = vmatpush1.bf16.msra.mxu0 %v4999_v25 }
0x1eb0   : > { %5235 = vmatmul.mubr.msk.bf16.vlgmr.msra.gmra.mrb[32].mxu0 %vm8490_vm6, %v4988_v42 }
0x1ebb   : > { %v4993_v51 = vpop.permute.xlu0 %4992 }
0x1f83   : > { %v5038_v32 = vpop.f32.mrb[32].mxu0 }
0x1f84   : > { %v5039_v22 = vadd.f32 %v5038_v32, %v4993_v51  ;;  %v5040_v23 = vpop.f32.mrb[33].mxu0 }
0x1f85   : > { %v5041_v7 = vadd.f32 %v5040_v23, %v4993_v51  ;;  %v5042_v60 = vpop.f32.mrb[34].mxu0 }
0x1f86   : > { %v5045_v1 = vmax.f32 %v5039_v22, 0.0  ;;  %v5043_v24 = vpop.f32.mrb[35].mxu0 }
0x1f87   : > { %v5046_v50 = vmax.f32 %v5041_v7, 0.0 }
0x1f88   : > { %v5047_v9 = vpack.c.bf16 %v5045_v1, %v5045_v1 }
0x1f89   : > { %v5048_v8 = vpack.c.bf16 %v5046_v50, %v5046_v50 }
0x1f8a   : > { %v5049_v61 = vunpack.c.l.bf16 %v5047_v9 }
0x1f8b   : > { %v5050_v55 = vunpack.c.l.bf16 %v5048_v8 }
0x1f8c   : > { %v5053_v31 = vadd.f32 %v5051_v21, %v5049_v61 }
0x1f8d   : > { %v5054_v36 = vadd.f32 %v5052_v11, %v5050_v55 }
0x1f8e   : > { %5055 = vst [vmem:[%s1098_s7] sm:$0xff] %v5053_v31 }
0x1f8f   : > { %5056 = vst [vmem:[%s1098_s7 + $0x8] sm:$0xff] %v5054_v36 }
0x1f90 PF: > { %s83_s28 = sadd.s32 1, %s5371_s28  }
0x1f91   : > { %p80_p4 = scmp.ge.s32.totalorder %s83_s28, 4  }
0x1f93   :  { %82 = sbr.rel (!%p80_p4) target bundleno = 72 (0x48), region = 230 }

</bundles_post_ra>
